<compile_context>
chip_gen: v5e
topology: v5e:2x2
jax: 0.10.0
libtpu: 0.0.40
codegen_flags: <defaults>
</compile_context>

<pallas_src>
import jax
import jax.numpy as jnp
from jax.experimental import pallas as pl
from jax.experimental.pallas import tpu as pltpu


def _round_up(v, m):
    return (v + m - 1) // m * m


def _vmem_footprint(shape, dtype):
    """Rough VMEM bytes for one buffer of `shape`, honoring (sublane, lane) tile padding."""
    itemsize = jnp.dtype(dtype).itemsize
    sub = 8 * max(1, 4 // itemsize)
    s = list(shape)
    s[-1] = _round_up(s[-1], 128)
    if len(s) >= 2:
        s[-2] = _round_up(s[-2], sub)
    n = 1
    for d in s:
        n *= d
    return n * itemsize


def _make_kernel(H, W, Cin, Cout, ks, Wacc):
    n_mw = (ks + 1) // 2  # number of distinct W shifts (3 for ks=5)

    def kernel(x_ref, w_ref, b_ref, out_ref, xs_ref, acc_ref):
        # x_ref:   (1, H, W, Cin)
        # w_ref:   (Cin, ks*ks*Cout)   taps grouped by mw=kw//2; within a group kh-major,
        #                              kw(-parity pw) minor -> matches acc lane order.
        # b_ref:   (1, 2*Cout)         f32 bias tiled for the (pw*Cout + c) lane layout
        # out_ref: (1, Hp, 2, Wacc, 2*Cout)
        # xs_ref:  (n_mw, H, Wacc, Cin)   VMEM scratch: zero-padded W-shifted inputs
        # acc_ref: (Hp, 2, Wacc, 2*Cout)  f32 VMEM accumulator
        two_cout = 2 * Cout

        # (1) f32 accumulator, initialized with the bias (added exactly once per pixel).
        acc_ref[...] = jnp.broadcast_to(
            b_ref[...].reshape(1, 1, 1, two_cout), acc_ref.shape)

        # (2) Stage zero-padded, W-shifted input copies: xs[mw, h, b, :] = x[h, b - mw].
        #     The misaligned (sublane) writes happen here, 3x on input-sized data,
        #     instead of 25x on output-sized accumulator slices.
        xs_ref[...] = jnp.zeros(xs_ref.shape, xs_ref.dtype)
        for mw in range(n_mw):
            xs_ref[mw, :, mw:mw + W, :] = x_ref[0]

        # (3) One lane-dense matmul per mw group, then fully aligned slice-adds into acc.
        col = 0
        for mw in range(n_mw):
            kws = [kw for kw in range(ks) if kw // 2 == mw]   # [0,1], [2,3], [4]
            lw = len(kws) * Cout                              # lanes covered per kh
            width = ks * lw
            lhs = xs_ref[mw].reshape(H * Wacc, Cin)           # layout-preserving (Wacc % sublanes == 0)
            rg = jnp.dot(lhs, w_ref[:, col:col + width],
                         preferred_element_type=jnp.float32)  # (H*Wacc, ks*lw)
            for kh in range(ks):
                ph, mh = kh % 2, kh // 2
                sl = rg[:, kh * lw:(kh + 1) * lw].reshape(H, Wacc, lw)
                # Within the group, pw=0 lanes come first -> target lanes [0:lw].
                # Row shift mh is on a non-tiled dim; W dim is full width (aligned).
                acc_ref[mh:mh + H, ph, :, 0:lw] += sl
            col += width

        # (4) Single cast + store to the pipelined output buffer.
        out_ref[0] = acc_ref[...].astype(out_ref.dtype)

    return kernel


def transposed_upsample(x_nchw, weight_pt, bias, *, stride=2):
    """x_nchw: (N, Cin, H, W); weight_pt: (Cin, Cout, ks, ks) (PyTorch ConvTranspose2d
    layout); bias: (Cout,). Returns (N, Cout, (H-1)*2+ks, (W-1)*2+ks) in NCHW."""
    assert stride == 2, "kernel is specialized for stride=2 (the module hardcodes stride=2)"
    N, Cin, H, W = x_nchw.shape
    Cin_w, Cout, ks, ks2 = weight_pt.shape
    assert Cin_w == Cin and ks == ks2

    H_out = (H - 1) * stride + ks
    W_out = (W - 1) * stride + ks
    half = (ks - 1) // 2
    n_mw = (ks + 1) // 2
    Hp = H + half                                    # parity rows: output row = 2a + ph

    # Accumulator / staging width rounded so in-kernel reshapes stay layout-preserving
    # and every W slice-add is full-width. Extra columns only hold the bias; cropped below.
    sub_mult = 8 * max(1, 4 // jnp.dtype(x_nchw.dtype).itemsize)
    Wacc = _round_up(W + half, sub_mult)

    x_nhwc = jnp.transpose(x_nchw, (0, 2, 3, 1))     # (N, H, W, Cin)

    # Fused weights: grouped by mw = kw//2; within a group kh-major, kw (=pw) minor.
    w_khkw = jnp.transpose(weight_pt, (2, 3, 0, 1))  # (ks, ks, Cin, Cout)
    blocks = []
    for mw in range(n_mw):
        for kh in range(ks):
            for kw in range(2 * mw, min(2 * mw + 2, ks)):
                blocks.append(w_khkw[kh, kw])        # (Cin, Cout)
    w_fused = jnp.concatenate(blocks, axis=1)        # (Cin, ks*ks*Cout)

    b_fused = jnp.tile(bias.astype(jnp.float32), 2).reshape(1, 2 * Cout)

    out_shape = jax.ShapeDtypeStruct((N, Hp, 2, Wacc, 2 * Cout), x_nhwc.dtype)

    # VMEM budget: double-buffered blocks + scratch (tile-padded estimate).
    est = (2 * _vmem_footprint((1, H, W, Cin), x_nhwc.dtype)
           + 2 * _vmem_footprint((Cin, ks * ks * Cout), w_fused.dtype)
           + 2 * _vmem_footprint((1, 2 * Cout), jnp.float32)
           + 2 * _vmem_footprint((Hp, 2, Wacc, 2 * Cout), x_nhwc.dtype)
           + _vmem_footprint((n_mw, H, Wacc, Cin), x_nhwc.dtype)
           + _vmem_footprint((Hp, 2, Wacc, 2 * Cout), jnp.float32))
    vmem_limit = int(min(100 * 2**20, max(32 * 2**20, 2 * est)))

    kernel = _make_kernel(H, W, Cin, Cout, ks, Wacc)

    acc = pl.pallas_call(
        kernel,
        out_shape=out_shape,
        grid=(N,),
        in_specs=[
            pl.BlockSpec((1, H, W, Cin), lambda n: (n, 0, 0, 0)),
            pl.BlockSpec((Cin, ks * ks * Cout), lambda n: (0, 0)),
            pl.BlockSpec((1, 2 * Cout), lambda n: (0, 0)),
        ],
        out_specs=pl.BlockSpec((1, Hp, 2, Wacc, 2 * Cout), lambda n: (n, 0, 0, 0, 0)),
        scratch_shapes=[
            pltpu.VMEM((n_mw, H, Wacc, Cin), x_nhwc.dtype),
            pltpu.VMEM((Hp, 2, Wacc, 2 * Cout), jnp.float32),
        ],
        compiler_params=pltpu.CompilerParams(
            dimension_semantics=("parallel",),
            vmem_limit_bytes=vmem_limit),
    )(x_nhwc, w_fused, b_fused)

    # Parity de-interleave is a pure reshape:
    #   acc[n, a, ph, b, pw*Cout + c] == y[n, 2a + ph, 2b + pw, c]
    y = acc.reshape(N, 2 * Hp, Wacc, 2, Cout).reshape(N, 2 * Hp, 2 * Wacc, Cout)
    y = y[:, :H_out, :W_out, :]
    # TODO(synk): for very large H/W/Cout add an H- or Cout-tile grid axis (halo-aware)
    # so per-step blocks also fit v7x's 64 MiB VMEM; unnecessary at these shapes.
    return jnp.transpose(y, (0, 3, 1, 2))            # NCHW, matching the PyTorch module


def _ref_conv_transpose2d(x_nchw, w_pt, b, stride=2):
    """Plain-JAX reference implementing the ConvTranspose2d scatter definition."""
    N, Cin, H, W = x_nchw.shape
    Cout, ks = w_pt.shape[1], w_pt.shape[2]
    H_out = (H - 1) * stride + ks
    W_out = (W - 1) * stride + ks
    y = jnp.zeros((N, Cout, H_out, W_out), x_nchw.dtype) + b.reshape(1, Cout, 1, 1)
    for kh in range(ks):
        for kw in range(ks):
            contrib = jnp.einsum('nchw,co->nohw', x_nchw, w_pt[:, :, kh, kw])
            y = y.at[:, :, kh:kh + stride * H:stride, kw:kw + stride * W:stride].add(contrib)
    return y


if __name__ == "__main__":
    N, C, H, W = 2, 4, 16, 16
    ks = 5
    Cout = C  # out_channels defaults to channels in the module

    key = jax.random.PRNGKey(0)
    kx, kw_, kb = jax.random.split(key, 3)

    x = jax.random.normal(kx, (N, C, H, W), dtype=jnp.float32)
    # Deterministic synthetic parameters (ConvTranspose2d weight layout: (Cin, Cout, kH, kW)).
    fan = C * ks * ks
    bound = 1.0 / (fan ** 0.5)
    weight = jax.random.uniform(kw_, (C, Cout, ks, ks), jnp.float32, -bound, bound)
    bias = jax.random.uniform(kb, (Cout,), jnp.float32, -bound, bound)

    out = transposed_upsample(x, weight, bias)
    out = jax.block_until_ready(out)

    expected_shape = (N, Cout, (H - 1) * 2 + ks, (W - 1) * 2 + ks)
    assert out.shape == expected_shape, (out.shape, expected_shape)

    ref = _ref_conv_transpose2d(x, weight, bias)
    assert jnp.allclose(out, ref, atol=1e-5, rtol=1e-5), float(jnp.max(jnp.abs(out - ref)))

    print("KERNEL_OK")
</pallas_src>

<mosaic_0001>
module attributes {stable_mosaic.version = 11 : i64} {
  func.func @kernel(%arg0: i32, %arg1: memref<1x16x16x4xf32, #tpu.memory_space<vmem>>, %arg2: memref<4x100xf32, #tpu.memory_space<vmem>>, %arg3: memref<1x8xf32, #tpu.memory_space<vmem>>, %arg4: memref<1x18x2x24x8xf32, #tpu.memory_space<vmem>>, %arg5: memref<3x16x24x4xf32, #tpu.memory_space<vmem>>, %arg6: memref<18x2x24x8xf32, #tpu.memory_space<vmem>>) attributes {dimension_semantics = [#tpu.dimension_semantics<parallel>], iteration_bounds = array<i64: 2>, scalar_prefetch = 0 : i64, scratch_operands = 2 : i64, tpu.core_type = #tpu.core_type<tc>, window_params = [{transform_indices = @transform_0, window_bounds = array<i64: 1, 16, 16, 4>}, {pipeline_mode = #tpu.pipeline_mode<synchronous>, transform_indices = @transform_1, window_bounds = array<i64: 4, 100>}, {pipeline_mode = #tpu.pipeline_mode<synchronous>, transform_indices = @transform_2, window_bounds = array<i64: 1, 8>}, {transform_indices = @transform_3, window_bounds = array<i64: 1, 18, 2, 24, 8>}]} {
    %c0 = arith.constant 0 : index
    %c0_0 = arith.constant 0 : index
    %0 = vector.load %arg3[%c0, %c0_0] : memref<1x8xf32, #tpu.memory_space<vmem>>, vector<1x8xf32>
    %1 = vector.shape_cast %0 : vector<1x8xf32> to vector<1x1x1x8xf32>
    %2 = vector.shape_cast %1 : vector<1x1x1x8xf32> to vector<1x1x1x8xf32>
    %3 = vector.broadcast %2 : vector<1x1x1x8xf32> to vector<18x2x24x8xf32>
    %c0_1 = arith.constant 0 : index
    %c0_2 = arith.constant 0 : index
    %c0_3 = arith.constant 0 : index
    %c0_4 = arith.constant 0 : index
    %4 = vector.load %arg6[%c0_1, %c0_2, %c0_3, %c0_4] : memref<18x2x24x8xf32, #tpu.memory_space<vmem>>, vector<18x2x24x8xf32>
    tpu.vector_store %arg6[%c0_1, %c0_2, %c0_3, %c0_4], %3 {strides = array<i32>} : memref<18x2x24x8xf32, #tpu.memory_space<vmem>>, vector<18x2x24x8xf32>,
    %cst = arith.constant 0.000000e+00 : f32
    %5 = vector.broadcast %cst : f32 to vector<3x16x24x4xf32>
    %c0_5 = arith.constant 0 : index
    %c0_6 = arith.constant 0 : index
    %c0_7 = arith.constant 0 : index
    %c0_8 = arith.constant 0 : index
    %6 = vector.load %arg5[%c0_5, %c0_6, %c0_7, %c0_8] : memref<3x16x24x4xf32, #tpu.memory_space<vmem>>, vector<3x16x24x4xf32>
    tpu.vector_store %arg5[%c0_5, %c0_6, %c0_7, %c0_8], %5 {strides = array<i32>} : memref<3x16x24x4xf32, #tpu.memory_space<vmem>>, vector<3x16x24x4xf32>,
    %c0_9 = arith.constant 0 : index
    %c0_10 = arith.constant 0 : index
    %c0_11 = arith.constant 0 : index
    %c0_12 = arith.constant 0 : index
    %7 = vector.load %arg1[%c0_9, %c0_10, %c0_11, %c0_12] : memref<1x16x16x4xf32, #tpu.memory_space<vmem>>, vector<1x16x16x4xf32>
    %8 = vector.shape_cast %7 : vector<1x16x16x4xf32> to vector<16x16x4xf32>
    %c0_13 = arith.constant 0 : index
    %c0_14 = arith.constant 0 : index
    %c0_15 = arith.constant 0 : index
    %c0_16 = arith.constant 0 : index
    %9 = vector.load %arg5[%c0_13, %c0_14, %c0_15, %c0_16] : memref<3x16x24x4xf32, #tpu.memory_space<vmem>>, vector<1x16x16x4xf32>
    %10 = vector.shape_cast %9 : vector<1x16x16x4xf32> to vector<16x16x4xf32>
    %11 = vector.shape_cast %8 : vector<16x16x4xf32> to vector<1x16x16x4xf32>
    tpu.vector_store %arg5[%c0_13, %c0_14, %c0_15, %c0_16], %11 {strides = array<i32>} : memref<3x16x24x4xf32, #tpu.memory_space<vmem>>, vector<1x16x16x4xf32>,
    %c0_17 = arith.constant 0 : index
    %c0_18 = arith.constant 0 : index
    %c0_19 = arith.constant 0 : index
    %c0_20 = arith.constant 0 : index
    %12 = vector.load %arg1[%c0_17, %c0_18, %c0_19, %c0_20] : memref<1x16x16x4xf32, #tpu.memory_space<vmem>>, vector<1x16x16x4xf32>
    %13 = vector.shape_cast %12 : vector<1x16x16x4xf32> to vector<16x16x4xf32>
    %c1 = arith.constant 1 : index
    %c0_21 = arith.constant 0 : index
    %c1_22 = arith.constant 1 : index
    %c0_23 = arith.constant 0 : index
    %14 = vector.load %arg5[%c1, %c0_21, %c1_22, %c0_23] : memref<3x16x24x4xf32, #tpu.memory_space<vmem>>, vector<1x16x16x4xf32>
    %15 = vector.shape_cast %14 : vector<1x16x16x4xf32> to vector<16x16x4xf32>
    %16 = vector.shape_cast %13 : vector<16x16x4xf32> to vector<1x16x16x4xf32>
    tpu.vector_store %arg5[%c1, %c0_21, %c1_22, %c0_23], %16 {strides = array<i32>} : memref<3x16x24x4xf32, #tpu.memory_space<vmem>>, vector<1x16x16x4xf32>,
    %c0_24 = arith.constant 0 : index
    %c0_25 = arith.constant 0 : index
    %c0_26 = arith.constant 0 : index
    %c0_27 = arith.constant 0 : index
    %17 = vector.load %arg1[%c0_24, %c0_25, %c0_26, %c0_27] : memref<1x16x16x4xf32, #tpu.memory_space<vmem>>, vector<1x16x16x4xf32>
    %18 = vector.shape_cast %17 : vector<1x16x16x4xf32> to vector<16x16x4xf32>
    %c2 = arith.constant 2 : index
    %c0_28 = arith.constant 0 : index
    %c2_29 = arith.constant 2 : index
    %c0_30 = arith.constant 0 : index
    %19 = vector.load %arg5[%c2, %c0_28, %c2_29, %c0_30] : memref<3x16x24x4xf32, #tpu.memory_space<vmem>>, vector<1x16x16x4xf32>
    %20 = vector.shape_cast %19 : vector<1x16x16x4xf32> to vector<16x16x4xf32>
    %21 = vector.shape_cast %18 : vector<16x16x4xf32> to vector<1x16x16x4xf32>
    tpu.vector_store %arg5[%c2, %c0_28, %c2_29, %c0_30], %21 {strides = array<i32>} : memref<3x16x24x4xf32, #tpu.memory_space<vmem>>, vector<1x16x16x4xf32>,
    %c0_31 = arith.constant 0 : index
    %c0_32 = arith.constant 0 : index
    %c0_33 = arith.constant 0 : index
    %c0_34 = arith.constant 0 : index
    %22 = vector.load %arg5[%c0_31, %c0_32, %c0_33, %c0_34] : memref<3x16x24x4xf32, #tpu.memory_space<vmem>>, vector<1x16x24x4xf32>
    %23 = vector.shape_cast %22 : vector<1x16x24x4xf32> to vector<16x24x4xf32>
    %24 = vector.shape_cast %23 : vector<16x24x4xf32> to vector<384x4xf32>
    %c0_35 = arith.constant 0 : index
    %c0_36 = arith.constant 0 : index
    %25 = vector.load %arg2[%c0_35, %c0_36] : memref<4x100xf32, #tpu.memory_space<vmem>>, vector<4x40xf32>
    %cst_37 = arith.constant dense<0.000000e+00> : vector<384x40xf32>
    %26 = tpu.matmul %24, %25, %cst_37 {dimension_numbers = #tpu.dot_dimension_numbers<[1], [0], [0], [1], [0, 0, 1, 1], [], []>} : vector<384x4xf32>, vector<4x40xf32>, vector<384x40xf32> -> vector<384x40xf32>
    %27 = vector.extract_strided_slice %26 {offsets = [0, 0], sizes = [384, 8], strides = [1, 1]} : vector<384x40xf32> to vector<384x8xf32>
    %28 = vector.shape_cast %27 : vector<384x8xf32> to vector<16x24x8xf32>
    %c0_38 = arith.constant 0 : index
    %c0_39 = arith.constant 0 : index
    %c0_40 = arith.constant 0 : index
    %c0_41 = arith.constant 0 : index
    %29 = vector.load %arg6[%c0_38, %c0_39, %c0_40, %c0_41] : memref<18x2x24x8xf32, #tpu.memory_space<vmem>>, vector<16x1x24x8xf32>
    %30 = vector.shape_cast %29 : vector<16x1x24x8xf32> to vector<16x24x8xf32>
    %31 = arith.addf %30, %28 : vector<16x24x8xf32>
    %c0_42 = arith.constant 0 : index
    %c0_43 = arith.constant 0 : index
    %c0_44 = arith.constant 0 : index
    %c0_45 = arith.constant 0 : index
    %32 = vector.load %arg6[%c0_42, %c0_43, %c0_44, %c0_45] : memref<18x2x24x8xf32, #tpu.memory_space<vmem>>, vector<16x1x24x8xf32>
    %33 = vector.shape_cast %32 : vector<16x1x24x8xf32> to vector<16x24x8xf32>
    %34 = vector.shape_cast %31 : vector<16x24x8xf32> to vector<16x1x24x8xf32>
    tpu.vector_store %arg6[%c0_42, %c0_43, %c0_44, %c0_45], %34 {strides = array<i32>} : memref<18x2x24x8xf32, #tpu.memory_space<vmem>>, vector<16x1x24x8xf32>,
    %35 = vector.extract_strided_slice %26 {offsets = [0, 8], sizes = [384, 8], strides = [1, 1]} : vector<384x40xf32> to vector<384x8xf32>
    %36 = vector.shape_cast %35 : vector<384x8xf32> to vector<16x24x8xf32>
    %c0_46 = arith.constant 0 : index
    %c1_47 = arith.constant 1 : index
    %c0_48 = arith.constant 0 : index
    %c0_49 = arith.constant 0 : index
    %37 = vector.load %arg6[%c0_46, %c1_47, %c0_48, %c0_49] : memref<18x2x24x8xf32, #tpu.memory_space<vmem>>, vector<16x1x24x8xf32>
    %38 = vector.shape_cast %37 : vector<16x1x24x8xf32> to vector<16x24x8xf32>
    %39 = arith.addf %38, %36 : vector<16x24x8xf32>
    %c0_50 = arith.constant 0 : index
    %c1_51 = arith.constant 1 : index
    %c0_52 = arith.constant 0 : index
    %c0_53 = arith.constant 0 : index
    %40 = vector.load %arg6[%c0_50, %c1_51, %c0_52, %c0_53] : memref<18x2x24x8xf32, #tpu.memory_space<vmem>>, vector<16x1x24x8xf32>
    %41 = vector.shape_cast %40 : vector<16x1x24x8xf32> to vector<16x24x8xf32>
    %42 = vector.shape_cast %39 : vector<16x24x8xf32> to vector<16x1x24x8xf32>
    tpu.vector_store %arg6[%c0_50, %c1_51, %c0_52, %c0_53], %42 {strides = array<i32>} : memref<18x2x24x8xf32, #tpu.memory_space<vmem>>, vector<16x1x24x8xf32>,
    %43 = vector.extract_strided_slice %26 {offsets = [0, 16], sizes = [384, 8], strides = [1, 1]} : vector<384x40xf32> to vector<384x8xf32>
    %44 = vector.shape_cast %43 : vector<384x8xf32> to vector<16x24x8xf32>
    %c1_54 = arith.constant 1 : index
    %c0_55 = arith.constant 0 : index
    %c0_56 = arith.constant 0 : index
    %c0_57 = arith.constant 0 : index
    %45 = vector.load %arg6[%c1_54, %c0_55, %c0_56, %c0_57] : memref<18x2x24x8xf32, #tpu.memory_space<vmem>>, vector<16x1x24x8xf32>
    %46 = vector.shape_cast %45 : vector<16x1x24x8xf32> to vector<16x24x8xf32>
    %47 = arith.addf %46, %44 : vector<16x24x8xf32>
    %c1_58 = arith.constant 1 : index
    %c0_59 = arith.constant 0 : index
    %c0_60 = arith.constant 0 : index
    %c0_61 = arith.constant 0 : index
    %48 = vector.load %arg6[%c1_58, %c0_59, %c0_60, %c0_61] : memref<18x2x24x8xf32, #tpu.memory_space<vmem>>, vector<16x1x24x8xf32>
    %49 = vector.shape_cast %48 : vector<16x1x24x8xf32> to vector<16x24x8xf32>
    %50 = vector.shape_cast %47 : vector<16x24x8xf32> to vector<16x1x24x8xf32>
    tpu.vector_store %arg6[%c1_58, %c0_59, %c0_60, %c0_61], %50 {strides = array<i32>} : memref<18x2x24x8xf32, #tpu.memory_space<vmem>>, vector<16x1x24x8xf32>,
    %51 = vector.extract_strided_slice %26 {offsets = [0, 24], sizes = [384, 8], strides = [1, 1]} : vector<384x40xf32> to vector<384x8xf32>
    %52 = vector.shape_cast %51 : vector<384x8xf32> to vector<16x24x8xf32>
    %c1_62 = arith.constant 1 : index
    %c1_63 = arith.constant 1 : index
    %c0_64 = arith.constant 0 : index
    %c0_65 = arith.constant 0 : index
    %53 = vector.load %arg6[%c1_62, %c1_63, %c0_64, %c0_65] : memref<18x2x24x8xf32, #tpu.memory_space<vmem>>, vector<16x1x24x8xf32>
    %54 = vector.shape_cast %53 : vector<16x1x24x8xf32> to vector<16x24x8xf32>
    %55 = arith.addf %54, %52 : vector<16x24x8xf32>
    %c1_66 = arith.constant 1 : index
    %c1_67 = arith.constant 1 : index
    %c0_68 = arith.constant 0 : index
    %c0_69 = arith.constant 0 : index
    %56 = vector.load %arg6[%c1_66, %c1_67, %c0_68, %c0_69] : memref<18x2x24x8xf32, #tpu.memory_space<vmem>>, vector<16x1x24x8xf32>
    %57 = vector.shape_cast %56 : vector<16x1x24x8xf32> to vector<16x24x8xf32>
    %58 = vector.shape_cast %55 : vector<16x24x8xf32> to vector<16x1x24x8xf32>
    tpu.vector_store %arg6[%c1_66, %c1_67, %c0_68, %c0_69], %58 {strides = array<i32>} : memref<18x2x24x8xf32, #tpu.memory_space<vmem>>, vector<16x1x24x8xf32>,
    %59 = vector.extract_strided_slice %26 {offsets = [0, 32], sizes = [384, 8], strides = [1, 1]} : vector<384x40xf32> to vector<384x8xf32>
    %60 = vector.shape_cast %59 : vector<384x8xf32> to vector<16x24x8xf32>
    %c2_70 = arith.constant 2 : index
    %c0_71 = arith.constant 0 : index
    %c0_72 = arith.constant 0 : index
    %c0_73 = arith.constant 0 : index
    %61 = vector.load %arg6[%c2_70, %c0_71, %c0_72, %c0_73] : memref<18x2x24x8xf32, #tpu.memory_space<vmem>>, vector<16x1x24x8xf32>
    %62 = vector.shape_cast %61 : vector<16x1x24x8xf32> to vector<16x24x8xf32>
    %63 = arith.addf %62, %60 : vector<16x24x8xf32>
    %c2_74 = arith.constant 2 : index
    %c0_75 = arith.constant 0 : index
    %c0_76 = arith.constant 0 : index
    %c0_77 = arith.constant 0 : index
    %64 = vector.load %arg6[%c2_74, %c0_75, %c0_76, %c0_77] : memref<18x2x24x8xf32, #tpu.memory_space<vmem>>, vector<16x1x24x8xf32>
    %65 = vector.shape_cast %64 : vector<16x1x24x8xf32> to vector<16x24x8xf32>
    %66 = vector.shape_cast %63 : vector<16x24x8xf32> to vector<16x1x24x8xf32>
    tpu.vector_store %arg6[%c2_74, %c0_75, %c0_76, %c0_77], %66 {strides = array<i32>} : memref<18x2x24x8xf32, #tpu.memory_space<vmem>>, vector<16x1x24x8xf32>,
    %c1_78 = arith.constant 1 : index
    %c0_79 = arith.constant 0 : index
    %c0_80 = arith.constant 0 : index
    %c0_81 = arith.constant 0 : index
    %67 = vector.load %arg5[%c1_78, %c0_79, %c0_80, %c0_81] : memref<3x16x24x4xf32, #tpu.memory_space<vmem>>, vector<1x16x24x4xf32>
    %68 = vector.shape_cast %67 : vector<1x16x24x4xf32> to vector<16x24x4xf32>
    %69 = vector.shape_cast %68 : vector<16x24x4xf32> to vector<384x4xf32>
    %c0_82 = arith.constant 0 : index
    %c40 = arith.constant 40 : index
    %70 = vector.load %arg2[%c0_82, %c40] : memref<4x100xf32, #tpu.memory_space<vmem>>, vector<4x40xf32>
    %cst_83 = arith.constant dense<0.000000e+00> : vector<384x40xf32>
    %71 = tpu.matmul %69, %70, %cst_83 {dimension_numbers = #tpu.dot_dimension_numbers<[1], [0], [0], [1], [0, 0, 1, 1], [], []>} : vector<384x4xf32>, vector<4x40xf32>, vector<384x40xf32> -> vector<384x40xf32>
    %72 = vector.extract_strided_slice %71 {offsets = [0, 0], sizes = [384, 8], strides = [1, 1]} : vector<384x40xf32> to vector<384x8xf32>
    %73 = vector.shape_cast %72 : vector<384x8xf32> to vector<16x24x8xf32>
    %c0_84 = arith.constant 0 : index
    %c0_85 = arith.constant 0 : index
    %c0_86 = arith.constant 0 : index
    %c0_87 = arith.constant 0 : index
    %74 = vector.load %arg6[%c0_84, %c0_85, %c0_86, %c0_87] : memref<18x2x24x8xf32, #tpu.memory_space<vmem>>, vector<16x1x24x8xf32>
    %75 = vector.shape_cast %74 : vector<16x1x24x8xf32> to vector<16x24x8xf32>
    %76 = arith.addf %75, %73 : vector<16x24x8xf32>
    %c0_88 = arith.constant 0 : index
    %c0_89 = arith.constant 0 : index
    %c0_90 = arith.constant 0 : index
    %c0_91 = arith.constant 0 : index
    %77 = vector.load %arg6[%c0_88, %c0_89, %c0_90, %c0_91] : memref<18x2x24x8xf32, #tpu.memory_space<vmem>>, vector<16x1x24x8xf32>
    %78 = vector.shape_cast %77 : vector<16x1x24x8xf32> to vector<16x24x8xf32>
    %79 = vector.shape_cast %76 : vector<16x24x8xf32> to vector<16x1x24x8xf32>
    tpu.vector_store %arg6[%c0_88, %c0_89, %c0_90, %c0_91], %79 {strides = array<i32>} : memref<18x2x24x8xf32, #tpu.memory_space<vmem>>, vector<16x1x24x8xf32>,
    %80 = vector.extract_strided_slice %71 {offsets = [0, 8], sizes = [384, 8], strides = [1, 1]} : vector<384x40xf32> to vector<384x8xf32>
    %81 = vector.shape_cast %80 : vector<384x8xf32> to vector<16x24x8xf32>
    %c0_92 = arith.constant 0 : index
    %c1_93 = arith.constant 1 : index
    %c0_94 = arith.constant 0 : index
    %c0_95 = arith.constant 0 : index
    %82 = vector.load %arg6[%c0_92, %c1_93, %c0_94, %c0_95] : memref<18x2x24x8xf32, #tpu.memory_space<vmem>>, vector<16x1x24x8xf32>
    %83 = vector.shape_cast %82 : vector<16x1x24x8xf32> to vector<16x24x8xf32>
    %84 = arith.addf %83, %81 : vector<16x24x8xf32>
    %c0_96 = arith.constant 0 : index
    %c1_97 = arith.constant 1 : index
    %c0_98 = arith.constant 0 : index
    %c0_99 = arith.constant 0 : index
    %85 = vector.load %arg6[%c0_96, %c1_97, %c0_98, %c0_99] : memref<18x2x24x8xf32, #tpu.memory_space<vmem>>, vector<16x1x24x8xf32>
    %86 = vector.shape_cast %85 : vector<16x1x24x8xf32> to vector<16x24x8xf32>
    %87 = vector.shape_cast %84 : vector<16x24x8xf32> to vector<16x1x24x8xf32>
    tpu.vector_store %arg6[%c0_96, %c1_97, %c0_98, %c0_99], %87 {strides = array<i32>} : memref<18x2x24x8xf32, #tpu.memory_space<vmem>>, vector<16x1x24x8xf32>,
    %88 = vector.extract_strided_slice %71 {offsets = [0, 16], sizes = [384, 8], strides = [1, 1]} : vector<384x40xf32> to vector<384x8xf32>
    %89 = vector.shape_cast %88 : vector<384x8xf32> to vector<16x24x8xf32>
    %c1_100 = arith.constant 1 : index
    %c0_101 = arith.constant 0 : index
    %c0_102 = arith.constant 0 : index
    %c0_103 = arith.constant 0 : index
    %90 = vector.load %arg6[%c1_100, %c0_101, %c0_102, %c0_103] : memref<18x2x24x8xf32, #tpu.memory_space<vmem>>, vector<16x1x24x8xf32>
    %91 = vector.shape_cast %90 : vector<16x1x24x8xf32> to vector<16x24x8xf32>
    %92 = arith.addf %91, %89 : vector<16x24x8xf32>
    %c1_104 = arith.constant 1 : index
    %c0_105 = arith.constant 0 : index
    %c0_106 = arith.constant 0 : index
    %c0_107 = arith.constant 0 : index
    %93 = vector.load %arg6[%c1_104, %c0_105, %c0_106, %c0_107] : memref<18x2x24x8xf32, #tpu.memory_space<vmem>>, vector<16x1x24x8xf32>
    %94 = vector.shape_cast %93 : vector<16x1x24x8xf32> to vector<16x24x8xf32>
    %95 = vector.shape_cast %92 : vector<16x24x8xf32> to vector<16x1x24x8xf32>
    tpu.vector_store %arg6[%c1_104, %c0_105, %c0_106, %c0_107], %95 {strides = array<i32>} : memref<18x2x24x8xf32, #tpu.memory_space<vmem>>, vector<16x1x24x8xf32>,
    %96 = vector.extract_strided_slice %71 {offsets = [0, 24], sizes = [384, 8], strides = [1, 1]} : vector<384x40xf32> to vector<384x8xf32>
    %97 = vector.shape_cast %96 : vector<384x8xf32> to vector<16x24x8xf32>
    %c1_108 = arith.constant 1 : index
    %c1_109 = arith.constant 1 : index
    %c0_110 = arith.constant 0 : index
    %c0_111 = arith.constant 0 : index
    %98 = vector.load %arg6[%c1_108, %c1_109, %c0_110, %c0_111] : memref<18x2x24x8xf32, #tpu.memory_space<vmem>>, vector<16x1x24x8xf32>
    %99 = vector.shape_cast %98 : vector<16x1x24x8xf32> to vector<16x24x8xf32>
    %100 = arith.addf %99, %97 : vector<16x24x8xf32>
    %c1_112 = arith.constant 1 : index
    %c1_113 = arith.constant 1 : index
    %c0_114 = arith.constant 0 : index
    %c0_115 = arith.constant 0 : index
    %101 = vector.load %arg6[%c1_112, %c1_113, %c0_114, %c0_115] : memref<18x2x24x8xf32, #tpu.memory_space<vmem>>, vector<16x1x24x8xf32>
    %102 = vector.shape_cast %101 : vector<16x1x24x8xf32> to vector<16x24x8xf32>
    %103 = vector.shape_cast %100 : vector<16x24x8xf32> to vector<16x1x24x8xf32>
    tpu.vector_store %arg6[%c1_112, %c1_113, %c0_114, %c0_115], %103 {strides = array<i32>} : memref<18x2x24x8xf32, #tpu.memory_space<vmem>>, vector<16x1x24x8xf32>,
    %104 = vector.extract_strided_slice %71 {offsets = [0, 32], sizes = [384, 8], strides = [1, 1]} : vector<384x40xf32> to vector<384x8xf32>
    %105 = vector.shape_cast %104 : vector<384x8xf32> to vector<16x24x8xf32>
    %c2_116 = arith.constant 2 : index
    %c0_117 = arith.constant 0 : index
    %c0_118 = arith.constant 0 : index
    %c0_119 = arith.constant 0 : index
    %106 = vector.load %arg6[%c2_116, %c0_117, %c0_118, %c0_119] : memref<18x2x24x8xf32, #tpu.memory_space<vmem>>, vector<16x1x24x8xf32>
    %107 = vector.shape_cast %106 : vector<16x1x24x8xf32> to vector<16x24x8xf32>
    %108 = arith.addf %107, %105 : vector<16x24x8xf32>
    %c2_120 = arith.constant 2 : index
    %c0_121 = arith.constant 0 : index
    %c0_122 = arith.constant 0 : index
    %c0_123 = arith.constant 0 : index
    %109 = vector.load %arg6[%c2_120, %c0_121, %c0_122, %c0_123] : memref<18x2x24x8xf32, #tpu.memory_space<vmem>>, vector<16x1x24x8xf32>
    %110 = vector.shape_cast %109 : vector<16x1x24x8xf32> to vector<16x24x8xf32>
    %111 = vector.shape_cast %108 : vector<16x24x8xf32> to vector<16x1x24x8xf32>
    tpu.vector_store %arg6[%c2_120, %c0_121, %c0_122, %c0_123], %111 {strides = array<i32>} : memref<18x2x24x8xf32, #tpu.memory_space<vmem>>, vector<16x1x24x8xf32>,
    %c2_124 = arith.constant 2 : index
    %c0_125 = arith.constant 0 : index
    %c0_126 = arith.constant 0 : index
    %c0_127 = arith.constant 0 : index
    %112 = vector.load %arg5[%c2_124, %c0_125, %c0_126, %c0_127] : memref<3x16x24x4xf32, #tpu.memory_space<vmem>>, vector<1x16x24x4xf32>
    %113 = vector.shape_cast %112 : vector<1x16x24x4xf32> to vector<16x24x4xf32>
    %114 = vector.shape_cast %113 : vector<16x24x4xf32> to vector<384x4xf32>
    %c0_128 = arith.constant 0 : index
    %c80 = arith.constant 80 : index
    %115 = vector.load %arg2[%c0_128, %c80] : memref<4x100xf32, #tpu.memory_space<vmem>>, vector<4x20xf32>
    %cst_129 = arith.constant dense<0.000000e+00> : vector<384x20xf32>
    %116 = tpu.matmul %114, %115, %cst_129 {dimension_numbers = #tpu.dot_dimension_numbers<[1], [0], [0], [1], [0, 0, 1, 1], [], []>} : vector<384x4xf32>, vector<4x20xf32>, vector<384x20xf32> -> vector<384x20xf32>
    %117 = vector.extract_strided_slice %116 {offsets = [0, 0], sizes = [384, 4], strides = [1, 1]} : vector<384x20xf32> to vector<384x4xf32>
    %118 = vector.shape_cast %117 : vector<384x4xf32> to vector<16x24x4xf32>
    %c0_130 = arith.constant 0 : index
    %c0_131 = arith.constant 0 : index
    %c0_132 = arith.constant 0 : index
    %c0_133 = arith.constant 0 : index
    %119 = vector.load %arg6[%c0_130, %c0_131, %c0_132, %c0_133] : memref<18x2x24x8xf32, #tpu.memory_space<vmem>>, vector<16x1x24x4xf32>
    %120 = vector.shape_cast %119 : vector<16x1x24x4xf32> to vector<16x24x4xf32>
    %121 = arith.addf %120, %118 : vector<16x24x4xf32>
    %c0_134 = arith.constant 0 : index
    %c0_135 = arith.constant 0 : index
    %c0_136 = arith.constant 0 : index
    %c0_137 = arith.constant 0 : index
    %122 = vector.load %arg6[%c0_134, %c0_135, %c0_136, %c0_137] : memref<18x2x24x8xf32, #tpu.memory_space<vmem>>, vector<16x1x24x4xf32>
    %123 = vector.shape_cast %122 : vector<16x1x24x4xf32> to vector<16x24x4xf32>
    %124 = vector.shape_cast %121 : vector<16x24x4xf32> to vector<16x1x24x4xf32>
    tpu.vector_store %arg6[%c0_134, %c0_135, %c0_136, %c0_137], %124 {strides = array<i32>} : memref<18x2x24x8xf32, #tpu.memory_space<vmem>>, vector<16x1x24x4xf32>,
    %125 = vector.extract_strided_slice %116 {offsets = [0, 4], sizes = [384, 4], strides = [1, 1]} : vector<384x20xf32> to vector<384x4xf32>
    %126 = vector.shape_cast %125 : vector<384x4xf32> to vector<16x24x4xf32>
    %c0_138 = arith.constant 0 : index
    %c1_139 = arith.constant 1 : index
    %c0_140 = arith.constant 0 : index
    %c0_141 = arith.constant 0 : index
    %127 = vector.load %arg6[%c0_138, %c1_139, %c0_140, %c0_141] : memref<18x2x24x8xf32, #tpu.memory_space<vmem>>, vector<16x1x24x4xf32>
    %128 = vector.shape_cast %127 : vector<16x1x24x4xf32> to vector<16x24x4xf32>
    %129 = arith.addf %128, %126 : vector<16x24x4xf32>
    %c0_142 = arith.constant 0 : index
    %c1_143 = arith.constant 1 : index
    %c0_144 = arith.constant 0 : index
    %c0_145 = arith.constant 0 : index
    %130 = vector.load %arg6[%c0_142, %c1_143, %c0_144, %c0_145] : memref<18x2x24x8xf32, #tpu.memory_space<vmem>>, vector<16x1x24x4xf32>
    %131 = vector.shape_cast %130 : vector<16x1x24x4xf32> to vector<16x24x4xf32>
    %132 = vector.shape_cast %129 : vector<16x24x4xf32> to vector<16x1x24x4xf32>
    tpu.vector_store %arg6[%c0_142, %c1_143, %c0_144, %c0_145], %132 {strides = array<i32>} : memref<18x2x24x8xf32, #tpu.memory_space<vmem>>, vector<16x1x24x4xf32>,
    %133 = vector.extract_strided_slice %116 {offsets = [0, 8], sizes = [384, 4], strides = [1, 1]} : vector<384x20xf32> to vector<384x4xf32>
    %134 = vector.shape_cast %133 : vector<384x4xf32> to vector<16x24x4xf32>
    %c1_146 = arith.constant 1 : index
    %c0_147 = arith.constant 0 : index
    %c0_148 = arith.constant 0 : index
    %c0_149 = arith.constant 0 : index
    %135 = vector.load %arg6[%c1_146, %c0_147, %c0_148, %c0_149] : memref<18x2x24x8xf32, #tpu.memory_space<vmem>>, vector<16x1x24x4xf32>
    %136 = vector.shape_cast %135 : vector<16x1x24x4xf32> to vector<16x24x4xf32>
    %137 = arith.addf %136, %134 : vector<16x24x4xf32>
    %c1_150 = arith.constant 1 : index
    %c0_151 = arith.constant 0 : index
    %c0_152 = arith.constant 0 : index
    %c0_153 = arith.constant 0 : index
    %138 = vector.load %arg6[%c1_150, %c0_151, %c0_152, %c0_153] : memref<18x2x24x8xf32, #tpu.memory_space<vmem>>, vector<16x1x24x4xf32>
    %139 = vector.shape_cast %138 : vector<16x1x24x4xf32> to vector<16x24x4xf32>
    %140 = vector.shape_cast %137 : vector<16x24x4xf32> to vector<16x1x24x4xf32>
    tpu.vector_store %arg6[%c1_150, %c0_151, %c0_152, %c0_153], %140 {strides = array<i32>} : memref<18x2x24x8xf32, #tpu.memory_space<vmem>>, vector<16x1x24x4xf32>,
    %141 = vector.extract_strided_slice %116 {offsets = [0, 12], sizes = [384, 4], strides = [1, 1]} : vector<384x20xf32> to vector<384x4xf32>
    %142 = vector.shape_cast %141 : vector<384x4xf32> to vector<16x24x4xf32>
    %c1_154 = arith.constant 1 : index
    %c1_155 = arith.constant 1 : index
    %c0_156 = arith.constant 0 : index
    %c0_157 = arith.constant 0 : index
    %143 = vector.load %arg6[%c1_154, %c1_155, %c0_156, %c0_157] : memref<18x2x24x8xf32, #tpu.memory_space<vmem>>, vector<16x1x24x4xf32>
    %144 = vector.shape_cast %143 : vector<16x1x24x4xf32> to vector<16x24x4xf32>
    %145 = arith.addf %144, %142 : vector<16x24x4xf32>
    %c1_158 = arith.constant 1 : index
    %c1_159 = arith.constant 1 : index
    %c0_160 = arith.constant 0 : index
    %c0_161 = arith.constant 0 : index
    %146 = vector.load %arg6[%c1_158, %c1_159, %c0_160, %c0_161] : memref<18x2x24x8xf32, #tpu.memory_space<vmem>>, vector<16x1x24x4xf32>
    %147 = vector.shape_cast %146 : vector<16x1x24x4xf32> to vector<16x24x4xf32>
    %148 = vector.shape_cast %145 : vector<16x24x4xf32> to vector<16x1x24x4xf32>
    tpu.vector_store %arg6[%c1_158, %c1_159, %c0_160, %c0_161], %148 {strides = array<i32>} : memref<18x2x24x8xf32, #tpu.memory_space<vmem>>, vector<16x1x24x4xf32>,
    %149 = vector.extract_strided_slice %116 {offsets = [0, 16], sizes = [384, 4], strides = [1, 1]} : vector<384x20xf32> to vector<384x4xf32>
    %150 = vector.shape_cast %149 : vector<384x4xf32> to vector<16x24x4xf32>
    %c2_162 = arith.constant 2 : index
    %c0_163 = arith.constant 0 : index
    %c0_164 = arith.constant 0 : index
    %c0_165 = arith.constant 0 : index
    %151 = vector.load %arg6[%c2_162, %c0_163, %c0_164, %c0_165] : memref<18x2x24x8xf32, #tpu.memory_space<vmem>>, vector<16x1x24x4xf32>
    %152 = vector.shape_cast %151 : vector<16x1x24x4xf32> to vector<16x24x4xf32>
    %153 = arith.addf %152, %150 : vector<16x24x4xf32>
    %c2_166 = arith.constant 2 : index
    %c0_167 = arith.constant 0 : index
    %c0_168 = arith.constant 0 : index
    %c0_169 = arith.constant 0 : index
    %154 = vector.load %arg6[%c2_166, %c0_167, %c0_168, %c0_169] : memref<18x2x24x8xf32, #tpu.memory_space<vmem>>, vector<16x1x24x4xf32>
    %155 = vector.shape_cast %154 : vector<16x1x24x4xf32> to vector<16x24x4xf32>
    %156 = vector.shape_cast %153 : vector<16x24x4xf32> to vector<16x1x24x4xf32>
    tpu.vector_store %arg6[%c2_166, %c0_167, %c0_168, %c0_169], %156 {strides = array<i32>} : memref<18x2x24x8xf32, #tpu.memory_space<vmem>>, vector<16x1x24x4xf32>,
    %c0_170 = arith.constant 0 : index
    %c0_171 = arith.constant 0 : index
    %c0_172 = arith.constant 0 : index
    %c0_173 = arith.constant 0 : index
    %157 = vector.load %arg6[%c0_170, %c0_171, %c0_172, %c0_173] : memref<18x2x24x8xf32, #tpu.memory_space<vmem>>, vector<18x2x24x8xf32>
    %c0_174 = arith.constant 0 : index
    %c0_175 = arith.constant 0 : index
    %c0_176 = arith.constant 0 : index
    %c0_177 = arith.constant 0 : index
    %c0_178 = arith.constant 0 : index
    %158 = vector.load %arg4[%c0_174, %c0_175, %c0_176, %c0_177, %c0_178] : memref<1x18x2x24x8xf32, #tpu.memory_space<vmem>>, vector<1x18x2x24x8xf32>
    %159 = vector.shape_cast %158 : vector<1x18x2x24x8xf32> to vector<18x2x24x8xf32>
    %160 = vector.shape_cast %157 : vector<18x2x24x8xf32> to vector<1x18x2x24x8xf32>
    tpu.vector_store %arg4[%c0_174, %c0_175, %c0_176, %c0_177, %c0_178], %160 {strides = array<i32>} : memref<1x18x2x24x8xf32, #tpu.memory_space<vmem>>, vector<1x18x2x24x8xf32>,
    return
  }
  func.func @transform_0(%arg0: i32) -> (i32, i32, i32, i32) {
    %c0_i32 = arith.constant 0 : i32
    %c0_i32_0 = arith.constant 0 : i32
    %c0_i32_1 = arith.constant 0 : i32
    %c0_i32_2 = arith.constant 0 : i32
    return %arg0, %c0_i32, %c0_i32_0, %c0_i32_1 : i32, i32, i32, i32
  }
  func.func @transform_1(%arg0: i32) -> (i32, i32) {
    %c0_i32 = arith.constant 0 : i32
    %c0_i32_0 = arith.constant 0 : i32
    %c0_i32_1 = arith.constant 0 : i32
    return %c0_i32, %c0_i32_0 : i32, i32
  }
  func.func @transform_2(%arg0: i32) -> (i32, i32) {
    %c0_i32 = arith.constant 0 : i32
    %c0_i32_0 = arith.constant 0 : i32
    %c0_i32_1 = arith.constant 0 : i32
    return %c0_i32, %c0_i32_0 : i32, i32
  }
  func.func @transform_3(%arg0: i32) -> (i32, i32, i32, i32, i32) {
    %c0_i32 = arith.constant 0 : i32
    %c0_i32_0 = arith.constant 0 : i32
    %c0_i32_1 = arith.constant 0 : i32
    %c0_i32_2 = arith.constant 0 : i32
    %c0_i32_3 = arith.constant 0 : i32
    return %arg0, %c0_i32, %c0_i32_0, %c0_i32_1, %c0_i32_2 : i32, i32, i32, i32, i32
  }
}

</mosaic_0001>

<bundles_post_ra>
// kernel: tpu_custom_call.1
= control target key start
LH: loop header
LB: loop body
LE: loop exit
PB: predicated region body
PF: predicated region fallthrough
CT: control target
= control target key end

     0   :  { %s6223_s12 = smov 0   ;;  %s9693_s0 = inlined_call_operand.vmem [shape: f32[2,16,16,4], index: 0, kind: input, shape index: {}]   ;;  %s9694_s1 = inlined_call_operand.vmem [shape: f32[4,100], index: 1, kind: input, shape index: {}]   ;;  %s9695_s2 = inlined_call_operand.vmem [shape: f32[1,8], index: 2, kind: input, shape index: {}]   ;;  %s9696_s3 = inlined_call_operand.vmem [shape: f32[2,18,2,24,8], index: 3, kind: output, shape index: {}]  }
   0x1 LB: > { %s6006_s13 = sadd.s32 4294967295, %s6192_s12   ;;  %p6010_p0 = scmp.ge.s32.totalorder %s6192_s12, 1  ;;  %s6192_s12 = sphi %s6223_s12, %s13_s12  }
   0x2   : > { %p137_p1 = scmp.lt.s32.totalorder %s6192_s12, 3 }
   0x4   : > { %p138_p2 = pnand %p6010_p0, %p137_p1 }
   0x5   : > { %p161_p3 = scmp.lt.s32.totalorder (!%p138_p2), %s6006_s13, 1  ;;  %s6195_s22 = smov (!%p138_p2), 120  }
   0x6   : > { %141 = sbr.rel (%p138_p2) target bundleno = 2791 (0xae7), region = 32  ;;  %s6196_s23 = smov (!%p138_p2), 112  }
   0x7   : > { %s6197_s24 = smov (!%p138_p2), 104   ;;  %s6198_s25 = smov (!%p138_p2), 96  }
   0x8   : > { %s6199_s28 = smov (!%p138_p2), 88   ;;  %s6200_s4 = smov (!%p138_p2), 48  }
   0x9   : > { %s6201_s5 = smov (!%p138_p2), 124   ;;  %s6202_s10 = smov (!%p138_p2), 116  }
   0xb   : > { %v671_v0 = vld [vmem:[%s9694_s1] sm:$0xf]  ;;  %vm816_vm0 = vcmask 1043456   ;;  %vm284_vm1 = vcmask 31744   ;;  %v6194_v1 = vmov 0.0   ;;  %s9698_s13 = smov (!%p161_p3, %s6006_s13), 1 }
   0xc   : > { %6014 = vmatpush.msk.msra.mxu0 %vm816_vm0, %v671_v0  ;;  %285 = vst.msk [vmem:[#allocation2] sm:$0xff] %vm284_vm1, %v6194_v1  ;;  %6164 = vmatpush.msk.msra.mxu3 %vm816_vm0, %v671_v0  ;;  %s6163_s16 = sshll.u32 %s9698_s13, 8  ;;  %v6561_v19 = vld [vmem:[%s9695_s2] ss:$0 sm:$0xff]  ;;  %vm175_vm2 = vcmask 64512   ;;  %s6167_s6 = smul.u32 864, %s9698_s13 }
   0xd   : > { %286 = vst.msk [vmem:[#allocation2 + $0x8] sm:$0xff] %vm284_vm1, %v6194_v1  ;;  %s6250_s19 = scalar_lea.vmem %s9693_s0, %s6163_s16 }
   0xe   : > { %287 = vst.msk [vmem:[#allocation2 + $0x10] sm:$0xff] %vm284_vm1, %v6194_v1  ;;  %v429_v2 = vld [vmem:[%s6250_s19] sm:$0xff]  ;;  %v430_v4 = vld [vmem:[%s6250_s19 + $0x8] sm:$0xff]  ;;  %v431_v7 = vld [vmem:[%s6250_s19 + $0x10] sm:$0xff]  ;;  %s8680_s9 = scalar_lea.vmem %s9696_s3, %s6167_s6 }
   0xf   : > { %288 = vst.msk [vmem:[#allocation2 + $0x18] sm:$0xff] %vm284_vm1, %v6194_v1  ;;  %v453_v5 = vld [vmem:[%s6250_s19 + $0xc0] sm:$0xff]  ;;  %v454_v6 = vld [vmem:[%s6250_s19 + $0xc8] sm:$0xff]  ;;  %v432_v8 = vld [vmem:[%s6250_s19 + $0x18] sm:$0xff] }
  0x10   : > { %289 = vst.msk [vmem:[#allocation2 + $0x20] sm:$0xff] %vm284_vm1, %v6194_v1  ;;  %v455_v11 = vld [vmem:[%s6250_s19 + $0xd0] sm:$0xff]  ;;  %v456_v12 = vld [vmem:[%s6250_s19 + $0xd8] sm:$0xff]  ;;  %v433_v15 = vld [vmem:[%s6250_s19 + $0x20] sm:$0xff] }
  0x11   : > { %290 = vst.msk [vmem:[#allocation2 + $0x28] sm:$0xff] %vm284_vm1, %v6194_v1  ;;  %v434_v16 = vld [vmem:[%s6250_s19 + $0x28] sm:$0xff]  ;;  %v457_v32 = vld [vmem:[%s6250_s19 + $0xe0] sm:$0xff]  ;;  %v435_v36 = vld [vmem:[%s6250_s19 + $0x30] sm:$0xff] }
  0x12   : > { %461 = vst.msk [vmem:[#allocation2] sm:$0xff] %vm284_vm1, %v429_v2  ;;  %v458_v35 = vld [vmem:[%s6250_s19 + $0xe8] sm:$0xff]  ;;  %v436_v40 = vld [vmem:[%s6250_s19 + $0x38] sm:$0xff]  ;;  %v459_v53 = vld [vmem:[%s6250_s19 + $0xf0] sm:$0xff] }
  0x13   : > { %291 = vst.msk [vmem:[#allocation2 + $0x30] sm:$0xff] %vm284_vm1, %v6194_v1  ;;  %v460_v62 = vld [vmem:[%s6250_s19 + $0xf8] sm:$0xff] }
  0x14   : > { %292 = vst.msk [vmem:[#allocation2 + $0x38] sm:$0xff] %vm284_vm1, %v6194_v1 }
  0x15   : > { %293 = vst.msk [vmem:[#allocation2 + $0x40] sm:$0xff] %vm284_vm1, %v6194_v1  ;;  %v625_v13 = vld [vmem:[#allocation2 + $0x10] sm:$0xff] }
  0x16   : > { %294 = vst.msk [vmem:[#allocation2 + $0x48] sm:$0xff] %vm284_vm1, %v6194_v1 }
  0x17   : > { %295 = vst.msk [vmem:[#allocation2 + $0x50] sm:$0xff] %vm284_vm1, %v6194_v1 }
  0x18   : > { %296 = vst.msk [vmem:[#allocation2 + $0x58] sm:$0xff] %vm284_vm1, %v6194_v1  ;;  %v628_v25 = vld [vmem:[#allocation2 + $0x28] sm:$0xff] }
  0x19   : > { %v623_v3 = vld [vmem:[#allocation2] sm:$0xff]  ;;  %297 = vst.msk [vmem:[#allocation2 + $0x60] sm:$0xff] %vm284_vm1, %v6194_v1 }
  0x1a   : > { %6015 = vmatmul.msk.f32.vlgmr.msra.gmra.mxu0 %vm284_vm1, %v623_v3  ;;  %298 = vst.msk [vmem:[#allocation2 + $0x68] sm:$0xff] %vm284_vm1, %v6194_v1 }
  0x1b   : > { %299 = vst.msk [vmem:[#allocation2 + $0x70] sm:$0xff] %vm284_vm1, %v6194_v1 }
  0x1c   : > { %300 = vst.msk [vmem:[#allocation2 + $0x78] sm:$0xff] %vm284_vm1, %v6194_v1  ;;  %v631_v30 = vld [vmem:[#allocation2 + $0x40] sm:$0xff] }
  0x1d   : > { %301 = vst.msk [vmem:[#allocation2 + $0x80] sm:$0xff] %vm284_vm1, %v6194_v1 }
  0x1e   : > { %302 = vst.msk [vmem:[#allocation2 + $0x88] sm:$0xff] %vm284_vm1, %v6194_v1 }
  0x1f   : > { %303 = vst.msk [vmem:[#allocation2 + $0x90] sm:$0xff] %vm284_vm1, %v6194_v1  ;;  %v634_v63 = vld [vmem:[#allocation2 + $0x58] sm:$0xff] }
  0x20   : > { %304 = vst.msk [vmem:[#allocation2 + $0x98] sm:$0xff] %vm284_vm1, %v6194_v1 }
  0x21   : > { %305 = vst.msk [vmem:[#allocation2 + $0xa0] sm:$0xff] %vm284_vm1, %v6194_v1 }
  0x22   : > { %306 = vst.msk [vmem:[#allocation2 + $0xa8] sm:$0xff] %vm284_vm1, %v6194_v1 }
  0x23   : > { %307 = vst.msk [vmem:[#allocation2 + $0xb0] sm:$0xff] %vm284_vm1, %v6194_v1 }
  0x24   : > { %308 = vst.msk [vmem:[#allocation2 + $0xb8] sm:$0xff] %vm284_vm1, %v6194_v1 }
  0x25   : > { %309 = vst.msk [vmem:[#allocation2 + $0xc0] sm:$0xff] %vm284_vm1, %v6194_v1 }
  0x26   : > { %310 = vst.msk [vmem:[#allocation2 + $0xc8] sm:$0xff] %vm284_vm1, %v6194_v1 }
  0x27   : > { %311 = vst.msk [vmem:[#allocation2 + $0xd0] sm:$0xff] %vm284_vm1, %v6194_v1 }
  0x28   : > { %312 = vst.msk [vmem:[#allocation2 + $0xd8] sm:$0xff] %vm284_vm1, %v6194_v1 }
  0x29   : > { %313 = vst.msk [vmem:[#allocation2 + $0xe0] sm:$0xff] %vm284_vm1, %v6194_v1 }
  0x2a   : > { %314 = vst.msk [vmem:[#allocation2 + $0xe8] sm:$0xff] %vm284_vm1, %v6194_v1 }
  0x2b   : > { %315 = vst.msk [vmem:[#allocation2 + $0xf0] sm:$0xff] %vm284_vm1, %v6194_v1 }
  0x2c   : > { %316 = vst.msk [vmem:[#allocation2 + $0xf8] sm:$0xff] %vm284_vm1, %v6194_v1 }
  0x2d   : > { %317 = vst.msk [vmem:[#allocation2 + $0x100] sm:$0xff] %vm284_vm1, %v6194_v1 }
  0x2e   : > { %318 = vst.msk [vmem:[#allocation2 + $0x108] sm:$0xff] %vm284_vm1, %v6194_v1 }
  0x2f   : > { %319 = vst.msk [vmem:[#allocation2 + $0x110] sm:$0xff] %vm284_vm1, %v6194_v1 }
  0x30   : > { %320 = vst.msk [vmem:[#allocation2 + $0x118] sm:$0xff] %vm284_vm1, %v6194_v1 }
  0x31   : > { %321 = vst.msk [vmem:[#allocation2 + $0x120] sm:$0xff] %vm284_vm1, %v6194_v1 }
  0x32   : > { %322 = vst.msk [vmem:[#allocation2 + $0x128] sm:$0xff] %vm284_vm1, %v6194_v1 }
  0x33   : > { %323 = vst.msk [vmem:[#allocation2 + $0x130] sm:$0xff] %vm284_vm1, %v6194_v1 }
  0x34   : > { %324 = vst.msk [vmem:[#allocation2 + $0x138] sm:$0xff] %vm284_vm1, %v6194_v1 }
  0x35   : > { %325 = vst.msk [vmem:[#allocation2 + $0x140] sm:$0xff] %vm284_vm1, %v6194_v1 }
  0x36   : > { %326 = vst.msk [vmem:[#allocation2 + $0x148] sm:$0xff] %vm284_vm1, %v6194_v1 }
  0x37   : > { %327 = vst.msk [vmem:[#allocation2 + $0x150] sm:$0xff] %vm284_vm1, %v6194_v1 }
  0x38   : > { %328 = vst.msk [vmem:[#allocation2 + $0x158] sm:$0xff] %vm284_vm1, %v6194_v1 }
  0x39   : > { %329 = vst.msk [vmem:[#allocation2 + $0x160] sm:$0xff] %vm284_vm1, %v6194_v1 }
  0x3a   : > { %330 = vst.msk [vmem:[#allocation2 + $0x168] sm:$0xff] %vm284_vm1, %v6194_v1  ;;  %v661_v18 = vld [vmem:[#allocation2 + $0x130] sm:$0xff] }
  0x3b   : > { %331 = vst.msk [vmem:[#allocation2 + $0x170] sm:$0xff] %vm284_vm1, %v6194_v1 }
  0x3c   : > { %332 = vst.msk [vmem:[#allocation2 + $0x178] sm:$0xff] %vm284_vm1, %v6194_v1 }
  0x3d   : > { %333 = vst.msk [vmem:[#allocation2 + $0x180] sm:$0xff] %vm284_vm1, %v6194_v1  ;;  %v664_v28 = vld [vmem:[#allocation2 + $0x148] sm:$0xff] }
  0x3e   : > { %334 = vst.msk [vmem:[#allocation2 + $0x188] sm:$0xff] %vm284_vm1, %v6194_v1 }
  0x3f   : > { %335 = vst.msk [vmem:[#allocation2 + $0x190] sm:$0xff] %vm284_vm1, %v6194_v1 }
  0x40   : > { %336 = vst.msk [vmem:[#allocation2 + $0x198] sm:$0xff] %vm284_vm1, %v6194_v1  ;;  %v667_v57 = vld [vmem:[#allocation2 + $0x160] sm:$0xff] }
  0x41   : > { %337 = vst.msk [vmem:[#allocation2 + $0x1a0] sm:$0xff] %vm284_vm1, %v6194_v1 }
  0x42   : > { %338 = vst.msk [vmem:[#allocation2 + $0x1a8] sm:$0xff] %vm284_vm1, %v6194_v1 }
  0x43   : > { %339 = vst.msk [vmem:[#allocation2 + $0x1b0] sm:$0xff] %vm284_vm1, %v6194_v1 }
  0x44   : > { %340 = vst.msk [vmem:[#allocation2 + $0x1b8] sm:$0xff] %vm284_vm1, %v6194_v1 }
  0x45   : > { %341 = vst.msk [vmem:[#allocation2 + $0x1c0] sm:$0xff] %vm284_vm1, %v6194_v1 }
  0x46   : > { %342 = vst.msk [vmem:[#allocation2 + $0x1c8] sm:$0xff] %vm284_vm1, %v6194_v1 }
  0x47   : > { %343 = vst.msk [vmem:[#allocation2 + $0x1d0] sm:$0xff] %vm284_vm1, %v6194_v1 }
  0x48   : > { %344 = vst.msk [vmem:[#allocation2 + $0x1d8] sm:$0xff] %vm284_vm1, %v6194_v1 }
  0x49   : > { %345 = vst.msk [vmem:[#allocation2 + $0x1e0] sm:$0xff] %vm284_vm1, %v6194_v1 }
  0x4a   : > { %346 = vst.msk [vmem:[#allocation2 + $0x1e8] sm:$0xff] %vm284_vm1, %v6194_v1 }
  0x4b   : > { %347 = vst.msk [vmem:[#allocation2 + $0x1f0] sm:$0xff] %vm284_vm1, %v6194_v1 }
  0x4c   : > { %348 = vst.msk [vmem:[#allocation2 + $0x1f8] sm:$0xff] %vm284_vm1, %v6194_v1 }
  0x4d   : > { %349 = vst.msk [vmem:[#allocation2 + $0x200] sm:$0xff] %vm284_vm1, %v6194_v1 }
  0x4e   : > { %350 = vst.msk [vmem:[#allocation2 + $0x208] sm:$0xff] %vm284_vm1, %v6194_v1 }
  0x4f   : > { %351 = vst.msk [vmem:[#allocation2 + $0x210] sm:$0xff] %vm284_vm1, %v6194_v1 }
  0x50   : > { %352 = vst.msk [vmem:[#allocation2 + $0x218] sm:$0xff] %vm284_vm1, %v6194_v1 }
  0x51   : > { %353 = vst.msk [vmem:[#allocation2 + $0x220] sm:$0xff] %vm284_vm1, %v6194_v1 }
  0x52   : > { %354 = vst.msk [vmem:[#allocation2 + $0x228] sm:$0xff] %vm284_vm1, %v6194_v1 }
  0x53   : > { %355 = vst.msk [vmem:[#allocation2 + $0x230] sm:$0xff] %vm284_vm1, %v6194_v1 }
  0x54   : > { %356 = vst.msk [vmem:[#allocation2 + $0x238] sm:$0xff] %vm284_vm1, %v6194_v1 }
  0x55   : > { %357 = vst.msk [vmem:[#allocation2 + $0x240] sm:$0xff] %vm284_vm1, %v6194_v1 }
  0x56   : > { %358 = vst.msk [vmem:[#allocation2 + $0x248] sm:$0xff] %vm284_vm1, %v6194_v1 }
  0x57   : > { %359 = vst.msk [vmem:[#allocation2 + $0x250] sm:$0xff] %vm284_vm1, %v6194_v1 }
  0x58   : > { %360 = vst.msk [vmem:[#allocation2 + $0x258] sm:$0xff] %vm284_vm1, %v6194_v1 }
  0x59   : > { %361 = vst.msk [vmem:[#allocation2 + $0x260] sm:$0xff] %vm284_vm1, %v6194_v1 }
  0x5a   : > { %362 = vst.msk [vmem:[#allocation2 + $0x268] sm:$0xff] %vm284_vm1, %v6194_v1 }
  0x5b   : > { %363 = vst.msk [vmem:[#allocation2 + $0x270] sm:$0xff] %vm284_vm1, %v6194_v1 }
  0x5c   : > { %364 = vst.msk [vmem:[#allocation2 + $0x278] sm:$0xff] %vm284_vm1, %v6194_v1 }
  0x5d   : > { %365 = vst.msk [vmem:[#allocation2 + $0x280] sm:$0xff] %vm284_vm1, %v6194_v1 }
  0x5e   : > { %366 = vst.msk [vmem:[#allocation2 + $0x288] sm:$0xff] %vm284_vm1, %v6194_v1 }
  0x5f   : > { %367 = vst.msk [vmem:[#allocation2 + $0x290] sm:$0xff] %vm284_vm1, %v6194_v1 }
  0x60   : > { %368 = vst.msk [vmem:[#allocation2 + $0x298] sm:$0xff] %vm284_vm1, %v6194_v1 }
  0x61   : > { %369 = vst.msk [vmem:[#allocation2 + $0x2a0] sm:$0xff] %vm284_vm1, %v6194_v1 }
  0x62   : > { %370 = vst.msk [vmem:[#allocation2 + $0x2a8] sm:$0xff] %vm284_vm1, %v6194_v1 }
  0x63   : > { %371 = vst.msk [vmem:[#allocation2 + $0x2b0] sm:$0xff] %vm284_vm1, %v6194_v1 }
  0x64   : > { %372 = vst.msk [vmem:[#allocation2 + $0x2b8] sm:$0xff] %vm284_vm1, %v6194_v1 }
  0x65   : > { %373 = vst.msk [vmem:[#allocation2 + $0x2c0] sm:$0xff] %vm284_vm1, %v6194_v1 }
  0x66   : > { %374 = vst.msk [vmem:[#allocation2 + $0x2c8] sm:$0xff] %vm284_vm1, %v6194_v1 }
  0x67   : > { %375 = vst.msk [vmem:[#allocation2 + $0x2d0] sm:$0xff] %vm284_vm1, %v6194_v1 }
  0x68   : > { %376 = vst.msk [vmem:[#allocation2 + $0x2d8] sm:$0xff] %vm284_vm1, %v6194_v1 }
  0x69   : > { %377 = vst.msk [vmem:[#allocation2 + $0x2e0] sm:$0xff] %vm284_vm1, %v6194_v1 }
  0x6a   : > { %378 = vst.msk [vmem:[#allocation2 + $0x2e8] sm:$0xff] %vm284_vm1, %v6194_v1 }
  0x6b   : > { %379 = vst.msk [vmem:[#allocation2 + $0x2f0] sm:$0xff] %vm284_vm1, %v6194_v1 }
  0x6c   : > { %380 = vst.msk [vmem:[#allocation2 + $0x2f8] sm:$0xff] %vm284_vm1, %v6194_v1 }
  0x6d   : > { %381 = vst.msk [vmem:[#allocation2 + $0x300] sm:$0xff] %vm284_vm1, %v6194_v1 }
  0x6e   : > { %382 = vst.msk [vmem:[#allocation2 + $0x308] sm:$0xff] %vm284_vm1, %v6194_v1 }
  0x6f   : > { %383 = vst.msk [vmem:[#allocation2 + $0x310] sm:$0xff] %vm284_vm1, %v6194_v1 }
  0x70   : > { %384 = vst.msk [vmem:[#allocation2 + $0x318] sm:$0xff] %vm284_vm1, %v6194_v1 }
  0x71   : > { %385 = vst.msk [vmem:[#allocation2 + $0x320] sm:$0xff] %vm284_vm1, %v6194_v1 }
  0x72   : > { %386 = vst.msk [vmem:[#allocation2 + $0x328] sm:$0xff] %vm284_vm1, %v6194_v1 }
  0x73   : > { %387 = vst.msk [vmem:[#allocation2 + $0x330] sm:$0xff] %vm284_vm1, %v6194_v1 }
  0x74   : > { %388 = vst.msk [vmem:[#allocation2 + $0x338] sm:$0xff] %vm284_vm1, %v6194_v1 }
  0x75   : > { %389 = vst.msk [vmem:[#allocation2 + $0x340] sm:$0xff] %vm284_vm1, %v6194_v1 }
  0x76   : > { %390 = vst.msk [vmem:[#allocation2 + $0x348] sm:$0xff] %vm284_vm1, %v6194_v1 }
  0x77   : > { %391 = vst.msk [vmem:[#allocation2 + $0x350] sm:$0xff] %vm284_vm1, %v6194_v1 }
  0x78   : > { %392 = vst.msk [vmem:[#allocation2 + $0x358] sm:$0xff] %vm284_vm1, %v6194_v1 }
  0x79   : > { %393 = vst.msk [vmem:[#allocation2 + $0x360] sm:$0xff] %vm284_vm1, %v6194_v1 }
  0x7a   : > { %394 = vst.msk [vmem:[#allocation2 + $0x368] sm:$0xff] %vm284_vm1, %v6194_v1 }
  0x7b   : > { %395 = vst.msk [vmem:[#allocation2 + $0x370] sm:$0xff] %vm284_vm1, %v6194_v1 }
  0x7c   : > { %396 = vst.msk [vmem:[#allocation2 + $0x378] sm:$0xff] %vm284_vm1, %v6194_v1 }
  0x7d   : > { %397 = vst.msk [vmem:[#allocation2 + $0x380] sm:$0xff] %vm284_vm1, %v6194_v1 }
  0x7e   : > { %398 = vst.msk [vmem:[#allocation2 + $0x388] sm:$0xff] %vm284_vm1, %v6194_v1 }
  0x7f   : > { %399 = vst.msk [vmem:[#allocation2 + $0x390] sm:$0xff] %vm284_vm1, %v6194_v1 }
  0x80   : > { %400 = vst.msk [vmem:[#allocation2 + $0x398] sm:$0xff] %vm284_vm1, %v6194_v1 }
  0x81   : > { %401 = vst.msk [vmem:[#allocation2 + $0x3a0] sm:$0xff] %vm284_vm1, %v6194_v1 }
  0x82   : > { %402 = vst.msk [vmem:[#allocation2 + $0x3a8] sm:$0xff] %vm284_vm1, %v6194_v1 }
  0x83   : > { %403 = vst.msk [vmem:[#allocation2 + $0x3b0] sm:$0xff] %vm284_vm1, %v6194_v1 }
  0x84   : > { %404 = vst.msk [vmem:[#allocation2 + $0x3b8] sm:$0xff] %vm284_vm1, %v6194_v1 }
  0x85   : > { %405 = vst.msk [vmem:[#allocation2 + $0x3c0] sm:$0xff] %vm284_vm1, %v6194_v1 }
  0x86   : > { %406 = vst.msk [vmem:[#allocation2 + $0x3c8] sm:$0xff] %vm284_vm1, %v6194_v1 }
  0x87   : > { %407 = vst.msk [vmem:[#allocation2 + $0x3d0] sm:$0xff] %vm284_vm1, %v6194_v1 }
  0x88   : > { %408 = vst.msk [vmem:[#allocation2 + $0x3d8] sm:$0xff] %vm284_vm1, %v6194_v1 }
  0x89   : > { %409 = vst.msk [vmem:[#allocation2 + $0x3e0] sm:$0xff] %vm284_vm1, %v6194_v1 }
  0x8a   : > { %410 = vst.msk [vmem:[#allocation2 + $0x3e8] sm:$0xff] %vm284_vm1, %v6194_v1 }
  0x8b   : > { %411 = vst.msk [vmem:[#allocation2 + $0x3f0] sm:$0xff] %vm284_vm1, %v6194_v1 }
  0x8c   : > { %412 = vst.msk [vmem:[#allocation2 + $0x3f8] sm:$0xff] %vm284_vm1, %v6194_v1 }
  0x8d   : > { %413 = vst.msk [vmem:[#allocation2 + $0x400] sm:$0xff] %vm284_vm1, %v6194_v1 }
  0x8e   : > { %414 = vst.msk [vmem:[#allocation2 + $0x408] sm:$0xff] %vm284_vm1, %v6194_v1 }
  0x8f   : > { %415 = vst.msk [vmem:[#allocation2 + $0x410] sm:$0xff] %vm284_vm1, %v6194_v1 }
  0x90   : > { %416 = vst.msk [vmem:[#allocation2 + $0x418] sm:$0xff] %vm284_vm1, %v6194_v1 }
  0x91   : > { %417 = vst.msk [vmem:[#allocation2 + $0x420] sm:$0xff] %vm284_vm1, %v6194_v1 }
  0x92   : > { %418 = vst.msk [vmem:[#allocation2 + $0x428] sm:$0xff] %vm284_vm1, %v6194_v1 }
  0x93   : > { %419 = vst.msk [vmem:[#allocation2 + $0x430] sm:$0xff] %vm284_vm1, %v6194_v1 }
  0x94   : > { %420 = vst.msk [vmem:[#allocation2 + $0x438] sm:$0xff] %vm284_vm1, %v6194_v1 }
  0x95   : > { %421 = vst.msk [vmem:[#allocation2 + $0x440] sm:$0xff] %vm284_vm1, %v6194_v1 }
  0x96   : > { %422 = vst.msk [vmem:[#allocation2 + $0x448] sm:$0xff] %vm284_vm1, %v6194_v1 }
  0x97   : > { %423 = vst.msk [vmem:[#allocation2 + $0x450] sm:$0xff] %vm284_vm1, %v6194_v1  ;;  %v837_v20 = vpop.f32.mrf.mxu0 }
  0x98   : > { %424 = vst.msk [vmem:[#allocation2 + $0x458] sm:$0xff] %vm284_vm1, %v6194_v1  ;;  %1222 = vrot.lane.b32.xlu0 %v837_v20, %s6195_s22 }
  0x99   : > { %425 = vst.msk [vmem:[#allocation2 + $0x460] sm:$0xff] %vm284_vm1, %v6194_v1 }
  0x9a   : > { %426 = vst.msk [vmem:[#allocation2 + $0x468] sm:$0xff] %vm284_vm1, %v6194_v1 }
  0x9b   : > { %427 = vst.msk [vmem:[#allocation2 + $0x470] sm:$0xff] %vm284_vm1, %v6194_v1 }
  0x9c   : > { %428 = vst.msk [vmem:[#allocation2 + $0x478] sm:$0xff] %vm284_vm1, %v6194_v1 }
  0x9d   : > { %462 = vst.msk [vmem:[#allocation2 + $0x8] sm:$0xff] %vm284_vm1, %v430_v4 }
  0x9e   : > { %485 = vst.msk [vmem:[#allocation2 + $0x120] sm:$0xff] %vm284_vm1, %v453_v5 }
  0x9f   : > { %486 = vst.msk [vmem:[#allocation2 + $0x128] sm:$0xff] %vm284_vm1, %v454_v6 }
  0xa0   : > { %463 = vst.msk [vmem:[#allocation2 + $0x18] sm:$0xff] %vm284_vm1, %v431_v7  ;;  %1511 = vrot.lane.b32.xlu0 %v837_v20, %s6196_s23 }
  0xa1   : > { %464 = vst.msk [vmem:[#allocation2 + $0x20] sm:$0xff] %vm284_vm1, %v432_v8  ;;  %v670_v8 = vld [vmem:[#allocation2 + $0x178] sm:$0xff] }
  0xa2   : > { %487 = vst.msk [vmem:[#allocation2 + $0x138] sm:$0xff] %vm284_vm1, %v455_v11 }
  0xa3   : > { %488 = vst.msk [vmem:[#allocation2 + $0x140] sm:$0xff] %vm284_vm1, %v456_v12 }
  0xa4   : > { %v624_v9 = vld [vmem:[#allocation2 + $0x8] sm:$0xff]  ;;  %465 = vst.msk [vmem:[#allocation2 + $0x30] sm:$0xff] %vm284_vm1, %v433_v15 }
  0xa5   : > { %6016 = vmatmul.msk.f32.gmra.mxu0 %vm284_vm1, %v624_v9  ;;  %v659_v10 = vld [vmem:[#allocation2 + $0x120] sm:$0xff]  ;;  %466 = vst.msk [vmem:[#allocation2 + $0x38] sm:$0xff] %vm284_vm1, %v434_v16 }
  0xa6   : > { %6051 = vmatmul.msk.f32.vlgmr.msra.gmra.mxu3 %vm284_vm1, %v659_v10  ;;  %v660_v14 = vld [vmem:[#allocation2 + $0x128] sm:$0xff]  ;;  %176 = vst.msk [vmem:[#allocation3] sm:$0xff] %vm175_vm2, %v6561_v19  ;;  %v437_v9 = vld [vmem:[%s6250_s19 + $0x40] sm:$0xff] }
  0xa7   : > { %v626_v17 = vld [vmem:[#allocation2 + $0x18] sm:$0xff]  ;;  %281 = vst.msk [vmem:[#allocation3 + $0x348] sm:$0xff] %vm175_vm2, %v6561_v19 }
  0xa8   : > { %282 = vst.msk [vmem:[#allocation3 + $0x350] sm:$0xff] %vm175_vm2, %v6561_v19  ;;  %v627_v21 = vld [vmem:[#allocation2 + $0x20] sm:$0xff]  ;;  %1800 = vrot.lane.b32.xlu0 %v837_v20, %s6197_s24 }
  0xa9   : > { %283 = vst.msk [vmem:[#allocation3 + $0x358] sm:$0xff] %vm175_vm2, %v6561_v19  ;;  %v662_v22 = vld [vmem:[#allocation2 + $0x138] sm:$0xff] }
  0xaa   : > { %177 = vst.msk [vmem:[#allocation3 + $0x8] sm:$0xff] %vm175_vm2, %v6561_v19  ;;  %v663_v26 = vld [vmem:[#allocation2 + $0x140] sm:$0xff] }
  0xab   : > { %178 = vst.msk [vmem:[#allocation3 + $0x10] sm:$0xff] %vm175_vm2, %v6561_v19  ;;  %v629_v27 = vld [vmem:[#allocation2 + $0x30] sm:$0xff] }
  0xac   : > { %179 = vst.msk [vmem:[#allocation3 + $0x18] sm:$0xff] %vm175_vm2, %v6561_v19  ;;  %v630_v29 = vld [vmem:[#allocation2 + $0x38] sm:$0xff] }
  0xad   : > { %6017 = vmatmul.msk.f32.gmra.mxu0 %vm284_vm1, %v625_v13  ;;  %v981_v23 = vld [vmem:[#allocation3] sm:$0xff]  ;;  %180 = vst.msk [vmem:[#allocation3 + $0x20] sm:$0xff] %vm175_vm2, %v6561_v19 }
  0xae   : > { %6052 = vmatmul.msk.f32.gmra.mxu3 %vm284_vm1, %v660_v14  ;;  %v1029_v24 = vadd.f32 %v981_v23, %v837_v20  ;;  %181 = vst.msk [vmem:[#allocation3 + $0x28] sm:$0xff] %vm175_vm2, %v6561_v19  ;;  %v438_v14 = vld [vmem:[%s6250_s19 + $0x48] sm:$0xff]  ;;  %v439_v23 = vld [vmem:[%s6250_s19 + $0x50] sm:$0xff] }
  0xaf   : > { %182 = vst.msk [vmem:[#allocation3 + $0x30] sm:$0xff] %vm175_vm2, %v6561_v19 }
  0xb0   : > { %1077 = vst.msk [vmem:[#allocation3] sm:$0xff] %vm175_vm2, %v1029_v24  ;;  %2089 = vrot.lane.b32.xlu0 %v837_v20, %s6198_s25 }
  0xb1   : > { %183 = vst.msk [vmem:[#allocation3 + $0x38] sm:$0xff] %vm175_vm2, %v6561_v19  ;;  %v982_v31 = vld [vmem:[#allocation3 + $0x8] sm:$0xff] }
  0xb2   : > { %184 = vst.msk [vmem:[#allocation3 + $0x40] sm:$0xff] %vm175_vm2, %v6561_v19  ;;  %v983_v38 = vld [vmem:[#allocation3 + $0x10] sm:$0xff] }
  0xb3   : > { %185 = vst.msk [vmem:[#allocation3 + $0x48] sm:$0xff] %vm175_vm2, %v6561_v19  ;;  %v1126_v24 = vld [vmem:[#allocation3 + $0x18] sm:$0xff] }
  0xb4   : > { %186 = vst.msk [vmem:[#allocation3 + $0x50] sm:$0xff] %vm175_vm2, %v6561_v19 }
  0xb5   : > { %6018 = vmatmul.msk.f32.gmra.mxu0 %vm284_vm1, %v626_v17  ;;  %187 = vst.msk [vmem:[#allocation3 + $0x58] sm:$0xff] %vm175_vm2, %v6561_v19 }
  0xb6   : > { %6053 = vmatmul.msk.f32.gmra.mxu3 %vm284_vm1, %v661_v18  ;;  %188 = vst.msk [vmem:[#allocation3 + $0x60] sm:$0xff] %vm175_vm2, %v6561_v19  ;;  %v984_v47 = vld [vmem:[#allocation3 + $0x30] sm:$0xff] }
  0xb7   : > { %189 = vst.msk [vmem:[#allocation3 + $0x68] sm:$0xff] %vm175_vm2, %v6561_v19 }
  0xb8   : > { %190 = vst.msk [vmem:[#allocation3 + $0x70] sm:$0xff] %vm175_vm2, %v6561_v19  ;;  %v985_v56 = vld [vmem:[#allocation3 + $0x38] sm:$0xff] }
  0xb9   : > { %191 = vst.msk [vmem:[#allocation3 + $0x78] sm:$0xff] %vm175_vm2, %v6561_v19  ;;  %v986_v0 = vld [vmem:[#allocation3 + $0x40] sm:$0xff] }
  0xba   : > { %192 = vst.msk [vmem:[#allocation3 + $0x80] sm:$0xff] %vm175_vm2, %v6561_v19 }
  0xbb   : > { %193 = vst.msk [vmem:[#allocation3 + $0x88] sm:$0xff] %vm175_vm2, %v6561_v19 }
  0xbc   : > { %194 = vst.msk [vmem:[#allocation3 + $0x90] sm:$0xff] %vm175_vm2, %v6561_v19 }
  0xbd   : > { %6019 = vmatmul.msk.f32.gmra.mxu0 %vm284_vm1, %v627_v21  ;;  %195 = vst.msk [vmem:[#allocation3 + $0x98] sm:$0xff] %vm175_vm2, %v6561_v19  ;;  %v987_v21 = vld [vmem:[#allocation3 + $0x60] sm:$0xff] }
  0xbe   : > { %6054 = vmatmul.msk.f32.gmra.mxu3 %vm284_vm1, %v662_v22  ;;  %196 = vst.msk [vmem:[#allocation3 + $0xa0] sm:$0xff] %vm175_vm2, %v6561_v19 }
  0xbf   : > { %197 = vst.msk [vmem:[#allocation3 + $0xa8] sm:$0xff] %vm175_vm2, %v6561_v19 }
  0xc0   : > { %198 = vst.msk [vmem:[#allocation3 + $0xb0] sm:$0xff] %vm175_vm2, %v6561_v19 }
  0xc1   : > { %199 = vst.msk [vmem:[#allocation3 + $0xb8] sm:$0xff] %vm175_vm2, %v6561_v19 }
  0xc2   : > { %200 = vst.msk [vmem:[#allocation3 + $0xc0] sm:$0xff] %vm175_vm2, %v6561_v19 }
  0xc3   : > { %201 = vst.msk [vmem:[#allocation3 + $0xc8] sm:$0xff] %vm175_vm2, %v6561_v19 }
  0xc4   : > { %202 = vst.msk [vmem:[#allocation3 + $0xd0] sm:$0xff] %vm175_vm2, %v6561_v19 }
  0xc5   : > { %6020 = vmatmul.msk.f32.gmra.mxu0 %vm284_vm1, %v628_v25  ;;  %203 = vst.msk [vmem:[#allocation3 + $0xd8] sm:$0xff] %vm175_vm2, %v6561_v19 }
  0xc6   : > { %6055 = vmatmul.msk.f32.gmra.mxu3 %vm284_vm1, %v663_v26  ;;  %204 = vst.msk [vmem:[#allocation3 + $0xe0] sm:$0xff] %vm175_vm2, %v6561_v19 }
  0xc7   : > { %205 = vst.msk [vmem:[#allocation3 + $0xe8] sm:$0xff] %vm175_vm2, %v6561_v19 }
  0xc8   : > { %206 = vst.msk [vmem:[#allocation3 + $0xf0] sm:$0xff] %vm175_vm2, %v6561_v19 }
  0xc9   : > { %207 = vst.msk [vmem:[#allocation3 + $0xf8] sm:$0xff] %vm175_vm2, %v6561_v19 }
  0xca   : > { %208 = vst.msk [vmem:[#allocation3 + $0x100] sm:$0xff] %vm175_vm2, %v6561_v19 }
  0xcb   : > { %209 = vst.msk [vmem:[#allocation3 + $0x108] sm:$0xff] %vm175_vm2, %v6561_v19 }
  0xcc   : > { %210 = vst.msk [vmem:[#allocation3 + $0x110] sm:$0xff] %vm175_vm2, %v6561_v19 }
  0xcd   : > { %6021 = vmatmul.msk.f32.gmra.mxu0 %vm284_vm1, %v629_v27  ;;  %211 = vst.msk [vmem:[#allocation3 + $0x118] sm:$0xff] %vm175_vm2, %v6561_v19  ;;  %v988_v27 = vld [vmem:[#allocation3 + $0x68] sm:$0xff] }
  0xce   : > { %6056 = vmatmul.msk.f32.gmra.mxu3 %vm284_vm1, %v664_v28  ;;  %212 = vst.msk [vmem:[#allocation3 + $0x120] sm:$0xff] %vm175_vm2, %v6561_v19 }
  0xcf   : > { %213 = vst.msk [vmem:[#allocation3 + $0x128] sm:$0xff] %vm175_vm2, %v6561_v19 }
  0xd0   : > { %214 = vst.msk [vmem:[#allocation3 + $0x130] sm:$0xff] %vm175_vm2, %v6561_v19 }
  0xd1   : > { %215 = vst.msk [vmem:[#allocation3 + $0x138] sm:$0xff] %vm175_vm2, %v6561_v19 }
  0xd2   : > { %216 = vst.msk [vmem:[#allocation3 + $0x140] sm:$0xff] %vm175_vm2, %v6561_v19 }
  0xd3   : > { %217 = vst.msk [vmem:[#allocation3 + $0x148] sm:$0xff] %vm175_vm2, %v6561_v19 }
  0xd4   : > { %218 = vst.msk [vmem:[#allocation3 + $0x150] sm:$0xff] %vm175_vm2, %v6561_v19 }
  0xd5   : > { %6022 = vmatmul.msk.f32.gmra.mxu0 %vm284_vm1, %v630_v29  ;;  %219 = vst.msk [vmem:[#allocation3 + $0x158] sm:$0xff] %vm175_vm2, %v6561_v19 }
  0xd6   : > { %220 = vst.msk [vmem:[#allocation3 + $0x160] sm:$0xff] %vm175_vm2, %v6561_v19 }
  0xd7   : > { %221 = vst.msk [vmem:[#allocation3 + $0x168] sm:$0xff] %vm175_vm2, %v6561_v19 }
  0xd8   : > { %222 = vst.msk [vmem:[#allocation3 + $0x170] sm:$0xff] %vm175_vm2, %v6561_v19 }
  0xd9   : > { %223 = vst.msk [vmem:[#allocation3 + $0x178] sm:$0xff] %vm175_vm2, %v6561_v19 }
  0xda   : > { %224 = vst.msk [vmem:[#allocation3 + $0x180] sm:$0xff] %vm175_vm2, %v6561_v19 }
  0xdb   : > { %225 = vst.msk [vmem:[#allocation3 + $0x188] sm:$0xff] %vm175_vm2, %v6561_v19 }
  0xdc   : > { %226 = vst.msk [vmem:[#allocation3 + $0x190] sm:$0xff] %vm175_vm2, %v6561_v19 }
  0xdd   : > { %227 = vst.msk [vmem:[#allocation3 + $0x198] sm:$0xff] %vm175_vm2, %v6561_v19  ;;  %6023 = vmatmul.msk.f32.gmra.mxu0 %vm284_vm1, %v631_v30 }
  0xde   : > { %228 = vst.msk [vmem:[#allocation3 + $0x1a0] sm:$0xff] %vm175_vm2, %v6561_v19 }
  0xdf   : > { %229 = vst.msk [vmem:[#allocation3 + $0x1a8] sm:$0xff] %vm175_vm2, %v6561_v19 }
  0xe0   : > { %230 = vst.msk [vmem:[#allocation3 + $0x1b0] sm:$0xff] %vm175_vm2, %v6561_v19 }
  0xe1   : > { %231 = vst.msk [vmem:[#allocation3 + $0x1b8] sm:$0xff] %vm175_vm2, %v6561_v19 }
  0xe2   : > { %232 = vst.msk [vmem:[#allocation3 + $0x1c0] sm:$0xff] %vm175_vm2, %v6561_v19 }
  0xe3   : > { %233 = vst.msk [vmem:[#allocation3 + $0x1c8] sm:$0xff] %vm175_vm2, %v6561_v19 }
  0xe4   : > { %234 = vst.msk [vmem:[#allocation3 + $0x1d0] sm:$0xff] %vm175_vm2, %v6561_v19 }
  0xe5   : > { %235 = vst.msk [vmem:[#allocation3 + $0x1d8] sm:$0xff] %vm175_vm2, %v6561_v19 }
  0xe6   : > { %236 = vst.msk [vmem:[#allocation3 + $0x1e0] sm:$0xff] %vm175_vm2, %v6561_v19 }
  0xe7   : > { %237 = vst.msk [vmem:[#allocation3 + $0x1e8] sm:$0xff] %vm175_vm2, %v6561_v19 }
  0xe8   : > { %238 = vst.msk [vmem:[#allocation3 + $0x1f0] sm:$0xff] %vm175_vm2, %v6561_v19 }
  0xe9   : > { %239 = vst.msk [vmem:[#allocation3 + $0x1f8] sm:$0xff] %vm175_vm2, %v6561_v19 }
  0xea   : > { %240 = vst.msk [vmem:[#allocation3 + $0x200] sm:$0xff] %vm175_vm2, %v6561_v19 }
  0xeb   : > { %241 = vst.msk [vmem:[#allocation3 + $0x208] sm:$0xff] %vm175_vm2, %v6561_v19 }
  0xec   : > { %242 = vst.msk [vmem:[#allocation3 + $0x210] sm:$0xff] %vm175_vm2, %v6561_v19 }
  0xed   : > { %243 = vst.msk [vmem:[#allocation3 + $0x218] sm:$0xff] %vm175_vm2, %v6561_v19 }
  0xee   : > { %244 = vst.msk [vmem:[#allocation3 + $0x220] sm:$0xff] %vm175_vm2, %v6561_v19 }
  0xef   : > { %245 = vst.msk [vmem:[#allocation3 + $0x228] sm:$0xff] %vm175_vm2, %v6561_v19 }
  0xf0   : > { %246 = vst.msk [vmem:[#allocation3 + $0x230] sm:$0xff] %vm175_vm2, %v6561_v19 }
  0xf1   : > { %247 = vst.msk [vmem:[#allocation3 + $0x238] sm:$0xff] %vm175_vm2, %v6561_v19 }
  0xf2   : > { %248 = vst.msk [vmem:[#allocation3 + $0x240] sm:$0xff] %vm175_vm2, %v6561_v19 }
  0xf3   : > { %249 = vst.msk [vmem:[#allocation3 + $0x248] sm:$0xff] %vm175_vm2, %v6561_v19 }
  0xf4   : > { %250 = vst.msk [vmem:[#allocation3 + $0x250] sm:$0xff] %vm175_vm2, %v6561_v19 }
  0xf5   : > { %251 = vst.msk [vmem:[#allocation3 + $0x258] sm:$0xff] %vm175_vm2, %v6561_v19 }
  0xf6   : > { %252 = vst.msk [vmem:[#allocation3 + $0x260] sm:$0xff] %vm175_vm2, %v6561_v19 }
  0xf7   : > { %253 = vst.msk [vmem:[#allocation3 + $0x268] sm:$0xff] %vm175_vm2, %v6561_v19 }
  0xf8   : > { %254 = vst.msk [vmem:[#allocation3 + $0x270] sm:$0xff] %vm175_vm2, %v6561_v19 }
  0xf9   : > { %255 = vst.msk [vmem:[#allocation3 + $0x278] sm:$0xff] %vm175_vm2, %v6561_v19  ;;  %v1017_v37 = vld [vmem:[#allocation3 + $0x240] sm:$0xff] }
  0xfa   : > { %256 = vst.msk [vmem:[#allocation3 + $0x280] sm:$0xff] %vm175_vm2, %v6561_v19  ;;  %v1018_v46 = vld [vmem:[#allocation3 + $0x248] sm:$0xff] }
  0xfb   : > { %257 = vst.msk [vmem:[#allocation3 + $0x288] sm:$0xff] %vm175_vm2, %v6561_v19  ;;  %v1019_v55 = vld [vmem:[#allocation3 + $0x250] sm:$0xff] }
  0xfc   : > { %258 = vst.msk [vmem:[#allocation3 + $0x290] sm:$0xff] %vm175_vm2, %v6561_v19 }
  0xfd   : > { %259 = vst.msk [vmem:[#allocation3 + $0x298] sm:$0xff] %vm175_vm2, %v6561_v19 }
  0xfe   : > { %260 = vst.msk [vmem:[#allocation3 + $0x2a0] sm:$0xff] %vm175_vm2, %v6561_v19 }
  0xff   : > { %261 = vst.msk [vmem:[#allocation3 + $0x2a8] sm:$0xff] %vm175_vm2, %v6561_v19  ;;  %v1020_v6 = vld [vmem:[#allocation3 + $0x270] sm:$0xff] }
 0x100   : > { %262 = vst.msk [vmem:[#allocation3 + $0x2b0] sm:$0xff] %vm175_vm2, %v6561_v19  ;;  %v1021_v11 = vld [vmem:[#allocation3 + $0x278] sm:$0xff] }
 0x101   : > { %263 = vst.msk [vmem:[#allocation3 + $0x2b8] sm:$0xff] %vm175_vm2, %v6561_v19  ;;  %v1022_v16 = vld [vmem:[#allocation3 + $0x280] sm:$0xff] }
 0x102   : > { %264 = vst.msk [vmem:[#allocation3 + $0x2c0] sm:$0xff] %vm175_vm2, %v6561_v19 }
 0x103   : > { %265 = vst.msk [vmem:[#allocation3 + $0x2c8] sm:$0xff] %vm175_vm2, %v6561_v19 }
 0x104   : > { %266 = vst.msk [vmem:[#allocation3 + $0x2d0] sm:$0xff] %vm175_vm2, %v6561_v19 }
 0x105   : > { %267 = vst.msk [vmem:[#allocation3 + $0x2d8] sm:$0xff] %vm175_vm2, %v6561_v19 }
 0x106   : > { %268 = vst.msk [vmem:[#allocation3 + $0x2e0] sm:$0xff] %vm175_vm2, %v6561_v19 }
 0x107   : > { %269 = vst.msk [vmem:[#allocation3 + $0x2e8] sm:$0xff] %vm175_vm2, %v6561_v19 }
 0x108   : > { %270 = vst.msk [vmem:[#allocation3 + $0x2f0] sm:$0xff] %vm175_vm2, %v6561_v19 }
 0x109   : > { %271 = vst.msk [vmem:[#allocation3 + $0x2f8] sm:$0xff] %vm175_vm2, %v6561_v19 }
 0x10a   : > { %272 = vst.msk [vmem:[#allocation3 + $0x300] sm:$0xff] %vm175_vm2, %v6561_v19  ;;  %v1223_v25 = vpop.permute.xlu0 %1222 }
 0x10b   : > { %273 = vst.msk [vmem:[#allocation3 + $0x308] sm:$0xff] %vm175_vm2, %v6561_v19  ;;  %v1366_v26 = vadd.f32 %v1223_v25, %v1126_v24 }
 0x10c   : > { %274 = vst.msk [vmem:[#allocation3 + $0x310] sm:$0xff] %vm175_vm2, %v6561_v19 }
 0x10d   : > { %275 = vst.msk [vmem:[#allocation3 + $0x318] sm:$0xff] %vm175_vm2, %v6561_v19 }
 0x10e   : > { %276 = vst.msk [vmem:[#allocation3 + $0x320] sm:$0xff] %vm175_vm2, %v6561_v19 }
 0x10f   : > { %277 = vst.msk [vmem:[#allocation3 + $0x328] sm:$0xff] %vm175_vm2, %v6561_v19 }
 0x110   : > { %278 = vst.msk [vmem:[#allocation3 + $0x330] sm:$0xff] %vm175_vm2, %v6561_v19 }
 0x111   : > { %279 = vst.msk [vmem:[#allocation3 + $0x338] sm:$0xff] %vm175_vm2, %v6561_v19 }
 0x112   : > { %280 = vst.msk [vmem:[#allocation3 + $0x340] sm:$0xff] %vm175_vm2, %v6561_v19  ;;  %v637_v19 = vld [vmem:[#allocation2 + $0x70] sm:$0xff] }
 0x113   : > { %489 = vst.msk [vmem:[#allocation2 + $0x150] sm:$0xff] %vm284_vm1, %v457_v32  ;;  %v1512_v32 = vpop.permute.xlu0 %1511 }
 0x114   : > { %490 = vst.msk [vmem:[#allocation2 + $0x158] sm:$0xff] %vm284_vm1, %v458_v35  ;;  %v989_v35 = vld [vmem:[#allocation3 + $0x70] sm:$0xff] }
 0x115   : > { %467 = vst.msk [vmem:[#allocation2 + $0x48] sm:$0xff] %vm284_vm1, %v435_v36 }
 0x116   : > { %468 = vst.msk [vmem:[#allocation2 + $0x50] sm:$0xff] %vm284_vm1, %v436_v40  ;;  %v640_v40 = vld [vmem:[#allocation2 + $0x88] sm:$0xff] }
 0x117   : > { %491 = vst.msk [vmem:[#allocation2 + $0x168] sm:$0xff] %vm284_vm1, %v459_v53 }
 0x118   : > { %492 = vst.msk [vmem:[#allocation2 + $0x170] sm:$0xff] %vm284_vm1, %v460_v62 }
 0x119   : > { %469 = vst.msk [vmem:[#allocation2 + $0x60] sm:$0xff] %vm284_vm1, %v437_v9 }
 0x11a   : > { %v665_v43 = vld [vmem:[#allocation2 + $0x150] sm:$0xff]  ;;  %470 = vst.msk [vmem:[#allocation2 + $0x68] sm:$0xff] %vm284_vm1, %v438_v14  ;;  %v1163_v14 = vld [vmem:[#allocation3 + $0x260] sm:$0xff] }
 0x11b   : > { %6057 = vmatmul.msk.f32.gmra.mxu3 %vm284_vm1, %v665_v43  ;;  %v666_v48 = vld [vmem:[#allocation2 + $0x158] sm:$0xff]  ;;  %471 = vst.msk [vmem:[#allocation2 + $0x78] sm:$0xff] %vm284_vm1, %v439_v23 }
 0x11c   : > { %v632_v45 = vld [vmem:[#allocation2 + $0x48] sm:$0xff]  ;;  %1414 = vst.msk [vmem:[#allocation3 + $0x18] sm:$0xff] %vm175_vm2, %v1366_v26  ;;  %v1127_v26 = vld [vmem:[#allocation3 + $0x20] sm:$0xff] }
 0x11d   : > { %6024 = vmatmul.msk.f32.gmra.mxu0 %vm284_vm1, %v632_v45  ;;  %v633_v54 = vld [vmem:[#allocation2 + $0x50] sm:$0xff]  ;;  %v6944_v45 = vpop.permute.xlu0 %1800 }
 0x11e   : > { %v668_v1 = vld [vmem:[#allocation2 + $0x168] sm:$0xff] }
 0x11f   : > { %v669_v4 = vld [vmem:[#allocation2 + $0x170] sm:$0xff] }
 0x120   : > { %v635_v13 = vld [vmem:[#allocation2 + $0x60] sm:$0xff] }
 0x121   : > { %v636_v18 = vld [vmem:[#allocation2 + $0x68] sm:$0xff] }
 0x122   : > { %v840_v33 = vpop.f32.mrf.mxu0  ;;  %v638_v29 = vld [vmem:[#allocation2 + $0x78] sm:$0xff] }
 0x123   : > { %v1030_v34 = vadd.f32 %v982_v31, %v840_v33  ;;  %1513 = vrot.lane.b32.xlu1 %v840_v33, %s6196_s23  ;;  %6058 = vmatmul.msk.f32.gmra.mxu3 %vm284_vm1, %v666_v48  ;;  %v440_v31 = vld [vmem:[%s6250_s19 + $0x58] sm:$0xff] }
 0x124   : > { %472 = vst.msk [vmem:[#allocation2 + $0x80] sm:$0xff] %vm284_vm1, %v440_v31 }
 0x125   : > { %1078 = vst.msk [vmem:[#allocation3 + $0x8] sm:$0xff] %vm175_vm2, %v1030_v34  ;;  %6025 = vmatmul.msk.f32.gmra.mxu0 %vm284_vm1, %v633_v54 }
 0x129   : > { %v6801_v39 = vpop.f32.mrf.mxu3 }
 0x12a   : > { %v6804_v41 = vpop.f32.mrf.mxu0  ;;  %v1065_v42 = vadd.f32 %v1017_v37, %v6801_v39  ;;  %1294 = vrot.lane.b32.xlu0 %v6801_v39, %s6195_s22 }
 0x12b   : > { %v1031_v44 = vadd.f32 %v983_v38, %v6804_v41  ;;  %1802 = vrot.lane.b32.xlu1 %v840_v33, %s6197_s24  ;;  %1515 = vrot.lane.b32.xlu2 %v6804_v41, %s6196_s23  ;;  %v639_v36 = vld [vmem:[#allocation2 + $0x80] sm:$0xff] }
 0x12c   : > { %1113 = vst.msk [vmem:[#allocation3 + $0x240] sm:$0xff] %vm175_vm2, %v1065_v42  ;;  %6059 = vmatmul.msk.f32.gmra.mxu3 %vm284_vm1, %v667_v57  ;;  %v1162_v57 = vld [vmem:[#allocation3 + $0x258] sm:$0xff] }
 0x12d   : > { %1079 = vst.msk [vmem:[#allocation3 + $0x10] sm:$0xff] %vm175_vm2, %v1031_v44  ;;  %6026 = vmatmul.msk.f32.gmra.mxu0 %vm284_vm1, %v634_v63 }
 0x131   : > { %v6818_v49 = vpop.f32.mrf.mxu3 }
 0x132   : > { %v1066_v50 = vadd.f32 %v1018_v46, %v6818_v49  ;;  %1583 = vrot.lane.b32.xlu0 %v6801_v39, %s6196_s23  ;;  %v846_v51 = vpop.f32.mrf.mxu0 }
 0x133   : > { %2091 = vrot.lane.b32.xlu1 %v840_v33, %s6198_s25  ;;  %1804 = vrot.lane.b32.xlu2 %v6804_v41, %s6197_s24  ;;  %v1032_v52 = vadd.f32 %v984_v47, %v846_v51  ;;  %v442_v47 = vld [vmem:[%s6250_s19 + $0x68] sm:$0xff] }
 0x134   : > { %1114 = vst.msk [vmem:[#allocation3 + $0x248] sm:$0xff] %vm175_vm2, %v1066_v50  ;;  %6060 = vmatmul.msk.f32.gmra.mxu3 %vm284_vm1, %v668_v1 }
 0x135   : > { %1080 = vst.msk [vmem:[#allocation3 + $0x30] sm:$0xff] %vm175_vm2, %v1032_v52  ;;  %6027 = vmatmul.msk.f32.gmra.mxu0 %vm284_vm1, %v635_v13  ;;  %v990_v13 = vld [vmem:[#allocation3 + $0x90] sm:$0xff] }
 0x136   : > { %474 = vst.msk [vmem:[#allocation2 + $0x98] sm:$0xff] %vm284_vm1, %v442_v47  ;;  %v446_v47 = vld [vmem:[%s6250_s19 + $0x88] sm:$0xff] }
 0x137   : > { %478 = vst.msk [vmem:[#allocation2 + $0xc8] sm:$0xff] %vm284_vm1, %v446_v47  ;;  %v1028_v47 = vld [vmem:[#allocation3 + $0x2e0] sm:$0xff] }
 0x139   : > { %v6832_v58 = vpop.f32.mrf.mxu3 }
 0x13a   : > { %v1067_v59 = vadd.f32 %v1019_v55, %v6832_v58  ;;  %1872 = vrot.lane.b32.xlu0 %v6801_v39, %s6197_s24  ;;  %v6837_v60 = vpop.f32.mrf.mxu0 }
 0x13b   : > { %1296 = vrot.lane.b32.xlu1 %v6818_v49, %s6195_s22  ;;  %2093 = vrot.lane.b32.xlu2 %v6804_v41, %s6198_s25  ;;  %v1033_v61 = vadd.f32 %v985_v56, %v6837_v60  ;;  %v643_v56 = vld [vmem:[#allocation2 + $0xa0] sm:$0xff] }
 0x13c   : > { %1115 = vst.msk [vmem:[#allocation3 + $0x250] sm:$0xff] %vm175_vm2, %v1067_v59  ;;  %6061 = vmatmul.msk.f32.gmra.mxu3 %vm284_vm1, %v669_v4  ;;  %v443_v59 = vld [vmem:[%s6250_s19 + $0x70] sm:$0xff]  ;;  %v444_v4 = vld [vmem:[%s6250_s19 + $0x78] sm:$0xff] }
 0x13d   : > { %1081 = vst.msk [vmem:[#allocation3 + $0x38] sm:$0xff] %vm175_vm2, %v1033_v61  ;;  %6028 = vmatmul.msk.f32.gmra.mxu0 %vm284_vm1, %v636_v18  ;;  %v642_v50 = vld [vmem:[#allocation2 + $0x98] sm:$0xff] }
 0x13e   : > { %475 = vst.msk [vmem:[#allocation2 + $0xa8] sm:$0xff] %vm284_vm1, %v443_v59 }
 0x13f   : > { %476 = vst.msk [vmem:[#allocation2 + $0xb0] sm:$0xff] %vm284_vm1, %v444_v4  ;;  %v1128_v4 = vld [vmem:[#allocation3 + $0x28] sm:$0xff] }
 0x141   : > { %v6865_v5 = vpop.f32.mrf.mxu3 }
 0x142   : > { %1224 = vrot.lane.b32.xlu0 %v840_v33, %s6195_s22  ;;  %v6851_v2 = vpop.f32.mrf.mxu0  ;;  %v1068_v7 = vadd.f32 %v1020_v6, %v6865_v5  ;;  %v1463_v33 = vld [vmem:[#allocation3 + $0x30] sm:$0xff] }
 0x143   : > { %1585 = vrot.lane.b32.xlu1 %v6818_v49, %s6196_s23  ;;  %1298 = vrot.lane.b32.xlu2 %v6832_v58, %s6195_s22  ;;  %v1034_v3 = vadd.f32 %v986_v0, %v6851_v2  ;;  %v1655_v34 = vadd.f32 %v1512_v32, %v1463_v33  ;;  %v991_v32 = vld [vmem:[#allocation3 + $0x98] sm:$0xff]  ;;  %v1024_v33 = vld [vmem:[#allocation3 + $0x2a8] sm:$0xff] }
 0x144   : > { %1116 = vst.msk [vmem:[#allocation3 + $0x270] sm:$0xff] %vm175_vm2, %v1068_v7  ;;  %6062 = vmatmul.msk.f32.gmra.mxu3 %vm284_vm1, %v670_v8  ;;  %v1464_v53 = vld [vmem:[#allocation3 + $0x38] sm:$0xff] }
 0x145   : > { %1082 = vst.msk [vmem:[#allocation3 + $0x40] sm:$0xff] %vm175_vm2, %v1034_v3  ;;  %6029 = vmatmul.msk.f32.gmra.mxu0 %vm284_vm1, %v637_v19  ;;  %v1023_v19 = vld [vmem:[#allocation3 + $0x2a0] sm:$0xff] }
 0x146   : > { %1703 = vst.msk [vmem:[#allocation3 + $0x30] sm:$0xff] %vm175_vm2, %v1655_v34 }
 0x149   : > { %v6877_v10 = vpop.f32.mrf.mxu3 }
 0x14a   : > { %1517 = vrot.lane.b32.xlu0 %v846_v51, %s6196_s23  ;;  %v1069_v12 = vadd.f32 %v1021_v11, %v6877_v10  ;;  %v855_v20 = vpop.f32.mrf.mxu0 }
 0x14b   : > { %1874 = vrot.lane.b32.xlu1 %v6818_v49, %s6197_s24  ;;  %1587 = vrot.lane.b32.xlu2 %v6832_v58, %s6196_s23  ;;  %v1035_v22 = vadd.f32 %v987_v21, %v855_v20  ;;  %v1499_v6 = vld [vmem:[#allocation3 + $0x270] sm:$0xff] }
 0x14c   : > { %1117 = vst.msk [vmem:[#allocation3 + $0x278] sm:$0xff] %vm175_vm2, %v1069_v12  ;;  %v1465_v42 = vld [vmem:[#allocation3 + $0x40] sm:$0xff] }
 0x14d   : > { %1083 = vst.msk [vmem:[#allocation3 + $0x60] sm:$0xff] %vm175_vm2, %v1035_v22  ;;  %6030 = vmatmul.msk.f32.gmra.mxu0 %vm284_vm1, %v638_v29  ;;  %v1130_v29 = vld [vmem:[#allocation3 + $0x50] sm:$0xff] }
 0x151   : > { %v6889_v15 = vpop.f32.mrf.mxu3 }
 0x152   : > { %1806 = vrot.lane.b32.xlu0 %v846_v51, %s6197_s24  ;;  %v1070_v17 = vadd.f32 %v1022_v16, %v6889_v15  ;;  %v6911_v28 = vpop.f32.mrf.mxu0  ;;  %v645_v16 = vld [vmem:[#allocation2 + $0xb0] sm:$0xff] }
 0x153   : > { %1876 = vrot.lane.b32.xlu2 %v6832_v58, %s6197_s24  ;;  %1226 = vrot.lane.b32.xlu1 %v6804_v41, %s6195_s22  ;;  %v1036_v30 = vadd.f32 %v988_v27, %v6911_v28  ;;  %v441_v41 = vld [vmem:[%s6250_s19 + $0x60] sm:$0xff]  ;;  %v646_v27 = vld [vmem:[#allocation2 + $0xb8] sm:$0xff] }
 0x154   : > { %1118 = vst.msk [vmem:[#allocation3 + $0x280] sm:$0xff] %vm175_vm2, %v1070_v17  ;;  %v1500_v34 = vld [vmem:[#allocation3 + $0x278] sm:$0xff] }
 0x155   : > { %1084 = vst.msk [vmem:[#allocation3 + $0x68] sm:$0xff] %vm175_vm2, %v1036_v30  ;;  %6031 = vmatmul.msk.f32.gmra.mxu0 %vm284_vm1, %v639_v36 }
 0x156   : > { %473 = vst.msk [vmem:[#allocation2 + $0x90] sm:$0xff] %vm284_vm1, %v441_v41 }
 0x15a   : > { %2095 = vrot.lane.b32.xlu0 %v846_v51, %s6198_s25  ;;  %v6927_v37 = vpop.f32.mrf.mxu0 }
 0x15b   : > { %1228 = vrot.lane.b32.xlu1 %v846_v51, %s6195_s22  ;;  %1230 = vrot.lane.b32.xlu2 %v6837_v60, %s6195_s22  ;;  %v1037_v38 = vadd.f32 %v989_v35, %v6927_v37  ;;  %v6957_v51 = vpop.permute.xlu0 %2089  ;;  %v1501_v3 = vld [vmem:[#allocation3 + $0x280] sm:$0xff] }
 0x15d   : > { %1085 = vst.msk [vmem:[#allocation3 + $0x70] sm:$0xff] %vm175_vm2, %v1037_v38  ;;  %6032 = vmatmul.msk.f32.gmra.mxu0 %vm284_vm1, %v640_v40  ;;  %v641_v46 = vld [vmem:[#allocation2 + $0x90] sm:$0xff] }
 0x162   : > { %1300 = vrot.lane.b32.xlu0 %v6865_v5, %s6195_s22 }
 0x163   : > { %1519 = vrot.lane.b32.xlu1 %v6837_v60, %s6196_s23  ;;  %1232 = vrot.lane.b32.xlu2 %v6851_v2, %s6195_s22 }
 0x165   : > { %6033 = vmatmul.msk.f32.gmra.mxu0 %vm284_vm1, %v641_v46 }
 0x16a   : > { %1589 = vrot.lane.b32.xlu0 %v6865_v5, %s6196_s23 }
 0x16b   : > { %1808 = vrot.lane.b32.xlu1 %v6837_v60, %s6197_s24  ;;  %1521 = vrot.lane.b32.xlu2 %v6851_v2, %s6196_s23 }
 0x16d   : > { %6034 = vmatmul.msk.f32.gmra.mxu0 %vm284_vm1, %v642_v50  ;;  %v1131_v50 = vld [vmem:[#allocation3 + $0x58] sm:$0xff] }
 0x172   : > { %1878 = vrot.lane.b32.xlu0 %v6865_v5, %s6197_s24 }
 0x173   : > { %2097 = vrot.lane.b32.xlu1 %v6837_v60, %s6198_s25  ;;  %1810 = vrot.lane.b32.xlu2 %v6851_v2, %s6197_s24  ;;  %v1164_v60 = vld [vmem:[#allocation3 + $0x268] sm:$0xff] }
 0x175   : > { %6035 = vmatmul.msk.f32.gmra.mxu0 %vm284_vm1, %v643_v56  ;;  %v1025_v56 = vld [vmem:[#allocation3 + $0x2b0] sm:$0xff] }
 0x17a   : > { %1234 = vrot.lane.b32.xlu0 %v855_v20, %s6195_s22 }
 0x17b   : > { %1302 = vrot.lane.b32.xlu1 %v6877_v10, %s6195_s22  ;;  %2099 = vrot.lane.b32.xlu2 %v6851_v2, %s6198_s25  ;;  %v644_v2 = vld [vmem:[#allocation2 + $0xa8] sm:$0xff] }
 0x17d   : > { %6036 = vmatmul.msk.f32.gmra.mxu0 %vm284_vm1, %v644_v2 }
 0x182   : > { %1523 = vrot.lane.b32.xlu0 %v855_v20, %s6196_s23 }
 0x183   : > { %1591 = vrot.lane.b32.xlu1 %v6877_v10, %s6196_s23  ;;  %1304 = vrot.lane.b32.xlu2 %v6889_v15, %s6195_s22 }
 0x185   : > { %v1516_v43 = vpop.permute.xlu2 %1515  ;;  %6037 = vmatmul.msk.f32.gmra.mxu0 %vm284_vm1, %v645_v16 }
 0x186   : > { %v1657_v44 = vadd.f32 %v1516_v43, %v1465_v42 }
 0x188   : > { %1705 = vst.msk [vmem:[#allocation3 + $0x40] sm:$0xff] %vm175_vm2, %v1657_v44  ;;  %v992_v44 = vld [vmem:[#allocation3 + $0xa0] sm:$0xff] }
 0x18a   : > { %1812 = vrot.lane.b32.xlu0 %v855_v20, %s6197_s24 }
 0x18b   : > { %1880 = vrot.lane.b32.xlu1 %v6877_v10, %s6197_s24  ;;  %1593 = vrot.lane.b32.xlu2 %v6889_v15, %s6196_s23 }
 0x18d   : > { %v6954_v48 = vpop.permute.xlu2 %1804  ;;  %6038 = vmatmul.msk.f32.gmra.mxu0 %vm284_vm1, %v646_v27  ;;  %v1129_v27 = vld [vmem:[#allocation3 + $0x48] sm:$0xff] }
 0x192   : > { %2101 = vrot.lane.b32.xlu0 %v855_v20, %s6198_s25 }
 0x193   : > { %1882 = vrot.lane.b32.xlu2 %v6889_v15, %s6197_s24  ;;  %1236 = vrot.lane.b32.xlu1 %v6911_v28, %s6195_s22 }
 0x195   : > { %v1514_v52 = vpop.permute.xlu1 %1513  ;;  %v6964_v54 = vpop.permute.xlu2 %2093 }
 0x196   : > { %v1656_v55 = vadd.f32 %v1514_v52, %v1464_v53  ;;  %v1466_v53 = vld [vmem:[#allocation3 + $0x60] sm:$0xff] }
 0x198   : > { %1704 = vst.msk [vmem:[#allocation3 + $0x38] sm:$0xff] %vm175_vm2, %v1656_v55 }
 0x19a   : > { %v6995_v18 = vpop.f32.mrf.mxu0 }
 0x19b   : > { %1525 = vrot.lane.b32.xlu1 %v6911_v28, %s6196_s23  ;;  %1238 = vrot.lane.b32.xlu2 %v6927_v37, %s6195_s22  ;;  %v1038_v22 = vadd.f32 %v990_v13, %v6995_v18  ;;  %v1026_v13 = vld [vmem:[#allocation3 + $0x2d0] sm:$0xff] }
 0x19c   : > { %v1295_v61 = vpop.permute.xlu0 %1294 }
 0x19d   : > { %v6974_v62 = vpop.permute.xlu1 %1802  ;;  %v1299_v63 = vpop.permute.xlu2 %1298  ;;  %v1402_v0 = vadd.f32 %v1295_v61, %v1162_v57  ;;  %1086 = vst.msk [vmem:[#allocation3 + $0x90] sm:$0xff] %vm175_vm2, %v1038_v22 }
 0x19e   : > { %v1404_v1 = vadd.f32 %v1299_v63, %v1164_v60  ;;  %v7001_v24 = vpop.f32.mrf.mxu3 }
 0x19f   : > { %1450 = vst.msk [vmem:[#allocation3 + $0x258] sm:$0xff] %vm175_vm2, %v1402_v0  ;;  %v1071_v25 = vadd.f32 %v1023_v19, %v7001_v24  ;;  %1306 = vrot.lane.b32.xlu0 %v7001_v24, %s6195_s22 }
 0x1a0   : > { %1452 = vst.msk [vmem:[#allocation3 + $0x268] sm:$0xff] %vm175_vm2, %v1404_v1 }
 0x1a1   : > { %1119 = vst.msk [vmem:[#allocation3 + $0x2a0] sm:$0xff] %vm175_vm2, %v1071_v25  ;;  %v649_v25 = vld [vmem:[#allocation2 + $0xd0] sm:$0xff] }
 0x1a2   : > { %v7013_v31 = vpop.f32.mrf.mxu0 }
 0x1a3   : > { %1814 = vrot.lane.b32.xlu1 %v6911_v28, %s6197_s24  ;;  %1527 = vrot.lane.b32.xlu2 %v6927_v37, %s6196_s23 }
 0x1a4   : > { %v1584_v7 = vpop.permute.xlu0 %1583 }
 0x1a5   : > { %v6985_v8 = vpop.permute.xlu1 %2091  ;;  %v1588_v9 = vpop.permute.xlu2 %1587  ;;  %v1691_v11 = vadd.f32 %v1584_v7, %v1499_v6  ;;  %v1468_v6 = vld [vmem:[#allocation3 + $0x70] sm:$0xff]  ;;  %v648_v7 = vld [vmem:[#allocation2 + $0xc8] sm:$0xff] }
 0x1a6   : > { %v1693_v12 = vadd.f32 %v1588_v9, %v1501_v3  ;;  %v7016_v42 = vpop.f32.mrf.mxu3 }
 0x1a7   : > { %1739 = vst.msk [vmem:[#allocation3 + $0x270] sm:$0xff] %vm175_vm2, %v1691_v11  ;;  %v1072_v43 = vadd.f32 %v1024_v33, %v7016_v42  ;;  %1595 = vrot.lane.b32.xlu0 %v7001_v24, %s6196_s23 }
 0x1a8   : > { %1741 = vst.msk [vmem:[#allocation3 + $0x280] sm:$0xff] %vm175_vm2, %v1693_v12 }
 0x1a9   : > { %1120 = vst.msk [vmem:[#allocation3 + $0x2a8] sm:$0xff] %vm175_vm2, %v1072_v43 }
 0x1aa   : > { %v7030_v55 = vpop.f32.mrf.mxu0 }
 0x1ab   : > { %2103 = vrot.lane.b32.xlu1 %v6911_v28, %s6198_s25  ;;  %1816 = vrot.lane.b32.xlu2 %v6927_v37, %s6197_s24  ;;  %v445_v28 = vld [vmem:[%s6250_s19 + $0x80] sm:$0xff]  ;;  %v1040_v61 = vadd.f32 %v992_v44, %v7030_v55  ;;  %v1467_v44 = vld [vmem:[#allocation3 + $0x68] sm:$0xff] }
 0x1ac   : > { %v6993_v17 = vpop.permute.xlu0 %1872  ;;  %477 = vst.msk [vmem:[#allocation2 + $0xc0] sm:$0xff] %vm284_vm1, %v445_v28 }
 0x1ad   : > { %v1297_v20 = vpop.permute.xlu1 %1296  ;;  %v6998_v21 = vpop.permute.xlu2 %1876  ;;  %1088 = vst.msk [vmem:[#allocation3 + $0xa0] sm:$0xff] %vm175_vm2, %v1040_v61 }
 0x1ae   : > { %v1403_v23 = vadd.f32 %v1297_v20, %v1163_v14 }
 0x1af   : > { %v7037_v0 = vpop.f32.mrf.mxu3  ;;  %1884 = vrot.lane.b32.xlu0 %v7001_v24, %s6197_s24 }
 0x1b0   : > { %1451 = vst.msk [vmem:[#allocation3 + $0x260] sm:$0xff] %vm175_vm2, %v1403_v23  ;;  %v1073_v1 = vadd.f32 %v1025_v56, %v7037_v0 }
 0x1b2   : > { %1121 = vst.msk [vmem:[#allocation3 + $0x2b0] sm:$0xff] %vm175_vm2, %v1073_v1  ;;  %v7099_v56 = vpop.f32.mrf.mxu0  ;;  %v1167_v1 = vld [vmem:[#allocation3 + $0x298] sm:$0xff] }
 0x1b3   : > { %2105 = vrot.lane.b32.xlu2 %v6927_v37, %s6198_s25  ;;  %v1039_v37 = vadd.f32 %v991_v32, %v7013_v31  ;;  %1308 = vrot.lane.b32.xlu1 %v7016_v42, %s6195_s22  ;;  %v647_v46 = vld [vmem:[#allocation2 + $0xc0] sm:$0xff]  ;;  %v1027_v32 = vld [vmem:[#allocation3 + $0x2d8] sm:$0xff] }
 0x1b4   : > { %v1225_v30 = vpop.permute.xlu0 %1224  ;;  %6039 = vmatmul.msk.f32.gmra.mxu0 %vm284_vm1, %v647_v46 }
 0x1b5   : > { %v1586_v35 = vpop.permute.xlu1 %1585  ;;  %v1231_v36 = vpop.permute.xlu2 %1230  ;;  %v1367_v38 = vadd.f32 %v1225_v30, %v1127_v26  ;;  %1087 = vst.msk [vmem:[#allocation3 + $0x98] sm:$0xff] %vm175_vm2, %v1039_v37  ;;  %v447_v26 = vld [vmem:[%s6250_s19 + $0x90] sm:$0xff] }
 0x1b6   : > { %v1692_v40 = vadd.f32 %v1586_v35, %v1500_v34  ;;  %v1370_v41 = vadd.f32 %v1231_v36, %v1130_v29  ;;  %479 = vst.msk [vmem:[#allocation2 + $0xd8] sm:$0xff] %vm284_vm1, %v447_v26 }
 0x1b7   : > { %1415 = vst.msk [vmem:[#allocation3 + $0x20] sm:$0xff] %vm175_vm2, %v1367_v38  ;;  %v7056_v20 = vpop.f32.mrf.mxu3  ;;  %1240 = vrot.lane.b32.xlu0 %v6995_v18, %s6195_s22  ;;  %v1165_v38 = vld [vmem:[#allocation3 + $0x288] sm:$0xff] }
 0x1b8   : > { %1740 = vst.msk [vmem:[#allocation3 + $0x278] sm:$0xff] %vm175_vm2, %v1692_v40  ;;  %v1074_v23 = vadd.f32 %v1026_v13, %v7056_v20  ;;  %v448_v40 = vld [vmem:[%s6250_s19 + $0x98] sm:$0xff] }
 0x1b9   : > { %1418 = vst.msk [vmem:[#allocation3 + $0x50] sm:$0xff] %vm175_vm2, %v1370_v41 }
 0x1ba   : > { %1122 = vst.msk [vmem:[#allocation3 + $0x2d0] sm:$0xff] %vm175_vm2, %v1074_v23  ;;  %v652_v23 = vld [vmem:[#allocation2 + $0xe8] sm:$0xff] }
 0x1bb   : > { %1597 = vrot.lane.b32.xlu1 %v7016_v42, %s6196_s23  ;;  %1310 = vrot.lane.b32.xlu2 %v7037_v0, %s6195_s22  ;;  %480 = vst.msk [vmem:[#allocation2 + $0xe0] sm:$0xff] %vm284_vm1, %v448_v40  ;;  %v1166_v40 = vld [vmem:[#allocation3 + $0x290] sm:$0xff] }
 0x1bc   : > { %v1518_v52 = vpop.permute.xlu0 %1517  ;;  %6040 = vmatmul.msk.f32.gmra.mxu0 %vm284_vm1, %v648_v7 }
 0x1bd   : > { %v7034_v57 = vpop.permute.xlu1 %1874  ;;  %v1233_v59 = vpop.permute.xlu2 %1232  ;;  %v1658_v60 = vadd.f32 %v1518_v52, %v1466_v53  ;;  %v650_v41 = vld [vmem:[#allocation2 + $0xd8] sm:$0xff] }
 0x1be   : > { %v1371_v63 = vadd.f32 %v1233_v59, %v1131_v50  ;;  %v993_v50 = vld [vmem:[#allocation3 + $0xc0] sm:$0xff] }
 0x1bf   : > { %1706 = vst.msk [vmem:[#allocation3 + $0x60] sm:$0xff] %vm175_vm2, %v1658_v60  ;;  %v7078_v33 = vpop.f32.mrf.mxu3  ;;  %1529 = vrot.lane.b32.xlu0 %v6995_v18, %s6196_s23  ;;  %v1041_v61 = vadd.f32 %v993_v50, %v7099_v56 }
 0x1c0   : > { %1419 = vst.msk [vmem:[#allocation3 + $0x58] sm:$0xff] %vm175_vm2, %v1371_v63  ;;  %v1753_v2 = vld [vmem:[#allocation3 + $0x50] sm:$0xff]  ;;  %v1075_v35 = vadd.f32 %v1027_v32, %v7078_v33 }
 0x1c1   : > { %v1945_v3 = vadd.f32 %v6974_v62, %v1753_v2  ;;  %1089 = vst.msk [vmem:[#allocation3 + $0xc0] sm:$0xff] %vm175_vm2, %v1041_v61 }
 0x1c2   : > { %1123 = vst.msk [vmem:[#allocation3 + $0x2d8] sm:$0xff] %vm175_vm2, %v1075_v35  ;;  %v651_v2 = vld [vmem:[#allocation2 + $0xe0] sm:$0xff] }
 0x1c3   : > { %1993 = vst.msk [vmem:[#allocation3 + $0x50] sm:$0xff] %vm175_vm2, %v1945_v3  ;;  %1886 = vrot.lane.b32.xlu1 %v7016_v42, %s6197_s24  ;;  %1599 = vrot.lane.b32.xlu2 %v7037_v0, %s6196_s23  ;;  %v1502_v3 = vld [vmem:[#allocation3 + $0x2a0] sm:$0xff] }
 0x1c4   : > { %v7052_v9 = vpop.permute.xlu0 %1806  ;;  %6041 = vmatmul.msk.f32.gmra.mxu0 %vm284_vm1, %v649_v25 }
 0x1c5   : > { %v1227_v11 = vpop.permute.xlu1 %1226  ;;  %v1522_v12 = vpop.permute.xlu2 %1521 }
 0x1c6   : > { %v1368_v14 = vadd.f32 %v1227_v11, %v1128_v4  ;;  %v1660_v16 = vadd.f32 %v1522_v12, %v1468_v6  ;;  %v2041_v19 = vld [vmem:[#allocation3 + $0x60] sm:$0xff] }
 0x1c7   : > { %v2233_v62 = vadd.f32 %v6957_v51, %v2041_v19  ;;  %v1754_v22 = vld [vmem:[#allocation3 + $0x58] sm:$0xff]  ;;  %v7097_v53 = vpop.f32.mrf.mxu3  ;;  %1818 = vrot.lane.b32.xlu0 %v6995_v18, %s6197_s24 }
 0x1c8   : > { %1416 = vst.msk [vmem:[#allocation3 + $0x28] sm:$0xff] %vm175_vm2, %v1368_v14  ;;  %v1946_v51 = vadd.f32 %v6954_v48, %v1754_v22  ;;  %v1076_v60 = vadd.f32 %v1028_v47, %v7097_v53  ;;  %v996_v47 = vld [vmem:[#allocation3 + $0xf0] sm:$0xff] }
 0x1c9   : > { %1708 = vst.msk [vmem:[#allocation3 + $0x70] sm:$0xff] %vm175_vm2, %v1660_v16  ;;  %v7118_v16 = vpop.f32.mrf.mxu0 }
 0x1ca   : > { %2281 = vst.msk [vmem:[#allocation3 + $0x60] sm:$0xff] %vm175_vm2, %v2233_v62 }
 0x1cb   : > { %1994 = vst.msk [vmem:[#allocation3 + $0x58] sm:$0xff] %vm175_vm2, %v1946_v51  ;;  %1242 = vrot.lane.b32.xlu1 %v7013_v31, %s6195_s22  ;;  %1888 = vrot.lane.b32.xlu2 %v7037_v0, %s6197_s24  ;;  %v1504_v51 = vld [vmem:[#allocation3 + $0x2b0] sm:$0xff] }
 0x1cc   : > { %v7071_v28 = vpop.permute.xlu0 %2095  ;;  %6042 = vmatmul.msk.f32.gmra.mxu0 %vm284_vm1, %v650_v41  ;;  %1124 = vst.msk [vmem:[#allocation3 + $0x2e0] sm:$0xff] %vm175_vm2, %v1076_v60 }
 0x1cd   : > { %v1229_v29 = vpop.permute.xlu1 %1228  ;;  %v7075_v30 = vpop.permute.xlu2 %1810 }
 0x1ce   : > { %v1369_v48 = vadd.f32 %v1229_v29, %v1129_v27 }
 0x1cf   : > { %1312 = vrot.lane.b32.xlu0 %v7056_v20, %s6195_s22 }
 0x1d0   : > { %v2043_v34 = vld [vmem:[#allocation3 + $0x70] sm:$0xff]  ;;  %1417 = vst.msk [vmem:[#allocation3 + $0x48] sm:$0xff] %vm175_vm2, %v1369_v48 }
 0x1d1   : > { %v2235_v36 = vadd.f32 %v6964_v54, %v2043_v34  ;;  %v7145_v32 = vpop.f32.mrf.mxu0  ;;  %v995_v48 = vld [vmem:[#allocation3 + $0xd0] sm:$0xff] }
 0x1d2   : > { %v1043_v35 = vadd.f32 %v995_v48, %v7145_v32  ;;  %v998_v48 = vld [vmem:[#allocation3 + $0x100] sm:$0xff] }
 0x1d3   : > { %2283 = vst.msk [vmem:[#allocation3 + $0x70] sm:$0xff] %vm175_vm2, %v2235_v36  ;;  %1531 = vrot.lane.b32.xlu1 %v7013_v31, %s6196_s23  ;;  %1244 = vrot.lane.b32.xlu2 %v7030_v55, %s6195_s22  ;;  %v1132_v36 = vld [vmem:[#allocation3 + $0x78] sm:$0xff] }
 0x1d4   : > { %v1301_v37 = vpop.permute.xlu0 %1300  ;;  %6043 = vmatmul.msk.f32.gmra.mxu0 %vm284_vm1, %v651_v2  ;;  %1091 = vst.msk [vmem:[#allocation3 + $0xd0] sm:$0xff] %vm175_vm2, %v1043_v35 }
 0x1d5   : > { %v1520_v43 = vpop.permute.xlu1 %1519  ;;  %v7094_v46 = vpop.permute.xlu2 %2099  ;;  %v1405_v54 = vadd.f32 %v1301_v37, %v1165_v38  ;;  %v450_v38 = vld [vmem:[%s6250_s19 + $0xa8] sm:$0xff] }
 0x1d6   : > { %v1659_v52 = vadd.f32 %v1520_v43, %v1467_v44  ;;  %482 = vst.msk [vmem:[#allocation2 + $0xf8] sm:$0xff] %vm284_vm1, %v450_v38  ;;  %v1133_v38 = vld [vmem:[#allocation3 + $0x80] sm:$0xff] }
 0x1d7   : > { %1453 = vst.msk [vmem:[#allocation3 + $0x288] sm:$0xff] %vm175_vm2, %v1405_v54  ;;  %v1752_v59 = vld [vmem:[#allocation3 + $0x48] sm:$0xff]  ;;  %1601 = vrot.lane.b32.xlu0 %v7056_v20, %s6196_s23 }
 0x1d8   : > { %1707 = vst.msk [vmem:[#allocation3 + $0x68] sm:$0xff] %vm175_vm2, %v1659_v52  ;;  %v1944_v63 = vadd.f32 %v6944_v45, %v1752_v59  ;;  %v994_v45 = vld [vmem:[#allocation3 + $0xc8] sm:$0xff] }
 0x1d9   : > { %v1042_v22 = vadd.f32 %v994_v45, %v7118_v16  ;;  %v7164_v50 = vpop.f32.mrf.mxu0  ;;  %v1134_v59 = vld [vmem:[#allocation3 + $0x88] sm:$0xff] }
 0x1da   : > { %1992 = vst.msk [vmem:[#allocation3 + $0x48] sm:$0xff] %vm175_vm2, %v1944_v63  ;;  %v1044_v52 = vadd.f32 %v996_v47, %v7164_v50  ;;  %v1469_v63 = vld [vmem:[#allocation3 + $0x90] sm:$0xff] }
 0x1db   : > { %1820 = vrot.lane.b32.xlu1 %v7013_v31, %s6197_s24  ;;  %1533 = vrot.lane.b32.xlu2 %v7030_v55, %s6196_s23  ;;  %1090 = vst.msk [vmem:[#allocation3 + $0xc8] sm:$0xff] %vm175_vm2, %v1042_v22  ;;  %v655_v22 = vld [vmem:[#allocation2 + $0x100] sm:$0xff] }
 0x1dc   : > { %v1590_v4 = vpop.permute.xlu0 %1589  ;;  %6044 = vmatmul.msk.f32.gmra.mxu0 %vm284_vm1, %v652_v23  ;;  %1092 = vst.msk [vmem:[#allocation3 + $0xf0] sm:$0xff] %vm175_vm2, %v1044_v52  ;;  %v451_v23 = vld [vmem:[%s6250_s19 + $0xb0] sm:$0xff] }
 0x1dd   : > { %v7115_v6 = vpop.permute.xlu1 %1808  ;;  %v1305_v7 = vpop.permute.xlu2 %1304  ;;  %v1694_v11 = vadd.f32 %v1590_v4, %v1502_v3  ;;  %v654_v60 = vld [vmem:[#allocation2 + $0xf8] sm:$0xff]  ;;  %483 = vst.msk [vmem:[#allocation2 + $0x108] sm:$0xff] %vm284_vm1, %v451_v23 }
 0x1de   : > { %v1407_v12 = vadd.f32 %v1305_v7, %v1167_v1  ;;  %v1788_v13 = vld [vmem:[#allocation3 + $0x288] sm:$0xff] }
 0x1df   : > { %v2042_v14 = vld [vmem:[#allocation3 + $0x68] sm:$0xff]  ;;  %1742 = vst.msk [vmem:[#allocation3 + $0x2a0] sm:$0xff] %vm175_vm2, %v1694_v11  ;;  %v1980_v19 = vadd.f32 %v6993_v17, %v1788_v13  ;;  %v449_v17 = vld [vmem:[%s6250_s19 + $0xa0] sm:$0xff]  ;;  %1890 = vrot.lane.b32.xlu0 %v7056_v20, %s6197_s24 }
 0x1e0   : > { %v2234_v62 = vadd.f32 %v6985_v8, %v2042_v14  ;;  %1455 = vst.msk [vmem:[#allocation3 + $0x298] sm:$0xff] %vm175_vm2, %v1407_v12  ;;  %v1503_v1 = vld [vmem:[#allocation3 + $0x2a8] sm:$0xff] }
 0x1e1   : > { %2028 = vst.msk [vmem:[#allocation3 + $0x288] sm:$0xff] %vm175_vm2, %v1980_v19  ;;  %v7178_v14 = vpop.f32.mrf.mxu0  ;;  %v997_v19 = vld [vmem:[#allocation3 + $0xf8] sm:$0xff] }
 0x1e2   : > { %2282 = vst.msk [vmem:[#allocation3 + $0x68] sm:$0xff] %vm175_vm2, %v2234_v62  ;;  %v1045_v62 = vadd.f32 %v997_v19, %v7178_v14 }
 0x1e3   : > { %481 = vst.msk [vmem:[#allocation2 + $0xf0] sm:$0xff] %vm284_vm1, %v449_v17  ;;  %1314 = vrot.lane.b32.xlu1 %v7078_v33, %s6195_s22  ;;  %1822 = vrot.lane.b32.xlu2 %v7030_v55, %s6197_s24 }
 0x1e4   : > { %v7134_v8 = vpop.permute.xlu0 %1878  ;;  %1093 = vst.msk [vmem:[#allocation3 + $0xf8] sm:$0xff] %vm175_vm2, %v1045_v62 }
 0x1e5   : > { %v7138_v25 = vpop.permute.xlu1 %2097  ;;  %v1594_v26 = vpop.permute.xlu2 %1593 }
 0x1e6   : > { %v1696_v27 = vadd.f32 %v1594_v26, %v1504_v51  ;;  %v1471_v26 = vld [vmem:[#allocation3 + $0xa0] sm:$0xff] }
 0x1e7   : > { %v1790_v29 = vld [vmem:[#allocation3 + $0x298] sm:$0xff]  ;;  %1246 = vrot.lane.b32.xlu0 %v7099_v56, %s6195_s22 }
 0x1e8   : > { %1744 = vst.msk [vmem:[#allocation3 + $0x2b0] sm:$0xff] %vm175_vm2, %v1696_v27  ;;  %v1982_v34 = vadd.f32 %v6998_v21, %v1790_v29 }
 0x1ea   : > { %2030 = vst.msk [vmem:[#allocation3 + $0x298] sm:$0xff] %vm175_vm2, %v1982_v34  ;;  %v653_v41 = vld [vmem:[#allocation2 + $0xf0] sm:$0xff]  ;;  %v7199_v34 = vpop.f32.mrf.mxu0 }
 0x1eb   : > { %6045 = vmatmul.msk.f32.gmra.mxu0 %vm284_vm1, %v653_v41  ;;  %1603 = vrot.lane.b32.xlu1 %v7078_v33, %s6196_s23 }
 0x1ec   : > { %v1235_v37 = vpop.permute.xlu0 %1234  ;;  %1316 = vrot.lane.b32.xlu2 %v7097_v53, %s6195_s22 }
 0x1ed   : > { %v1303_v43 = vpop.permute.xlu1 %1302  ;;  %v7156_v21 = vpop.permute.xlu2 %1882  ;;  %v1372_v44 = vadd.f32 %v1235_v37, %v1132_v36  ;;  %v1046_v36 = vadd.f32 %v998_v48, %v7199_v34  ;;  %v1507_v48 = vld [vmem:[#allocation3 + $0x2e0] sm:$0xff] }
 0x1ee   : > { %v1406_v54 = vadd.f32 %v1303_v43, %v1166_v40  ;;  %v656_v40 = vld [vmem:[#allocation2 + $0x108] sm:$0xff]  ;;  %v999_v43 = vld [vmem:[#allocation3 + $0x120] sm:$0xff] }
 0x1ef   : > { %1420 = vst.msk [vmem:[#allocation3 + $0x78] sm:$0xff] %vm175_vm2, %v1372_v44  ;;  %1535 = vrot.lane.b32.xlu0 %v7099_v56, %s6196_s23 }
 0x1f0   : > { %1454 = vst.msk [vmem:[#allocation3 + $0x290] sm:$0xff] %vm175_vm2, %v1406_v54 }
 0x1f1   : > { %1094 = vst.msk [vmem:[#allocation3 + $0x100] sm:$0xff] %vm175_vm2, %v1046_v36 }
 0x1f3   : > { %6046 = vmatmul.msk.f32.gmra.mxu0 %vm284_vm1, %v654_v60  ;;  %1892 = vrot.lane.b32.xlu1 %v7078_v33, %s6197_s24  ;;  %v1470_v60 = vld [vmem:[#allocation3 + $0x98] sm:$0xff] }
 0x1f4   : > { %v1524_v61 = vpop.permute.xlu0 %1523  ;;  %1605 = vrot.lane.b32.xlu2 %v7097_v53, %s6196_s23 }
 0x1f5   : > { %v1592_v2 = vpop.permute.xlu1 %1591  ;;  %v1239_v3 = vpop.permute.xlu2 %1238  ;;  %v1661_v4 = vadd.f32 %v1524_v61, %v1469_v63 }
 0x1f6   : > { %v1695_v7 = vadd.f32 %v1592_v2, %v1503_v1  ;;  %v1374_v11 = vadd.f32 %v1239_v3, %v1134_v59  ;;  %v1755_v45 = vld [vmem:[#allocation3 + $0x78] sm:$0xff]  ;;  %v1000_v1 = vld [vmem:[#allocation3 + $0x128] sm:$0xff] }
 0x1f7   : > { %1709 = vst.msk [vmem:[#allocation3 + $0x90] sm:$0xff] %vm175_vm2, %v1661_v4  ;;  %v1947_v12 = vadd.f32 %v7052_v9, %v1755_v45  ;;  %v1789_v13 = vld [vmem:[#allocation3 + $0x290] sm:$0xff]  ;;  %1824 = vrot.lane.b32.xlu0 %v7099_v56, %s6197_s24  ;;  %v452_v59 = vld [vmem:[%s6250_s19 + $0xb8] sm:$0xff] }
 0x1f8   : > { %1743 = vst.msk [vmem:[#allocation3 + $0x2a8] sm:$0xff] %vm175_vm2, %v1695_v7  ;;  %v1981_v9 = vadd.f32 %v7034_v57, %v1789_v13  ;;  %v1001_v13 = vld [vmem:[#allocation3 + $0x130] sm:$0xff] }
 0x1f9   : > { %1422 = vst.msk [vmem:[#allocation3 + $0x88] sm:$0xff] %vm175_vm2, %v1374_v11 }
 0x1fa   : > { %1995 = vst.msk [vmem:[#allocation3 + $0x78] sm:$0xff] %vm175_vm2, %v1947_v12 }
 0x1fb   : > { %6047 = vmatmul.msk.f32.gmra.mxu0 %vm284_vm1, %v655_v22  ;;  %2029 = vst.msk [vmem:[#allocation3 + $0x290] sm:$0xff] %vm175_vm2, %v1981_v9  ;;  %1248 = vrot.lane.b32.xlu1 %v7118_v16, %s6195_s22  ;;  %v1170_v22 = vld [vmem:[#allocation3 + $0x2c8] sm:$0xff] }
 0x1fc   : > { %1894 = vrot.lane.b32.xlu2 %v7097_v53, %s6197_s24  ;;  %484 = vst.msk [vmem:[#allocation2 + $0x110] sm:$0xff] %vm284_vm1, %v452_v59  ;;  %v7226_v61 = vpop.permute.xlu0 %1812  ;;  %v1505_v59 = vld [vmem:[#allocation3 + $0x2d0] sm:$0xff] }
 0x1fd   : > { %v7190_v17 = vpop.permute.xlu1 %1880  ;;  %v1528_v51 = vpop.permute.xlu2 %1527 }
 0x1fe   : > { %v1663_v27 = vadd.f32 %v1528_v51, %v1471_v26  ;;  %v2044_v29 = vld [vmem:[#allocation3 + $0x90] sm:$0xff]  ;;  %v1168_v26 = vld [vmem:[#allocation3 + $0x2b8] sm:$0xff] }
 0x1ff   : > { %v2236_v57 = vadd.f32 %v7071_v28, %v2044_v29  ;;  %1252 = vrot.lane.b32.xlu0 %v7164_v50, %s6195_s22  ;;  %v1002_v29 = vld [vmem:[#allocation3 + $0x150] sm:$0xff] }
 0x200   : > { %1711 = vst.msk [vmem:[#allocation3 + $0xa0] sm:$0xff] %vm175_vm2, %v1663_v27  ;;  %v1757_v35 = vld [vmem:[#allocation3 + $0x88] sm:$0xff] }
 0x201   : > { %2284 = vst.msk [vmem:[#allocation3 + $0x90] sm:$0xff] %vm175_vm2, %v2236_v57  ;;  %v1949_v28 = vadd.f32 %v7075_v30, %v1757_v35  ;;  %v7217_v30 = vpop.f32.mrf.mxu0 }
 0x202   : > { %v1047_v52 = vadd.f32 %v999_v43, %v7217_v30 }
 0x203   : > { %6048 = vmatmul.msk.f32.gmra.mxu0 %vm284_vm1, %v656_v40  ;;  %1997 = vst.msk [vmem:[#allocation3 + $0x88] sm:$0xff] %vm175_vm2, %v1949_v28  ;;  %1537 = vrot.lane.b32.xlu1 %v7118_v16, %s6196_s23  ;;  %v657_v45 = vld [vmem:[#allocation2 + $0x110] sm:$0xff]  ;;  %v658_v28 = vld [vmem:[#allocation2 + $0x118] sm:$0xff] }
 0x204   : > { %1250 = vrot.lane.b32.xlu2 %v7145_v32, %s6195_s22  ;;  %1095 = vst.msk [vmem:[#allocation3 + $0x120] sm:$0xff] %vm175_vm2, %v1047_v52  ;;  %v7251_v62 = vpop.permute.xlu0 %2101 }
 0x205   : > { %v1237_v41 = vpop.permute.xlu1 %1236  ;;  %v7209_v54 = vpop.permute.xlu2 %1816 }
 0x206   : > { %v1373_v37 = vadd.f32 %v1237_v41, %v1133_v38 }
 0x207   : > { %v2046_v44 = vld [vmem:[#allocation3 + $0xa0] sm:$0xff]  ;;  %1541 = vrot.lane.b32.xlu0 %v7164_v50, %s6196_s23 }
 0x208   : > { %v2238_v47 = vadd.f32 %v7094_v46, %v2046_v44  ;;  %1421 = vst.msk [vmem:[#allocation3 + $0x80] sm:$0xff] %vm175_vm2, %v1373_v37  ;;  %v1169_v44 = vld [vmem:[#allocation3 + $0x2c0] sm:$0xff] }
 0x209   : > { %v7233_v3 = vpop.f32.mrf.mxu0 }
 0x20a   : > { %2286 = vst.msk [vmem:[#allocation3 + $0xa0] sm:$0xff] %vm175_vm2, %v2238_v47  ;;  %v1048_v11 = vadd.f32 %v1000_v1, %v7233_v3  ;;  %v1003_v47 = vld [vmem:[#allocation3 + $0x158] sm:$0xff] }
 0x20b   : > { %1826 = vrot.lane.b32.xlu1 %v7118_v16, %s6197_s24  ;;  %6049 = vmatmul.msk.f32.gmra.mxu0 %vm284_vm1, %v657_v45  ;;  %v1506_v45 = vld [vmem:[#allocation3 + $0x2d8] sm:$0xff] }
 0x20c   : > { %1539 = vrot.lane.b32.xlu2 %v7145_v32, %s6196_s23  ;;  %1096 = vst.msk [vmem:[#allocation3 + $0x128] sm:$0xff] %vm175_vm2, %v1048_v11 }
 0x20d   : > { %v1526_v46 = vpop.permute.xlu1 %1525  ;;  %v7238_v7 = vpop.permute.xlu2 %2105 }
 0x20e   : > { %v1662_v63 = vadd.f32 %v1526_v46, %v1470_v60 }
 0x20f   : > { %v1756_v2 = vld [vmem:[#allocation3 + $0x80] sm:$0xff]  ;;  %1830 = vrot.lane.b32.xlu0 %v7164_v50, %s6197_s24 }
 0x210   : > { %1710 = vst.msk [vmem:[#allocation3 + $0x98] sm:$0xff] %vm175_vm2, %v1662_v63  ;;  %v1948_v4 = vadd.f32 %v7115_v6, %v1756_v2 }
 0x211   : > { %v7253_v9 = vpop.f32.mrf.mxu0  ;;  %v1307_v35 = vpop.permute.xlu0 %1306 }
 0x212   : > { %1996 = vst.msk [vmem:[#allocation3 + $0x80] sm:$0xff] %vm175_vm2, %v1948_v4  ;;  %v1049_v23 = vadd.f32 %v1001_v13, %v7253_v9  ;;  %v1408_v38 = vadd.f32 %v1307_v35, %v1168_v26  ;;  %v1004_v13 = vld [vmem:[#allocation3 + $0x160] sm:$0xff] }
 0x213   : > { %1254 = vrot.lane.b32.xlu1 %v7178_v14, %s6195_s22  ;;  %6050 = vmatmul.msk.f32.gmra.mxu0 %vm284_vm1, %v658_v28  ;;  %v1005_v35 = vld [vmem:[#allocation3 + $0x180] sm:$0xff] }
 0x214   : > { %1828 = vrot.lane.b32.xlu2 %v7145_v32, %s6197_s24  ;;  %1097 = vst.msk [vmem:[#allocation3 + $0x130] sm:$0xff] %vm175_vm2, %v1049_v23 }
 0x215   : > { %v7244_v12 = vpop.permute.xlu1 %1814  ;;  %v1311_v51 = vpop.permute.xlu2 %1310  ;;  %1456 = vst.msk [vmem:[#allocation3 + $0x2b8] sm:$0xff] %vm175_vm2, %v1408_v38 }
 0x217   : > { %v2045_v19 = vld [vmem:[#allocation3 + $0x98] sm:$0xff]  ;;  %1258 = vrot.lane.b32.xlu0 %v7217_v30, %s6195_s22 }
 0x218   : > { %v2237_v6 = vadd.f32 %v7138_v25, %v2045_v19  ;;  %v1410_v25 = vadd.f32 %v1311_v51, %v1170_v22  ;;  %v1137_v19 = vld [vmem:[#allocation3 + $0xb8] sm:$0xff] }
 0x219   : > { %v7269_v57 = vpop.f32.mrf.mxu0  ;;  %v1596_v46 = vpop.permute.xlu0 %1595 }
 0x21a   : > { %2285 = vst.msk [vmem:[#allocation3 + $0x98] sm:$0xff] %vm175_vm2, %v2237_v6  ;;  %v1050_v36 = vadd.f32 %v1002_v29, %v7269_v57  ;;  %v1697_v63 = vadd.f32 %v1596_v46, %v1505_v59  ;;  %v1006_v46 = vld [vmem:[#allocation3 + $0x188] sm:$0xff] }
 0x21b   : > { %1458 = vst.msk [vmem:[#allocation3 + $0x2c8] sm:$0xff] %vm175_vm2, %v1410_v25  ;;  %1543 = vrot.lane.b32.xlu1 %v7178_v14, %s6196_s23 }
 0x21c   : > { %1256 = vrot.lane.b32.xlu2 %v7199_v34, %s6195_s22  ;;  %1098 = vst.msk [vmem:[#allocation3 + $0x150] sm:$0xff] %vm175_vm2, %v1050_v36  ;;  %v1791_v4 = vld [vmem:[#allocation3 + $0x2b8] sm:$0xff]  ;;  %v1135_v36 = vld [vmem:[#allocation3 + $0xa8] sm:$0xff] }
 0x21d   : > { %v7265_v27 = vpop.permute.xlu1 %2103  ;;  %v1600_v40 = vpop.permute.xlu2 %1599  ;;  %1745 = vst.msk [vmem:[#allocation3 + $0x2d0] sm:$0xff] %vm175_vm2, %v1697_v63  ;;  %v1983_v11 = vadd.f32 %v7134_v8, %v1791_v4 }
 0x21e   : > { %v1699_v41 = vadd.f32 %v1600_v40, %v1507_v48 }
 0x21f   : > { %2031 = vst.msk [vmem:[#allocation3 + $0x2b8] sm:$0xff] %vm175_vm2, %v1983_v11  ;;  %1547 = vrot.lane.b32.xlu0 %v7217_v30, %s6196_s23 }
 0x220   : > { %1747 = vst.msk [vmem:[#allocation3 + $0x2e0] sm:$0xff] %vm175_vm2, %v1699_v41 }
 0x221   : > { %v7284_v52 = vpop.f32.mrf.mxu0  ;;  %v7302_v22 = vpop.permute.xlu0 %1884 }
 0x222   : > { %v1793_v37 = vld [vmem:[#allocation3 + $0x2c8] sm:$0xff] }
 0x223   : > { %v1985_v43 = vadd.f32 %v7156_v21, %v1793_v37  ;;  %1832 = vrot.lane.b32.xlu1 %v7178_v14, %s6197_s24  ;;  %v1051_v21 = vadd.f32 %v1003_v47, %v7284_v52 }
 0x224   : > { %1545 = vrot.lane.b32.xlu2 %v7199_v34, %s6196_s23 }
 0x225   : > { %2033 = vst.msk [vmem:[#allocation3 + $0x2c8] sm:$0xff] %vm175_vm2, %v1985_v43  ;;  %v1309_v60 = vpop.permute.xlu1 %1308  ;;  %v7287_v2 = vpop.permute.xlu2 %1888  ;;  %v1474_v43 = vld [vmem:[#allocation3 + $0xd0] sm:$0xff] }
 0x226   : > { %v1409_v1 = vadd.f32 %v1309_v60, %v1169_v44  ;;  %1099 = vst.msk [vmem:[#allocation3 + $0x158] sm:$0xff] %vm175_vm2, %v1051_v21  ;;  %v1136_v60 = vld [vmem:[#allocation3 + $0xb0] sm:$0xff] }
 0x227   : > { %1836 = vrot.lane.b32.xlu0 %v7217_v30, %s6197_s24 }
 0x228   : > { %1457 = vst.msk [vmem:[#allocation3 + $0x2c0] sm:$0xff] %vm175_vm2, %v1409_v1  ;;  %v1472_v1 = vld [vmem:[#allocation3 + $0xc0] sm:$0xff] }
 0x229   : > { %v7300_v6 = vpop.f32.mrf.mxu0  ;;  %v1241_v40 = vpop.permute.xlu0 %1240 }
 0x22a   : > { %v1052_v23 = vadd.f32 %v1004_v13, %v7300_v6  ;;  %v1375_v41 = vadd.f32 %v1241_v40, %v1135_v36 }
 0x22b   : > { %1260 = vrot.lane.b32.xlu1 %v7233_v3, %s6195_s22 }
 0x22c   : > { %1834 = vrot.lane.b32.xlu2 %v7199_v34, %s6197_s24  ;;  %1100 = vst.msk [vmem:[#allocation3 + $0x160] sm:$0xff] %vm175_vm2, %v1052_v23 }
 0x22d   : > { %v1598_v8 = vpop.permute.xlu1 %1597  ;;  %v1245_v25 = vpop.permute.xlu2 %1244  ;;  %1423 = vst.msk [vmem:[#allocation3 + $0xa8] sm:$0xff] %vm175_vm2, %v1375_v41 }
 0x22e   : > { %v1698_v51 = vadd.f32 %v1598_v8, %v1506_v45  ;;  %v1377_v26 = vadd.f32 %v1245_v25, %v1137_v19  ;;  %v1007_v25 = vld [vmem:[#allocation3 + $0x190] sm:$0xff] }
 0x22f   : > { %v1792_v29 = vld [vmem:[#allocation3 + $0x2c0] sm:$0xff]  ;;  %1264 = vrot.lane.b32.xlu0 %v7269_v57, %s6195_s22 }
 0x230   : > { %1746 = vst.msk [vmem:[#allocation3 + $0x2d8] sm:$0xff] %vm175_vm2, %v1698_v51  ;;  %v1984_v48 = vadd.f32 %v7190_v17, %v1792_v29 }
 0x231   : > { %1425 = vst.msk [vmem:[#allocation3 + $0xb8] sm:$0xff] %vm175_vm2, %v1377_v26  ;;  %v7316_v28 = vpop.f32.mrf.mxu0  ;;  %v1530_v63 = vpop.permute.xlu0 %1529  ;;  %v1173_v26 = vld [vmem:[#allocation3 + $0x2f8] sm:$0xff] }
 0x232   : > { %2032 = vst.msk [vmem:[#allocation3 + $0x2c0] sm:$0xff] %vm175_vm2, %v1984_v48  ;;  %v1053_v17 = vadd.f32 %v1005_v35, %v7316_v28  ;;  %v1664_v11 = vadd.f32 %v1530_v63, %v1472_v1  ;;  %v1473_v48 = vld [vmem:[#allocation3 + $0xc8] sm:$0xff] }
 0x233   : > { %1549 = vrot.lane.b32.xlu1 %v7233_v3, %s6196_s23 }
 0x234   : > { %1262 = vrot.lane.b32.xlu2 %v7253_v9, %s6195_s22  ;;  %1101 = vst.msk [vmem:[#allocation3 + $0x180] sm:$0xff] %vm175_vm2, %v1053_v17  ;;  %v1758_v19 = vld [vmem:[#allocation3 + $0xa8] sm:$0xff] }
 0x235   : > { %v7318_v38 = vpop.permute.xlu1 %1886  ;;  %v1534_v37 = vpop.permute.xlu2 %1533  ;;  %1712 = vst.msk [vmem:[#allocation3 + $0xc0] sm:$0xff] %vm175_vm2, %v1664_v11  ;;  %v1950_v23 = vadd.f32 %v7226_v61, %v1758_v19 }
 0x236   : > { %v1666_v44 = vadd.f32 %v1534_v37, %v1474_v43 }
 0x237   : > { %1998 = vst.msk [vmem:[#allocation3 + $0xa8] sm:$0xff] %vm175_vm2, %v1950_v23  ;;  %1553 = vrot.lane.b32.xlu0 %v7269_v57, %s6196_s23  ;;  %v1009_v23 = vld [vmem:[#allocation3 + $0x1b8] sm:$0xff] }
 0x238   : > { %v1760_v47 = vld [vmem:[#allocation3 + $0xb8] sm:$0xff]  ;;  %1714 = vst.msk [vmem:[#allocation3 + $0xd0] sm:$0xff] %vm175_vm2, %v1666_v44 }
 0x239   : > { %v1952_v59 = vadd.f32 %v7209_v54, %v1760_v47  ;;  %v7332_v21 = vpop.f32.mrf.mxu0  ;;  %v1008_v47 = vld [vmem:[#allocation3 + $0x1b0] sm:$0xff] }
 0x23a   : > { %v1054_v54 = vadd.f32 %v1006_v46, %v7332_v21 }
 0x23b   : > { %1838 = vrot.lane.b32.xlu1 %v7233_v3, %s6197_s24  ;;  %2000 = vst.msk [vmem:[#allocation3 + $0xb8] sm:$0xff] %vm175_vm2, %v1952_v59  ;;  %v1171_v59 = vld [vmem:[#allocation3 + $0x2e8] sm:$0xff] }
 0x23c   : > { %1551 = vrot.lane.b32.xlu2 %v7253_v9, %s6196_s23  ;;  %1102 = vst.msk [vmem:[#allocation3 + $0x188] sm:$0xff] %vm175_vm2, %v1054_v54  ;;  %v2047_v17 = vld [vmem:[#allocation3 + $0xc0] sm:$0xff] }
 0x23d   : > { %v1243_v4 = vpop.permute.xlu1 %1242  ;;  %v7335_v13 = vpop.permute.xlu2 %1822  ;;  %v2239_v37 = vadd.f32 %v7251_v62, %v2047_v17  ;;  %v1510_v62 = vld [vmem:[#allocation3 + $0x310] sm:$0xff] }
 0x23e   : > { %v1376_v45 = vadd.f32 %v1243_v4, %v1136_v60 }
 0x23f   : > { %v2049_v8 = vld [vmem:[#allocation3 + $0xd0] sm:$0xff]  ;;  %2287 = vst.msk [vmem:[#allocation3 + $0xc0] sm:$0xff] %vm175_vm2, %v2239_v37  ;;  %1842 = vrot.lane.b32.xlu0 %v7269_v57, %s6197_s24 }
 0x240   : > { %v2241_v51 = vadd.f32 %v7238_v7, %v2049_v8  ;;  %1424 = vst.msk [vmem:[#allocation3 + $0xb0] sm:$0xff] %vm175_vm2, %v1376_v45  ;;  %v7352_v7 = vpop.permute.xlu0 %1818 }
 0x241   : > { %v7350_v61 = vpop.f32.mrf.mxu0 }
 0x242   : > { %2289 = vst.msk [vmem:[#allocation3 + $0xd0] sm:$0xff] %vm175_vm2, %v2241_v51  ;;  %v1055_v35 = vadd.f32 %v1007_v25, %v7350_v61  ;;  %v1508_v51 = vld [vmem:[#allocation3 + $0x300] sm:$0xff]  ;;  %v1172_v25 = vld [vmem:[#allocation3 + $0x2f0] sm:$0xff] }
 0x243   : > { %1266 = vrot.lane.b32.xlu1 %v7284_v52, %s6195_s22 }
 0x244   : > { %1840 = vrot.lane.b32.xlu2 %v7253_v9, %s6197_s24  ;;  %1103 = vst.msk [vmem:[#allocation3 + $0x190] sm:$0xff] %vm175_vm2, %v1055_v35 }
 0x245   : > { %v1532_v29 = vpop.permute.xlu1 %1531 }
 0x246   : > { %v1665_v36 = vadd.f32 %v1532_v29, %v1473_v48  ;;  %v1317_v40 = vpop.permute.xlu2 %1316 }
 0x247   : > { %v1413_v41 = vadd.f32 %v1317_v40, %v1173_v26  ;;  %v1759_v43 = vld [vmem:[#allocation3 + $0xb0] sm:$0xff]  ;;  %1270 = vrot.lane.b32.xlu0 %v7316_v28, %s6195_s22 }
 0x248   : > { %1713 = vst.msk [vmem:[#allocation3 + $0xc8] sm:$0xff] %vm175_vm2, %v1665_v36  ;;  %v1951_v44 = vadd.f32 %v7244_v12, %v1759_v43  ;;  %v1313_v60 = vpop.permute.xlu0 %1312  ;;  %v1010_v43 = vld [vmem:[#allocation3 + $0x1c0] sm:$0xff] }
 0x249   : > { %1461 = vst.msk [vmem:[#allocation3 + $0x2f8] sm:$0xff] %vm175_vm2, %v1413_v41  ;;  %v7368_v46 = vpop.f32.mrf.mxu0  ;;  %v1411_v1 = vadd.f32 %v1313_v60, %v1171_v59  ;;  %v1140_v59 = vld [vmem:[#allocation3 + $0xe8] sm:$0xff] }
 0x24a   : > { %1999 = vst.msk [vmem:[#allocation3 + $0xb0] sm:$0xff] %vm175_vm2, %v1951_v44  ;;  %v1056_v63 = vadd.f32 %v1008_v47, %v7368_v46  ;;  %v1797_v44 = vld [vmem:[#allocation3 + $0x318] sm:$0xff]  ;;  %v1509_v47 = vld [vmem:[#allocation3 + $0x308] sm:$0xff] }
 0x24b   : > { %1555 = vrot.lane.b32.xlu1 %v7284_v52, %s6196_s23  ;;  %1459 = vst.msk [vmem:[#allocation3 + $0x2e8] sm:$0xff] %vm175_vm2, %v1411_v1 }
 0x24c   : > { %1268 = vrot.lane.b32.xlu2 %v7300_v6, %s6195_s22  ;;  %1104 = vst.msk [vmem:[#allocation3 + $0x1b0] sm:$0xff] %vm175_vm2, %v1056_v63 }
 0x24d   : > { %v7370_v12 = vpop.permute.xlu1 %1820 }
 0x24e   : > { %v1606_v4 = vpop.permute.xlu2 %1605 }
 0x24f   : > { %v2048_v54 = vld [vmem:[#allocation3 + $0xc8] sm:$0xff]  ;;  %v1702_v11 = vadd.f32 %v1606_v4, %v1510_v62  ;;  %1559 = vrot.lane.b32.xlu0 %v7316_v28, %s6196_s23 }
 0x250   : > { %v2240_v45 = vadd.f32 %v7265_v27, %v2048_v54  ;;  %v1796_v19 = vld [vmem:[#allocation3 + $0x2f8] sm:$0xff]  ;;  %v1799_v27 = vld [vmem:[#allocation3 + $0x328] sm:$0xff] }
 0x251   : > { %1750 = vst.msk [vmem:[#allocation3 + $0x310] sm:$0xff] %vm175_vm2, %v1702_v11  ;;  %v1988_v8 = vadd.f32 %v7287_v2, %v1796_v19  ;;  %v7386_v26 = vpop.f32.mrf.mxu0  ;;  %v1602_v2 = vpop.permute.xlu0 %1601 }
 0x252   : > { %2288 = vst.msk [vmem:[#allocation3 + $0xc8] sm:$0xff] %vm175_vm2, %v2240_v45  ;;  %v1057_v48 = vadd.f32 %v1009_v23, %v7386_v26  ;;  %v1700_v35 = vadd.f32 %v1602_v2, %v1508_v51  ;;  %v1794_v41 = vld [vmem:[#allocation3 + $0x2e8] sm:$0xff]  ;;  %v1798_v23 = vld [vmem:[#allocation3 + $0x320] sm:$0xff]  ;;  %v1138_v51 = vld [vmem:[#allocation3 + $0xd8] sm:$0xff] }
 0x253   : > { %1844 = vrot.lane.b32.xlu1 %v7284_v52, %s6197_s24  ;;  %2036 = vst.msk [vmem:[#allocation3 + $0x2f8] sm:$0xff] %vm175_vm2, %v1988_v8  ;;  %v1986_v37 = vadd.f32 %v7302_v22, %v1794_v41  ;;  %v1011_v8 = vld [vmem:[#allocation3 + $0x1e0] sm:$0xff]  ;;  %v1012_v41 = vld [vmem:[#allocation3 + $0x1e8] sm:$0xff] }
 0x254   : > { %1557 = vrot.lane.b32.xlu2 %v7300_v6, %s6196_s23  ;;  %1105 = vst.msk [vmem:[#allocation3 + $0x1b8] sm:$0xff] %vm175_vm2, %v1057_v48 }
 0x255   : > { %v1315_v29 = vpop.permute.xlu1 %1314  ;;  %1748 = vst.msk [vmem:[#allocation3 + $0x300] sm:$0xff] %vm175_vm2, %v1700_v35 }
 0x256   : > { %v1412_v36 = vadd.f32 %v1315_v29, %v1172_v25  ;;  %v1895_v40 = vpop.permute.xlu2 %1894  ;;  %2034 = vst.msk [vmem:[#allocation3 + $0x2e8] sm:$0xff] %vm175_vm2, %v1986_v37 }
 0x257   : > { %v1991_v17 = vadd.f32 %v1895_v40, %v1799_v27  ;;  %1848 = vrot.lane.b32.xlu0 %v7316_v28, %s6197_s24 }
 0x258   : > { %1460 = vst.msk [vmem:[#allocation3 + $0x2f0] sm:$0xff] %vm175_vm2, %v1412_v36  ;;  %v1477_v36 = vld [vmem:[#allocation3 + $0x100] sm:$0xff] }
 0x259   : > { %2039 = vst.msk [vmem:[#allocation3 + $0x328] sm:$0xff] %vm175_vm2, %v1991_v17  ;;  %v7401_v22 = vpop.f32.mrf.mxu0  ;;  %v1891_v62 = vpop.permute.xlu0 %1890 }
 0x25a   : > { %v1058_v63 = vadd.f32 %v1010_v43, %v7401_v22  ;;  %v1989_v1 = vadd.f32 %v1891_v62, %v1797_v44  ;;  %v1139_v43 = vld [vmem:[#allocation3 + $0xe0] sm:$0xff] }
 0x25b   : > { %1272 = vrot.lane.b32.xlu1 %v7332_v21, %s6195_s22 }
 0x25c   : > { %1846 = vrot.lane.b32.xlu2 %v7300_v6, %s6197_s24  ;;  %1106 = vst.msk [vmem:[#allocation3 + $0x1c0] sm:$0xff] %vm175_vm2, %v1058_v63 }
 0x25d   : > { %v1604_v60 = vpop.permute.xlu1 %1603  ;;  %2037 = vst.msk [vmem:[#allocation3 + $0x318] sm:$0xff] %vm175_vm2, %v1989_v1 }
 0x25e   : > { %v1701_v4 = vadd.f32 %v1604_v60, %v1509_v47  ;;  %v1251_v54 = vpop.permute.xlu2 %1250 }
 0x25f   : > { %v1380_v11 = vadd.f32 %v1251_v54, %v1140_v59  ;;  %v1795_v45 = vld [vmem:[#allocation3 + $0x2f0] sm:$0xff]  ;;  %1276 = vrot.lane.b32.xlu0 %v7368_v46, %s6195_s22 }
 0x260   : > { %1749 = vst.msk [vmem:[#allocation3 + $0x308] sm:$0xff] %vm175_vm2, %v1701_v4  ;;  %v1987_v19 = vadd.f32 %v7318_v38, %v1795_v45  ;;  %v1475_v59 = vld [vmem:[#allocation3 + $0xf0] sm:$0xff]  ;;  %v1143_v45 = vld [vmem:[#allocation3 + $0x118] sm:$0xff] }
 0x261   : > { %1428 = vst.msk [vmem:[#allocation3 + $0xe8] sm:$0xff] %vm175_vm2, %v1380_v11  ;;  %v1247_v38 = vpop.permute.xlu0 %1246  ;;  %v1013_v11 = vld [vmem:[#allocation3 + $0x1f0] sm:$0xff] }
 0x262   : > { %2035 = vst.msk [vmem:[#allocation3 + $0x2f0] sm:$0xff] %vm175_vm2, %v1987_v19  ;;  %v1378_v48 = vadd.f32 %v1247_v38, %v1138_v51  ;;  %v1476_v51 = vld [vmem:[#allocation3 + $0xf8] sm:$0xff] }
 0x263   : > { %1561 = vrot.lane.b32.xlu1 %v7332_v21, %s6196_s23 }
 0x264   : > { %1274 = vrot.lane.b32.xlu2 %v7350_v61, %s6195_s22  ;;  %1426 = vst.msk [vmem:[#allocation3 + $0xd8] sm:$0xff] %vm175_vm2, %v1378_v48 }
 0x265   : > { %v1893_v27 = vpop.permute.xlu1 %1892 }
 0x266   : > { %v1990_v29 = vadd.f32 %v1893_v27, %v1798_v23  ;;  %v1540_v35 = vpop.permute.xlu2 %1539 }
 0x267   : > { %v1669_v40 = vadd.f32 %v1540_v35, %v1477_v36  ;;  %1565 = vrot.lane.b32.xlu0 %v7368_v46, %s6196_s23  ;;  %v1014_v35 = vld [vmem:[#allocation3 + $0x210] sm:$0xff]  ;;  %v1141_v36 = vld [vmem:[#allocation3 + $0x108] sm:$0xff] }
 0x268   : > { %v7416_v25 = vpop.f32.mrf.mxu0  ;;  %2038 = vst.msk [vmem:[#allocation3 + $0x320] sm:$0xff] %vm175_vm2, %v1990_v29  ;;  %v1763_v17 = vld [vmem:[#allocation3 + $0xe8] sm:$0xff] }
 0x269   : > { %v1059_v2 = vadd.f32 %v1011_v8, %v7416_v25  ;;  %1717 = vst.msk [vmem:[#allocation3 + $0x100] sm:$0xff] %vm175_vm2, %v1669_v40  ;;  %v1955_v37 = vadd.f32 %v7335_v13, %v1763_v17  ;;  %v1536_v47 = vpop.permute.xlu0 %1535 }
 0x26a   : > { %v1667_v13 = vadd.f32 %v1536_v47, %v1475_v59  ;;  %v1480_v47 = vld [vmem:[#allocation3 + $0x130] sm:$0xff] }
 0x26b   : > { %1107 = vst.msk [vmem:[#allocation3 + $0x1e0] sm:$0xff] %vm175_vm2, %v1059_v2  ;;  %1850 = vrot.lane.b32.xlu1 %v7332_v21, %s6197_s24  ;;  %v1761_v4 = vld [vmem:[#allocation3 + $0xd8] sm:$0xff] }
 0x26c   : > { %1563 = vrot.lane.b32.xlu2 %v7350_v61, %s6196_s23  ;;  %2003 = vst.msk [vmem:[#allocation3 + $0xe8] sm:$0xff] %vm175_vm2, %v1955_v37  ;;  %v1953_v54 = vadd.f32 %v7352_v7, %v1761_v4  ;;  %v1478_v4 = vld [vmem:[#allocation3 + $0x120] sm:$0xff] }
 0x26d   : > { %v1249_v62 = vpop.permute.xlu1 %1248  ;;  %1715 = vst.msk [vmem:[#allocation3 + $0xf0] sm:$0xff] %vm175_vm2, %v1667_v13  ;;  %v1142_v13 = vld [vmem:[#allocation3 + $0x110] sm:$0xff] }
 0x26e   : > { %v1379_v63 = vadd.f32 %v1249_v62, %v1139_v43  ;;  %v1829_v1 = vpop.permute.xlu2 %1828  ;;  %2001 = vst.msk [vmem:[#allocation3 + $0xd8] sm:$0xff] %vm175_vm2, %v1953_v54 }
 0x26f   : > { %1854 = vrot.lane.b32.xlu0 %v7368_v46, %s6197_s24 }
 0x270   : > { %v7430_v44 = vpop.f32.mrf.mxu0  ;;  %1427 = vst.msk [vmem:[#allocation3 + $0xe0] sm:$0xff] %vm175_vm2, %v1379_v63 }
 0x271   : > { %v1060_v60 = vadd.f32 %v1012_v41, %v7430_v44  ;;  %v1825_v8 = vpop.permute.xlu0 %1824 }
 0x273   : > { %1108 = vst.msk [vmem:[#allocation3 + $0x1e8] sm:$0xff] %vm175_vm2, %v1060_v60  ;;  %1278 = vrot.lane.b32.xlu1 %v7386_v26, %s6195_s22 }
 0x274   : > { %1852 = vrot.lane.b32.xlu2 %v7350_v61, %s6197_s24 }
 0x275   : > { %v1538_v23 = vpop.permute.xlu1 %1537 }
 0x276   : > { %v1668_v27 = vadd.f32 %v1538_v23, %v1476_v51  ;;  %v1257_v38 = vpop.permute.xlu2 %1256 }
 0x277   : > { %v1383_v2 = vadd.f32 %v1257_v38, %v1143_v45  ;;  %v1762_v29 = vld [vmem:[#allocation3 + $0xe0] sm:$0xff]  ;;  %1282 = vrot.lane.b32.xlu0 %v7416_v25, %s6195_s22 }
 0x278   : > { %v7445_v19 = vpop.f32.mrf.mxu0  ;;  %1716 = vst.msk [vmem:[#allocation3 + $0xf8] sm:$0xff] %vm175_vm2, %v1668_v27  ;;  %v1954_v48 = vadd.f32 %v7370_v12, %v1762_v29  ;;  %v1146_v27 = vld [vmem:[#allocation3 + $0x148] sm:$0xff] }
 0x279   : > { %v1061_v7 = vadd.f32 %v1013_v11, %v7445_v19  ;;  %1431 = vst.msk [vmem:[#allocation3 + $0x118] sm:$0xff] %vm175_vm2, %v1383_v2  ;;  %v1253_v41 = vpop.permute.xlu0 %1252 }
 0x27a   : > { %2002 = vst.msk [vmem:[#allocation3 + $0xe0] sm:$0xff] %vm175_vm2, %v1954_v48  ;;  %v1381_v12 = vadd.f32 %v1253_v41, %v1141_v36 }
 0x27b   : > { %1109 = vst.msk [vmem:[#allocation3 + $0x1f0] sm:$0xff] %vm175_vm2, %v1061_v7  ;;  %1567 = vrot.lane.b32.xlu1 %v7386_v26, %s6196_s23  ;;  %v1015_v7 = vld [vmem:[#allocation3 + $0x218] sm:$0xff] }
 0x27c   : > { %1280 = vrot.lane.b32.xlu2 %v7401_v22, %s6195_s22  ;;  %1429 = vst.msk [vmem:[#allocation3 + $0x108] sm:$0xff] %vm175_vm2, %v1381_v12 }
 0x27d   : > { %v1827_v17 = vpop.permute.xlu1 %1826 }
 0x27e   : > { %v1546_v43 = vpop.permute.xlu2 %1545 }
 0x27f   : > { %v1672_v59 = vadd.f32 %v1546_v43, %v1480_v47  ;;  %1571 = vrot.lane.b32.xlu0 %v7416_v25, %s6196_s23  ;;  %v1144_v43 = vld [vmem:[#allocation3 + $0x138] sm:$0xff] }
 0x280   : > { %v7459_v40 = vpop.f32.mrf.mxu0  ;;  %v1766_v62 = vld [vmem:[#allocation3 + $0x118] sm:$0xff] }
 0x281   : > { %v1062_v37 = vadd.f32 %v1014_v35, %v7459_v40  ;;  %1720 = vst.msk [vmem:[#allocation3 + $0x130] sm:$0xff] %vm175_vm2, %v1672_v59  ;;  %v1958_v60 = vadd.f32 %v1829_v1, %v1766_v62  ;;  %v1542_v63 = vpop.permute.xlu0 %1541 }
 0x282   : > { %v1670_v11 = vadd.f32 %v1542_v63, %v1478_v4  ;;  %v1016_v4 = vld [vmem:[#allocation3 + $0x220] sm:$0xff] }
 0x283   : > { %1110 = vst.msk [vmem:[#allocation3 + $0x210] sm:$0xff] %vm175_vm2, %v1062_v37  ;;  %1856 = vrot.lane.b32.xlu1 %v7386_v26, %s6197_s24  ;;  %v1764_v51 = vld [vmem:[#allocation3 + $0x108] sm:$0xff] }
 0x284   : > { %2006 = vst.msk [vmem:[#allocation3 + $0x118] sm:$0xff] %vm175_vm2, %v1958_v60  ;;  %1569 = vrot.lane.b32.xlu2 %v7401_v22, %s6196_s23  ;;  %v1956_v1 = vadd.f32 %v1825_v8, %v1764_v51  ;;  %v1479_v8 = vld [vmem:[#allocation3 + $0x128] sm:$0xff] }
 0x285   : > { %v1255_v54 = vpop.permute.xlu1 %1254  ;;  %1718 = vst.msk [vmem:[#allocation3 + $0x120] sm:$0xff] %vm175_vm2, %v1670_v11  ;;  %v1145_v11 = vld [vmem:[#allocation3 + $0x140] sm:$0xff] }
 0x286   : > { %v1382_v45 = vadd.f32 %v1255_v54, %v1142_v13  ;;  %v1835_v23 = vpop.permute.xlu2 %1834  ;;  %2004 = vst.msk [vmem:[#allocation3 + $0x108] sm:$0xff] %vm175_vm2, %v1956_v1  ;;  %v1483_v13 = vld [vmem:[#allocation3 + $0x160] sm:$0xff] }
 0x287   : > { %1860 = vrot.lane.b32.xlu0 %v7416_v25, %s6197_s24 }
 0x288   : > { %1430 = vst.msk [vmem:[#allocation3 + $0x110] sm:$0xff] %vm175_vm2, %v1382_v45  ;;  %v7481_v38 = vpop.f32.mrf.mxu0 }
 0x289   : > { %v1831_v2 = vpop.permute.xlu0 %1830  ;;  %v1063_v48 = vadd.f32 %v1015_v7, %v7481_v38  ;;  %v1481_v7 = vld [vmem:[#allocation3 + $0x150] sm:$0xff] }
 0x28b   : > { %1284 = vrot.lane.b32.xlu1 %v7430_v44, %s6195_s22  ;;  %1111 = vst.msk [vmem:[#allocation3 + $0x218] sm:$0xff] %vm175_vm2, %v1063_v48 }
 0x28c   : > { %1858 = vrot.lane.b32.xlu2 %v7401_v22, %s6197_s24 }
 0x28d   : > { %v1544_v29 = vpop.permute.xlu1 %1543 }
 0x28e   : > { %v1671_v35 = vadd.f32 %v1544_v29, %v1479_v8  ;;  %v1263_v36 = vpop.permute.xlu2 %1262 }
 0x28f   : > { %v1386_v41 = vadd.f32 %v1263_v36, %v1146_v27  ;;  %v1765_v37 = vld [vmem:[#allocation3 + $0x110] sm:$0xff]  ;;  %1288 = vrot.lane.b32.xlu0 %v7459_v40, %s6195_s22  ;;  %v1149_v36 = vld [vmem:[#allocation3 + $0x178] sm:$0xff] }
 0x290   : > { %1719 = vst.msk [vmem:[#allocation3 + $0x128] sm:$0xff] %vm175_vm2, %v1671_v35  ;;  %v1957_v12 = vadd.f32 %v1827_v17, %v1765_v37  ;;  %v7500_v45 = vpop.f32.mrf.mxu0 }
 0x291   : > { %1434 = vst.msk [vmem:[#allocation3 + $0x148] sm:$0xff] %vm175_vm2, %v1386_v41  ;;  %v1259_v59 = vpop.permute.xlu0 %1258  ;;  %v1064_v51 = vadd.f32 %v1016_v4, %v7500_v45 }
 0x292   : > { %2005 = vst.msk [vmem:[#allocation3 + $0x110] sm:$0xff] %vm175_vm2, %v1957_v12  ;;  %v1384_v62 = vadd.f32 %v1259_v59, %v1144_v43  ;;  %v1482_v12 = vld [vmem:[#allocation3 + $0x158] sm:$0xff] }
 0x293   : > { %1573 = vrot.lane.b32.xlu1 %v7430_v44, %s6196_s23  ;;  %1112 = vst.msk [vmem:[#allocation3 + $0x220] sm:$0xff] %vm175_vm2, %v1064_v51 }
 0x294   : > { %1286 = vrot.lane.b32.xlu2 %v7445_v19, %s6195_s22  ;;  %1432 = vst.msk [vmem:[#allocation3 + $0x138] sm:$0xff] %vm175_vm2, %v1384_v62 }
 0x295   : > { %v1833_v47 = vpop.permute.xlu1 %1832 }
 0x296   : > { %v1552_v60 = vpop.permute.xlu2 %1551 }
 0x297   : > { %v1675_v63 = vadd.f32 %v1552_v60, %v1483_v13  ;;  %1577 = vrot.lane.b32.xlu0 %v7459_v40, %s6196_s23 }
 0x298   : > { %v1769_v17 = vld [vmem:[#allocation3 + $0x148] sm:$0xff] }
 0x299   : > { %1723 = vst.msk [vmem:[#allocation3 + $0x160] sm:$0xff] %vm175_vm2, %v1675_v63  ;;  %v1961_v54 = vadd.f32 %v1835_v23, %v1769_v17  ;;  %v1548_v1 = vpop.permute.xlu0 %1547 }
 0x29a   : > { %v1673_v23 = vadd.f32 %v1548_v1, %v1481_v7  ;;  %v1148_v1 = vld [vmem:[#allocation3 + $0x170] sm:$0xff]  ;;  %v1484_v7 = vld [vmem:[#allocation3 + $0x180] sm:$0xff] }
 0x29b   : > { %1862 = vrot.lane.b32.xlu1 %v7430_v44, %s6197_s24  ;;  %2009 = vst.msk [vmem:[#allocation3 + $0x148] sm:$0xff] %vm175_vm2, %v1961_v54  ;;  %v1767_v48 = vld [vmem:[#allocation3 + $0x138] sm:$0xff]  ;;  %v1486_v54 = vld [vmem:[#allocation3 + $0x190] sm:$0xff] }
 0x29c   : > { %1575 = vrot.lane.b32.xlu2 %v7445_v19, %s6196_s23  ;;  %1721 = vst.msk [vmem:[#allocation3 + $0x150] sm:$0xff] %vm175_vm2, %v1673_v23  ;;  %v1959_v35 = vadd.f32 %v1831_v2, %v1767_v48 }
 0x29d   : > { %v1261_v27 = vpop.permute.xlu1 %1260 }
 0x29e   : > { %v1385_v29 = vadd.f32 %v1261_v27, %v1145_v11  ;;  %v1841_v8 = vpop.permute.xlu2 %1840  ;;  %2007 = vst.msk [vmem:[#allocation3 + $0x138] sm:$0xff] %vm175_vm2, %v1959_v35 }
 0x29f   : > { %1866 = vrot.lane.b32.xlu0 %v7459_v40, %s6197_s24 }
 0x2a0   : > { %1433 = vst.msk [vmem:[#allocation3 + $0x140] sm:$0xff] %vm175_vm2, %v1385_v29 }
 0x2a1   : > { %v1837_v41 = vpop.permute.xlu0 %1836 }
 0x2a3   : > { %2109 = vrot.lane.b32.xlu1 %v7013_v31, %s6198_s25  ;;  %v1147_v31 = vld [vmem:[#allocation3 + $0x168] sm:$0xff] }
 0x2a4   : > { %1864 = vrot.lane.b32.xlu2 %v7445_v19, %s6197_s24 }
 0x2a5   : > { %v1550_v37 = vpop.permute.xlu1 %1549 }
 0x2a6   : > { %v1674_v43 = vadd.f32 %v1550_v37, %v1482_v12  ;;  %v1269_v59 = vpop.permute.xlu2 %1268  ;;  %v1485_v37 = vld [vmem:[#allocation3 + $0x188] sm:$0xff] }
 0x2a7   : > { %v1389_v2 = vadd.f32 %v1269_v59, %v1149_v36  ;;  %v1768_v62 = vld [vmem:[#allocation3 + $0x140] sm:$0xff]  ;;  %2107 = vrot.lane.b32.xlu0 %v6995_v18, %s6198_s25  ;;  %v1152_v18 = vld [vmem:[#allocation3 + $0x1a8] sm:$0xff] }
 0x2a8   : > { %1722 = vst.msk [vmem:[#allocation3 + $0x158] sm:$0xff] %vm175_vm2, %v1674_v43  ;;  %v1960_v60 = vadd.f32 %v1833_v47, %v1768_v62 }
 0x2a9   : > { %1437 = vst.msk [vmem:[#allocation3 + $0x178] sm:$0xff] %vm175_vm2, %v1389_v2  ;;  %v1265_v63 = vpop.permute.xlu0 %1264 }
 0x2aa   : > { %2008 = vst.msk [vmem:[#allocation3 + $0x140] sm:$0xff] %vm175_vm2, %v1960_v60  ;;  %v1387_v17 = vadd.f32 %v1265_v63, %v1147_v31 }
 0x2ab   : > { %1290 = vrot.lane.b32.xlu1 %v7481_v38, %s6195_s22 }
 0x2ac   : > { %2111 = vrot.lane.b32.xlu2 %v7030_v55, %s6198_s25  ;;  %1435 = vst.msk [vmem:[#allocation3 + $0x168] sm:$0xff] %vm175_vm2, %v1387_v17  ;;  %v1489_v17 = vld [vmem:[#allocation3 + $0x1c0] sm:$0xff] }
 0x2ad   : > { %v1839_v13 = vpop.permute.xlu1 %1838 }
 0x2ae   : > { %v1558_v4 = vpop.permute.xlu2 %1557 }
 0x2af   : > { %v1678_v11 = vadd.f32 %v1558_v4, %v1486_v54  ;;  %2113 = vrot.lane.b32.xlu0 %v7099_v56, %s6198_s25  ;;  %v1150_v56 = vld [vmem:[#allocation3 + $0x198] sm:$0xff] }
 0x2b0   : > { %v1772_v47 = vld [vmem:[#allocation3 + $0x178] sm:$0xff] }
 0x2b1   : > { %1726 = vst.msk [vmem:[#allocation3 + $0x190] sm:$0xff] %vm175_vm2, %v1678_v11  ;;  %v1964_v51 = vadd.f32 %v1841_v8, %v1772_v47  ;;  %v1554_v55 = vpop.permute.xlu0 %1553  ;;  %v1487_v11 = vld [vmem:[#allocation3 + $0x1b0] sm:$0xff] }
 0x2b2   : > { %v1676_v23 = vadd.f32 %v1554_v55, %v1484_v7 }
 0x2b3   : > { %1579 = vrot.lane.b32.xlu1 %v7481_v38, %s6196_s23  ;;  %2012 = vst.msk [vmem:[#allocation3 + $0x178] sm:$0xff] %vm175_vm2, %v1964_v51  ;;  %v1770_v35 = vld [vmem:[#allocation3 + $0x168] sm:$0xff] }
 0x2b4   : > { %2117 = vrot.lane.b32.xlu2 %v7145_v32, %s6198_s25  ;;  %1724 = vst.msk [vmem:[#allocation3 + $0x180] sm:$0xff] %vm175_vm2, %v1676_v23  ;;  %v1962_v8 = vadd.f32 %v1837_v41, %v1770_v35 }
 0x2b5   : > { %v1267_v27 = vpop.permute.xlu1 %1266 }
 0x2b6   : > { %v1388_v29 = vadd.f32 %v1267_v27, %v1148_v1  ;;  %v1847_v48 = vpop.permute.xlu2 %1846  ;;  %2010 = vst.msk [vmem:[#allocation3 + $0x168] sm:$0xff] %vm175_vm2, %v1962_v8 }
 0x2b7   : > { %2119 = vrot.lane.b32.xlu0 %v7164_v50, %s6198_s25 }
 0x2b8   : > { %1436 = vst.msk [vmem:[#allocation3 + $0x170] sm:$0xff] %vm175_vm2, %v1388_v29  ;;  %v1488_v29 = vld [vmem:[#allocation3 + $0x1b8] sm:$0xff] }
 0x2b9   : > { %v1843_v32 = vpop.permute.xlu0 %1842 }
 0x2bb   : > { %1868 = vrot.lane.b32.xlu1 %v7481_v38, %s6197_s24 }
 0x2bc   : > { %1292 = vrot.lane.b32.xlu2 %v7500_v45, %s6195_s22 }
 0x2bd   : > { %v1556_v36 = vpop.permute.xlu1 %1555 }
 0x2be   : > { %v1677_v12 = vadd.f32 %v1556_v36, %v1485_v37  ;;  %v1275_v43 = vpop.permute.xlu2 %1274 }
 0x2bf   : > { %v1392_v41 = vadd.f32 %v1275_v43, %v1152_v18  ;;  %v1771_v59 = vld [vmem:[#allocation3 + $0x170] sm:$0xff]  ;;  %2125 = vrot.lane.b32.xlu0 %v7217_v30, %s6198_s25 }
 0x2c0   : > { %1725 = vst.msk [vmem:[#allocation3 + $0x188] sm:$0xff] %vm175_vm2, %v1677_v12  ;;  %v1963_v2 = vadd.f32 %v1839_v13, %v1771_v59  ;;  %v1492_v12 = vld [vmem:[#allocation3 + $0x1f0] sm:$0xff]  ;;  %v1490_v59 = vld [vmem:[#allocation3 + $0x1e0] sm:$0xff] }
 0x2c1   : > { %1440 = vst.msk [vmem:[#allocation3 + $0x1a8] sm:$0xff] %vm175_vm2, %v1392_v41  ;;  %v1271_v60 = vpop.permute.xlu0 %1270 }
 0x2c2   : > { %2011 = vst.msk [vmem:[#allocation3 + $0x170] sm:$0xff] %vm175_vm2, %v1963_v2  ;;  %v1390_v31 = vadd.f32 %v1271_v60, %v1150_v56 }
 0x2c3   : > { %2115 = vrot.lane.b32.xlu1 %v7118_v16, %s6198_s25  ;;  %v1151_v16 = vld [vmem:[#allocation3 + $0x1a0] sm:$0xff] }
 0x2c4   : > { %1581 = vrot.lane.b32.xlu2 %v7500_v45, %s6196_s23  ;;  %1438 = vst.msk [vmem:[#allocation3 + $0x198] sm:$0xff] %vm175_vm2, %v1390_v31 }
 0x2c5   : > { %v1845_v62 = vpop.permute.xlu1 %1844 }
 0x2c6   : > { %v1564_v63 = vpop.permute.xlu2 %1563 }
 0x2c7   : > { %v1681_v4 = vadd.f32 %v1564_v63, %v1489_v17  ;;  %2131 = vrot.lane.b32.xlu0 %v7269_v57, %s6198_s25  ;;  %v1491_v17 = vld [vmem:[#allocation3 + $0x1e8] sm:$0xff] }
 0x2c8   : > { %v1775_v13 = vld [vmem:[#allocation3 + $0x1a8] sm:$0xff] }
 0x2c9   : > { %1729 = vst.msk [vmem:[#allocation3 + $0x1c0] sm:$0xff] %vm175_vm2, %v1681_v4  ;;  %v1967_v50 = vadd.f32 %v1847_v48, %v1775_v13  ;;  %v1560_v54 = vpop.permute.xlu0 %1559 }
 0x2ca   : > { %v1679_v51 = vadd.f32 %v1560_v54, %v1487_v11 }
 0x2cb   : > { %2121 = vrot.lane.b32.xlu1 %v7178_v14, %s6198_s25  ;;  %2015 = vst.msk [vmem:[#allocation3 + $0x1a8] sm:$0xff] %vm175_vm2, %v1967_v50  ;;  %v1773_v7 = vld [vmem:[#allocation3 + $0x198] sm:$0xff] }
 0x2cc   : > { %1870 = vrot.lane.b32.xlu2 %v7500_v45, %s6197_s24  ;;  %1727 = vst.msk [vmem:[#allocation3 + $0x1b0] sm:$0xff] %vm175_vm2, %v1679_v51  ;;  %v1965_v27 = vadd.f32 %v1843_v32, %v1773_v7  ;;  %v1155_v14 = vld [vmem:[#allocation3 + $0x1d8] sm:$0xff]  ;;  %v1493_v7 = vld [vmem:[#allocation3 + $0x210] sm:$0xff] }
 0x2cd   : > { %v1273_v47 = vpop.permute.xlu1 %1272 }
 0x2ce   : > { %v1391_v1 = vadd.f32 %v1273_v47, %v1151_v16  ;;  %v1853_v55 = vpop.permute.xlu2 %1852  ;;  %2013 = vst.msk [vmem:[#allocation3 + $0x198] sm:$0xff] %vm175_vm2, %v1965_v27 }
 0x2cf   : > { %2137 = vrot.lane.b32.xlu0 %v7316_v28, %s6198_s25 }
 0x2d0   : > { %1439 = vst.msk [vmem:[#allocation3 + $0x1a0] sm:$0xff] %vm175_vm2, %v1391_v1 }
 0x2d1   : > { %v1849_v30 = vpop.permute.xlu0 %1848 }
 0x2d3   : > { %2127 = vrot.lane.b32.xlu1 %v7233_v3, %s6198_s25 }
 0x2d4   : > { %2123 = vrot.lane.b32.xlu2 %v7199_v34, %s6198_s25  ;;  %v1153_v34 = vld [vmem:[#allocation3 + $0x1c8] sm:$0xff] }
 0x2d5   : > { %v1562_v23 = vpop.permute.xlu1 %1561 }
 0x2d6   : > { %v1680_v48 = vadd.f32 %v1562_v23, %v1488_v29  ;;  %v1281_v35 = vpop.permute.xlu2 %1280 }
 0x2d7   : > { %v1395_v8 = vadd.f32 %v1281_v35, %v1155_v14  ;;  %v1774_v18 = vld [vmem:[#allocation3 + $0x1a0] sm:$0xff]  ;;  %2143 = vrot.lane.b32.xlu0 %v7368_v46, %s6198_s25 }
 0x2d8   : > { %1728 = vst.msk [vmem:[#allocation3 + $0x1b8] sm:$0xff] %vm175_vm2, %v1680_v48  ;;  %v1966_v32 = vadd.f32 %v1845_v62, %v1774_v18 }
 0x2d9   : > { %1443 = vst.msk [vmem:[#allocation3 + $0x1d8] sm:$0xff] %vm175_vm2, %v1395_v8  ;;  %v1277_v57 = vpop.permute.xlu0 %1276  ;;  %v2052_v8 = vld [vmem:[#allocation3 + $0x100] sm:$0xff] }
 0x2da   : > { %2014 = vst.msk [vmem:[#allocation3 + $0x1a0] sm:$0xff] %vm175_vm2, %v1966_v32  ;;  %v1393_v36 = vadd.f32 %v1277_v57, %v1153_v34  ;;  %v2055_v57 = vld [vmem:[#allocation3 + $0x130] sm:$0xff] }
 0x2db   : > { %2133 = vrot.lane.b32.xlu1 %v7284_v52, %s6198_s25  ;;  %v1154_v52 = vld [vmem:[#allocation3 + $0x1d0] sm:$0xff] }
 0x2dc   : > { %2129 = vrot.lane.b32.xlu2 %v7253_v9, %s6198_s25  ;;  %1441 = vst.msk [vmem:[#allocation3 + $0x1c8] sm:$0xff] %vm175_vm2, %v1393_v36 }
 0x2dd   : > { %v1851_v3 = vpop.permute.xlu1 %1850 }
 0x2de   : > { %v1570_v37 = vpop.permute.xlu2 %1569 }
 0x2df   : > { %v1684_v43 = vadd.f32 %v1570_v37, %v1492_v12  ;;  %2149 = vrot.lane.b32.xlu0 %v7416_v25, %s6198_s25 }
 0x2e0   : > { %v1778_v41 = vld [vmem:[#allocation3 + $0x1d8] sm:$0xff] }
 0x2e1   : > { %1732 = vst.msk [vmem:[#allocation3 + $0x1f0] sm:$0xff] %vm175_vm2, %v1684_v43  ;;  %v1970_v28 = vadd.f32 %v1853_v55, %v1778_v41  ;;  %v1566_v9 = vpop.permute.xlu0 %1565  ;;  %v1496_v43 = vld [vmem:[#allocation3 + $0x240] sm:$0xff] }
 0x2e2   : > { %v1682_v56 = vadd.f32 %v1566_v9, %v1490_v59 }
 0x2e3   : > { %2139 = vrot.lane.b32.xlu1 %v7332_v21, %s6198_s25  ;;  %2018 = vst.msk [vmem:[#allocation3 + $0x1d8] sm:$0xff] %vm175_vm2, %v1970_v28  ;;  %v1776_v31 = vld [vmem:[#allocation3 + $0x1c8] sm:$0xff] }
 0x2e4   : > { %2135 = vrot.lane.b32.xlu2 %v7300_v6, %s6198_s25  ;;  %1730 = vst.msk [vmem:[#allocation3 + $0x1e0] sm:$0xff] %vm175_vm2, %v1682_v56  ;;  %v1968_v63 = vadd.f32 %v1849_v30, %v1776_v31  ;;  %v1158_v6 = vld [vmem:[#allocation3 + $0x208] sm:$0xff]  ;;  %v1785_v56 = vld [vmem:[#allocation3 + $0x258] sm:$0xff] }
 0x2e5   : > { %v1279_v2 = vpop.permute.xlu1 %1278 }
 0x2e6   : > { %v1394_v62 = vadd.f32 %v1279_v2, %v1154_v52  ;;  %v1859_v60 = vpop.permute.xlu2 %1858  ;;  %2016 = vst.msk [vmem:[#allocation3 + $0x1c8] sm:$0xff] %vm175_vm2, %v1968_v63 }
 0x2e7   : > { %2155 = vrot.lane.b32.xlu0 %v7459_v40, %s6198_s25 }
 0x2e8   : > { %1442 = vst.msk [vmem:[#allocation3 + $0x1d0] sm:$0xff] %vm175_vm2, %v1394_v62 }
 0x2e9   : > { %v1855_v21 = vpop.permute.xlu0 %1854 }
 0x2eb   : > { %2145 = vrot.lane.b32.xlu1 %v7386_v26, %s6198_s25  ;;  %v1495_v26 = vld [vmem:[#allocation3 + $0x220] sm:$0xff] }
 0x2ec   : > { %2141 = vrot.lane.b32.xlu2 %v7350_v61, %s6198_s25  ;;  %v1156_v61 = vld [vmem:[#allocation3 + $0x1f8] sm:$0xff] }
 0x2ed   : > { %v1568_v46 = vpop.permute.xlu1 %1567 }
 0x2ee   : > { %v1683_v4 = vadd.f32 %v1568_v46, %v1491_v17  ;;  %v1287_v13 = vpop.permute.xlu2 %1286 }
 0x2ef   : > { %v1398_v50 = vadd.f32 %v1287_v13, %v1158_v6  ;;  %v1777_v16 = vld [vmem:[#allocation3 + $0x1d0] sm:$0xff]  ;;  %2161 = vrot.lane.b32.xlu0 %v6801_v39, %s6198_s25  ;;  %v1497_v13 = vld [vmem:[#allocation3 + $0x248] sm:$0xff] }
 0x2f0   : > { %1731 = vst.msk [vmem:[#allocation3 + $0x1e8] sm:$0xff] %vm175_vm2, %v1683_v4  ;;  %v1969_v54 = vadd.f32 %v1851_v3, %v1777_v16  ;;  %v1498_v6 = vld [vmem:[#allocation3 + $0x250] sm:$0xff] }
 0x2f1   : > { %1446 = vst.msk [vmem:[#allocation3 + $0x208] sm:$0xff] %vm175_vm2, %v1398_v50  ;;  %v1283_v11 = vpop.permute.xlu0 %1282 }
 0x2f2   : > { %2017 = vst.msk [vmem:[#allocation3 + $0x1d0] sm:$0xff] %vm175_vm2, %v1969_v54  ;;  %v1396_v47 = vadd.f32 %v1283_v11, %v1156_v61  ;;  %v1787_v61 = vld [vmem:[#allocation3 + $0x268] sm:$0xff] }
 0x2f3   : > { %2151 = vrot.lane.b32.xlu1 %v7430_v44, %s6198_s25  ;;  %v1157_v44 = vld [vmem:[#allocation3 + $0x200] sm:$0xff] }
 0x2f4   : > { %2147 = vrot.lane.b32.xlu2 %v7401_v22, %s6198_s25  ;;  %1444 = vst.msk [vmem:[#allocation3 + $0x1f8] sm:$0xff] %vm175_vm2, %v1396_v47 }
 0x2f5   : > { %v1857_v25 = vpop.permute.xlu1 %1856 }
 0x2f6   : > { %v1576_v51 = vpop.permute.xlu2 %1575 }
 0x2f7   : > { %v1687_v1 = vadd.f32 %v1576_v51, %v1495_v26  ;;  %2167 = vrot.lane.b32.xlu0 %v6865_v5, %s6198_s25 }
 0x2f8   : > { %v1781_v55 = vld [vmem:[#allocation3 + $0x208] sm:$0xff] }
 0x2f9   : > { %1735 = vst.msk [vmem:[#allocation3 + $0x220] sm:$0xff] %vm175_vm2, %v1687_v1  ;;  %v1973_v40 = vadd.f32 %v1859_v60, %v1781_v55  ;;  %v1572_v22 = vpop.permute.xlu0 %1571  ;;  %v1786_v1 = vld [vmem:[#allocation3 + $0x260] sm:$0xff] }
 0x2fa   : > { %v1685_v14 = vadd.f32 %v1572_v22, %v1493_v7  ;;  %v2058_v22 = vld [vmem:[#allocation3 + $0x160] sm:$0xff] }
 0x2fb   : > { %2157 = vrot.lane.b32.xlu1 %v7481_v38, %s6198_s25  ;;  %2021 = vst.msk [vmem:[#allocation3 + $0x208] sm:$0xff] %vm175_vm2, %v1973_v40  ;;  %v1779_v29 = vld [vmem:[#allocation3 + $0x1f8] sm:$0xff] }
 0x2fc   : > { %2153 = vrot.lane.b32.xlu2 %v7445_v19, %s6198_s25  ;;  %1733 = vst.msk [vmem:[#allocation3 + $0x210] sm:$0xff] %vm175_vm2, %v1685_v14  ;;  %v1971_v39 = vadd.f32 %v1855_v21, %v1779_v29  ;;  %v1494_v19 = vld [vmem:[#allocation3 + $0x218] sm:$0xff]  ;;  %v2056_v14 = vld [vmem:[#allocation3 + $0x150] sm:$0xff] }
 0x2fd   : > { %v1285_v27 = vpop.permute.xlu1 %1284 }
 0x2fe   : > { %v1397_v30 = vadd.f32 %v1285_v27, %v1157_v44  ;;  %v7615_v23 = vpop.permute.xlu2 %1864  ;;  %2019 = vst.msk [vmem:[#allocation3 + $0x1f8] sm:$0xff] %vm175_vm2, %v1971_v39 }
 0x2ff   : > { %2173 = vrot.lane.b32.xlu0 %v7001_v24, %s6198_s25 }
 0x300   : > { %1445 = vst.msk [vmem:[#allocation3 + $0x200] sm:$0xff] %vm175_vm2, %v1397_v30 }
 0x301   : > { %v1861_v38 = vpop.permute.xlu0 %1860 }
 0x303   : > { %2163 = vrot.lane.b32.xlu1 %v6818_v49, %s6198_s25  ;;  %v1159_v49 = vld [vmem:[#allocation3 + $0x228] sm:$0xff] }
 0x304   : > { %2159 = vrot.lane.b32.xlu2 %v7500_v45, %s6198_s25 }
 0x305   : > { %v1574_v48 = vpop.permute.xlu1 %1573 }
 0x306   : > { %v1686_v35 = vadd.f32 %v1574_v48, %v1494_v19  ;;  %v2112_v18 = vpop.permute.xlu2 %2111 }
 0x307   : > { %v2244_v32 = vadd.f32 %v2112_v18, %v2052_v8  ;;  %v1780_v34 = vld [vmem:[#allocation3 + $0x200] sm:$0xff]  ;;  %2179 = vrot.lane.b32.xlu0 %v7056_v20, %s6198_s25 }
 0x308   : > { %1734 = vst.msk [vmem:[#allocation3 + $0x218] sm:$0xff] %vm175_vm2, %v1686_v35  ;;  %v1972_v3 = vadd.f32 %v1857_v25, %v1780_v34  ;;  %v2377_v20 = vld [vmem:[%s9694_s1] sm:$0xf] }
 0x309   : > { %2292 = vst.msk [vmem:[#allocation3 + $0x100] sm:$0xff] %vm175_vm2, %v2244_v32  ;;  %v1289_v45 = vpop.permute.xlu0 %1288  ;;  %v2059_v8 = vld [vmem:[#allocation3 + $0x180] sm:$0xff]  ;;  %v2057_v32 = vld [vmem:[#allocation3 + $0x158] sm:$0xff] }
 0x30a   : > { %2020 = vst.msk [vmem:[#allocation3 + $0x200] sm:$0xff] %vm175_vm2, %v1972_v3  ;;  %v1399_v37 = vadd.f32 %v1289_v45, %v1159_v49 }
 0x30b   : > { %2169 = vrot.lane.b32.xlu1 %v6877_v10, %s6198_s25  ;;  %v2051_v10 = vld [vmem:[#allocation3 + $0xf8] sm:$0xff] }
 0x30c   : > { %2165 = vrot.lane.b32.xlu2 %v6832_v58, %s6198_s25  ;;  %1447 = vst.msk [vmem:[#allocation3 + $0x228] sm:$0xff] %vm175_vm2, %v1399_v37  ;;  %v1161_v58 = vld [vmem:[#allocation3 + $0x238] sm:$0xff] }
 0x30d   : > { %v1863_v5 = vpop.permute.xlu1 %1862 }
 0x30e   : > { %v2118_v36 = vpop.permute.xlu2 %2117 }
 0x30f   : > { %v2247_v12 = vadd.f32 %v2118_v36, %v2055_v57  ;;  %2379 = vrot.lane.b32.xlu0 %v2377_v20, %s6199_s28  ;;  %v2062_v36 = vld [vmem:[#allocation3 + $0x1b0] sm:$0xff] }
 0x311   : > { %2295 = vst.msk [vmem:[#allocation3 + $0x130] sm:$0xff] %vm175_vm2, %v2247_v12  ;;  %v1578_v41 = vpop.permute.xlu0 %1577  ;;  %v2060_v12 = vld [vmem:[#allocation3 + $0x188] sm:$0xff] }
 0x312   : > { %v1688_v52 = vadd.f32 %v1578_v41, %v1496_v43  ;;  %v2067_v43 = vld [vmem:[#allocation3 + $0x1f0] sm:$0xff] }
 0x313   : > { %2175 = vrot.lane.b32.xlu1 %v7016_v42, %s6198_s25  ;;  %v1782_v2 = vld [vmem:[#allocation3 + $0x228] sm:$0xff] }
 0x314   : > { %2171 = vrot.lane.b32.xlu2 %v6889_v15, %s6198_s25  ;;  %v1974_v42 = vadd.f32 %v1861_v38, %v1782_v2  ;;  %1736 = vst.msk [vmem:[#allocation3 + $0x240] sm:$0xff] %vm175_vm2, %v1688_v52  ;;  %v1160_v15 = vld [vmem:[#allocation3 + $0x230] sm:$0xff]  ;;  %v2065_v52 = vld [vmem:[#allocation3 + $0x1e0] sm:$0xff] }
 0x315   : > { %v2110_v24 = vpop.permute.xlu1 %2109  ;;  %v2061_v38 = vld [vmem:[#allocation3 + $0x190] sm:$0xff] }
 0x316   : > { %v2243_v28 = vadd.f32 %v2110_v24, %v2051_v10  ;;  %v1293_v9 = vpop.permute.xlu2 %1292  ;;  %2022 = vst.msk [vmem:[#allocation3 + $0x228] sm:$0xff] %vm175_vm2, %v1974_v42 }
 0x317   : > { %v1401_v59 = vadd.f32 %v1293_v9, %v1161_v58 }
 0x318   : > { %2291 = vst.msk [vmem:[#allocation3 + $0xf8] sm:$0xff] %vm175_vm2, %v2243_v28 }
 0x319   : > { %1449 = vst.msk [vmem:[#allocation3 + $0x238] sm:$0xff] %vm175_vm2, %v1401_v59  ;;  %v1867_v62 = vpop.permute.xlu0 %1866  ;;  %v2063_v59 = vld [vmem:[#allocation3 + $0x1b8] sm:$0xff] }
 0x31a   : > { %v1977_v31 = vadd.f32 %v1867_v62, %v1785_v56  ;;  %v2070_v56 = vld [vmem:[#allocation3 + $0x220] sm:$0xff] }
 0x31b   : > { %2181 = vrot.lane.b32.xlu1 %v7078_v33, %s6198_s25 }
 0x31c   : > { %2177 = vrot.lane.b32.xlu2 %v7037_v0, %s6198_s25  ;;  %2025 = vst.msk [vmem:[#allocation3 + $0x258] sm:$0xff] %vm175_vm2, %v1977_v31  ;;  %v2050_v0 = vld [vmem:[#allocation3 + $0xf0] sm:$0xff] }
 0x31d   : > { %v1291_v60 = vpop.permute.xlu1 %1290  ;;  %v2068_v31 = vld [vmem:[#allocation3 + $0x210] sm:$0xff] }
 0x31e   : > { %v1400_v63 = vadd.f32 %v1291_v60, %v1160_v15  ;;  %v1582_v21 = vpop.permute.xlu2 %1581 }
 0x31f   : > { %v1690_v46 = vadd.f32 %v1582_v21, %v1498_v6 }
 0x320   : > { %1448 = vst.msk [vmem:[#allocation3 + $0x230] sm:$0xff] %vm175_vm2, %v1400_v63  ;;  %v1784_v17 = vld [vmem:[#allocation3 + $0x238] sm:$0xff]  ;;  %v2066_v63 = vld [vmem:[#allocation3 + $0x1e8] sm:$0xff] }
 0x321   : > { %1738 = vst.msk [vmem:[#allocation3 + $0x250] sm:$0xff] %vm175_vm2, %v1690_v46  ;;  %v1976_v33 = vadd.f32 %v7615_v23, %v1784_v17  ;;  %v2108_v4 = vpop.permute.xlu0 %2107  ;;  %v2054_v23 = vld [vmem:[#allocation3 + $0x128] sm:$0xff] }
 0x322   : > { %v2242_v16 = vadd.f32 %v2108_v4, %v2050_v0  ;;  %v2071_v4 = vld [vmem:[#allocation3 + $0x240] sm:$0xff] }
 0x323   : > { %2024 = vst.msk [vmem:[#allocation3 + $0x238] sm:$0xff] %vm175_vm2, %v1976_v33 }
 0x324   : > { %2183 = vrot.lane.b32.xlu2 %v7097_v53, %s6198_s25  ;;  %2290 = vst.msk [vmem:[#allocation3 + $0xf0] sm:$0xff] %vm175_vm2, %v2242_v16  ;;  %v2053_v53 = vld [vmem:[#allocation3 + $0x120] sm:$0xff]  ;;  %v2069_v16 = vld [vmem:[#allocation3 + $0x218] sm:$0xff] }
 0x325   : > { %v1580_v50 = vpop.permute.xlu1 %1579 }
 0x326   : > { %v1689_v54 = vadd.f32 %v1580_v50, %v1497_v13  ;;  %v1871_v26 = vpop.permute.xlu2 %1870 }
 0x327   : > { %v1979_v25 = vadd.f32 %v1871_v26, %v1787_v61  ;;  %v1783_v11 = vld [vmem:[#allocation3 + $0x230] sm:$0xff]  ;;  %v2076_v26 = vld [vmem:[#allocation3 + $0x280] sm:$0xff] }
 0x328   : > { %1737 = vst.msk [vmem:[#allocation3 + $0x248] sm:$0xff] %vm175_vm2, %v1689_v54  ;;  %v1975_v47 = vadd.f32 %v1863_v5, %v1783_v11  ;;  %v2064_v5 = vld [vmem:[#allocation3 + $0x1c0] sm:$0xff]  ;;  %v2073_v17 = vld [vmem:[#allocation3 + $0x250] sm:$0xff] }
 0x329   : > { %2027 = vst.msk [vmem:[#allocation3 + $0x268] sm:$0xff] %vm175_vm2, %v1979_v25  ;;  %v2114_v51 = vpop.permute.xlu0 %2113 }
 0x32a   : > { %2023 = vst.msk [vmem:[#allocation3 + $0x230] sm:$0xff] %vm175_vm2, %v1975_v47  ;;  %v2245_v40 = vadd.f32 %v2114_v51, %v2053_v53  ;;  %v2074_v47 = vld [vmem:[#allocation3 + $0x270] sm:$0xff] }
 0x32c   : > { %2293 = vst.msk [vmem:[#allocation3 + $0x120] sm:$0xff] %vm175_vm2, %v2245_v40 }
 0x32d   : > { %v1869_v55 = vpop.permute.xlu1 %1868 }
 0x32e   : > { %v1978_v44 = vadd.f32 %v1869_v55, %v1786_v1  ;;  %v2124_v7 = vpop.permute.xlu2 %2123 }
 0x32f   : > { %v2250_v27 = vadd.f32 %v2124_v7, %v2058_v22  ;;  %v2072_v51 = vld [vmem:[#allocation3 + $0x248] sm:$0xff] }
 0x330   : > { %2026 = vst.msk [vmem:[#allocation3 + $0x260] sm:$0xff] %vm175_vm2, %v1978_v44  ;;  %v2079_v44 = vld [vmem:[#allocation3 + $0x2b0] sm:$0xff] }
 0x331   : > { %2298 = vst.msk [vmem:[#allocation3 + $0x160] sm:$0xff] %vm175_vm2, %v2250_v27  ;;  %v2120_v30 = vpop.permute.xlu0 %2119  ;;  %v493_v27 = vld [vmem:[%s6250_s19] sm:$0xff] }
 0x332   : > { %v2248_v39 = vadd.f32 %v2120_v30, %v2056_v14  ;;  %v517_v14 = vld [vmem:[%s6250_s19 + $0xc0] sm:$0xff]  ;;  %526 = vst.msk [vmem:[#allocation2 + $0x181] sm:$0xff] %vm284_vm1, %v493_v27 }
 0x333   : > { %550 = vst.msk [vmem:[#allocation2 + $0x2a1] sm:$0xff] %vm284_vm1, %v517_v14  ;;  %v2077_v30 = vld [vmem:[#allocation3 + $0x2a0] sm:$0xff] }
 0x334   : > { %2296 = vst.msk [vmem:[#allocation3 + $0x150] sm:$0xff] %vm175_vm2, %v2248_v39 }
 0x335   : > { %v2116_v29 = vpop.permute.xlu1 %2115 }
 0x336   : > { %v2246_v19 = vadd.f32 %v2116_v29, %v2054_v23  ;;  %v2130_v48 = vpop.permute.xlu2 %2129  ;;  %v2075_v29 = vld [vmem:[#allocation3 + $0x278] sm:$0xff] }
 0x337   : > { %v2253_v35 = vadd.f32 %v2130_v48, %v2061_v38  ;;  %v2082_v48 = vld [vmem:[#allocation3 + $0x2e0] sm:$0xff] }
 0x338   : > { %2294 = vst.msk [vmem:[#allocation3 + $0x128] sm:$0xff] %vm175_vm2, %v2246_v19 }
 0x339   : > { %2301 = vst.msk [vmem:[#allocation3 + $0x190] sm:$0xff] %vm175_vm2, %v2253_v35  ;;  %v2126_v18 = vpop.permute.xlu0 %2125 }
 0x33a   : > { %v2251_v3 = vadd.f32 %v2126_v18, %v2059_v8  ;;  %v494_v18 = vld [vmem:[%s6250_s19 + $0x8] sm:$0xff] }
 0x33b   : > { %527 = vst.msk [vmem:[#allocation2 + $0x189] sm:$0xff] %vm284_vm1, %v494_v18 }
 0x33c   : > { %2299 = vst.msk [vmem:[#allocation3 + $0x180] sm:$0xff] %vm175_vm2, %v2251_v3  ;;  %v2080_v3 = vld [vmem:[#allocation3 + $0x2d0] sm:$0xff] }
 0x33d   : > { %v2122_v34 = vpop.permute.xlu1 %2121 }
 0x33e   : > { %v2249_v49 = vadd.f32 %v2122_v34, %v2057_v32  ;;  %v2136_v45 = vpop.permute.xlu2 %2135  ;;  %v518_v32 = vld [vmem:[%s6250_s19 + $0xc8] sm:$0xff]  ;;  %v2085_v34 = vld [vmem:[#allocation3 + $0x310] sm:$0xff] }
 0x33f   : > { %v2256_v57 = vadd.f32 %v2136_v45, %v2064_v5  ;;  %551 = vst.msk [vmem:[#allocation2 + $0x2a9] sm:$0xff] %vm284_vm1, %v518_v32  ;;  %v2078_v5 = vld [vmem:[#allocation3 + $0x2a8] sm:$0xff] }
 0x340   : > { %2297 = vst.msk [vmem:[#allocation3 + $0x158] sm:$0xff] %vm175_vm2, %v2249_v49 }
 0x341   : > { %2304 = vst.msk [vmem:[#allocation3 + $0x1c0] sm:$0xff] %vm175_vm2, %v2256_v57  ;;  %v2132_v37 = vpop.permute.xlu0 %2131 }
 0x342   : > { %v2254_v10 = vadd.f32 %v2132_v37, %v2062_v36 }
 0x344   : > { %2302 = vst.msk [vmem:[#allocation3 + $0x1b0] sm:$0xff] %vm175_vm2, %v2254_v10 }
 0x345   : > { %v2128_v58 = vpop.permute.xlu1 %2127 }
 0x346   : > { %v2252_v24 = vadd.f32 %v2128_v58, %v2060_v12  ;;  %v2142_v41 = vpop.permute.xlu2 %2141  ;;  %v2083_v58 = vld [vmem:[#allocation3 + $0x300] sm:$0xff] }
 0x347   : > { %v2259_v28 = vadd.f32 %v2142_v41, %v2067_v43 }
 0x348   : > { %2300 = vst.msk [vmem:[#allocation3 + $0x188] sm:$0xff] %vm175_vm2, %v2252_v24  ;;  %v2081_v24 = vld [vmem:[#allocation3 + $0x2d8] sm:$0xff] }
 0x349   : > { %2307 = vst.msk [vmem:[#allocation3 + $0x1f0] sm:$0xff] %vm175_vm2, %v2259_v28  ;;  %v2138_v9 = vpop.permute.xlu0 %2137 }
 0x34a   : > { %v2257_v20 = vadd.f32 %v2138_v9, %v2065_v52  ;;  %v495_v52 = vld [vmem:[%s6250_s19 + $0x10] sm:$0xff] }
 0x34b   : > { %v519_v9 = vld [vmem:[%s6250_s19 + $0xd0] sm:$0xff]  ;;  %528 = vst.msk [vmem:[#allocation2 + $0x199] sm:$0xff] %vm284_vm1, %v495_v52 }
 0x34c   : > { %2305 = vst.msk [vmem:[#allocation3 + $0x1e0] sm:$0xff] %vm175_vm2, %v2257_v20 }
 0x34d   : > { %v2134_v2 = vpop.permute.xlu1 %2133  ;;  %552 = vst.msk [vmem:[#allocation2 + $0x2b9] sm:$0xff] %vm284_vm1, %v519_v9  ;;  %v2689_v9 = vld [vmem:[#allocation3 + $0x8] sm:$0xff] }
 0x34e   : > { %v2255_v42 = vadd.f32 %v2134_v2, %v2063_v59  ;;  %v2148_v15 = vpop.permute.xlu2 %2147  ;;  %v2086_v59 = vld [vmem:[#allocation3 + $0x330] sm:$0xff]  ;;  %v2084_v2 = vld [vmem:[#allocation3 + $0x308] sm:$0xff] }
 0x34f   : > { %v2262_v62 = vadd.f32 %v2148_v15, %v2070_v56 }
 0x350   : > { %2303 = vst.msk [vmem:[#allocation3 + $0x1b8] sm:$0xff] %vm175_vm2, %v2255_v42 }
 0x351   : > { %2310 = vst.msk [vmem:[#allocation3 + $0x220] sm:$0xff] %vm175_vm2, %v2262_v62  ;;  %v2144_v60 = vpop.permute.xlu0 %2143  ;;  %v496_v62 = vld [vmem:[%s6250_s19 + $0x18] sm:$0xff] }
 0x352   : > { %v2260_v21 = vadd.f32 %v2144_v60, %v2068_v31  ;;  %v520_v60 = vld [vmem:[%s6250_s19 + $0xd8] sm:$0xff]  ;;  %529 = vst.msk [vmem:[#allocation2 + $0x1a1] sm:$0xff] %vm284_vm1, %v496_v62  ;;  %v2329_v31 = vld [vmem:[#allocation2 + $0x180] sm:$0xff] }
 0x353   : > { %553 = vst.msk [vmem:[#allocation2 + $0x2c1] sm:$0xff] %vm284_vm1, %v520_v60  ;;  %v2690_v60 = vld [vmem:[#allocation3 + $0x10] sm:$0xff] }
 0x354   : > { %2308 = vst.msk [vmem:[#allocation3 + $0x210] sm:$0xff] %vm175_vm2, %v2260_v21  ;;  %v2330_v21 = vld [vmem:[#allocation2 + $0x188] sm:$0xff] }
 0x355   : > { %v2140_v6 = vpop.permute.xlu1 %2139 }
 0x356   : > { %v2258_v46 = vadd.f32 %v2140_v6, %v2066_v63  ;;  %v2154_v33 = vpop.permute.xlu2 %2153  ;;  %v2365_v63 = vld [vmem:[#allocation2 + $0x2a0] sm:$0xff] }
 0x357   : > { %v2265_v0 = vadd.f32 %v2154_v33, %v2073_v17  ;;  %v497_v17 = vld [vmem:[%s6250_s19 + $0x20] sm:$0xff] }
 0x358   : > { %2306 = vst.msk [vmem:[#allocation3 + $0x1e8] sm:$0xff] %vm175_vm2, %v2258_v46  ;;  %v2366_v46 = vld [vmem:[#allocation2 + $0x2a8] sm:$0xff]  ;;  %v521_v33 = vld [vmem:[%s6250_s19 + $0xe0] sm:$0xff] }
 0x359   : > { %2313 = vst.msk [vmem:[#allocation3 + $0x250] sm:$0xff] %vm175_vm2, %v2265_v0  ;;  %v2150_v13 = vpop.permute.xlu0 %2149  ;;  %v2331_v0 = vld [vmem:[#allocation2 + $0x190] sm:$0xff] }
 0x35a   : > { %v2263_v54 = vadd.f32 %v2150_v13, %v2071_v4  ;;  %530 = vst.msk [vmem:[#allocation2 + $0x1b1] sm:$0xff] %vm284_vm1, %v497_v17  ;;  %v2367_v4 = vld [vmem:[#allocation2 + $0x2b0] sm:$0xff]  ;;  %v498_v13 = vld [vmem:[%s6250_s19 + $0x28] sm:$0xff] }
 0x35b   : > { %554 = vst.msk [vmem:[#allocation2 + $0x2d1] sm:$0xff] %vm284_vm1, %v521_v33  ;;  %v2691_v33 = vld [vmem:[#allocation3 + $0x30] sm:$0xff] }
 0x35c   : > { %2311 = vst.msk [vmem:[#allocation3 + $0x240] sm:$0xff] %vm175_vm2, %v2263_v54  ;;  %v2368_v54 = vld [vmem:[#allocation2 + $0x2b8] sm:$0xff] }
 0x35d   : > { %v2146_v50 = vpop.permute.xlu1 %2145  ;;  %531 = vst.msk [vmem:[#allocation2 + $0x1b9] sm:$0xff] %vm284_vm1, %v498_v13  ;;  %v509_v13 = vld [vmem:[%s6250_s19 + $0x80] sm:$0xff] }
 0x35e   : > { %v2261_v61 = vadd.f32 %v2146_v50, %v2069_v16  ;;  %v2160_v25 = vpop.permute.xlu2 %2159  ;;  %v522_v50 = vld [vmem:[%s6250_s19 + $0xe8] sm:$0xff]  ;;  %v2332_v16 = vld [vmem:[#allocation2 + $0x198] sm:$0xff]  ;;  %542 = vst.msk [vmem:[#allocation2 + $0x241] sm:$0xff] %vm284_vm1, %v509_v13 }
 0x35f   : > { %v2268_v11 = vadd.f32 %v2160_v25, %v2076_v26  ;;  %555 = vst.msk [vmem:[#allocation2 + $0x2d9] sm:$0xff] %vm284_vm1, %v522_v50  ;;  %v2369_v26 = vld [vmem:[#allocation2 + $0x2c0] sm:$0xff]  ;;  %v499_v25 = vld [vmem:[%s6250_s19 + $0x30] sm:$0xff]  ;;  %v514_v13 = vld [vmem:[%s6250_s19 + $0xa8] sm:$0xff] }
 0x360   : > { %2309 = vst.msk [vmem:[#allocation3 + $0x218] sm:$0xff] %vm175_vm2, %v2261_v61  ;;  %v2333_v61 = vld [vmem:[#allocation2 + $0x1a0] sm:$0xff] }
 0x361   : > { %2316 = vst.msk [vmem:[#allocation3 + $0x280] sm:$0xff] %vm175_vm2, %v2268_v11  ;;  %v2156_v53 = vpop.permute.xlu0 %2155  ;;  %v523_v11 = vld [vmem:[%s6250_s19 + $0xf0] sm:$0xff] }
 0x362   : > { %v2266_v55 = vadd.f32 %v2156_v53, %v2074_v47  ;;  %532 = vst.msk [vmem:[#allocation2 + $0x1c9] sm:$0xff] %vm284_vm1, %v499_v25  ;;  %v2334_v47 = vld [vmem:[#allocation2 + $0x1a8] sm:$0xff] }
 0x363   : > { %556 = vst.msk [vmem:[#allocation2 + $0x2e9] sm:$0xff] %vm284_vm1, %v523_v11  ;;  %v2370_v53 = vld [vmem:[#allocation2 + $0x2c8] sm:$0xff] }
 0x364   : > { %2314 = vst.msk [vmem:[#allocation3 + $0x270] sm:$0xff] %vm175_vm2, %v2266_v55  ;;  %v2335_v55 = vld [vmem:[#allocation2 + $0x1b0] sm:$0xff]  ;;  %v2337_v27 = vld [vmem:[#allocation2 + $0x1c0] sm:$0xff] }
 0x365   : > { %v2152_v1 = vpop.permute.xlu1 %2151  ;;  %547 = vst.msk [vmem:[#allocation2 + $0x279] sm:$0xff] %vm284_vm1, %v514_v13 }
 0x366   : > { %v2264_v40 = vadd.f32 %v2152_v1, %v2072_v51  ;;  %v2166_v22 = vpop.permute.xlu2 %2165  ;;  %v500_v51 = vld [vmem:[%s6250_s19 + $0x38] sm:$0xff]  ;;  %v2373_v14 = vld [vmem:[#allocation2 + $0x2e0] sm:$0xff] }
 0x367   : > { %v2271_v7 = vadd.f32 %v2166_v22, %v2079_v44  ;;  %533 = vst.msk [vmem:[#allocation2 + $0x1d1] sm:$0xff] %vm284_vm1, %v500_v51  ;;  %v524_v1 = vld [vmem:[%s6250_s19 + $0xf8] sm:$0xff] }
 0x368   : > { %2312 = vst.msk [vmem:[#allocation3 + $0x248] sm:$0xff] %vm175_vm2, %v2264_v40  ;;  %v2371_v40 = vld [vmem:[#allocation2 + $0x2d0] sm:$0xff]  ;;  %v2336_v44 = vld [vmem:[#allocation2 + $0x1b8] sm:$0xff] }
 0x369   : > { %2319 = vst.msk [vmem:[#allocation3 + $0x2b0] sm:$0xff] %vm175_vm2, %v2271_v7  ;;  %v2162_v23 = vpop.permute.xlu0 %2161  ;;  %v2372_v22 = vld [vmem:[#allocation2 + $0x2d8] sm:$0xff]  ;;  %v501_v7 = vld [vmem:[%s6250_s19 + $0x40] sm:$0xff] }
 0x36a   : > { %v2269_v19 = vadd.f32 %v2162_v23, %v2077_v30  ;;  %557 = vst.msk [vmem:[#allocation2 + $0x2f1] sm:$0xff] %vm284_vm1, %v524_v1  ;;  %v2087_v30 = vld [vmem:[#allocation3 + $0x338] sm:$0xff] }
 0x36b   : > { %534 = vst.msk [vmem:[#allocation2 + $0x1e1] sm:$0xff] %vm284_vm1, %v501_v7 }
 0x36c   : > { %2317 = vst.msk [vmem:[#allocation3 + $0x2a0] sm:$0xff] %vm175_vm2, %v2269_v19  ;;  %v2338_v19 = vld [vmem:[#allocation2 + $0x1c8] sm:$0xff] }
 0x36d   : > { %v2158_v39 = vpop.permute.xlu1 %2157 }
 0x36e   : > { %v2267_v38 = vadd.f32 %v2158_v39, %v2075_v29  ;;  %v2172_v35 = vpop.permute.xlu2 %2171  ;;  %v502_v29 = vld [vmem:[%s6250_s19 + $0x48] sm:$0xff]  ;;  %v2340_v18 = vld [vmem:[#allocation2 + $0x1d8] sm:$0xff] }
 0x36f   : > { %v2274_v8 = vadd.f32 %v2172_v35, %v2082_v48  ;;  %535 = vst.msk [vmem:[#allocation2 + $0x1e9] sm:$0xff] %vm284_vm1, %v502_v29  ;;  %v2339_v48 = vld [vmem:[#allocation2 + $0x1d0] sm:$0xff] }
 0x370   : > { %2315 = vst.msk [vmem:[#allocation3 + $0x278] sm:$0xff] %vm175_vm2, %v2267_v38  ;;  %v2374_v38 = vld [vmem:[#allocation2 + $0x2e8] sm:$0xff] }
 0x371   : > { %2322 = vst.msk [vmem:[#allocation3 + $0x2e0] sm:$0xff] %vm175_vm2, %v2274_v8  ;;  %v2168_v49 = vpop.permute.xlu0 %2167  ;;  %v2375_v35 = vld [vmem:[#allocation2 + $0x2f0] sm:$0xff]  ;;  %v2376_v32 = vld [vmem:[#allocation2 + $0x2f8] sm:$0xff] }
 0x372   : > { %v2272_v57 = vadd.f32 %v2168_v49, %v2080_v3  ;;  %v503_v8 = vld [vmem:[%s6250_s19 + $0x50] sm:$0xff]  ;;  %v2341_v3 = vld [vmem:[#allocation2 + $0x1e0] sm:$0xff] }
 0x373   : > { %536 = vst.msk [vmem:[#allocation2 + $0x1f9] sm:$0xff] %vm284_vm1, %v503_v8 }
 0x374   : > { %2320 = vst.msk [vmem:[#allocation3 + $0x2d0] sm:$0xff] %vm175_vm2, %v2272_v57  ;;  %v506_v57 = vld [vmem:[%s6250_s19 + $0x68] sm:$0xff] }
 0x375   : > { %v2164_v45 = vpop.permute.xlu1 %2163  ;;  %539 = vst.msk [vmem:[#allocation2 + $0x219] sm:$0xff] %vm284_vm1, %v506_v57 }
 0x376   : > { %v2270_v36 = vadd.f32 %v2164_v45, %v2078_v5  ;;  %v2178_v37 = vpop.permute.xlu2 %2177  ;;  %v2342_v49 = vld [vmem:[#allocation2 + $0x1e8] sm:$0xff]  ;;  %v505_v5 = vld [vmem:[%s6250_s19 + $0x60] sm:$0xff]  ;;  %v2343_v45 = vld [vmem:[#allocation2 + $0x1f0] sm:$0xff] }
 0x377   : > { %v2277_v12 = vadd.f32 %v2178_v37, %v2085_v34  ;;  %v504_v34 = vld [vmem:[%s6250_s19 + $0x58] sm:$0xff]  ;;  %538 = vst.msk [vmem:[#allocation2 + $0x211] sm:$0xff] %vm284_vm1, %v505_v5 }
 0x378   : > { %2318 = vst.msk [vmem:[#allocation3 + $0x2a8] sm:$0xff] %vm175_vm2, %v2270_v36  ;;  %v2728_v51 = vld [vmem:[#allocation3 + $0x278] sm:$0xff] }
 0x379   : > { %2325 = vst.msk [vmem:[#allocation3 + $0x310] sm:$0xff] %vm175_vm2, %v2277_v12  ;;  %v2174_v10 = vpop.permute.xlu0 %2173  ;;  %v2688_v12 = vld [vmem:[#allocation3] sm:$0xff] }
 0x37a   : > { %v2275_v41 = vadd.f32 %v2174_v10, %v2083_v58  ;;  %537 = vst.msk [vmem:[#allocation2 + $0x201] sm:$0xff] %vm284_vm1, %v504_v34  ;;  %v2344_v36 = vld [vmem:[#allocation2 + $0x1f8] sm:$0xff] }
 0x37c   : > { %2323 = vst.msk [vmem:[#allocation3 + $0x300] sm:$0xff] %vm175_vm2, %v2275_v41  ;;  %v2724_v41 = vld [vmem:[#allocation3 + $0x240] sm:$0xff] }
 0x37d   : > { %v2170_v43 = vpop.permute.xlu1 %2169  ;;  %v2349_v25 = vld [vmem:[#allocation2 + $0x220] sm:$0xff] }
 0x37e   : > { %v2273_v28 = vadd.f32 %v2170_v43, %v2081_v24  ;;  %v507_v24 = vld [vmem:[%s6250_s19 + $0x70] sm:$0xff] }
 0x37f   : > { %540 = vst.msk [vmem:[#allocation2 + $0x229] sm:$0xff] %vm284_vm1, %v507_v24  ;;  %v2353_v24 = vld [vmem:[#allocation2 + $0x240] sm:$0xff] }
 0x380   : > { %2321 = vst.msk [vmem:[#allocation3 + $0x2d8] sm:$0xff] %vm175_vm2, %v2273_v28 }
 0x381   : > { %v2180_v20 = vpop.permute.xlu0 %2179  ;;  %v2345_v58 = vld [vmem:[#allocation2 + $0x200] sm:$0xff] }
 0x382   : > { %v2278_v15 = vadd.f32 %v2180_v20, %v2086_v59  ;;  %v2346_v59 = vld [vmem:[#allocation2 + $0x208] sm:$0xff]  ;;  %v508_v20 = vld [vmem:[%s6250_s19 + $0x78] sm:$0xff] }
 0x383   : > { %541 = vst.msk [vmem:[#allocation2 + $0x231] sm:$0xff] %vm284_vm1, %v508_v20  ;;  %v2697_v20 = vld [vmem:[#allocation3 + $0x90] sm:$0xff] }
 0x384   : > { %2326 = vst.msk [vmem:[#allocation3 + $0x330] sm:$0xff] %vm175_vm2, %v2278_v15  ;;  %v2725_v15 = vld [vmem:[#allocation3 + $0x248] sm:$0xff] }
 0x385   : > { %v2176_v42 = vpop.permute.xlu1 %2175 }
 0x386   : > { %v2276_v56 = vadd.f32 %v2176_v42, %v2084_v2 }
 0x388   : > { %2324 = vst.msk [vmem:[#allocation3 + $0x308] sm:$0xff] %vm175_vm2, %v2276_v56 }
 0x389   : > { %v2380_v6 = vpop.permute.xlu0 %2379 }
 0x38a   : > { %6063 = vmatpush.msk.msra.mxu1 %vm816_vm0, %v2380_v6  ;;  %6165 = vmatpush.msk.msrb.mxu3 %vm816_vm0, %v2380_v6  ;;  %v2351_v29 = vld [vmem:[#allocation2 + $0x230] sm:$0xff] }
 0x38b   : > { %6064 = vmatmul.msk.f32.vlgmr.msra.gmra.mxu1 %vm284_vm1, %v2329_v31  ;;  %6100 = vmatmul.msk.f32.vlgmr.msrb.gmra.mxu3 %vm284_vm1, %v2365_v63  ;;  %v2347_v31 = vld [vmem:[#allocation2 + $0x210] sm:$0xff] }
 0x38d   : > { %v2182_v23 = vpop.permute.xlu1 %2181 }
 0x38e   : > { %v2279_v39 = vadd.f32 %v2182_v23, %v2087_v30  ;;  %v2694_v23 = vld [vmem:[#allocation3 + $0x60] sm:$0xff] }
 0x390   : > { %2327 = vst.msk [vmem:[#allocation3 + $0x338] sm:$0xff] %vm175_vm2, %v2279_v39 }
 0x393   : > { %6065 = vmatmul.msk.f32.gmra.mxu1 %vm284_vm1, %v2330_v21  ;;  %6101 = vmatmul.msk.f32.gmra.mxu3 %vm284_vm1, %v2366_v46  ;;  %v2726_v21 = vld [vmem:[#allocation3 + $0x250] sm:$0xff] }
 0x39b   : > { %6066 = vmatmul.msk.f32.gmra.mxu1 %vm284_vm1, %v2331_v0  ;;  %6102 = vmatmul.msk.f32.gmra.mxu3 %vm284_vm1, %v2367_v4  ;;  %v2348_v0 = vld [vmem:[#allocation2 + $0x218] sm:$0xff] }
 0x3a3   : > { %6067 = vmatmul.msk.f32.gmra.mxu1 %vm284_vm1, %v2332_v16  ;;  %6103 = vmatmul.msk.f32.gmra.mxu3 %vm284_vm1, %v2368_v54  ;;  %v2727_v16 = vld [vmem:[#allocation3 + $0x270] sm:$0xff] }
 0x3ab   : > { %6068 = vmatmul.msk.f32.gmra.mxu1 %vm284_vm1, %v2333_v61  ;;  %6104 = vmatmul.msk.f32.gmra.mxu3 %vm284_vm1, %v2369_v26  ;;  %v2692_v26 = vld [vmem:[#allocation3 + $0x38] sm:$0xff] }
 0x3b3   : > { %6069 = vmatmul.msk.f32.gmra.mxu1 %vm284_vm1, %v2334_v47  ;;  %6105 = vmatmul.msk.f32.gmra.mxu3 %vm284_vm1, %v2370_v53  ;;  %v510_v47 = vld [vmem:[%s6250_s19 + $0x88] sm:$0xff] }
 0x3b4   : > { %543 = vst.msk [vmem:[#allocation2 + $0x249] sm:$0xff] %vm284_vm1, %v510_v47 }
 0x3bb   : > { %6070 = vmatmul.msk.f32.gmra.mxu1 %vm284_vm1, %v2335_v55  ;;  %6106 = vmatmul.msk.f32.gmra.mxu3 %vm284_vm1, %v2371_v40  ;;  %v2693_v40 = vld [vmem:[#allocation3 + $0x40] sm:$0xff] }
 0x3c3   : > { %6071 = vmatmul.msk.f32.gmra.mxu1 %vm284_vm1, %v2336_v44  ;;  %6107 = vmatmul.msk.f32.gmra.mxu3 %vm284_vm1, %v2372_v22  ;;  %v2350_v44 = vld [vmem:[#allocation2 + $0x228] sm:$0xff] }
 0x3cb   : > { %6072 = vmatmul.msk.f32.gmra.mxu1 %vm284_vm1, %v2337_v27  ;;  %6108 = vmatmul.msk.f32.gmra.mxu3 %vm284_vm1, %v2373_v14  ;;  %v2729_v27 = vld [vmem:[#allocation3 + $0x280] sm:$0xff] }
 0x3d3   : > { %6073 = vmatmul.msk.f32.gmra.mxu1 %vm284_vm1, %v2338_v19  ;;  %6109 = vmatmul.msk.f32.gmra.mxu3 %vm284_vm1, %v2374_v38  ;;  %v511_v19 = vld [vmem:[%s6250_s19 + $0x90] sm:$0xff] }
 0x3d4   : > { %544 = vst.msk [vmem:[#allocation2 + $0x259] sm:$0xff] %vm284_vm1, %v511_v19 }
 0x3db   : > { %6074 = vmatmul.msk.f32.gmra.mxu1 %vm284_vm1, %v2339_v48  ;;  %6110 = vmatmul.msk.f32.gmra.mxu3 %vm284_vm1, %v2375_v35  ;;  %v2730_v48 = vld [vmem:[#allocation3 + $0x2a0] sm:$0xff]  ;;  %v2356_v47 = vld [vmem:[#allocation2 + $0x258] sm:$0xff] }
 0x3e3   : > { %6075 = vmatmul.msk.f32.gmra.mxu1 %vm284_vm1, %v2340_v18  ;;  %6111 = vmatmul.msk.f32.gmra.mxu3 %vm284_vm1, %v2376_v32  ;;  %v2695_v18 = vld [vmem:[#allocation3 + $0x68] sm:$0xff]  ;;  %v2352_v32 = vld [vmem:[#allocation2 + $0x238] sm:$0xff] }
 0x3eb   : > { %6076 = vmatmul.msk.f32.gmra.mxu1 %vm284_vm1, %v2341_v3  ;;  %v2088_v3 = vld [vmem:[#allocation3 + $0x340] sm:$0xff] }
 0x3f3   : > { %6077 = vmatmul.msk.f32.gmra.mxu1 %vm284_vm1, %v2342_v49  ;;  %v2184_v49 = vpop.permute.xlu2 %2183 }
 0x3f4   : > { %v2280_v5 = vadd.f32 %v2184_v49, %v2088_v3  ;;  %v516_v3 = vld [vmem:[%s6250_s19 + $0xb8] sm:$0xff] }
 0x3f5   : > { %549 = vst.msk [vmem:[#allocation2 + $0x291] sm:$0xff] %vm284_vm1, %v516_v3 }
 0x3f6   : > { %2328 = vst.msk [vmem:[#allocation3 + $0x340] sm:$0xff] %vm175_vm2, %v2280_v5  ;;  %v2702_v5 = vld [vmem:[#allocation3 + $0xd0] sm:$0xff] }
 0x3fb   : > { %6078 = vmatmul.msk.f32.gmra.mxu1 %vm284_vm1, %v2343_v45  ;;  %v512_v45 = vld [vmem:[%s6250_s19 + $0x98] sm:$0xff] }
 0x3fc   : > { %545 = vst.msk [vmem:[#allocation2 + $0x261] sm:$0xff] %vm284_vm1, %v512_v45  ;;  %v2364_v3 = vld [vmem:[#allocation2 + $0x298] sm:$0xff] }
 0x403   : > { %6079 = vmatmul.msk.f32.gmra.mxu1 %vm284_vm1, %v2344_v36  ;;  %v2731_v36 = vld [vmem:[#allocation3 + $0x2a8] sm:$0xff] }
 0x408   : > { %v7774_v37 = vpop.f32.mrf.mxu1 }
 0x409   : > { %v2736_v10 = vadd.f32 %v2688_v12, %v7774_v37  ;;  %2928 = vrot.lane.b32.xlu1 %v7774_v37, %s6195_s22 }
 0x40b   : > { %2784 = vst.msk [vmem:[#allocation3] sm:$0xff] %vm175_vm2, %v2736_v10  ;;  %6080 = vmatmul.msk.f32.gmra.mxu1 %vm284_vm1, %v2345_v58  ;;  %v2696_v10 = vld [vmem:[#allocation3 + $0x70] sm:$0xff] }
 0x40e   : > { %v7783_v43 = vpop.f32.mrf.mxu3 }
 0x40f   : > { %v2772_v28 = vadd.f32 %v2724_v41, %v7783_v43 }
 0x410   : > { %v7786_v52 = vpop.f32.mrf.mxu1 }
 0x411   : > { %2820 = vst.msk [vmem:[#allocation3 + $0x240] sm:$0xff] %vm175_vm2, %v2772_v28  ;;  %v2737_v2 = vadd.f32 %v2689_v9, %v7786_v52  ;;  %2930 = vrot.lane.b32.xlu2 %v7786_v52, %s6195_s22  ;;  %v2732_v9 = vld [vmem:[#allocation3 + $0x2b0] sm:$0xff] }
 0x413   : > { %2785 = vst.msk [vmem:[#allocation3 + $0x8] sm:$0xff] %vm175_vm2, %v2737_v2  ;;  %6081 = vmatmul.msk.f32.gmra.mxu1 %vm284_vm1, %v2346_v59 }
 0x416   : > { %v7796_v42 = vpop.f32.mrf.mxu3 }
 0x417   : > { %v2773_v56 = vadd.f32 %v2725_v15, %v7796_v42  ;;  %v2354_v15 = vld [vmem:[#allocation2 + $0x248] sm:$0xff] }
 0x418   : > { %v7799_v62 = vpop.f32.mrf.mxu1 }
 0x419   : > { %2821 = vst.msk [vmem:[#allocation3 + $0x248] sm:$0xff] %vm175_vm2, %v2773_v56  ;;  %v2738_v63 = vadd.f32 %v2690_v60, %v7799_v62  ;;  %2932 = vrot.lane.b32.xlu0 %v7799_v62, %s6195_s22  ;;  %v513_v60 = vld [vmem:[%s6250_s19 + $0xa0] sm:$0xff] }
 0x41a   : > { %546 = vst.msk [vmem:[#allocation2 + $0x271] sm:$0xff] %vm284_vm1, %v513_v60 }
 0x41b   : > { %2786 = vst.msk [vmem:[#allocation3 + $0x10] sm:$0xff] %vm175_vm2, %v2738_v63  ;;  %6082 = vmatmul.msk.f32.gmra.mxu1 %vm284_vm1, %v2347_v31  ;;  %v2733_v63 = vld [vmem:[#allocation3 + $0x2d0] sm:$0xff] }
 0x41e   : > { %v7807_v6 = vpop.f32.mrf.mxu3 }
 0x41f   : > { %v2774_v46 = vadd.f32 %v2726_v21, %v7807_v6 }
 0x420   : > { %v7810_v17 = vpop.f32.mrf.mxu1 }
 0x421   : > { %2822 = vst.msk [vmem:[#allocation3 + $0x250] sm:$0xff] %vm175_vm2, %v2774_v46  ;;  %v2739_v4 = vadd.f32 %v2691_v33, %v7810_v17  ;;  %2934 = vrot.lane.b32.xlu1 %v7810_v17, %s6195_s22  ;;  %v2698_v33 = vld [vmem:[#allocation3 + $0x98] sm:$0xff]  ;;  %v2359_v45 = vld [vmem:[#allocation2 + $0x270] sm:$0xff] }
 0x423   : > { %2787 = vst.msk [vmem:[#allocation3 + $0x30] sm:$0xff] %vm175_vm2, %v2739_v4  ;;  %6083 = vmatmul.msk.f32.gmra.mxu1 %vm284_vm1, %v2348_v0  ;;  %v2355_v0 = vld [vmem:[#allocation2 + $0x250] sm:$0xff] }
 0x426   : > { %v7820_v50 = vpop.f32.mrf.mxu3 }
 0x427   : > { %v2775_v54 = vadd.f32 %v2727_v16, %v7820_v50 }
 0x428   : > { %v7823_v61 = vpop.f32.mrf.mxu1 }
 0x429   : > { %2823 = vst.msk [vmem:[#allocation3 + $0x270] sm:$0xff] %vm175_vm2, %v2775_v54  ;;  %v2740_v11 = vadd.f32 %v2692_v26, %v7823_v61  ;;  %2936 = vrot.lane.b32.xlu2 %v7823_v61, %s6195_s22  ;;  %v2734_v54 = vld [vmem:[#allocation3 + $0x2d8] sm:$0xff] }
 0x42b   : > { %2788 = vst.msk [vmem:[#allocation3 + $0x38] sm:$0xff] %vm175_vm2, %v2740_v11  ;;  %6084 = vmatmul.msk.f32.gmra.mxu1 %vm284_vm1, %v2349_v25  ;;  %v2699_v11 = vld [vmem:[#allocation3 + $0xa0] sm:$0xff] }
 0x42e   : > { %v7833_v53 = vpop.f32.mrf.mxu3 }
 0x42f   : > { %v2776_v1 = vadd.f32 %v2728_v51, %v7833_v53 }
 0x430   : > { %v7836_v55 = vpop.f32.mrf.mxu1 }
 0x431   : > { %2824 = vst.msk [vmem:[#allocation3 + $0x278] sm:$0xff] %vm175_vm2, %v2776_v1  ;;  %v2741_v22 = vadd.f32 %v2693_v40, %v7836_v55  ;;  %2938 = vrot.lane.b32.xlu0 %v7836_v55, %s6195_s22  ;;  %v2735_v40 = vld [vmem:[#allocation3 + $0x2e0] sm:$0xff] }
 0x433   : > { %2789 = vst.msk [vmem:[#allocation3 + $0x40] sm:$0xff] %vm175_vm2, %v2741_v22  ;;  %6085 = vmatmul.msk.f32.gmra.mxu1 %vm284_vm1, %v2350_v44 }
 0x436   : > { %v7844_v7 = vpop.f32.mrf.mxu3 }
 0x437   : > { %v2777_v14 = vadd.f32 %v2729_v27, %v7844_v7  ;;  %v2700_v27 = vld [vmem:[#allocation3 + $0xc0] sm:$0xff] }
 0x438   : > { %v7847_v30 = vpop.f32.mrf.mxu1 }
 0x439   : > { %2825 = vst.msk [vmem:[#allocation3 + $0x280] sm:$0xff] %vm175_vm2, %v2777_v14  ;;  %v2742_v39 = vadd.f32 %v2694_v23, %v7847_v30  ;;  %2940 = vrot.lane.b32.xlu1 %v7847_v30, %s6195_s22  ;;  %v2357_v14 = vld [vmem:[#allocation2 + $0x260] sm:$0xff] }
 0x43b   : > { %2790 = vst.msk [vmem:[#allocation3 + $0x60] sm:$0xff] %vm175_vm2, %v2742_v39  ;;  %6086 = vmatmul.msk.f32.gmra.mxu1 %vm284_vm1, %v2351_v29  ;;  %v2833_v29 = vld [vmem:[#allocation3 + $0x20] sm:$0xff] }
 0x43e   : > { %v7857_v38 = vpop.f32.mrf.mxu3 }
 0x43f   : > { %v2778_v35 = vadd.f32 %v2730_v48, %v7857_v38  ;;  %v515_v48 = vld [vmem:[%s6250_s19 + $0xb0] sm:$0xff] }
 0x440   : > { %v7860_v8 = vpop.f32.mrf.mxu1  ;;  %548 = vst.msk [vmem:[#allocation2 + $0x289] sm:$0xff] %vm284_vm1, %v515_v48 }
 0x441   : > { %2826 = vst.msk [vmem:[#allocation3 + $0x2a0] sm:$0xff] %vm175_vm2, %v2778_v35  ;;  %v2743_v34 = vadd.f32 %v2695_v18, %v7860_v8  ;;  %2942 = vrot.lane.b32.xlu2 %v7860_v8, %s6195_s22  ;;  %v2701_v18 = vld [vmem:[#allocation3 + $0xc8] sm:$0xff] }
 0x443   : > { %2791 = vst.msk [vmem:[#allocation3 + $0x68] sm:$0xff] %vm175_vm2, %v2743_v34  ;;  %6087 = vmatmul.msk.f32.gmra.mxu1 %vm284_vm1, %v2352_v32  ;;  %v2358_v32 = vld [vmem:[#allocation2 + $0x268] sm:$0xff] }
 0x446   : > { %v7870_v57 = vpop.f32.mrf.mxu3 }
 0x447   : > { %v2779_v12 = vadd.f32 %v2731_v36, %v7870_v57 }
 0x448   : > { %v7874_v58 = vpop.f32.mrf.mxu1 }
 0x449   : > { %2827 = vst.msk [vmem:[#allocation3 + $0x2a8] sm:$0xff] %vm175_vm2, %v2779_v12  ;;  %v2744_v41 = vadd.f32 %v2696_v10, %v7874_v58  ;;  %2944 = vrot.lane.b32.xlu0 %v7874_v58, %s6195_s22  ;;  %v2832_v12 = vld [vmem:[#allocation3 + $0x18] sm:$0xff] }
 0x44b   : > { %2792 = vst.msk [vmem:[#allocation3 + $0x70] sm:$0xff] %vm175_vm2, %v2744_v41  ;;  %6088 = vmatmul.msk.f32.gmra.mxu1 %vm284_vm1, %v2353_v24 }
 0x44e   : > { %v7882_v28 = vpop.f32.mrf.mxu3 }
 0x44f   : > { %v2780_v59 = vadd.f32 %v2732_v9, %v7882_v28  ;;  %v2703_v9 = vld [vmem:[#allocation3 + $0xf0] sm:$0xff] }
 0x450   : > { %v7885_v2 = vpop.f32.mrf.mxu1 }
 0x451   : > { %2828 = vst.msk [vmem:[#allocation3 + $0x2b0] sm:$0xff] %vm175_vm2, %v2780_v59  ;;  %v2745_v56 = vadd.f32 %v2697_v20, %v7885_v2  ;;  %2946 = vrot.lane.b32.xlu1 %v7885_v2, %s6195_s22  ;;  %v2360_v59 = vld [vmem:[#allocation2 + $0x278] sm:$0xff] }
 0x453   : > { %2793 = vst.msk [vmem:[#allocation3 + $0x90] sm:$0xff] %vm175_vm2, %v2745_v56  ;;  %6089 = vmatmul.msk.f32.gmra.mxu1 %vm284_vm1, %v2354_v15  ;;  %v2836_v15 = vld [vmem:[#allocation3 + $0x50] sm:$0xff] }
 0x456   : > { %v7895_v31 = vpop.f32.mrf.mxu3 }
 0x457   : > { %v2781_v21 = vadd.f32 %v2733_v63, %v7895_v31 }
 0x458   : > { %v7898_v46 = vpop.f32.mrf.mxu1 }
 0x459   : > { %2829 = vst.msk [vmem:[#allocation3 + $0x2d0] sm:$0xff] %vm175_vm2, %v2781_v21  ;;  %v2746_v4 = vadd.f32 %v2698_v33, %v7898_v46  ;;  %2948 = vrot.lane.b32.xlu2 %v7898_v46, %s6195_s22  ;;  %v2704_v21 = vld [vmem:[#allocation3 + $0xf8] sm:$0xff]  ;;  %v2361_v33 = vld [vmem:[#allocation2 + $0x280] sm:$0xff] }
 0x45b   : > { %2794 = vst.msk [vmem:[#allocation3 + $0x98] sm:$0xff] %vm175_vm2, %v2746_v4  ;;  %6090 = vmatmul.msk.f32.gmra.mxu1 %vm284_vm1, %v2355_v0  ;;  %v2834_v4 = vld [vmem:[#allocation3 + $0x28] sm:$0xff] }
 0x45e   : > { %v7908_v16 = vpop.f32.mrf.mxu3 }
 0x45f   : > { %v2782_v26 = vadd.f32 %v2734_v54, %v7908_v16 }
 0x460   : > { %v7911_v25 = vpop.f32.mrf.mxu1 }
 0x461   : > { %2830 = vst.msk [vmem:[#allocation3 + $0x2d8] sm:$0xff] %vm175_vm2, %v2782_v26  ;;  %v2747_v51 = vadd.f32 %v2699_v11, %v7911_v25  ;;  %2950 = vrot.lane.b32.xlu0 %v7911_v25, %s6195_s22  ;;  %v2705_v11 = vld [vmem:[#allocation3 + $0x100] sm:$0xff] }
 0x463   : > { %2795 = vst.msk [vmem:[#allocation3 + $0xa0] sm:$0xff] %vm175_vm2, %v2747_v51  ;;  %6091 = vmatmul.msk.f32.gmra.mxu1 %vm284_vm1, %v2356_v47  ;;  %v2362_v47 = vld [vmem:[#allocation2 + $0x288] sm:$0xff] }
 0x466   : > { %v7919_v1 = vpop.f32.mrf.mxu3 }
 0x467   : > { %v2783_v44 = vadd.f32 %v2735_v40, %v7919_v1  ;;  %v2835_v40 = vld [vmem:[#allocation3 + $0x48] sm:$0xff] }
 0x468   : > { %v7922_v22 = vpop.f32.mrf.mxu1 }
 0x469   : > { %2831 = vst.msk [vmem:[#allocation3 + $0x2e0] sm:$0xff] %vm175_vm2, %v2783_v44  ;;  %v2748_v23 = vadd.f32 %v2700_v27, %v7922_v22  ;;  %2952 = vrot.lane.b32.xlu1 %v7922_v22, %s6195_s22 }
 0x46b   : > { %2796 = vst.msk [vmem:[#allocation3 + $0xc0] sm:$0xff] %vm175_vm2, %v2748_v23  ;;  %6092 = vmatmul.msk.f32.gmra.mxu1 %vm284_vm1, %v2357_v14  ;;  %v2931_v39 = vpop.permute.xlu2 %2930  ;;  %v2706_v23 = vld [vmem:[#allocation3 + $0x120] sm:$0xff] }
 0x46c   : > { %v3073_v19 = vadd.f32 %v2931_v39, %v2833_v29  ;;  %v2363_v29 = vld [vmem:[#allocation2 + $0x290] sm:$0xff] }
 0x46e   : > { %3121 = vst.msk [vmem:[#allocation3 + $0x20] sm:$0xff] %vm175_vm2, %v3073_v19  ;;  %v2839_v19 = vld [vmem:[#allocation3 + $0x80] sm:$0xff] }
 0x470   : > { %v7933_v35 = vpop.f32.mrf.mxu1 }
 0x471   : > { %v2749_v34 = vadd.f32 %v2701_v18, %v7933_v35  ;;  %2954 = vrot.lane.b32.xlu2 %v7933_v35, %s6195_s22 }
 0x473   : > { %2797 = vst.msk [vmem:[#allocation3 + $0xc8] sm:$0xff] %vm175_vm2, %v2749_v34  ;;  %6093 = vmatmul.msk.f32.gmra.mxu1 %vm284_vm1, %v2358_v32  ;;  %v2707_v34 = vld [vmem:[#allocation3 + $0x128] sm:$0xff] }
 0x478   : > { %v7942_v49 = vpop.f32.mrf.mxu1 }
 0x479   : > { %v2750_v36 = vadd.f32 %v2702_v5, %v7942_v49  ;;  %2956 = vrot.lane.b32.xlu0 %v7942_v49, %s6195_s22 }
 0x47b   : > { %2798 = vst.msk [vmem:[#allocation3 + $0xd0] sm:$0xff] %vm175_vm2, %v2750_v36  ;;  %6094 = vmatmul.msk.f32.gmra.mxu1 %vm284_vm1, %v2359_v45  ;;  %v2929_v10 = vpop.permute.xlu1 %2928  ;;  %v2837_v45 = vld [vmem:[#allocation3 + $0x58] sm:$0xff] }
 0x47c   : > { %v3072_v24 = vadd.f32 %v2929_v10, %v2832_v12 }
 0x47e   : > { %3120 = vst.msk [vmem:[#allocation3 + $0x18] sm:$0xff] %vm175_vm2, %v3072_v24  ;;  %v2708_v24 = vld [vmem:[#allocation3 + $0x130] sm:$0xff] }
 0x480   : > { %v7950_v41 = vpop.f32.mrf.mxu1 }
 0x481   : > { %v2751_v20 = vadd.f32 %v2703_v9, %v7950_v41  ;;  %2958 = vrot.lane.b32.xlu1 %v7950_v41, %s6195_s22 }
 0x483   : > { %2799 = vst.msk [vmem:[#allocation3 + $0xf0] sm:$0xff] %vm175_vm2, %v2751_v20  ;;  %6095 = vmatmul.msk.f32.gmra.mxu1 %vm284_vm1, %v2360_v59  ;;  %v2937_v56 = vpop.permute.xlu2 %2936  ;;  %v2838_v59 = vld [vmem:[#allocation3 + $0x78] sm:$0xff] }
 0x484   : > { %v3076_v60 = vadd.f32 %v2937_v56, %v2836_v15 }
 0x486   : > { %3124 = vst.msk [vmem:[#allocation3 + $0x50] sm:$0xff] %vm175_vm2, %v3076_v60  ;;  %v2709_v60 = vld [vmem:[#allocation3 + $0x150] sm:$0xff] }
 0x488   : > { %v7958_v63 = vpop.f32.mrf.mxu1 }
 0x489   : > { %v2752_v0 = vadd.f32 %v2704_v21, %v7958_v63  ;;  %2960 = vrot.lane.b32.xlu2 %v7958_v63, %s6195_s22 }
 0x48b   : > { %2800 = vst.msk [vmem:[#allocation3 + $0xf8] sm:$0xff] %vm175_vm2, %v2752_v0  ;;  %v2933_v13 = vpop.permute.xlu0 %2932  ;;  %6096 = vmatmul.msk.f32.gmra.mxu1 %vm284_vm1, %v2361_v33  ;;  %v2842_v33 = vld [vmem:[#allocation3 + $0xb0] sm:$0xff] }
 0x48c   : > { %v3074_v54 = vadd.f32 %v2933_v13, %v2834_v4 }
 0x48e   : > { %3122 = vst.msk [vmem:[#allocation3 + $0x28] sm:$0xff] %vm175_vm2, %v3074_v54  ;;  %v2710_v54 = vld [vmem:[#allocation3 + $0x158] sm:$0xff] }
 0x490   : > { %v7966_v26 = vpop.f32.mrf.mxu1 }
 0x491   : > { %v2753_v51 = vadd.f32 %v2705_v11, %v7966_v26  ;;  %2962 = vrot.lane.b32.xlu0 %v7966_v26, %s6195_s22 }
 0x493   : > { %2801 = vst.msk [vmem:[#allocation3 + $0x100] sm:$0xff] %vm175_vm2, %v2753_v51  ;;  %6097 = vmatmul.msk.f32.gmra.mxu1 %vm284_vm1, %v2362_v47  ;;  %v2935_v44 = vpop.permute.xlu1 %2934  ;;  %v2840_v47 = vld [vmem:[#allocation3 + $0x88] sm:$0xff] }
 0x494   : > { %v3075_v27 = vadd.f32 %v2935_v44, %v2835_v40 }
 0x496   : > { %3123 = vst.msk [vmem:[#allocation3 + $0x48] sm:$0xff] %vm175_vm2, %v3075_v27  ;;  %v2711_v27 = vld [vmem:[#allocation3 + $0x160] sm:$0xff] }
 0x498   : > { %v7974_v14 = vpop.f32.mrf.mxu1 }
 0x499   : > { %v2754_v39 = vadd.f32 %v2706_v23, %v7974_v14  ;;  %2964 = vrot.lane.b32.xlu1 %v7974_v14, %s6195_s22 }
 0x49b   : > { %2802 = vst.msk [vmem:[#allocation3 + $0x120] sm:$0xff] %vm175_vm2, %v2754_v39  ;;  %6098 = vmatmul.msk.f32.gmra.mxu1 %vm284_vm1, %v2363_v29  ;;  %v2943_v48 = vpop.permute.xlu2 %2942  ;;  %v2841_v29 = vld [vmem:[#allocation3 + $0xa8] sm:$0xff] }
 0x49c   : > { %v3079_v18 = vadd.f32 %v2943_v48, %v2839_v19 }
 0x49e   : > { %3127 = vst.msk [vmem:[#allocation3 + $0x80] sm:$0xff] %vm175_vm2, %v3079_v18  ;;  %v2712_v18 = vld [vmem:[#allocation3 + $0x180] sm:$0xff] }
 0x4a0   : > { %v7982_v32 = vpop.f32.mrf.mxu1 }
 0x4a1   : > { %v2755_v5 = vadd.f32 %v2707_v34, %v7982_v32  ;;  %2966 = vrot.lane.b32.xlu2 %v7982_v32, %s6195_s22 }
 0x4a3   : > { %2803 = vst.msk [vmem:[#allocation3 + $0x128] sm:$0xff] %vm175_vm2, %v2755_v5  ;;  %v2939_v36 = vpop.permute.xlu0 %2938  ;;  %6099 = vmatmul.msk.f32.gmra.mxu1 %vm284_vm1, %v2364_v3  ;;  %v2845_v3 = vld [vmem:[#allocation3 + $0xe0] sm:$0xff] }
 0x4a4   : > { %v3077_v12 = vadd.f32 %v2939_v36, %v2837_v45 }
 0x4a6   : > { %3125 = vst.msk [vmem:[#allocation3 + $0x58] sm:$0xff] %vm175_vm2, %v3077_v12  ;;  %v2713_v12 = vld [vmem:[#allocation3 + $0x188] sm:$0xff] }
 0x4a8   : > { %v7990_v10 = vpop.f32.mrf.mxu1 }
 0x4a9   : > { %v2756_v9 = vadd.f32 %v2708_v24, %v7990_v10  ;;  %2968 = vrot.lane.b32.xlu0 %v7990_v10, %s6195_s22 }
 0x4ab   : > { %2804 = vst.msk [vmem:[#allocation3 + $0x130] sm:$0xff] %vm175_vm2, %v2756_v9  ;;  %v2941_v20 = vpop.permute.xlu1 %2940  ;;  %v2843_v9 = vld [vmem:[#allocation3 + $0xb8] sm:$0xff] }
 0x4ac   : > { %v3078_v15 = vadd.f32 %v2941_v20, %v2838_v59 }
 0x4ae   : > { %3126 = vst.msk [vmem:[#allocation3 + $0x78] sm:$0xff] %vm175_vm2, %v3078_v15 }
 0x4b0   : > { %v7997_v56 = vpop.f32.mrf.mxu1 }
 0x4b1   : > { %v2757_v21 = vadd.f32 %v2709_v60, %v7997_v56  ;;  %2970 = vrot.lane.b32.xlu1 %v7997_v56, %s6195_s22  ;;  %v2714_v60 = vld [vmem:[#allocation3 + $0x190] sm:$0xff] }
 0x4b3   : > { %2805 = vst.msk [vmem:[#allocation3 + $0x150] sm:$0xff] %vm175_vm2, %v2757_v21  ;;  %v2949_v0 = vpop.permute.xlu2 %2948 }
 0x4b4   : > { %v3082_v4 = vadd.f32 %v2949_v0, %v2842_v33  ;;  %v2844_v33 = vld [vmem:[#allocation3 + $0xd8] sm:$0xff] }
 0x4b6   : > { %3130 = vst.msk [vmem:[#allocation3 + $0xb0] sm:$0xff] %vm175_vm2, %v3082_v4 }
 0x4b8   : > { %v8004_v13 = vpop.f32.mrf.mxu1 }
 0x4b9   : > { %v2758_v11 = vadd.f32 %v2710_v54, %v8004_v13  ;;  %2972 = vrot.lane.b32.xlu2 %v8004_v13, %s6195_s22 }
 0x4bb   : > { %2806 = vst.msk [vmem:[#allocation3 + $0x158] sm:$0xff] %vm175_vm2, %v2758_v11  ;;  %v2945_v51 = vpop.permute.xlu0 %2944  ;;  %v2715_v11 = vld [vmem:[#allocation3 + $0x1b0] sm:$0xff] }
 0x4bc   : > { %v3080_v40 = vadd.f32 %v2945_v51, %v2840_v47  ;;  %v2848_v51 = vld [vmem:[#allocation3 + $0x110] sm:$0xff] }
 0x4be   : > { %3128 = vst.msk [vmem:[#allocation3 + $0x88] sm:$0xff] %vm175_vm2, %v3080_v40 }
 0x4c0   : > { %v8011_v44 = vpop.f32.mrf.mxu1 }
 0x4c1   : > { %v2759_v23 = vadd.f32 %v2711_v27, %v8011_v44  ;;  %2974 = vrot.lane.b32.xlu0 %v8011_v44, %s6195_s22 }
 0x4c3   : > { %2807 = vst.msk [vmem:[#allocation3 + $0x160] sm:$0xff] %vm175_vm2, %v2759_v23  ;;  %v2947_v39 = vpop.permute.xlu1 %2946 }
 0x4c4   : > { %v3081_v19 = vadd.f32 %v2947_v39, %v2841_v29  ;;  %v2716_v29 = vld [vmem:[#allocation3 + $0x1b8] sm:$0xff] }
 0x4c6   : > { %3129 = vst.msk [vmem:[#allocation3 + $0xa8] sm:$0xff] %vm175_vm2, %v3081_v19  ;;  %v2846_v19 = vld [vmem:[#allocation3 + $0xe8] sm:$0xff] }
 0x4c8   : > { %v8018_v48 = vpop.f32.mrf.mxu1 }
 0x4c9   : > { %v2760_v34 = vadd.f32 %v2712_v18, %v8018_v48  ;;  %2976 = vrot.lane.b32.xlu1 %v8018_v48, %s6195_s22 }
 0x4cb   : > { %2808 = vst.msk [vmem:[#allocation3 + $0x180] sm:$0xff] %vm175_vm2, %v2760_v34  ;;  %v2955_v5 = vpop.permute.xlu2 %2954 }
 0x4cc   : > { %v3085_v45 = vadd.f32 %v2955_v5, %v2845_v3  ;;  %v2717_v5 = vld [vmem:[#allocation3 + $0x1c0] sm:$0xff] }
 0x4ce   : > { %3133 = vst.msk [vmem:[#allocation3 + $0xe0] sm:$0xff] %vm175_vm2, %v3085_v45 }
 0x4d0   : > { %v8025_v36 = vpop.f32.mrf.mxu1 }
 0x4d1   : > { %v2761_v24 = vadd.f32 %v2713_v12, %v8025_v36  ;;  %2978 = vrot.lane.b32.xlu2 %v8025_v36, %s6195_s22  ;;  %v2847_v12 = vld [vmem:[#allocation3 + $0x108] sm:$0xff] }
 0x4d3   : > { %2809 = vst.msk [vmem:[#allocation3 + $0x188] sm:$0xff] %vm175_vm2, %v2761_v24  ;;  %v2951_v59 = vpop.permute.xlu0 %2950 }
 0x4d4   : > { %v3083_v20 = vadd.f32 %v2951_v59, %v2843_v9 }
 0x4d6   : > { %3131 = vst.msk [vmem:[#allocation3 + $0xb8] sm:$0xff] %vm175_vm2, %v3083_v20  ;;  %v2718_v20 = vld [vmem:[#allocation3 + $0x1e0] sm:$0xff] }
 0x4d8   : > { %v8032_v15 = vpop.f32.mrf.mxu1 }
 0x4d9   : > { %v2762_v21 = vadd.f32 %v2714_v60, %v8032_v15  ;;  %2980 = vrot.lane.b32.xlu0 %v8032_v15, %s6195_s22 }
 0x4db   : > { %2810 = vst.msk [vmem:[#allocation3 + $0x190] sm:$0xff] %vm175_vm2, %v2762_v21  ;;  %v2953_v0 = vpop.permute.xlu1 %2952  ;;  %v2851_v21 = vld [vmem:[#allocation3 + $0x140] sm:$0xff] }
 0x4dc   : > { %v3084_v4 = vadd.f32 %v2953_v0, %v2844_v33 }
 0x4de   : > { %3132 = vst.msk [vmem:[#allocation3 + $0xd8] sm:$0xff] %vm175_vm2, %v3084_v4 }
 0x4e0   : > { %v8039_v54 = vpop.f32.mrf.mxu1 }
 0x4e1   : > { %v2763_v47 = vadd.f32 %v2715_v11, %v8039_v54  ;;  %2982 = vrot.lane.b32.xlu1 %v8039_v54, %s6195_s22  ;;  %v2719_v11 = vld [vmem:[#allocation3 + $0x1e8] sm:$0xff] }
 0x4e3   : > { %2811 = vst.msk [vmem:[#allocation3 + $0x1b0] sm:$0xff] %vm175_vm2, %v2763_v47  ;;  %v2961_v40 = vpop.permute.xlu2 %2960 }
 0x4e4   : > { %v3088_v27 = vadd.f32 %v2961_v40, %v2848_v51  ;;  %v2849_v51 = vld [vmem:[#allocation3 + $0x118] sm:$0xff] }
 0x4e6   : > { %3136 = vst.msk [vmem:[#allocation3 + $0x110] sm:$0xff] %vm175_vm2, %v3088_v27 }
 0x4e8   : > { %v8046_v23 = vpop.f32.mrf.mxu1 }
 0x4e9   : > { %v2764_v39 = vadd.f32 %v2716_v29, %v8046_v23  ;;  %2984 = vrot.lane.b32.xlu2 %v8046_v23, %s6195_s22 }
 0x4eb   : > { %2812 = vst.msk [vmem:[#allocation3 + $0x1b8] sm:$0xff] %vm175_vm2, %v2764_v39  ;;  %v2957_v18 = vpop.permute.xlu0 %2956  ;;  %v2720_v39 = vld [vmem:[#allocation3 + $0x1f0] sm:$0xff] }
 0x4ec   : > { %v3086_v34 = vadd.f32 %v2957_v18, %v2846_v19  ;;  %v2850_v18 = vld [vmem:[#allocation3 + $0x138] sm:$0xff] }
 0x4ee   : > { %3134 = vst.msk [vmem:[#allocation3 + $0xe8] sm:$0xff] %vm175_vm2, %v3086_v34 }
 0x4f0   : > { %v8053_v3 = vpop.f32.mrf.mxu1 }
 0x4f1   : > { %v2765_v45 = vadd.f32 %v2717_v5, %v8053_v3  ;;  %2986 = vrot.lane.b32.xlu0 %v8053_v3, %s6195_s22 }
 0x4f3   : > { %2813 = vst.msk [vmem:[#allocation3 + $0x1c0] sm:$0xff] %vm175_vm2, %v2765_v45  ;;  %v2959_v24 = vpop.permute.xlu1 %2958 }
 0x4f4   : > { %v3087_v9 = vadd.f32 %v2959_v24, %v2847_v12  ;;  %v2721_v12 = vld [vmem:[#allocation3 + $0x210] sm:$0xff] }
 0x4f6   : > { %3135 = vst.msk [vmem:[#allocation3 + $0x108] sm:$0xff] %vm175_vm2, %v3087_v9  ;;  %v2854_v9 = vld [vmem:[#allocation3 + $0x170] sm:$0xff] }
 0x4f8   : > { %v8060_v59 = vpop.f32.mrf.mxu1 }
 0x4f9   : > { %v2766_v60 = vadd.f32 %v2718_v20, %v8060_v59  ;;  %2988 = vrot.lane.b32.xlu1 %v8060_v59, %s6195_s22 }
 0x4fb   : > { %2814 = vst.msk [vmem:[#allocation3 + $0x1e0] sm:$0xff] %vm175_vm2, %v2766_v60  ;;  %v2967_v33 = vpop.permute.xlu2 %2966 }
 0x4fc   : > { %v3091_v0 = vadd.f32 %v2967_v33, %v2851_v21  ;;  %v2722_v33 = vld [vmem:[#allocation3 + $0x218] sm:$0xff] }
 0x4fe   : > { %3139 = vst.msk [vmem:[#allocation3 + $0x140] sm:$0xff] %vm175_vm2, %v3091_v0 }
 0x500   : > { %v8067_v4 = vpop.f32.mrf.mxu1 }
 0x501   : > { %v2767_v47 = vadd.f32 %v2719_v11, %v8067_v4  ;;  %2990 = vrot.lane.b32.xlu2 %v8067_v4, %s6195_s22  ;;  %v2852_v11 = vld [vmem:[#allocation3 + $0x148] sm:$0xff] }
 0x503   : > { %2815 = vst.msk [vmem:[#allocation3 + $0x1e8] sm:$0xff] %vm175_vm2, %v2767_v47  ;;  %v2963_v40 = vpop.permute.xlu0 %2962 }
 0x504   : > { %v3089_v27 = vadd.f32 %v2963_v40, %v2849_v51 }
 0x506   : > { %3137 = vst.msk [vmem:[#allocation3 + $0x118] sm:$0xff] %vm175_vm2, %v3089_v27  ;;  %v2723_v27 = vld [vmem:[#allocation3 + $0x220] sm:$0xff] }
 0x508   : > { %v8074_v29 = vpop.f32.mrf.mxu1 }
 0x509   : > { %v2768_v19 = vadd.f32 %v2720_v39, %v8074_v29  ;;  %2992 = vrot.lane.b32.xlu0 %v8074_v29, %s6195_s22 }
 0x50b   : > { %2816 = vst.msk [vmem:[#allocation3 + $0x1f0] sm:$0xff] %vm175_vm2, %v2768_v19  ;;  %v2965_v34 = vpop.permute.xlu1 %2964  ;;  %v2853_v19 = vld [vmem:[#allocation3 + $0x168] sm:$0xff] }
 0x50c   : > { %v3090_v5 = vadd.f32 %v2965_v34, %v2850_v18 }
 0x50e   : > { %3138 = vst.msk [vmem:[#allocation3 + $0x138] sm:$0xff] %vm175_vm2, %v3090_v5  ;;  %v2857_v5 = vld [vmem:[#allocation3 + $0x1a0] sm:$0xff] }
 0x510   : > { %v8081_v45 = vpop.f32.mrf.mxu1 }
 0x511   : > { %v2769_v24 = vadd.f32 %v2721_v12, %v8081_v45  ;;  %2994 = vrot.lane.b32.xlu1 %v8081_v45, %s6195_s22 }
 0x513   : > { %2817 = vst.msk [vmem:[#allocation3 + $0x210] sm:$0xff] %vm175_vm2, %v2769_v24  ;;  %v2973_v20 = vpop.permute.xlu2 %2972 }
 0x514   : > { %v3094_v60 = vadd.f32 %v2973_v20, %v2854_v9  ;;  %v2855_v9 = vld [vmem:[#allocation3 + $0x178] sm:$0xff] }
 0x516   : > { %3142 = vst.msk [vmem:[#allocation3 + $0x170] sm:$0xff] %vm175_vm2, %v3094_v60 }
 0x518   : > { %v8088_v21 = vpop.f32.mrf.mxu1 }
 0x519   : > { %v2770_v0 = vadd.f32 %v2722_v33, %v8088_v21  ;;  %3000 = vrot.lane.b32.xlu1 %v7783_v43, %s6195_s22  ;;  %2996 = vrot.lane.b32.xlu2 %v8088_v21, %s6195_s22  ;;  %v2856_v33 = vld [vmem:[#allocation3 + $0x198] sm:$0xff] }
 0x51b   : > { %2818 = vst.msk [vmem:[#allocation3 + $0x218] sm:$0xff] %vm175_vm2, %v2770_v0  ;;  %v2969_v47 = vpop.permute.xlu0 %2968 }
 0x51c   : > { %v3092_v51 = vadd.f32 %v2969_v47, %v2852_v11  ;;  %v2860_v47 = vld [vmem:[#allocation3 + $0x1d0] sm:$0xff] }
 0x51e   : > { %3140 = vst.msk [vmem:[#allocation3 + $0x148] sm:$0xff] %vm175_vm2, %v3092_v51 }
 0x520   : > { %v8097_v40 = vpop.f32.mrf.mxu1 }
 0x521   : > { %v2771_v39 = vadd.f32 %v2723_v27, %v8097_v40  ;;  %2998 = vrot.lane.b32.xlu0 %v8097_v40, %s6195_s22  ;;  %3006 = vrot.lane.b32.xlu1 %v7820_v50, %s6195_s22 }
 0x522   : > { %3002 = vrot.lane.b32.xlu2 %v7796_v42, %s6195_s22 }
 0x523   : > { %2819 = vst.msk [vmem:[#allocation3 + $0x220] sm:$0xff] %vm175_vm2, %v2771_v39  ;;  %v2971_v18 = vpop.permute.xlu1 %2970  ;;  %v2858_v39 = vld [vmem:[#allocation3 + $0x1a8] sm:$0xff] }
 0x524   : > { %v3093_v34 = vadd.f32 %v2971_v18, %v2853_v19 }
 0x526   : > { %3141 = vst.msk [vmem:[#allocation3 + $0x168] sm:$0xff] %vm175_vm2, %v3093_v34  ;;  %v2859_v34 = vld [vmem:[#allocation3 + $0x1c8] sm:$0xff] }
 0x529   : > { %3004 = vrot.lane.b32.xlu0 %v7807_v6, %s6195_s22  ;;  %3012 = vrot.lane.b32.xlu1 %v7857_v38, %s6195_s22 }
 0x52a   : > { %3008 = vrot.lane.b32.xlu2 %v7833_v53, %s6195_s22 }
 0x52b   : > { %v2979_v12 = vpop.permute.xlu2 %2978 }
 0x52c   : > { %v3097_v24 = vadd.f32 %v2979_v12, %v2857_v5 }
 0x52e   : > { %3145 = vst.msk [vmem:[#allocation3 + $0x1a0] sm:$0xff] %vm175_vm2, %v3097_v24  ;;  %v2863_v24 = vld [vmem:[#allocation3 + $0x200] sm:$0xff] }
 0x531   : > { %3010 = vrot.lane.b32.xlu0 %v7844_v7, %s6195_s22  ;;  %3018 = vrot.lane.b32.xlu1 %v7895_v31, %s6195_s22 }
 0x532   : > { %3014 = vrot.lane.b32.xlu2 %v7870_v57, %s6195_s22 }
 0x533   : > { %v2975_v20 = vpop.permute.xlu0 %2974 }
 0x534   : > { %v3095_v60 = vadd.f32 %v2975_v20, %v2855_v9 }
 0x536   : > { %3143 = vst.msk [vmem:[#allocation3 + $0x178] sm:$0xff] %vm175_vm2, %v3095_v60  ;;  %v2861_v60 = vld [vmem:[#allocation3 + $0x1d8] sm:$0xff] }
 0x539   : > { %3016 = vrot.lane.b32.xlu0 %v7882_v28, %s6195_s22  ;;  %3216 = vrot.lane.b32.xlu1 %v7774_v37, %s6196_s23 }
 0x53a   : > { %3020 = vrot.lane.b32.xlu2 %v7908_v16, %s6195_s22 }
 0x53b   : > { %v2977_v0 = vpop.permute.xlu1 %2976 }
 0x53c   : > { %v3096_v11 = vadd.f32 %v2977_v0, %v2856_v33 }
 0x53e   : > { %3144 = vst.msk [vmem:[#allocation3 + $0x198] sm:$0xff] %vm175_vm2, %v3096_v11  ;;  %v2862_v11 = vld [vmem:[#allocation3 + $0x1f8] sm:$0xff] }
 0x541   : > { %3022 = vrot.lane.b32.xlu0 %v7919_v1, %s6195_s22  ;;  %3222 = vrot.lane.b32.xlu1 %v7810_v17, %s6196_s23 }
 0x542   : > { %3218 = vrot.lane.b32.xlu2 %v7786_v52, %s6196_s23 }
 0x543   : > { %v2985_v51 = vpop.permute.xlu2 %2984 }
 0x544   : > { %v3100_v27 = vadd.f32 %v2985_v51, %v2860_v47 }
 0x546   : > { %3148 = vst.msk [vmem:[#allocation3 + $0x1d0] sm:$0xff] %vm175_vm2, %v3100_v27  ;;  %v2866_v27 = vld [vmem:[#allocation3 + $0x230] sm:$0xff] }
 0x549   : > { %3220 = vrot.lane.b32.xlu0 %v7799_v62, %s6196_s23  ;;  %3228 = vrot.lane.b32.xlu1 %v7847_v30, %s6196_s23 }
 0x54a   : > { %3224 = vrot.lane.b32.xlu2 %v7823_v61, %s6196_s23 }
 0x54b   : > { %v2981_v19 = vpop.permute.xlu0 %2980 }
 0x54c   : > { %v3098_v18 = vadd.f32 %v2981_v19, %v2858_v39 }
 0x54e   : > { %3146 = vst.msk [vmem:[#allocation3 + $0x1a8] sm:$0xff] %vm175_vm2, %v3098_v18  ;;  %v2864_v18 = vld [vmem:[#allocation3 + $0x208] sm:$0xff] }
 0x551   : > { %3226 = vrot.lane.b32.xlu0 %v7836_v55, %s6196_s23  ;;  %3234 = vrot.lane.b32.xlu1 %v7885_v2, %s6196_s23 }
 0x552   : > { %3230 = vrot.lane.b32.xlu2 %v7860_v8, %s6196_s23 }
 0x553   : > { %v2983_v5 = vpop.permute.xlu1 %2982 }
 0x554   : > { %v3099_v12 = vadd.f32 %v2983_v5, %v2859_v34 }
 0x556   : > { %3147 = vst.msk [vmem:[#allocation3 + $0x1c8] sm:$0xff] %vm175_vm2, %v3099_v12  ;;  %v2869_v12 = vld [vmem:[#allocation3 + $0x260] sm:$0xff] }
 0x559   : > { %3232 = vrot.lane.b32.xlu0 %v7874_v58, %s6196_s23  ;;  %3240 = vrot.lane.b32.xlu1 %v7922_v22, %s6196_s23 }
 0x55a   : > { %3236 = vrot.lane.b32.xlu2 %v7898_v46, %s6196_s23 }
 0x55b   : > { %v2991_v9 = vpop.permute.xlu2 %2990 }
 0x55c   : > { %v3103_v20 = vadd.f32 %v2991_v9, %v2863_v24 }
 0x55e   : > { %3151 = vst.msk [vmem:[#allocation3 + $0x200] sm:$0xff] %vm175_vm2, %v3103_v20  ;;  %v2865_v20 = vld [vmem:[#allocation3 + $0x228] sm:$0xff] }
 0x561   : > { %3238 = vrot.lane.b32.xlu0 %v7911_v25, %s6196_s23  ;;  %3246 = vrot.lane.b32.xlu1 %v7950_v41, %s6196_s23 }
 0x562   : > { %3242 = vrot.lane.b32.xlu2 %v7933_v35, %s6196_s23 }
 0x563   : > { %v2987_v33 = vpop.permute.xlu0 %2986 }
 0x564   : > { %v3101_v0 = vadd.f32 %v2987_v33, %v2861_v60 }
 0x566   : > { %3149 = vst.msk [vmem:[#allocation3 + $0x1d8] sm:$0xff] %vm175_vm2, %v3101_v0  ;;  %v2872_v0 = vld [vmem:[#allocation3 + $0x290] sm:$0xff] }
 0x569   : > { %3244 = vrot.lane.b32.xlu0 %v7942_v49, %s6196_s23  ;;  %3252 = vrot.lane.b32.xlu1 %v7974_v14, %s6196_s23 }
 0x56a   : > { %3248 = vrot.lane.b32.xlu2 %v7958_v63, %s6196_s23 }
 0x56b   : > { %v2989_v47 = vpop.permute.xlu1 %2988 }
 0x56c   : > { %v3102_v51 = vadd.f32 %v2989_v47, %v2862_v11 }
 0x56e   : > { %3150 = vst.msk [vmem:[#allocation3 + $0x1f8] sm:$0xff] %vm175_vm2, %v3102_v51  ;;  %v2868_v51 = vld [vmem:[#allocation3 + $0x258] sm:$0xff] }
 0x571   : > { %3250 = vrot.lane.b32.xlu0 %v7966_v26, %s6196_s23  ;;  %3258 = vrot.lane.b32.xlu1 %v7997_v56, %s6196_s23 }
 0x572   : > { %3254 = vrot.lane.b32.xlu2 %v7982_v32, %s6196_s23 }
 0x573   : > { %v2997_v39 = vpop.permute.xlu2 %2996 }
 0x574   : > { %v3106_v19 = vadd.f32 %v2997_v39, %v2866_v27 }
 0x576   : > { %3154 = vst.msk [vmem:[#allocation3 + $0x230] sm:$0xff] %vm175_vm2, %v3106_v19  ;;  %v2875_v19 = vld [vmem:[#allocation3 + $0x2c0] sm:$0xff] }
 0x579   : > { %3256 = vrot.lane.b32.xlu0 %v7990_v10, %s6196_s23  ;;  %3264 = vrot.lane.b32.xlu1 %v8018_v48, %s6196_s23 }
 0x57a   : > { %3260 = vrot.lane.b32.xlu2 %v8004_v13, %s6196_s23 }
 0x57b   : > { %v2993_v34 = vpop.permute.xlu0 %2992 }
 0x57c   : > { %v3104_v5 = vadd.f32 %v2993_v34, %v2864_v18  ;;  %v3003_v24 = vpop.permute.xlu2 %3002 }
 0x57d   : > { %v3109_v9 = vadd.f32 %v3003_v24, %v2869_v12  ;;  %v2867_v12 = vld [vmem:[#allocation3 + $0x238] sm:$0xff]  ;;  %v2871_v24 = vld [vmem:[#allocation3 + $0x288] sm:$0xff] }
 0x57e   : > { %3152 = vst.msk [vmem:[#allocation3 + $0x208] sm:$0xff] %vm175_vm2, %v3104_v5 }
 0x57f   : > { %3157 = vst.msk [vmem:[#allocation3 + $0x260] sm:$0xff] %vm175_vm2, %v3109_v9 }
 0x581   : > { %3262 = vrot.lane.b32.xlu0 %v8011_v44, %s6196_s23  ;;  %3270 = vrot.lane.b32.xlu1 %v8039_v54, %s6196_s23 }
 0x582   : > { %3266 = vrot.lane.b32.xlu2 %v8025_v36, %s6196_s23 }
 0x583   : > { %v2995_v60 = vpop.permute.xlu1 %2994 }
 0x584   : > { %v3105_v33 = vadd.f32 %v2995_v60, %v2865_v20  ;;  %v3009_v11 = vpop.permute.xlu2 %3008 }
 0x585   : > { %v3112_v47 = vadd.f32 %v3009_v11, %v2872_v0 }
 0x586   : > { %3153 = vst.msk [vmem:[#allocation3 + $0x228] sm:$0xff] %vm175_vm2, %v3105_v33  ;;  %v2878_v33 = vld [vmem:[#allocation3 + $0x2f0] sm:$0xff] }
 0x587   : > { %3160 = vst.msk [vmem:[#allocation3 + $0x290] sm:$0xff] %vm175_vm2, %v3112_v47 }
 0x589   : > { %3268 = vrot.lane.b32.xlu0 %v8032_v15, %s6196_s23  ;;  %3276 = vrot.lane.b32.xlu1 %v8060_v59, %s6196_s23 }
 0x58a   : > { %3272 = vrot.lane.b32.xlu2 %v8046_v23, %s6196_s23 }
 0x58b   : > { %v3001_v27 = vpop.permute.xlu1 %3000 }
 0x58c   : > { %v3108_v39 = vadd.f32 %v3001_v27, %v2868_v51  ;;  %v3015_v18 = vpop.permute.xlu2 %3014  ;;  %v2870_v51 = vld [vmem:[#allocation3 + $0x268] sm:$0xff]  ;;  %v2874_v27 = vld [vmem:[#allocation3 + $0x2b8] sm:$0xff] }
 0x58d   : > { %v3115_v34 = vadd.f32 %v3015_v18, %v2875_v19 }
 0x58e   : > { %3156 = vst.msk [vmem:[#allocation3 + $0x258] sm:$0xff] %vm175_vm2, %v3108_v39 }
 0x58f   : > { %3163 = vst.msk [vmem:[#allocation3 + $0x2c0] sm:$0xff] %vm175_vm2, %v3115_v34  ;;  %v3169_v34 = vld [vmem:[#allocation3 + $0x38] sm:$0xff] }
 0x591   : > { %3274 = vrot.lane.b32.xlu0 %v8053_v3, %s6196_s23  ;;  %3282 = vrot.lane.b32.xlu1 %v8081_v45, %s6196_s23 }
 0x592   : > { %3278 = vrot.lane.b32.xlu2 %v8067_v4, %s6196_s23 }
 0x593   : > { %v2999_v5 = vpop.permute.xlu0 %2998  ;;  %v3007_v9 = vpop.permute.xlu1 %3006 }
 0x594   : > { %v3107_v20 = vadd.f32 %v2999_v5, %v2867_v12  ;;  %v3111_v60 = vadd.f32 %v3007_v9, %v2871_v24  ;;  %v3021_v0 = vpop.permute.xlu2 %3020  ;;  %v2873_v24 = vld [vmem:[#allocation3 + $0x298] sm:$0xff] }
 0x595   : > { %v3118_v11 = vadd.f32 %v3021_v0, %v2878_v33 }
 0x596   : > { %3155 = vst.msk [vmem:[#allocation3 + $0x238] sm:$0xff] %vm175_vm2, %v3107_v20  ;;  %v2877_v20 = vld [vmem:[#allocation3 + $0x2e8] sm:$0xff] }
 0x597   : > { %3159 = vst.msk [vmem:[#allocation3 + $0x288] sm:$0xff] %vm175_vm2, %v3111_v60 }
 0x598   : > { %3166 = vst.msk [vmem:[#allocation3 + $0x2f0] sm:$0xff] %vm175_vm2, %v3118_v11  ;;  %v3172_v11 = vld [vmem:[#allocation3 + $0x68] sm:$0xff] }
 0x599   : > { %3280 = vrot.lane.b32.xlu0 %v8074_v29, %s6196_s23  ;;  %3288 = vrot.lane.b32.xlu1 %v7783_v43, %s6196_s23 }
 0x59a   : > { %3284 = vrot.lane.b32.xlu2 %v8088_v21, %s6196_s23 }
 0x59b   : > { %v3005_v47 = vpop.permute.xlu0 %3004  ;;  %v3013_v39 = vpop.permute.xlu1 %3012 }
 0x59c   : > { %v3110_v19 = vadd.f32 %v3005_v47, %v2870_v51  ;;  %v3114_v18 = vadd.f32 %v3013_v39, %v2874_v27  ;;  %v3219_v5 = vpop.permute.xlu2 %3218  ;;  %v2876_v27 = vld [vmem:[#allocation3 + $0x2c8] sm:$0xff] }
 0x59d   : > { %v3361_v12 = vadd.f32 %v3219_v5, %v3169_v34 }
 0x59e   : > { %3158 = vst.msk [vmem:[#allocation3 + $0x268] sm:$0xff] %vm175_vm2, %v3110_v19  ;;  %v3168_v19 = vld [vmem:[#allocation3 + $0x30] sm:$0xff] }
 0x59f   : > { %3162 = vst.msk [vmem:[#allocation3 + $0x2b8] sm:$0xff] %vm175_vm2, %v3114_v18 }
 0x5a0   : > { %3409 = vst.msk [vmem:[#allocation3 + $0x38] sm:$0xff] %vm175_vm2, %v3361_v12  ;;  %v3175_v12 = vld [vmem:[#allocation3 + $0x98] sm:$0xff] }
 0x5a1   : > { %3286 = vrot.lane.b32.xlu0 %v8097_v40, %s6196_s23  ;;  %3294 = vrot.lane.b32.xlu1 %v7820_v50, %s6196_s23 }
 0x5a2   : > { %3290 = vrot.lane.b32.xlu2 %v7796_v42, %s6196_s23 }
 0x5a3   : > { %v3011_v9 = vpop.permute.xlu0 %3010  ;;  %v3019_v60 = vpop.permute.xlu1 %3018 }
 0x5a4   : > { %v3113_v33 = vadd.f32 %v3011_v9, %v2873_v24  ;;  %v3117_v0 = vadd.f32 %v3019_v60, %v2877_v20  ;;  %v3225_v47 = vpop.permute.xlu2 %3224  ;;  %v2879_v20 = vld [vmem:[#allocation3 + $0x2f8] sm:$0xff] }
 0x5a5   : > { %v3364_v51 = vadd.f32 %v3225_v47, %v3172_v11 }
 0x5a6   : > { %3161 = vst.msk [vmem:[#allocation3 + $0x298] sm:$0xff] %vm175_vm2, %v3113_v33  ;;  %v3171_v33 = vld [vmem:[#allocation3 + $0x60] sm:$0xff] }
 0x5a7   : > { %3165 = vst.msk [vmem:[#allocation3 + $0x2e8] sm:$0xff] %vm175_vm2, %v3117_v0 }
 0x5a8   : > { %3412 = vst.msk [vmem:[#allocation3 + $0x68] sm:$0xff] %vm175_vm2, %v3364_v51  ;;  %v3178_v51 = vld [vmem:[#allocation3 + $0xc8] sm:$0xff] }
 0x5a9   : > { %3292 = vrot.lane.b32.xlu0 %v7807_v6, %s6196_s23  ;;  %3300 = vrot.lane.b32.xlu1 %v7857_v38, %s6196_s23 }
 0x5aa   : > { %3296 = vrot.lane.b32.xlu2 %v7833_v53, %s6196_s23 }
 0x5ab   : > { %v3017_v39 = vpop.permute.xlu0 %3016  ;;  %v3217_v18 = vpop.permute.xlu1 %3216 }
 0x5ac   : > { %v3116_v34 = vadd.f32 %v3017_v39, %v2876_v27  ;;  %v3360_v5 = vadd.f32 %v3217_v18, %v3168_v19  ;;  %v3231_v24 = vpop.permute.xlu2 %3230  ;;  %v3170_v19 = vld [vmem:[#allocation3 + $0x40] sm:$0xff] }
 0x5ad   : > { %v3367_v9 = vadd.f32 %v3231_v24, %v3175_v12 }
 0x5ae   : > { %3164 = vst.msk [vmem:[#allocation3 + $0x2c8] sm:$0xff] %vm175_vm2, %v3116_v34  ;;  %v3174_v34 = vld [vmem:[#allocation3 + $0x90] sm:$0xff] }
 0x5af   : > { %3408 = vst.msk [vmem:[#allocation3 + $0x30] sm:$0xff] %vm175_vm2, %v3360_v5 }
 0x5b0   : > { %3415 = vst.msk [vmem:[#allocation3 + $0x98] sm:$0xff] %vm175_vm2, %v3367_v9  ;;  %v3181_v9 = vld [vmem:[#allocation3 + $0xf8] sm:$0xff] }
 0x5b1   : > { %3298 = vrot.lane.b32.xlu0 %v7844_v7, %s6196_s23  ;;  %3306 = vrot.lane.b32.xlu1 %v7895_v31, %s6196_s23 }
 0x5b2   : > { %3302 = vrot.lane.b32.xlu2 %v7870_v57, %s6196_s23 }
 0x5b3   : > { %v3023_v60 = vpop.permute.xlu0 %3022  ;;  %v3223_v0 = vpop.permute.xlu1 %3222 }
 0x5b4   : > { %v3119_v11 = vadd.f32 %v3023_v60, %v2879_v20  ;;  %v3363_v47 = vadd.f32 %v3223_v0, %v3171_v33  ;;  %v3237_v27 = vpop.permute.xlu2 %3236  ;;  %v3173_v33 = vld [vmem:[#allocation3 + $0x70] sm:$0xff] }
 0x5b5   : > { %v3370_v39 = vadd.f32 %v3237_v27, %v3178_v51 }
 0x5b6   : > { %3167 = vst.msk [vmem:[#allocation3 + $0x2f8] sm:$0xff] %vm175_vm2, %v3119_v11  ;;  %v3177_v11 = vld [vmem:[#allocation3 + $0xc0] sm:$0xff] }
 0x5b7   : > { %3411 = vst.msk [vmem:[#allocation3 + $0x60] sm:$0xff] %vm175_vm2, %v3363_v47 }
 0x5b8   : > { %3418 = vst.msk [vmem:[#allocation3 + $0xc8] sm:$0xff] %vm175_vm2, %v3370_v39  ;;  %v3184_v39 = vld [vmem:[#allocation3 + $0x128] sm:$0xff] }
 0x5b9   : > { %3304 = vrot.lane.b32.xlu0 %v7882_v28, %s6196_s23  ;;  %3504 = vrot.lane.b32.xlu1 %v7774_v37, %s6197_s24 }
 0x5ba   : > { %3308 = vrot.lane.b32.xlu2 %v7908_v16, %s6196_s23 }
 0x5bb   : > { %v3221_v18 = vpop.permute.xlu0 %3220  ;;  %v3229_v5 = vpop.permute.xlu1 %3228 }
 0x5bc   : > { %v3362_v12 = vadd.f32 %v3221_v18, %v3170_v19  ;;  %v3366_v24 = vadd.f32 %v3229_v5, %v3174_v34  ;;  %v3243_v20 = vpop.permute.xlu2 %3242  ;;  %v3176_v34 = vld [vmem:[#allocation3 + $0xa0] sm:$0xff] }
 0x5bd   : > { %v3373_v60 = vadd.f32 %v3243_v20, %v3181_v9 }
 0x5be   : > { %3410 = vst.msk [vmem:[#allocation3 + $0x40] sm:$0xff] %vm175_vm2, %v3362_v12  ;;  %v3180_v12 = vld [vmem:[#allocation3 + $0xf0] sm:$0xff] }
 0x5bf   : > { %3414 = vst.msk [vmem:[#allocation3 + $0x90] sm:$0xff] %vm175_vm2, %v3366_v24 }
 0x5c0   : > { %3421 = vst.msk [vmem:[#allocation3 + $0xf8] sm:$0xff] %vm175_vm2, %v3373_v60  ;;  %v3187_v60 = vld [vmem:[#allocation3 + $0x158] sm:$0xff] }
 0x5c1   : > { %3310 = vrot.lane.b32.xlu0 %v7919_v1, %s6196_s23  ;;  %3510 = vrot.lane.b32.xlu1 %v7810_v17, %s6197_s24 }
 0x5c2   : > { %3506 = vrot.lane.b32.xlu2 %v7786_v52, %s6197_s24 }
 0x5c3   : > { %v3227_v0 = vpop.permute.xlu0 %3226  ;;  %v3235_v47 = vpop.permute.xlu1 %3234 }
 0x5c4   : > { %v3365_v51 = vadd.f32 %v3227_v0, %v3173_v33  ;;  %v3369_v27 = vadd.f32 %v3235_v47, %v3177_v11  ;;  %v3249_v19 = vpop.permute.xlu2 %3248  ;;  %v3179_v11 = vld [vmem:[#allocation3 + $0xd0] sm:$0xff] }
 0x5c5   : > { %v3376_v18 = vadd.f32 %v3249_v19, %v3184_v39 }
 0x5c6   : > { %3413 = vst.msk [vmem:[#allocation3 + $0x70] sm:$0xff] %vm175_vm2, %v3365_v51  ;;  %v3183_v51 = vld [vmem:[#allocation3 + $0x120] sm:$0xff] }
 0x5c7   : > { %3417 = vst.msk [vmem:[#allocation3 + $0xc0] sm:$0xff] %vm175_vm2, %v3369_v27 }
 0x5c8   : > { %3424 = vst.msk [vmem:[#allocation3 + $0x128] sm:$0xff] %vm175_vm2, %v3376_v18  ;;  %v3190_v18 = vld [vmem:[#allocation3 + $0x188] sm:$0xff] }
 0x5c9   : > { %3508 = vrot.lane.b32.xlu0 %v7799_v62, %s6197_s24  ;;  %3516 = vrot.lane.b32.xlu1 %v7847_v30, %s6197_s24 }
 0x5ca   : > { %3512 = vrot.lane.b32.xlu2 %v7823_v61, %s6197_s24 }
 0x5cb   : > { %v3233_v5 = vpop.permute.xlu0 %3232  ;;  %v3241_v24 = vpop.permute.xlu1 %3240 }
 0x5cc   : > { %v3368_v9 = vadd.f32 %v3233_v5, %v3176_v34  ;;  %v3372_v20 = vadd.f32 %v3241_v24, %v3180_v12  ;;  %v3255_v33 = vpop.permute.xlu2 %3254  ;;  %v3182_v12 = vld [vmem:[#allocation3 + $0x100] sm:$0xff] }
 0x5cd   : > { %v3379_v0 = vadd.f32 %v3255_v33, %v3187_v60 }
 0x5ce   : > { %3416 = vst.msk [vmem:[#allocation3 + $0xa0] sm:$0xff] %vm175_vm2, %v3368_v9  ;;  %v3186_v9 = vld [vmem:[#allocation3 + $0x150] sm:$0xff] }
 0x5cf   : > { %3420 = vst.msk [vmem:[#allocation3 + $0xf0] sm:$0xff] %vm175_vm2, %v3372_v20 }
 0x5d0   : > { %3427 = vst.msk [vmem:[#allocation3 + $0x158] sm:$0xff] %vm175_vm2, %v3379_v0  ;;  %v3193_v0 = vld [vmem:[#allocation3 + $0x1b8] sm:$0xff] }
 0x5d1   : > { %3514 = vrot.lane.b32.xlu0 %v7836_v55, %s6197_s24  ;;  %3522 = vrot.lane.b32.xlu1 %v7885_v2, %s6197_s24 }
 0x5d2   : > { %3518 = vrot.lane.b32.xlu2 %v7860_v8, %s6197_s24 }
 0x5d3   : > { %v3239_v47 = vpop.permute.xlu0 %3238  ;;  %v3247_v27 = vpop.permute.xlu1 %3246 }
 0x5d4   : > { %v3371_v39 = vadd.f32 %v3239_v47, %v3179_v11  ;;  %v3375_v19 = vadd.f32 %v3247_v27, %v3183_v51  ;;  %v3261_v34 = vpop.permute.xlu2 %3260  ;;  %v3185_v51 = vld [vmem:[#allocation3 + $0x130] sm:$0xff] }
 0x5d5   : > { %v3382_v5 = vadd.f32 %v3261_v34, %v3190_v18 }
 0x5d6   : > { %3419 = vst.msk [vmem:[#allocation3 + $0xd0] sm:$0xff] %vm175_vm2, %v3371_v39  ;;  %v3189_v39 = vld [vmem:[#allocation3 + $0x180] sm:$0xff] }
 0x5d7   : > { %3423 = vst.msk [vmem:[#allocation3 + $0x120] sm:$0xff] %vm175_vm2, %v3375_v19 }
 0x5d8   : > { %3430 = vst.msk [vmem:[#allocation3 + $0x188] sm:$0xff] %vm175_vm2, %v3382_v5  ;;  %v3196_v5 = vld [vmem:[#allocation3 + $0x1e8] sm:$0xff] }
 0x5d9   : > { %3520 = vrot.lane.b32.xlu0 %v7874_v58, %s6197_s24  ;;  %3528 = vrot.lane.b32.xlu1 %v7922_v22, %s6197_s24 }
 0x5da   : > { %3524 = vrot.lane.b32.xlu2 %v7898_v46, %s6197_s24 }
 0x5db   : > { %v3245_v24 = vpop.permute.xlu0 %3244  ;;  %v3253_v20 = vpop.permute.xlu1 %3252 }
 0x5dc   : > { %v3374_v60 = vadd.f32 %v3245_v24, %v3182_v12  ;;  %v3378_v33 = vadd.f32 %v3253_v20, %v3186_v9  ;;  %v3267_v11 = vpop.permute.xlu2 %3266  ;;  %v3188_v20 = vld [vmem:[#allocation3 + $0x160] sm:$0xff] }
 0x5dd   : > { %v3385_v47 = vadd.f32 %v3267_v11, %v3193_v0 }
 0x5de   : > { %3422 = vst.msk [vmem:[#allocation3 + $0x100] sm:$0xff] %vm175_vm2, %v3374_v60  ;;  %v3192_v60 = vld [vmem:[#allocation3 + $0x1b0] sm:$0xff] }
 0x5df   : > { %3426 = vst.msk [vmem:[#allocation3 + $0x150] sm:$0xff] %vm175_vm2, %v3378_v33 }
 0x5e0   : > { %3433 = vst.msk [vmem:[#allocation3 + $0x1b8] sm:$0xff] %vm175_vm2, %v3385_v47  ;;  %v3199_v47 = vld [vmem:[#allocation3 + $0x218] sm:$0xff] }
 0x5e1   : > { %3526 = vrot.lane.b32.xlu0 %v7911_v25, %s6197_s24  ;;  %3534 = vrot.lane.b32.xlu1 %v7950_v41, %s6197_s24 }
 0x5e2   : > { %3530 = vrot.lane.b32.xlu2 %v7933_v35, %s6197_s24 }
 0x5e3   : > { %v3251_v27 = vpop.permute.xlu0 %3250  ;;  %v3259_v19 = vpop.permute.xlu1 %3258 }
 0x5e4   : > { %v3377_v18 = vadd.f32 %v3251_v27, %v3185_v51  ;;  %v3381_v34 = vadd.f32 %v3259_v19, %v3189_v39  ;;  %v3273_v12 = vpop.permute.xlu2 %3272  ;;  %v3191_v19 = vld [vmem:[#allocation3 + $0x190] sm:$0xff] }
 0x5e5   : > { %v3388_v24 = vadd.f32 %v3273_v12, %v3196_v5 }
 0x5e6   : > { %3425 = vst.msk [vmem:[#allocation3 + $0x130] sm:$0xff] %vm175_vm2, %v3377_v18  ;;  %v3195_v18 = vld [vmem:[#allocation3 + $0x1e0] sm:$0xff] }
 0x5e7   : > { %3429 = vst.msk [vmem:[#allocation3 + $0x180] sm:$0xff] %vm175_vm2, %v3381_v34 }
 0x5e8   : > { %3436 = vst.msk [vmem:[#allocation3 + $0x1e8] sm:$0xff] %vm175_vm2, %v3388_v24  ;;  %v3202_v24 = vld [vmem:[#allocation3 + $0x248] sm:$0xff] }
 0x5e9   : > { %3532 = vrot.lane.b32.xlu0 %v7942_v49, %s6197_s24  ;;  %3540 = vrot.lane.b32.xlu1 %v7974_v14, %s6197_s24 }
 0x5ea   : > { %3536 = vrot.lane.b32.xlu2 %v7958_v63, %s6197_s24 }
 0x5eb   : > { %v3257_v9 = vpop.permute.xlu0 %3256  ;;  %v3265_v33 = vpop.permute.xlu1 %3264 }
 0x5ec   : > { %v3380_v0 = vadd.f32 %v3257_v9, %v3188_v20  ;;  %v3384_v11 = vadd.f32 %v3265_v33, %v3192_v60  ;;  %v3279_v51 = vpop.permute.xlu2 %3278  ;;  %v3194_v33 = vld [vmem:[#allocation3 + $0x1c0] sm:$0xff] }
 0x5ed   : > { %v3391_v27 = vadd.f32 %v3279_v51, %v3199_v47 }
 0x5ee   : > { %3428 = vst.msk [vmem:[#allocation3 + $0x160] sm:$0xff] %vm175_vm2, %v3380_v0  ;;  %v3198_v0 = vld [vmem:[#allocation3 + $0x210] sm:$0xff] }
 0x5ef   : > { %3432 = vst.msk [vmem:[#allocation3 + $0x1b0] sm:$0xff] %vm175_vm2, %v3384_v11 }
 0x5f0   : > { %3439 = vst.msk [vmem:[#allocation3 + $0x218] sm:$0xff] %vm175_vm2, %v3391_v27  ;;  %v3205_v27 = vld [vmem:[#allocation3 + $0x278] sm:$0xff] }
 0x5f1   : > { %3538 = vrot.lane.b32.xlu0 %v7966_v26, %s6197_s24  ;;  %3546 = vrot.lane.b32.xlu1 %v7997_v56, %s6197_s24 }
 0x5f2   : > { %3542 = vrot.lane.b32.xlu2 %v7982_v32, %s6197_s24 }
 0x5f3   : > { %v3263_v39 = vpop.permute.xlu0 %3262  ;;  %v3271_v34 = vpop.permute.xlu1 %3270 }
 0x5f4   : > { %v3383_v5 = vadd.f32 %v3263_v39, %v3191_v19  ;;  %v3387_v12 = vadd.f32 %v3271_v34, %v3195_v18  ;;  %v3285_v9 = vpop.permute.xlu2 %3284  ;;  %v3197_v34 = vld [vmem:[#allocation3 + $0x1f0] sm:$0xff] }
 0x5f5   : > { %v3394_v20 = vadd.f32 %v3285_v9, %v3202_v24 }
 0x5f6   : > { %3431 = vst.msk [vmem:[#allocation3 + $0x190] sm:$0xff] %vm175_vm2, %v3383_v5  ;;  %v3201_v5 = vld [vmem:[#allocation3 + $0x240] sm:$0xff] }
 0x5f7   : > { %3435 = vst.msk [vmem:[#allocation3 + $0x1e0] sm:$0xff] %vm175_vm2, %v3387_v12 }
 0x5f8   : > { %3442 = vst.msk [vmem:[#allocation3 + $0x248] sm:$0xff] %vm175_vm2, %v3394_v20  ;;  %v3208_v20 = vld [vmem:[#allocation3 + $0x2a8] sm:$0xff] }
 0x5f9   : > { %3544 = vrot.lane.b32.xlu0 %v7990_v10, %s6197_s24  ;;  %3552 = vrot.lane.b32.xlu1 %v8018_v48, %s6197_s24 }
 0x5fa   : > { %3548 = vrot.lane.b32.xlu2 %v8004_v13, %s6197_s24 }
 0x5fb   : > { %v3269_v60 = vpop.permute.xlu0 %3268  ;;  %v3277_v11 = vpop.permute.xlu1 %3276 }
 0x5fc   : > { %v3386_v47 = vadd.f32 %v3269_v60, %v3194_v33  ;;  %v3390_v51 = vadd.f32 %v3277_v11, %v3198_v0  ;;  %v3291_v39 = vpop.permute.xlu2 %3290  ;;  %v3200_v11 = vld [vmem:[#allocation3 + $0x220] sm:$0xff] }
 0x5fd   : > { %v3397_v19 = vadd.f32 %v3291_v39, %v3205_v27 }
 0x5fe   : > { %3434 = vst.msk [vmem:[#allocation3 + $0x1c0] sm:$0xff] %vm175_vm2, %v3386_v47  ;;  %v3204_v47 = vld [vmem:[#allocation3 + $0x270] sm:$0xff] }
 0x5ff   : > { %3438 = vst.msk [vmem:[#allocation3 + $0x210] sm:$0xff] %vm175_vm2, %v3390_v51 }
 0x600   : > { %3445 = vst.msk [vmem:[#allocation3 + $0x278] sm:$0xff] %vm175_vm2, %v3397_v19  ;;  %v3211_v19 = vld [vmem:[#allocation3 + $0x2d8] sm:$0xff] }
 0x601   : > { %3550 = vrot.lane.b32.xlu0 %v8011_v44, %s6197_s24  ;;  %3558 = vrot.lane.b32.xlu1 %v8039_v54, %s6197_s24 }
 0x602   : > { %3554 = vrot.lane.b32.xlu2 %v8025_v36, %s6197_s24 }
 0x603   : > { %v3275_v18 = vpop.permute.xlu0 %3274  ;;  %v3283_v12 = vpop.permute.xlu1 %3282 }
 0x604   : > { %v3389_v24 = vadd.f32 %v3275_v18, %v3197_v34  ;;  %v3393_v9 = vadd.f32 %v3283_v12, %v3201_v5  ;;  %v3297_v60 = vpop.permute.xlu2 %3296  ;;  %v3203_v12 = vld [vmem:[#allocation3 + $0x250] sm:$0xff] }
 0x605   : > { %v3400_v33 = vadd.f32 %v3297_v60, %v3208_v20 }
 0x606   : > { %3437 = vst.msk [vmem:[#allocation3 + $0x1f0] sm:$0xff] %vm175_vm2, %v3389_v24  ;;  %v3207_v24 = vld [vmem:[#allocation3 + $0x2a0] sm:$0xff] }
 0x607   : > { %3441 = vst.msk [vmem:[#allocation3 + $0x240] sm:$0xff] %vm175_vm2, %v3393_v9 }
 0x608   : > { %3448 = vst.msk [vmem:[#allocation3 + $0x2a8] sm:$0xff] %vm175_vm2, %v3400_v33  ;;  %v3214_v33 = vld [vmem:[#allocation3 + $0x308] sm:$0xff] }
 0x609   : > { %3556 = vrot.lane.b32.xlu0 %v8032_v15, %s6197_s24  ;;  %3564 = vrot.lane.b32.xlu1 %v8060_v59, %s6197_s24 }
 0x60a   : > { %3560 = vrot.lane.b32.xlu2 %v8046_v23, %s6197_s24 }
 0x60b   : > { %v3281_v0 = vpop.permute.xlu0 %3280  ;;  %v3289_v51 = vpop.permute.xlu1 %3288 }
 0x60c   : > { %v3392_v27 = vadd.f32 %v3281_v0, %v3200_v11  ;;  %v3396_v39 = vadd.f32 %v3289_v51, %v3204_v47  ;;  %v3303_v18 = vpop.permute.xlu2 %3302  ;;  %v3206_v51 = vld [vmem:[#allocation3 + $0x280] sm:$0xff] }
 0x60d   : > { %v3403_v34 = vadd.f32 %v3303_v18, %v3211_v19 }
 0x60e   : > { %3440 = vst.msk [vmem:[#allocation3 + $0x220] sm:$0xff] %vm175_vm2, %v3392_v27  ;;  %v3210_v27 = vld [vmem:[#allocation3 + $0x2d0] sm:$0xff] }
 0x60f   : > { %3444 = vst.msk [vmem:[#allocation3 + $0x270] sm:$0xff] %vm175_vm2, %v3396_v39 }
 0x610   : > { %3451 = vst.msk [vmem:[#allocation3 + $0x2d8] sm:$0xff] %vm175_vm2, %v3403_v34  ;;  %v3457_v34 = vld [vmem:[#allocation3 + $0x50] sm:$0xff] }
 0x611   : > { %3562 = vrot.lane.b32.xlu0 %v8053_v3, %s6197_s24  ;;  %3570 = vrot.lane.b32.xlu1 %v8081_v45, %s6197_s24 }
 0x612   : > { %3566 = vrot.lane.b32.xlu2 %v8067_v4, %s6197_s24 }
 0x613   : > { %v3287_v5 = vpop.permute.xlu0 %3286  ;;  %v3295_v9 = vpop.permute.xlu1 %3294 }
 0x614   : > { %v3395_v20 = vadd.f32 %v3287_v5, %v3203_v12  ;;  %v3399_v60 = vadd.f32 %v3295_v9, %v3207_v24  ;;  %v3309_v0 = vpop.permute.xlu2 %3308  ;;  %v3209_v9 = vld [vmem:[#allocation3 + $0x2b0] sm:$0xff] }
 0x615   : > { %v3406_v11 = vadd.f32 %v3309_v0, %v3214_v33 }
 0x616   : > { %3443 = vst.msk [vmem:[#allocation3 + $0x250] sm:$0xff] %vm175_vm2, %v3395_v20  ;;  %v3213_v20 = vld [vmem:[#allocation3 + $0x300] sm:$0xff] }
 0x617   : > { %3447 = vst.msk [vmem:[#allocation3 + $0x2a0] sm:$0xff] %vm175_vm2, %v3399_v60 }
 0x618   : > { %3454 = vst.msk [vmem:[#allocation3 + $0x308] sm:$0xff] %vm175_vm2, %v3406_v11  ;;  %v3460_v11 = vld [vmem:[#allocation3 + $0x80] sm:$0xff] }
 0x619   : > { %3568 = vrot.lane.b32.xlu0 %v8074_v29, %s6197_s24  ;;  %3576 = vrot.lane.b32.xlu1 %v7783_v43, %s6197_s24 }
 0x61a   : > { %3572 = vrot.lane.b32.xlu2 %v8088_v21, %s6197_s24 }
 0x61b   : > { %v3293_v47 = vpop.permute.xlu0 %3292  ;;  %v3301_v39 = vpop.permute.xlu1 %3300 }
 0x61c   : > { %v3398_v19 = vadd.f32 %v3293_v47, %v3206_v51  ;;  %v3402_v18 = vadd.f32 %v3301_v39, %v3210_v27  ;;  %v3507_v5 = vpop.permute.xlu2 %3506  ;;  %v3212_v39 = vld [vmem:[#allocation3 + $0x2e0] sm:$0xff] }
 0x61d   : > { %v3649_v12 = vadd.f32 %v3507_v5, %v3457_v34 }
 0x61e   : > { %3446 = vst.msk [vmem:[#allocation3 + $0x280] sm:$0xff] %vm175_vm2, %v3398_v19  ;;  %v3456_v19 = vld [vmem:[#allocation3 + $0x48] sm:$0xff] }
 0x61f   : > { %3450 = vst.msk [vmem:[#allocation3 + $0x2d0] sm:$0xff] %vm175_vm2, %v3402_v18 }
 0x620   : > { %3697 = vst.msk [vmem:[#allocation3 + $0x50] sm:$0xff] %vm175_vm2, %v3649_v12  ;;  %v3463_v12 = vld [vmem:[#allocation3 + $0xb0] sm:$0xff] }
 0x621   : > { %3574 = vrot.lane.b32.xlu0 %v8097_v40, %s6197_s24  ;;  %3582 = vrot.lane.b32.xlu1 %v7820_v50, %s6197_s24 }
 0x622   : > { %3578 = vrot.lane.b32.xlu2 %v7796_v42, %s6197_s24 }
 0x623   : > { %v3299_v24 = vpop.permute.xlu0 %3298  ;;  %v3307_v60 = vpop.permute.xlu1 %3306 }
 0x624   : > { %v3401_v33 = vadd.f32 %v3299_v24, %v3209_v9  ;;  %v3405_v0 = vadd.f32 %v3307_v60, %v3213_v20  ;;  %v3513_v47 = vpop.permute.xlu2 %3512  ;;  %v3215_v60 = vld [vmem:[#allocation3 + $0x310] sm:$0xff] }
 0x625   : > { %v3652_v51 = vadd.f32 %v3513_v47, %v3460_v11 }
 0x626   : > { %3449 = vst.msk [vmem:[#allocation3 + $0x2b0] sm:$0xff] %vm175_vm2, %v3401_v33  ;;  %v3459_v33 = vld [vmem:[#allocation3 + $0x78] sm:$0xff] }
 0x627   : > { %3453 = vst.msk [vmem:[#allocation3 + $0x300] sm:$0xff] %vm175_vm2, %v3405_v0 }
 0x628   : > { %3700 = vst.msk [vmem:[#allocation3 + $0x80] sm:$0xff] %vm175_vm2, %v3652_v51  ;;  %v3466_v51 = vld [vmem:[#allocation3 + $0xe0] sm:$0xff] }
 0x629   : > { %3580 = vrot.lane.b32.xlu0 %v7807_v6, %s6197_s24  ;;  %3588 = vrot.lane.b32.xlu1 %v7857_v38, %s6197_s24 }
 0x62a   : > { %3584 = vrot.lane.b32.xlu2 %v7833_v53, %s6197_s24 }
 0x62b   : > { %v3305_v27 = vpop.permute.xlu0 %3304  ;;  %v3505_v18 = vpop.permute.xlu1 %3504 }
 0x62c   : > { %v3404_v34 = vadd.f32 %v3305_v27, %v3212_v39  ;;  %v3648_v5 = vadd.f32 %v3505_v18, %v3456_v19  ;;  %v3519_v24 = vpop.permute.xlu2 %3518  ;;  %v3458_v19 = vld [vmem:[#allocation3 + $0x58] sm:$0xff] }
 0x62d   : > { %v3655_v9 = vadd.f32 %v3519_v24, %v3463_v12 }
 0x62e   : > { %3452 = vst.msk [vmem:[#allocation3 + $0x2e0] sm:$0xff] %vm175_vm2, %v3404_v34  ;;  %v3462_v34 = vld [vmem:[#allocation3 + $0xa8] sm:$0xff] }
 0x62f   : > { %3696 = vst.msk [vmem:[#allocation3 + $0x48] sm:$0xff] %vm175_vm2, %v3648_v5 }
 0x630   : > { %3703 = vst.msk [vmem:[#allocation3 + $0xb0] sm:$0xff] %vm175_vm2, %v3655_v9  ;;  %v3469_v9 = vld [vmem:[#allocation3 + $0x110] sm:$0xff] }
 0x631   : > { %3586 = vrot.lane.b32.xlu0 %v7844_v7, %s6197_s24  ;;  %3594 = vrot.lane.b32.xlu1 %v7895_v31, %s6197_s24 }
 0x632   : > { %3590 = vrot.lane.b32.xlu2 %v7870_v57, %s6197_s24 }
 0x633   : > { %v3311_v20 = vpop.permute.xlu0 %3310  ;;  %v3511_v0 = vpop.permute.xlu1 %3510 }
 0x634   : > { %v3407_v11 = vadd.f32 %v3311_v20, %v3215_v60  ;;  %v3651_v47 = vadd.f32 %v3511_v0, %v3459_v33  ;;  %v3525_v27 = vpop.permute.xlu2 %3524  ;;  %v3465_v0 = vld [vmem:[#allocation3 + $0xd8] sm:$0xff] }
 0x635   : > { %v3658_v39 = vadd.f32 %v3525_v27, %v3466_v51  ;;  %v3472_v27 = vld [vmem:[#allocation3 + $0x140] sm:$0xff] }
 0x636   : > { %3455 = vst.msk [vmem:[#allocation3 + $0x310] sm:$0xff] %vm175_vm2, %v3407_v11 }
 0x637   : > { %3699 = vst.msk [vmem:[#allocation3 + $0x78] sm:$0xff] %vm175_vm2, %v3651_v47 }
 0x638   : > { %3706 = vst.msk [vmem:[#allocation3 + $0xe0] sm:$0xff] %vm175_vm2, %v3658_v39 }
 0x639   : > { %3592 = vrot.lane.b32.xlu0 %v7882_v28, %s6197_s24  ;;  %3792 = vrot.lane.b32.xlu1 %v7774_v37, %s6198_s25  ;;  %v3461_v37 = vld [vmem:[#allocation3 + $0x88] sm:$0xff] }
 0x63a   : > { %3596 = vrot.lane.b32.xlu2 %v7908_v16, %s6197_s24 }
 0x63b   : > { %v3509_v18 = vpop.permute.xlu0 %3508  ;;  %v3517_v5 = vpop.permute.xlu1 %3516 }
 0x63c   : > { %v3650_v12 = vadd.f32 %v3509_v18, %v3458_v19  ;;  %v3654_v24 = vadd.f32 %v3517_v5, %v3462_v34  ;;  %v3531_v20 = vpop.permute.xlu2 %3530  ;;  %v3468_v18 = vld [vmem:[#allocation3 + $0x108] sm:$0xff] }
 0x63d   : > { %v3661_v60 = vadd.f32 %v3531_v20, %v3469_v9 }
 0x63e   : > { %3698 = vst.msk [vmem:[#allocation3 + $0x58] sm:$0xff] %vm175_vm2, %v3650_v12 }
 0x63f   : > { %3702 = vst.msk [vmem:[#allocation3 + $0xa8] sm:$0xff] %vm175_vm2, %v3654_v24  ;;  %v3475_v24 = vld [vmem:[#allocation3 + $0x170] sm:$0xff] }
 0x640   : > { %3709 = vst.msk [vmem:[#allocation3 + $0x110] sm:$0xff] %vm175_vm2, %v3661_v60 }
 0x641   : > { %3598 = vrot.lane.b32.xlu0 %v7919_v1, %s6197_s24  ;;  %3798 = vrot.lane.b32.xlu1 %v7810_v17, %s6198_s25 }
 0x642   : > { %3794 = vrot.lane.b32.xlu2 %v7786_v52, %s6198_s25  ;;  %v3464_v52 = vld [vmem:[#allocation3 + $0xb8] sm:$0xff] }
 0x643   : > { %v3515_v33 = vpop.permute.xlu0 %3514  ;;  %v3523_v11 = vpop.permute.xlu1 %3522 }
 0x644   : > { %v3653_v47 = vadd.f32 %v3515_v33, %v3461_v37  ;;  %v3657_v51 = vadd.f32 %v3523_v11, %v3465_v0  ;;  %v3537_v39 = vpop.permute.xlu2 %3536  ;;  %v3478_v0 = vld [vmem:[#allocation3 + $0x1a0] sm:$0xff] }
 0x645   : > { %v3664_v19 = vadd.f32 %v3537_v39, %v3472_v27 }
 0x646   : > { %3701 = vst.msk [vmem:[#allocation3 + $0x88] sm:$0xff] %vm175_vm2, %v3653_v47 }
 0x647   : > { %3705 = vst.msk [vmem:[#allocation3 + $0xd8] sm:$0xff] %vm175_vm2, %v3657_v51 }
 0x648   : > { %3712 = vst.msk [vmem:[#allocation3 + $0x140] sm:$0xff] %vm175_vm2, %v3664_v19  ;;  %v3481_v19 = vld [vmem:[#allocation3 + $0x1d0] sm:$0xff] }
 0x649   : > { %3796 = vrot.lane.b32.xlu0 %v7799_v62, %s6198_s25  ;;  %3804 = vrot.lane.b32.xlu1 %v7847_v30, %s6198_s25  ;;  %v3467_v62 = vld [vmem:[#allocation3 + $0xe8] sm:$0xff]  ;;  %v3471_v30 = vld [vmem:[#allocation3 + $0x138] sm:$0xff] }
 0x64a   : > { %3800 = vrot.lane.b32.xlu2 %v7823_v61, %s6198_s25 }
 0x64b   : > { %v3521_v17 = vpop.permute.xlu0 %3520  ;;  %v3529_v34 = vpop.permute.xlu1 %3528 }
 0x64c   : > { %v3656_v5 = vadd.f32 %v3521_v17, %v3464_v52  ;;  %v3660_v12 = vadd.f32 %v3529_v34, %v3468_v18  ;;  %v3543_v9 = vpop.permute.xlu2 %3542 }
 0x64d   : > { %v3667_v20 = vadd.f32 %v3543_v9, %v3475_v24 }
 0x64e   : > { %3704 = vst.msk [vmem:[#allocation3 + $0xb8] sm:$0xff] %vm175_vm2, %v3656_v5 }
 0x64f   : > { %3708 = vst.msk [vmem:[#allocation3 + $0x108] sm:$0xff] %vm175_vm2, %v3660_v12  ;;  %v3484_v12 = vld [vmem:[#allocation3 + $0x200] sm:$0xff] }
 0x650   : > { %3715 = vst.msk [vmem:[#allocation3 + $0x170] sm:$0xff] %vm175_vm2, %v3667_v20 }
 0x651   : > { %3802 = vrot.lane.b32.xlu0 %v7836_v55, %s6198_s25  ;;  %3810 = vrot.lane.b32.xlu1 %v7885_v2, %s6198_s25  ;;  %v3470_v55 = vld [vmem:[#allocation3 + $0x118] sm:$0xff]  ;;  %v3474_v2 = vld [vmem:[#allocation3 + $0x168] sm:$0xff] }
 0x652   : > { %3806 = vrot.lane.b32.xlu2 %v7860_v8, %s6198_s25 }
 0x653   : > { %v3527_v61 = vpop.permute.xlu0 %3526  ;;  %v3535_v60 = vpop.permute.xlu1 %3534 }
 0x654   : > { %v3659_v37 = vadd.f32 %v3527_v61, %v3467_v62  ;;  %v3663_v33 = vadd.f32 %v3535_v60, %v3471_v30  ;;  %v3549_v11 = vpop.permute.xlu2 %3548  ;;  %v3487_v30 = vld [vmem:[#allocation3 + $0x230] sm:$0xff] }
 0x655   : > { %v3670_v47 = vadd.f32 %v3549_v11, %v3478_v0 }
 0x656   : > { %3707 = vst.msk [vmem:[#allocation3 + $0xe8] sm:$0xff] %vm175_vm2, %v3659_v37 }
 0x657   : > { %3711 = vst.msk [vmem:[#allocation3 + $0x138] sm:$0xff] %vm175_vm2, %v3663_v33 }
 0x658   : > { %3718 = vst.msk [vmem:[#allocation3 + $0x1a0] sm:$0xff] %vm175_vm2, %v3670_v47  ;;  %v3490_v47 = vld [vmem:[#allocation3 + $0x260] sm:$0xff] }
 0x659   : > { %3808 = vrot.lane.b32.xlu0 %v7874_v58, %s6198_s25  ;;  %3816 = vrot.lane.b32.xlu1 %v7922_v22, %s6198_s25  ;;  %v3473_v58 = vld [vmem:[#allocation3 + $0x148] sm:$0xff]  ;;  %v3477_v22 = vld [vmem:[#allocation3 + $0x198] sm:$0xff] }
 0x65a   : > { %3812 = vrot.lane.b32.xlu2 %v7898_v46, %s6198_s25 }
 0x65b   : > { %v3533_v8 = vpop.permute.xlu0 %3532  ;;  %v3541_v51 = vpop.permute.xlu1 %3540 }
 0x65c   : > { %v3662_v27 = vadd.f32 %v3533_v8, %v3470_v55  ;;  %v3666_v39 = vadd.f32 %v3541_v51, %v3474_v2  ;;  %v3555_v52 = vpop.permute.xlu2 %3554 }
 0x65d   : > { %v3673_v17 = vadd.f32 %v3555_v52, %v3481_v19 }
 0x65e   : > { %3710 = vst.msk [vmem:[#allocation3 + $0x118] sm:$0xff] %vm175_vm2, %v3662_v27 }
 0x65f   : > { %3714 = vst.msk [vmem:[#allocation3 + $0x168] sm:$0xff] %vm175_vm2, %v3666_v39  ;;  %v3493_v39 = vld [vmem:[#allocation3 + $0x290] sm:$0xff] }
 0x660   : > { %3721 = vst.msk [vmem:[#allocation3 + $0x1d0] sm:$0xff] %vm175_vm2, %v3673_v17 }
 0x661   : > { %3814 = vrot.lane.b32.xlu0 %v7911_v25, %s6198_s25  ;;  %3822 = vrot.lane.b32.xlu1 %v7950_v41, %s6198_s25  ;;  %v3476_v25 = vld [vmem:[#allocation3 + $0x178] sm:$0xff]  ;;  %v3480_v41 = vld [vmem:[#allocation3 + $0x1c8] sm:$0xff] }
 0x662   : > { %3818 = vrot.lane.b32.xlu2 %v7933_v35, %s6198_s25 }
 0x663   : > { %v3539_v46 = vpop.permute.xlu0 %3538  ;;  %v3547_v18 = vpop.permute.xlu1 %3546 }
 0x664   : > { %v3665_v34 = vadd.f32 %v3539_v46, %v3473_v58  ;;  %v3669_v5 = vadd.f32 %v3547_v18, %v3477_v22  ;;  %v3561_v24 = vpop.permute.xlu2 %3560  ;;  %v3496_v22 = vld [vmem:[#allocation3 + $0x2c0] sm:$0xff] }
 0x665   : > { %v3676_v9 = vadd.f32 %v3561_v24, %v3484_v12 }
 0x666   : > { %3713 = vst.msk [vmem:[#allocation3 + $0x148] sm:$0xff] %vm175_vm2, %v3665_v34 }
 0x667   : > { %3717 = vst.msk [vmem:[#allocation3 + $0x198] sm:$0xff] %vm175_vm2, %v3669_v5 }
 0x668   : > { %3724 = vst.msk [vmem:[#allocation3 + $0x200] sm:$0xff] %vm175_vm2, %v3676_v9  ;;  %v3499_v9 = vld [vmem:[#allocation3 + $0x2f0] sm:$0xff] }
 0x669   : > { %3820 = vrot.lane.b32.xlu0 %v7942_v49, %s6198_s25  ;;  %3828 = vrot.lane.b32.xlu1 %v7974_v14, %s6198_s25  ;;  %v3479_v49 = vld [vmem:[#allocation3 + $0x1a8] sm:$0xff]  ;;  %v3483_v14 = vld [vmem:[#allocation3 + $0x1f8] sm:$0xff] }
 0x66a   : > { %3824 = vrot.lane.b32.xlu2 %v7958_v63, %s6198_s25 }
 0x66b   : > { %v3545_v35 = vpop.permute.xlu0 %3544  ;;  %v3553_v20 = vpop.permute.xlu1 %3552 }
 0x66c   : > { %v3668_v62 = vadd.f32 %v3545_v35, %v3476_v25  ;;  %v3672_v61 = vadd.f32 %v3553_v20, %v3480_v41  ;;  %v3567_v60 = vpop.permute.xlu2 %3566 }
 0x66d   : > { %v3679_v37 = vadd.f32 %v3567_v60, %v3487_v30 }
 0x66e   : > { %3716 = vst.msk [vmem:[#allocation3 + $0x178] sm:$0xff] %vm175_vm2, %v3668_v62 }
 0x66f   : > { %3720 = vst.msk [vmem:[#allocation3 + $0x1c8] sm:$0xff] %vm175_vm2, %v3672_v61  ;;  %v3502_v61 = vld [vmem:[#allocation3 + $0x320] sm:$0xff] }
 0x670   : > { %3727 = vst.msk [vmem:[#allocation3 + $0x230] sm:$0xff] %vm175_vm2, %v3679_v37 }
 0x671   : > { %3826 = vrot.lane.b32.xlu0 %v7966_v26, %s6198_s25  ;;  %3834 = vrot.lane.b32.xlu1 %v7997_v56, %s6198_s25  ;;  %v3482_v26 = vld [vmem:[#allocation3 + $0x1d8] sm:$0xff]  ;;  %v3486_v56 = vld [vmem:[#allocation3 + $0x228] sm:$0xff] }
 0x672   : > { %3830 = vrot.lane.b32.xlu2 %v7982_v32, %s6198_s25 }
 0x673   : > { %v3551_v63 = vpop.permute.xlu0 %3550  ;;  %v3559_v33 = vpop.permute.xlu1 %3558 }
 0x674   : > { %v3671_v0 = vadd.f32 %v3551_v63, %v3479_v49  ;;  %v3675_v11 = vadd.f32 %v3559_v33, %v3483_v14  ;;  %v3573_v55 = vpop.permute.xlu2 %3572  ;;  %v3745_v14 = vld [vmem:[#allocation3 + $0x68] sm:$0xff] }
 0x675   : > { %v3682_v8 = vadd.f32 %v3573_v55, %v3490_v47 }
 0x676   : > { %3719 = vst.msk [vmem:[#allocation3 + $0x1a8] sm:$0xff] %vm175_vm2, %v3671_v0 }
 0x677   : > { %3723 = vst.msk [vmem:[#allocation3 + $0x1f8] sm:$0xff] %vm175_vm2, %v3675_v11 }
 0x678   : > { %3730 = vst.msk [vmem:[#allocation3 + $0x260] sm:$0xff] %vm175_vm2, %v3682_v8  ;;  %v3748_v8 = vld [vmem:[#allocation3 + $0x98] sm:$0xff] }
 0x679   : > { %3832 = vrot.lane.b32.xlu0 %v7990_v10, %s6198_s25  ;;  %3840 = vrot.lane.b32.xlu1 %v8018_v48, %s6198_s25  ;;  %v3485_v10 = vld [vmem:[#allocation3 + $0x208] sm:$0xff]  ;;  %v3489_v48 = vld [vmem:[#allocation3 + $0x258] sm:$0xff] }
 0x67a   : > { %3836 = vrot.lane.b32.xlu2 %v8004_v13, %s6198_s25 }
 0x67b   : > { %v3557_v32 = vpop.permute.xlu0 %3556  ;;  %v3565_v2 = vpop.permute.xlu1 %3564 }
 0x67c   : > { %v3674_v51 = vadd.f32 %v3557_v32, %v3482_v26  ;;  %v3678_v27 = vadd.f32 %v3565_v2, %v3486_v56  ;;  %v3579_v19 = vpop.permute.xlu2 %3578 }
 0x67d   : > { %v3685_v52 = vadd.f32 %v3579_v19, %v3493_v39 }
 0x67e   : > { %3722 = vst.msk [vmem:[#allocation3 + $0x1d8] sm:$0xff] %vm175_vm2, %v3674_v51 }
 0x67f   : > { %3726 = vst.msk [vmem:[#allocation3 + $0x228] sm:$0xff] %vm175_vm2, %v3678_v27  ;;  %v3751_v27 = vld [vmem:[#allocation3 + $0xc8] sm:$0xff] }
 0x680   : > { %3733 = vst.msk [vmem:[#allocation3 + $0x290] sm:$0xff] %vm175_vm2, %v3685_v52 }
 0x681   : > { %3838 = vrot.lane.b32.xlu0 %v8011_v44, %s6198_s25  ;;  %3846 = vrot.lane.b32.xlu1 %v8039_v54, %s6198_s25  ;;  %v3492_v54 = vld [vmem:[#allocation3 + $0x288] sm:$0xff] }
 0x682   : > { %3842 = vrot.lane.b32.xlu2 %v8025_v36, %s6198_s25  ;;  %v3488_v36 = vld [vmem:[#allocation3 + $0x238] sm:$0xff] }
 0x683   : > { %v3563_v13 = vpop.permute.xlu0 %3562  ;;  %v3571_v17 = vpop.permute.xlu1 %3570 }
 0x684   : > { %v3677_v58 = vadd.f32 %v3563_v13, %v3485_v10  ;;  %v3681_v46 = vadd.f32 %v3571_v17, %v3489_v48  ;;  %v3585_v18 = vpop.permute.xlu2 %3584  ;;  %v3754_v48 = vld [vmem:[#allocation3 + $0xf8] sm:$0xff] }
 0x685   : > { %v3688_v34 = vadd.f32 %v3585_v18, %v3496_v22 }
 0x686   : > { %3725 = vst.msk [vmem:[#allocation3 + $0x208] sm:$0xff] %vm175_vm2, %v3677_v58 }
 0x687   : > { %3729 = vst.msk [vmem:[#allocation3 + $0x258] sm:$0xff] %vm175_vm2, %v3681_v46  ;;  %v3750_v46 = vld [vmem:[#allocation3 + $0xc0] sm:$0xff] }
 0x688   : > { %3736 = vst.msk [vmem:[#allocation3 + $0x2c0] sm:$0xff] %vm175_vm2, %v3688_v34 }
 0x689   : > { %3844 = vrot.lane.b32.xlu0 %v8032_v15, %s6198_s25  ;;  %3852 = vrot.lane.b32.xlu1 %v8060_v59, %s6198_s25  ;;  %v3495_v59 = vld [vmem:[#allocation3 + $0x2b8] sm:$0xff] }
 0x68a   : > { %3848 = vrot.lane.b32.xlu2 %v8046_v23, %s6198_s25  ;;  %v3491_v23 = vld [vmem:[#allocation3 + $0x268] sm:$0xff] }
 0x68b   : > { %v3569_v44 = vpop.permute.xlu0 %3568  ;;  %v3577_v5 = vpop.permute.xlu1 %3576 }
 0x68c   : > { %v3680_v12 = vadd.f32 %v3569_v44, %v3488_v36  ;;  %v3684_v24 = vadd.f32 %v3577_v5, %v3492_v54  ;;  %v3591_v25 = vpop.permute.xlu2 %3590  ;;  %v3757_v44 = vld [vmem:[#allocation3 + $0x128] sm:$0xff]  ;;  %v3753_v5 = vld [vmem:[#allocation3 + $0xf0] sm:$0xff] }
 0x68d   : > { %v3691_v35 = vadd.f32 %v3591_v25, %v3499_v9  ;;  %v3760_v25 = vld [vmem:[#allocation3 + $0x158] sm:$0xff] }
 0x68e   : > { %3728 = vst.msk [vmem:[#allocation3 + $0x238] sm:$0xff] %vm175_vm2, %v3680_v12 }
 0x68f   : > { %3732 = vst.msk [vmem:[#allocation3 + $0x288] sm:$0xff] %vm175_vm2, %v3684_v24 }
 0x690   : > { %3739 = vst.msk [vmem:[#allocation3 + $0x2f0] sm:$0xff] %vm175_vm2, %v3691_v35 }
 0x691   : > { %3850 = vrot.lane.b32.xlu0 %v8053_v3, %s6198_s25  ;;  %3858 = vrot.lane.b32.xlu1 %v8081_v45, %s6198_s25  ;;  %v3494_v3 = vld [vmem:[#allocation3 + $0x298] sm:$0xff]  ;;  %v3498_v45 = vld [vmem:[#allocation3 + $0x2e8] sm:$0xff] }
 0x692   : > { %3854 = vrot.lane.b32.xlu2 %v8067_v4, %s6198_s25 }
 0x693   : > { %v3575_v15 = vpop.permute.xlu0 %3574  ;;  %v3583_v41 = vpop.permute.xlu1 %3582 }
 0x694   : > { %v3683_v20 = vadd.f32 %v3575_v15, %v3491_v23  ;;  %v3687_v62 = vadd.f32 %v3583_v41, %v3495_v59  ;;  %v3597_v30 = vpop.permute.xlu2 %3596  ;;  %v3752_v23 = vld [vmem:[#allocation3 + $0xd0] sm:$0xff]  ;;  %v3756_v41 = vld [vmem:[#allocation3 + $0x120] sm:$0xff] }
 0x695   : > { %v3694_v60 = vadd.f32 %v3597_v30, %v3502_v61  ;;  %v3763_v61 = vld [vmem:[#allocation3 + $0x188] sm:$0xff] }
 0x696   : > { %3731 = vst.msk [vmem:[#allocation3 + $0x268] sm:$0xff] %vm175_vm2, %v3683_v20 }
 0x697   : > { %3735 = vst.msk [vmem:[#allocation3 + $0x2b8] sm:$0xff] %vm175_vm2, %v3687_v62 }
 0x698   : > { %3742 = vst.msk [vmem:[#allocation3 + $0x320] sm:$0xff] %vm175_vm2, %v3694_v60 }
 0x699   : > { %3856 = vrot.lane.b32.xlu0 %v8074_v29, %s6198_s25  ;;  %3864 = vrot.lane.b32.xlu1 %v7783_v43, %s6198_s25  ;;  %v3497_v43 = vld [vmem:[#allocation3 + $0x2c8] sm:$0xff] }
 0x69a   : > { %3860 = vrot.lane.b32.xlu2 %v8088_v21, %s6198_s25  ;;  %v3501_v21 = vld [vmem:[#allocation3 + $0x318] sm:$0xff] }
 0x69b   : > { %v3581_v4 = vpop.permute.xlu0 %3580  ;;  %v3589_v37 = vpop.permute.xlu1 %3588 }
 0x69c   : > { %v3686_v49 = vadd.f32 %v3581_v4, %v3494_v3  ;;  %v3690_v63 = vadd.f32 %v3589_v37, %v3498_v45  ;;  %v3795_v33 = vpop.permute.xlu2 %3794  ;;  %v3755_v3 = vld [vmem:[#allocation3 + $0x100] sm:$0xff]  ;;  %v3759_v45 = vld [vmem:[#allocation3 + $0x150] sm:$0xff] }
 0x69d   : > { %v3937_v0 = vadd.f32 %v3795_v33, %v3745_v14  ;;  %v3766_v14 = vld [vmem:[#allocation3 + $0x1b8] sm:$0xff] }
 0x69e   : > { %3734 = vst.msk [vmem:[#allocation3 + $0x298] sm:$0xff] %vm175_vm2, %v3686_v49 }
 0x69f   : > { %3738 = vst.msk [vmem:[#allocation3 + $0x2e8] sm:$0xff] %vm175_vm2, %v3690_v63 }
 0x6a0   : > { %3985 = vst.msk [vmem:[#allocation3 + $0x68] sm:$0xff] %vm175_vm2, %v3937_v0 }
 0x6a1   : > { %3862 = vrot.lane.b32.xlu0 %v8097_v40, %s6198_s25  ;;  %3870 = vrot.lane.b32.xlu1 %v7820_v50, %s6198_s25  ;;  %v3744_v40 = vld [vmem:[#allocation3 + $0x60] sm:$0xff] }
 0x6a2   : > { %3866 = vrot.lane.b32.xlu2 %v7796_v42, %s6198_s25  ;;  %v3500_v42 = vld [vmem:[#allocation3 + $0x2f8] sm:$0xff] }
 0x6a3   : > { %v3587_v29 = vpop.permute.xlu0 %3586  ;;  %v3595_v11 = vpop.permute.xlu1 %3594 }
 0x6a4   : > { %v3689_v47 = vadd.f32 %v3587_v29, %v3497_v43  ;;  %v3693_v55 = vadd.f32 %v3595_v11, %v3501_v21  ;;  %v3801_v26 = vpop.permute.xlu2 %3800  ;;  %v3758_v43 = vld [vmem:[#allocation3 + $0x130] sm:$0xff]  ;;  %v3762_v21 = vld [vmem:[#allocation3 + $0x180] sm:$0xff] }
 0x6a5   : > { %v3940_v32 = vadd.f32 %v3801_v26, %v3748_v8  ;;  %v3769_v8 = vld [vmem:[#allocation3 + $0x1e8] sm:$0xff] }
 0x6a6   : > { %3737 = vst.msk [vmem:[#allocation3 + $0x2c8] sm:$0xff] %vm175_vm2, %v3689_v47 }
 0x6a7   : > { %3741 = vst.msk [vmem:[#allocation3 + $0x318] sm:$0xff] %vm175_vm2, %v3693_v55 }
 0x6a8   : > { %3988 = vst.msk [vmem:[#allocation3 + $0x98] sm:$0xff] %vm175_vm2, %v3940_v32 }
 0x6a9   : > { %3868 = vrot.lane.b32.xlu0 %v7807_v6, %s6198_s25  ;;  %3876 = vrot.lane.b32.xlu1 %v7857_v38, %s6198_s25  ;;  %v3503_v6 = vld [vmem:[#allocation3 + $0x328] sm:$0xff]  ;;  %v3747_v38 = vld [vmem:[#allocation3 + $0x90] sm:$0xff] }
 0x6aa   : > { %3872 = vrot.lane.b32.xlu2 %v7833_v53, %s6198_s25 }
 0x6ab   : > { %v3593_v50 = vpop.permute.xlu0 %3592  ;;  %v3793_v56 = vpop.permute.xlu1 %3792 }
 0x6ac   : > { %v3692_v2 = vadd.f32 %v3593_v50, %v3500_v42  ;;  %v3936_v51 = vadd.f32 %v3793_v56, %v3744_v40  ;;  %v3807_v39 = vpop.permute.xlu2 %3806  ;;  %v3761_v50 = vld [vmem:[#allocation3 + $0x160] sm:$0xff]  ;;  %v3765_v40 = vld [vmem:[#allocation3 + $0x1b0] sm:$0xff] }
 0x6ad   : > { %v3943_v19 = vadd.f32 %v3807_v39, %v3751_v27  ;;  %v3772_v27 = vld [vmem:[#allocation3 + $0x218] sm:$0xff] }
 0x6ae   : > { %3740 = vst.msk [vmem:[#allocation3 + $0x2f8] sm:$0xff] %vm175_vm2, %v3692_v2 }
 0x6af   : > { %3984 = vst.msk [vmem:[#allocation3 + $0x60] sm:$0xff] %vm175_vm2, %v3936_v51 }
 0x6b0   : > { %3991 = vst.msk [vmem:[#allocation3 + $0xc8] sm:$0xff] %vm175_vm2, %v3943_v19 }
 0x6b1   : > { %3874 = vrot.lane.b32.xlu0 %v7844_v7, %s6198_s25  ;;  %3882 = vrot.lane.b32.xlu1 %v7895_v31, %s6198_s25  ;;  %v4080_v7 = vld [vmem:[%s9694_s1] sm:$0xf] }
 0x6b2   : > { %3878 = vrot.lane.b32.xlu2 %v7870_v57, %s6198_s25  ;;  %v3746_v57 = vld [vmem:[#allocation3 + $0x70] sm:$0xff] }
 0x6b3   : > { %v3599_v53 = vpop.permute.xlu0 %3598  ;;  %v3799_v52 = vpop.permute.xlu1 %3798 }
 0x6b4   : > { %v3695_v10 = vadd.f32 %v3599_v53, %v3503_v6  ;;  %v3939_v13 = vadd.f32 %v3799_v52, %v3747_v38  ;;  %v3813_v17 = vpop.permute.xlu2 %3812  ;;  %v3764_v53 = vld [vmem:[#allocation3 + $0x190] sm:$0xff]  ;;  %v3768_v38 = vld [vmem:[#allocation3 + $0x1e0] sm:$0xff] }
 0x6b5   : > { %v3946_v58 = vadd.f32 %v3813_v17, %v3754_v48  ;;  %v3775_v48 = vld [vmem:[#allocation3 + $0x248] sm:$0xff] }
 0x6b6   : > { %3743 = vst.msk [vmem:[#allocation3 + $0x328] sm:$0xff] %vm175_vm2, %v3695_v10 }
 0x6b7   : > { %3987 = vst.msk [vmem:[#allocation3 + $0x90] sm:$0xff] %vm175_vm2, %v3939_v13 }
 0x6b8   : > { %3994 = vst.msk [vmem:[#allocation3 + $0xf8] sm:$0xff] %vm175_vm2, %v3946_v58 }
 0x6b9   : > { %3880 = vrot.lane.b32.xlu0 %v7882_v28, %s6198_s25  ;;  %4082 = vrot.lane.b32.xlu1 %v4080_v7, %s6200_s4  ;;  %v3749_v28 = vld [vmem:[#allocation3 + $0xa0] sm:$0xff] }
 0x6ba   : > { %3884 = vrot.lane.b32.xlu2 %v7908_v16, %s6198_s25 }
 0x6bb   : > { %v3797_v31 = vpop.permute.xlu0 %3796  ;;  %v3805_v22 = vpop.permute.xlu1 %3804 }
 0x6bc   : > { %v3938_v18 = vadd.f32 %v3797_v31, %v3746_v57  ;;  %v3942_v34 = vadd.f32 %v3805_v22, %v3750_v46  ;;  %v3819_v36 = vpop.permute.xlu2 %3818  ;;  %v3767_v57 = vld [vmem:[#allocation3 + $0x1c0] sm:$0xff]  ;;  %v3771_v31 = vld [vmem:[#allocation3 + $0x210] sm:$0xff] }
 0x6bd   : > { %v3949_v54 = vadd.f32 %v3819_v36, %v3757_v44 }
 0x6be   : > { %3986 = vst.msk [vmem:[#allocation3 + $0x70] sm:$0xff] %vm175_vm2, %v3938_v18 }
 0x6bf   : > { %3990 = vst.msk [vmem:[#allocation3 + $0xc0] sm:$0xff] %vm175_vm2, %v3942_v34  ;;  %v3778_v34 = vld [vmem:[#allocation3 + $0x278] sm:$0xff] }
 0x6c0   : > { %3997 = vst.msk [vmem:[#allocation3 + $0x128] sm:$0xff] %vm175_vm2, %v3949_v54 }
 0x6c1   : > { %3886 = vrot.lane.b32.xlu0 %v7919_v1, %s6198_s25 }
 0x6c3   : > { %v3803_v16 = vpop.permute.xlu0 %3802  ;;  %v3811_v12 = vpop.permute.xlu1 %3810 }
 0x6c4   : > { %v3941_v24 = vadd.f32 %v3803_v16, %v3749_v28  ;;  %v3945_v9 = vadd.f32 %v3811_v12, %v3753_v5  ;;  %v3825_v35 = vpop.permute.xlu2 %3824  ;;  %v3770_v28 = vld [vmem:[#allocation3 + $0x1f0] sm:$0xff]  ;;  %v3774_v16 = vld [vmem:[#allocation3 + $0x240] sm:$0xff] }
 0x6c5   : > { %v3952_v15 = vadd.f32 %v3825_v35, %v3760_v25 }
 0x6c6   : > { %3989 = vst.msk [vmem:[#allocation3 + $0xa0] sm:$0xff] %vm175_vm2, %v3941_v24 }
 0x6c7   : > { %3993 = vst.msk [vmem:[#allocation3 + $0xf0] sm:$0xff] %vm175_vm2, %v3945_v9  ;;  %v3781_v9 = vld [vmem:[#allocation3 + $0x2a8] sm:$0xff] }
 0x6c8   : > { %4000 = vst.msk [vmem:[#allocation3 + $0x158] sm:$0xff] %vm175_vm2, %v3952_v15 }
 0x6cb   : > { %v3809_v59 = vpop.permute.xlu0 %3808  ;;  %v3817_v20 = vpop.permute.xlu1 %3816 }
 0x6cc   : > { %v3944_v1 = vadd.f32 %v3809_v59, %v3752_v23  ;;  %v3948_v62 = vadd.f32 %v3817_v20, %v3756_v41  ;;  %v3831_v30 = vpop.permute.xlu2 %3830  ;;  %v3773_v23 = vld [vmem:[#allocation3 + $0x220] sm:$0xff]  ;;  %v3777_v59 = vld [vmem:[#allocation3 + $0x270] sm:$0xff] }
 0x6cd   : > { %v3955_v60 = vadd.f32 %v3831_v30, %v3763_v61 }
 0x6ce   : > { %3992 = vst.msk [vmem:[#allocation3 + $0xd0] sm:$0xff] %vm175_vm2, %v3944_v1 }
 0x6cf   : > { %3996 = vst.msk [vmem:[#allocation3 + $0x120] sm:$0xff] %vm175_vm2, %v3948_v62  ;;  %v3784_v62 = vld [vmem:[#allocation3 + $0x2d8] sm:$0xff] }
 0x6d0   : > { %4003 = vst.msk [vmem:[#allocation3 + $0x188] sm:$0xff] %vm175_vm2, %v3955_v60  ;;  %v558_v60 = vld [vmem:[%s6250_s19] sm:$0xff] }
 0x6d1   : > { %591 = vst.msk [vmem:[#allocation2 + $0x302] sm:$0xff] %vm284_vm1, %v558_v60  ;;  %v589_v60 = vld [vmem:[%s6250_s19 + $0xf8] sm:$0xff] }
 0x6d2   : > { %622 = vst.msk [vmem:[#allocation2 + $0x472] sm:$0xff] %vm284_vm1, %v589_v60 }
 0x6d3   : > { %v3815_v4 = vpop.permute.xlu0 %3814  ;;  %v3823_v37 = vpop.permute.xlu1 %3822 }
 0x6d4   : > { %v3947_v49 = vadd.f32 %v3815_v4, %v3755_v3  ;;  %v3951_v63 = vadd.f32 %v3823_v37, %v3759_v45  ;;  %v3837_v33 = vpop.permute.xlu2 %3836  ;;  %v582_v3 = vld [vmem:[%s6250_s19 + $0xc0] sm:$0xff]  ;;  %v3776_v45 = vld [vmem:[#allocation3 + $0x250] sm:$0xff] }
 0x6d5   : > { %v3958_v0 = vadd.f32 %v3837_v33, %v3766_v14  ;;  %615 = vst.msk [vmem:[#allocation2 + $0x422] sm:$0xff] %vm284_vm1, %v582_v3  ;;  %v3780_v37 = vld [vmem:[#allocation3 + $0x2a0] sm:$0xff]  ;;  %v3787_v33 = vld [vmem:[#allocation3 + $0x308] sm:$0xff] }
 0x6d6   : > { %3995 = vst.msk [vmem:[#allocation3 + $0x100] sm:$0xff] %vm175_vm2, %v3947_v49 }
 0x6d7   : > { %3999 = vst.msk [vmem:[#allocation3 + $0x150] sm:$0xff] %vm175_vm2, %v3951_v63 }
 0x6d8   : > { %4006 = vst.msk [vmem:[#allocation3 + $0x1b8] sm:$0xff] %vm175_vm2, %v3958_v0 }
 0x6db   : > { %v3821_v29 = vpop.permute.xlu0 %3820  ;;  %v3829_v11 = vpop.permute.xlu1 %3828 }
 0x6dc   : > { %v3950_v47 = vadd.f32 %v3821_v29, %v3758_v43  ;;  %v3954_v55 = vadd.f32 %v3829_v11, %v3762_v21  ;;  %v3843_v26 = vpop.permute.xlu2 %3842  ;;  %v559_v29 = vld [vmem:[%s6250_s19 + $0x8] sm:$0xff] }
 0x6dd   : > { %v3961_v32 = vadd.f32 %v3843_v26, %v3769_v8  ;;  %v583_v21 = vld [vmem:[%s6250_s19 + $0xc8] sm:$0xff]  ;;  %592 = vst.msk [vmem:[#allocation2 + $0x30a] sm:$0xff] %vm284_vm1, %v559_v29 }
 0x6de   : > { %3998 = vst.msk [vmem:[#allocation3 + $0x130] sm:$0xff] %vm175_vm2, %v3950_v47  ;;  %v3779_v47 = vld [vmem:[#allocation3 + $0x280] sm:$0xff] }
 0x6df   : > { %4002 = vst.msk [vmem:[#allocation3 + $0x180] sm:$0xff] %vm175_vm2, %v3954_v55  ;;  %v3783_v55 = vld [vmem:[#allocation3 + $0x2d0] sm:$0xff] }
 0x6e0   : > { %4009 = vst.msk [vmem:[#allocation3 + $0x1e8] sm:$0xff] %vm175_vm2, %v3961_v32 }
 0x6e1   : > { %616 = vst.msk [vmem:[#allocation2 + $0x42a] sm:$0xff] %vm284_vm1, %v583_v21 }
 0x6e3   : > { %v3827_v42 = vpop.permute.xlu0 %3826  ;;  %v3835_v56 = vpop.permute.xlu1 %3834 }
 0x6e4   : > { %v3953_v2 = vadd.f32 %v3827_v42, %v3761_v50  ;;  %v3957_v51 = vadd.f32 %v3835_v56, %v3765_v40  ;;  %v3849_v39 = vpop.permute.xlu2 %3848  ;;  %v3790_v42 = vld [vmem:[#allocation3 + $0x338] sm:$0xff] }
 0x6e5   : > { %v3964_v19 = vadd.f32 %v3849_v39, %v3772_v27 }
 0x6e6   : > { %4001 = vst.msk [vmem:[#allocation3 + $0x160] sm:$0xff] %vm175_vm2, %v3953_v2  ;;  %v3782_v2 = vld [vmem:[#allocation3 + $0x2b0] sm:$0xff] }
 0x6e7   : > { %4005 = vst.msk [vmem:[#allocation3 + $0x1b0] sm:$0xff] %vm175_vm2, %v3957_v51  ;;  %v3786_v51 = vld [vmem:[#allocation3 + $0x300] sm:$0xff] }
 0x6e8   : > { %4012 = vst.msk [vmem:[#allocation3 + $0x218] sm:$0xff] %vm175_vm2, %v3964_v19 }
 0x6eb   : > { %v3833_v6 = vpop.permute.xlu0 %3832  ;;  %v3841_v52 = vpop.permute.xlu1 %3840 }
 0x6ec   : > { %v3956_v10 = vadd.f32 %v3833_v6, %v3764_v53  ;;  %v3960_v13 = vadd.f32 %v3841_v52, %v3768_v38  ;;  %v3855_v17 = vpop.permute.xlu2 %3854  ;;  %v560_v6 = vld [vmem:[%s6250_s19 + $0x10] sm:$0xff]  ;;  %v3785_v52 = vld [vmem:[#allocation3 + $0x2e0] sm:$0xff] }
 0x6ed   : > { %v3967_v58 = vadd.f32 %v3855_v17, %v3775_v48  ;;  %v584_v53 = vld [vmem:[%s6250_s19 + $0xd0] sm:$0xff]  ;;  %593 = vst.msk [vmem:[#allocation2 + $0x31a] sm:$0xff] %vm284_vm1, %v560_v6 }
 0x6ee   : > { %4004 = vst.msk [vmem:[#allocation3 + $0x190] sm:$0xff] %vm175_vm2, %v3956_v10  ;;  %v3789_v10 = vld [vmem:[#allocation3 + $0x330] sm:$0xff] }
 0x6ef   : > { %4008 = vst.msk [vmem:[#allocation3 + $0x1e0] sm:$0xff] %vm175_vm2, %v3960_v13 }
 0x6f0   : > { %4015 = vst.msk [vmem:[#allocation3 + $0x248] sm:$0xff] %vm175_vm2, %v3967_v58  ;;  %v561_v58 = vld [vmem:[%s6250_s19 + $0x18] sm:$0xff] }
 0x6f1   : > { %617 = vst.msk [vmem:[#allocation2 + $0x43a] sm:$0xff] %vm284_vm1, %v584_v53 }
 0x6f2   : > { %594 = vst.msk [vmem:[#allocation2 + $0x322] sm:$0xff] %vm284_vm1, %v561_v58 }
 0x6f3   : > { %v3839_v7 = vpop.permute.xlu0 %3838  ;;  %v3847_v46 = vpop.permute.xlu1 %3846 }
 0x6f4   : > { %v3959_v22 = vadd.f32 %v3839_v7, %v3767_v57  ;;  %v3963_v18 = vadd.f32 %v3847_v46, %v3771_v31  ;;  %v3861_v44 = vpop.permute.xlu2 %3860  ;;  %v585_v7 = vld [vmem:[%s6250_s19 + $0xd8] sm:$0xff]  ;;  %v4032_v57 = vld [vmem:[#allocation2 + $0x300] sm:$0xff] }
 0x6f5   : > { %v3970_v36 = vadd.f32 %v3861_v44, %v3778_v34  ;;  %618 = vst.msk [vmem:[#allocation2 + $0x442] sm:$0xff] %vm284_vm1, %v585_v7  ;;  %v4068_v31 = vld [vmem:[#allocation2 + $0x420] sm:$0xff]  ;;  %v4033_v44 = vld [vmem:[#allocation2 + $0x308] sm:$0xff] }
 0x6f6   : > { %4007 = vst.msk [vmem:[#allocation3 + $0x1c0] sm:$0xff] %vm175_vm2, %v3959_v22  ;;  %v3788_v22 = vld [vmem:[#allocation3 + $0x310] sm:$0xff] }
 0x6f7   : > { %4011 = vst.msk [vmem:[#allocation3 + $0x210] sm:$0xff] %vm175_vm2, %v3963_v18  ;;  %v4428_v58 = vld [vmem:[#allocation3 + $0x248] sm:$0xff] }
 0x6f8   : > { %4018 = vst.msk [vmem:[#allocation3 + $0x278] sm:$0xff] %vm175_vm2, %v3970_v36  ;;  %v4069_v36 = vld [vmem:[#allocation2 + $0x428] sm:$0xff] }
 0x6fb   : > { %v3845_v54 = vpop.permute.xlu0 %3844  ;;  %v3853_v5 = vpop.permute.xlu1 %3852 }
 0x6fc   : > { %v3962_v12 = vadd.f32 %v3845_v54, %v3770_v28  ;;  %v3966_v24 = vadd.f32 %v3853_v5, %v3774_v16  ;;  %v3867_v25 = vpop.permute.xlu2 %3866  ;;  %v3791_v28 = vld [vmem:[#allocation3 + $0x340] sm:$0xff] }
 0x6fd   : > { %v3973_v35 = vadd.f32 %v3867_v25, %v3781_v9  ;;  %v562_v5 = vld [vmem:[%s6250_s19 + $0x20] sm:$0xff]  ;;  %v4070_v9 = vld [vmem:[#allocation2 + $0x430] sm:$0xff]  ;;  %v563_v25 = vld [vmem:[%s6250_s19 + $0x28] sm:$0xff] }
 0x6fe   : > { %4010 = vst.msk [vmem:[#allocation3 + $0x1f0] sm:$0xff] %vm175_vm2, %v3962_v12  ;;  %v586_v12 = vld [vmem:[%s6250_s19 + $0xe0] sm:$0xff] }
 0x6ff   : > { %4014 = vst.msk [vmem:[#allocation3 + $0x240] sm:$0xff] %vm175_vm2, %v3966_v24  ;;  %v4034_v24 = vld [vmem:[#allocation2 + $0x310] sm:$0xff] }
 0x700   : > { %4021 = vst.msk [vmem:[#allocation3 + $0x2a8] sm:$0xff] %vm175_vm2, %v3973_v35  ;;  %v587_v35 = vld [vmem:[%s6250_s19 + $0xe8] sm:$0xff] }
 0x701   : > { %595 = vst.msk [vmem:[#allocation2 + $0x332] sm:$0xff] %vm284_vm1, %v562_v5  ;;  %v574_v5 = vld [vmem:[%s6250_s19 + $0x80] sm:$0xff] }
 0x702   : > { %619 = vst.msk [vmem:[#allocation2 + $0x452] sm:$0xff] %vm284_vm1, %v586_v12 }
 0x703   : > { %v3851_v15 = vpop.permute.xlu0 %3850  ;;  %v3859_v41 = vpop.permute.xlu1 %3858  ;;  %596 = vst.msk [vmem:[#allocation2 + $0x33a] sm:$0xff] %vm284_vm1, %v563_v25 }
 0x704   : > { %v3965_v20 = vadd.f32 %v3851_v15, %v3773_v23  ;;  %v3969_v1 = vadd.f32 %v3859_v41, %v3777_v59  ;;  %v3873_v61 = vpop.permute.xlu2 %3872  ;;  %620 = vst.msk [vmem:[#allocation2 + $0x45a] sm:$0xff] %vm284_vm1, %v587_v35  ;;  %v4035_v15 = vld [vmem:[#allocation2 + $0x318] sm:$0xff]  ;;  %v4036_v59 = vld [vmem:[#allocation2 + $0x320] sm:$0xff] }
 0x705   : > { %v3976_v30 = vadd.f32 %v3873_v61, %v3784_v62  ;;  %v4071_v23 = vld [vmem:[#allocation2 + $0x438] sm:$0xff]  ;;  %v4072_v41 = vld [vmem:[#allocation2 + $0x440] sm:$0xff]  ;;  %v4037_v62 = vld [vmem:[#allocation2 + $0x328] sm:$0xff]  ;;  %607 = vst.msk [vmem:[#allocation2 + $0x3c2] sm:$0xff] %vm284_vm1, %v574_v5 }
 0x706   : > { %4013 = vst.msk [vmem:[#allocation3 + $0x220] sm:$0xff] %vm175_vm2, %v3965_v20  ;;  %v564_v20 = vld [vmem:[%s6250_s19 + $0x30] sm:$0xff]  ;;  %v4073_v61 = vld [vmem:[#allocation2 + $0x448] sm:$0xff]  ;;  %v4427_v6 = vld [vmem:[#allocation3 + $0x240] sm:$0xff] }
 0x707   : > { %4017 = vst.msk [vmem:[#allocation3 + $0x270] sm:$0xff] %vm175_vm2, %v3969_v1  ;;  %v588_v1 = vld [vmem:[%s6250_s19 + $0xf0] sm:$0xff] }
 0x708   : > { %4024 = vst.msk [vmem:[#allocation3 + $0x2d8] sm:$0xff] %vm175_vm2, %v3976_v30  ;;  %v565_v30 = vld [vmem:[%s6250_s19 + $0x38] sm:$0xff]  ;;  %v4038_v3 = vld [vmem:[#allocation2 + $0x330] sm:$0xff] }
 0x709   : > { %597 = vst.msk [vmem:[#allocation2 + $0x34a] sm:$0xff] %vm284_vm1, %v564_v20 }
 0x70a   : > { %621 = vst.msk [vmem:[#allocation2 + $0x46a] sm:$0xff] %vm284_vm1, %v588_v1  ;;  %v4395_v1 = vld [vmem:[#allocation3 + $0x38] sm:$0xff] }
 0x70b   : > { %v3857_v4 = vpop.permute.xlu0 %3856  ;;  %v3865_v49 = vpop.permute.xlu1 %3864  ;;  %598 = vst.msk [vmem:[#allocation2 + $0x352] sm:$0xff] %vm284_vm1, %v565_v30 }
 0x70c   : > { %v3968_v63 = vadd.f32 %v3857_v4, %v3776_v45  ;;  %v3972_v14 = vadd.f32 %v3865_v49, %v3780_v37  ;;  %v3879_v0 = vpop.permute.xlu2 %3878  ;;  %v4074_v4 = vld [vmem:[#allocation2 + $0x450] sm:$0xff]  ;;  %v4039_v45 = vld [vmem:[#allocation2 + $0x338] sm:$0xff]  ;;  %v566_v49 = vld [vmem:[%s6250_s19 + $0x40] sm:$0xff] }
 0x70d   : > { %v3979_v43 = vadd.f32 %v3879_v0, %v3787_v33  ;;  %v4075_v37 = vld [vmem:[#allocation2 + $0x458] sm:$0xff]  ;;  %599 = vst.msk [vmem:[#allocation2 + $0x362] sm:$0xff] %vm284_vm1, %v566_v49  ;;  %v567_v33 = vld [vmem:[%s6250_s19 + $0x48] sm:$0xff] }
 0x70e   : > { %4016 = vst.msk [vmem:[#allocation3 + $0x250] sm:$0xff] %vm175_vm2, %v3968_v63  ;;  %v4040_v63 = vld [vmem:[#allocation2 + $0x340] sm:$0xff]  ;;  %v4430_v25 = vld [vmem:[#allocation3 + $0x270] sm:$0xff] }
 0x70f   : > { %4020 = vst.msk [vmem:[#allocation3 + $0x2a0] sm:$0xff] %vm175_vm2, %v3972_v14  ;;  %v4076_v14 = vld [vmem:[#allocation2 + $0x460] sm:$0xff] }
 0x710   : > { %4027 = vst.msk [vmem:[#allocation3 + $0x308] sm:$0xff] %vm175_vm2, %v3979_v43  ;;  %v4041_v0 = vld [vmem:[#allocation2 + $0x348] sm:$0xff] }
 0x711   : > { %600 = vst.msk [vmem:[#allocation2 + $0x36a] sm:$0xff] %vm284_vm1, %v567_v33  ;;  %v4077_v43 = vld [vmem:[#allocation2 + $0x468] sm:$0xff]  ;;  %v4078_v21 = vld [vmem:[#allocation2 + $0x470] sm:$0xff] }
 0x712   : > { %v4042_v29 = vld [vmem:[#allocation2 + $0x350] sm:$0xff] }
 0x713   : > { %v3863_v11 = vpop.permute.xlu0 %3862  ;;  %v3871_v8 = vpop.permute.xlu1 %3870 }
 0x714   : > { %v3971_v26 = vadd.f32 %v3863_v11, %v3779_v47  ;;  %v3975_v32 = vadd.f32 %v3871_v8, %v3783_v55  ;;  %v3885_v50 = vpop.permute.xlu2 %3884  ;;  %v568_v11 = vld [vmem:[%s6250_s19 + $0x50] sm:$0xff]  ;;  %v4043_v47 = vld [vmem:[#allocation2 + $0x358] sm:$0xff] }
 0x715   : > { %v3982_v40 = vadd.f32 %v3885_v50, %v3790_v42  ;;  %601 = vst.msk [vmem:[#allocation2 + $0x37a] sm:$0xff] %vm284_vm1, %v568_v11  ;;  %v4079_v55 = vld [vmem:[#allocation2 + $0x478] sm:$0xff]  ;;  %v570_v42 = vld [vmem:[%s6250_s19 + $0x60] sm:$0xff] }
 0x716   : > { %4019 = vst.msk [vmem:[#allocation3 + $0x280] sm:$0xff] %vm175_vm2, %v3971_v26  ;;  %v569_v8 = vld [vmem:[%s6250_s19 + $0x58] sm:$0xff]  ;;  %v4044_v26 = vld [vmem:[#allocation2 + $0x360] sm:$0xff] }
 0x717   : > { %4023 = vst.msk [vmem:[#allocation3 + $0x2d0] sm:$0xff] %vm175_vm2, %v3975_v32  ;;  %v4433_v11 = vld [vmem:[#allocation3 + $0x2a0] sm:$0xff] }
 0x718   : > { %4030 = vst.msk [vmem:[#allocation3 + $0x338] sm:$0xff] %vm175_vm2, %v3982_v40  ;;  %v4045_v32 = vld [vmem:[#allocation2 + $0x368] sm:$0xff]  ;;  %v4046_v50 = vld [vmem:[#allocation2 + $0x370] sm:$0xff] }
 0x719   : > { %602 = vst.msk [vmem:[#allocation2 + $0x382] sm:$0xff] %vm284_vm1, %v569_v8  ;;  %v571_v40 = vld [vmem:[%s6250_s19 + $0x68] sm:$0xff] }
 0x71a   : > { %603 = vst.msk [vmem:[#allocation2 + $0x392] sm:$0xff] %vm284_vm1, %v570_v42  ;;  %v4398_v42 = vld [vmem:[#allocation3 + $0x68] sm:$0xff] }
 0x71b   : > { %v3869_v56 = vpop.permute.xlu0 %3868  ;;  %v3877_v27 = vpop.permute.xlu1 %3876  ;;  %604 = vst.msk [vmem:[#allocation2 + $0x39a] sm:$0xff] %vm284_vm1, %v571_v40  ;;  %v4434_v40 = vld [vmem:[#allocation3 + $0x2a8] sm:$0xff] }
 0x71c   : > { %v3974_v39 = vadd.f32 %v3869_v56, %v3782_v2  ;;  %v3978_v19 = vadd.f32 %v3877_v27, %v3786_v51  ;;  %v4047_v56 = vld [vmem:[#allocation2 + $0x378] sm:$0xff]  ;;  %v572_v51 = vld [vmem:[%s6250_s19 + $0x70] sm:$0xff] }
 0x71d   : > { %605 = vst.msk [vmem:[#allocation2 + $0x3aa] sm:$0xff] %vm284_vm1, %v572_v51  ;;  %v4432_v49 = vld [vmem:[#allocation3 + $0x280] sm:$0xff] }
 0x71e   : > { %4022 = vst.msk [vmem:[#allocation3 + $0x2b0] sm:$0xff] %vm175_vm2, %v3974_v39  ;;  %v4391_v39 = vld [vmem:[#allocation3] sm:$0xff] }
 0x71f   : > { %4026 = vst.msk [vmem:[#allocation3 + $0x300] sm:$0xff] %vm175_vm2, %v3978_v19  ;;  %v4056_v51 = vld [vmem:[#allocation2 + $0x3c0] sm:$0xff] }
 0x720   : > { %v4048_v2 = vld [vmem:[#allocation2 + $0x380] sm:$0xff] }
 0x723   : > { %v3875_v38 = vpop.permute.xlu0 %3874  ;;  %v3883_v13 = vpop.permute.xlu1 %3882 }
 0x724   : > { %v3977_v48 = vadd.f32 %v3875_v38, %v3785_v52  ;;  %v3981_v17 = vadd.f32 %v3883_v13, %v3789_v10  ;;  %v4049_v52 = vld [vmem:[#allocation2 + $0x388] sm:$0xff]  ;;  %v573_v10 = vld [vmem:[%s6250_s19 + $0x78] sm:$0xff] }
 0x725   : > { %606 = vst.msk [vmem:[#allocation2 + $0x3b2] sm:$0xff] %vm284_vm1, %v573_v10 }
 0x726   : > { %4025 = vst.msk [vmem:[#allocation3 + $0x2e0] sm:$0xff] %vm175_vm2, %v3977_v48  ;;  %v4392_v48 = vld [vmem:[#allocation3 + $0x8] sm:$0xff] }
 0x727   : > { %4029 = vst.msk [vmem:[#allocation3 + $0x330] sm:$0xff] %vm175_vm2, %v3981_v17 }
 0x72b   : > { %v3881_v46 = vpop.permute.xlu0 %3880  ;;  %v4083_v18 = vpop.permute.xlu1 %4082 }
 0x72c   : > { %v3980_v34 = vadd.f32 %v3881_v46, %v3788_v22  ;;  %6112 = vmatpush.msk.msra.mxu2 %vm816_vm0, %v4083_v18  ;;  %6166 = vmatpush.msk.msra.mxu3 %vm816_vm0, %v4083_v18  ;;  %v4050_v46 = vld [vmem:[#allocation2 + $0x390] sm:$0xff]  ;;  %v4055_v8 = vld [vmem:[#allocation2 + $0x3b8] sm:$0xff] }
 0x72d   : > { %6113 = vmatmul.msk.f32.vlgmr.msra.gmra.mxu2 %vm284_vm1, %v4032_v57  ;;  %6149 = vmatmul.msk.f32.vlgmr.msra.gmra.mxu3 %vm284_vm1, %v4068_v31  ;;  %v4393_v18 = vld [vmem:[#allocation3 + $0x10] sm:$0xff] }
 0x72e   : > { %4028 = vst.msk [vmem:[#allocation3 + $0x310] sm:$0xff] %vm175_vm2, %v3980_v34  ;;  %v4054_v33 = vld [vmem:[#allocation2 + $0x3b0] sm:$0xff] }
 0x733   : > { %v3887_v54 = vpop.permute.xlu0 %3886 }
 0x734   : > { %v3983_v16 = vadd.f32 %v3887_v54, %v3791_v28  ;;  %v4051_v28 = vld [vmem:[#allocation2 + $0x398] sm:$0xff] }
 0x735   : > { %6114 = vmatmul.msk.f32.gmra.mxu2 %vm284_vm1, %v4033_v44  ;;  %6150 = vmatmul.msk.f32.gmra.mxu3 %vm284_vm1, %v4069_v36  ;;  %v4429_v44 = vld [vmem:[#allocation3 + $0x250] sm:$0xff] }
 0x736   : > { %4031 = vst.msk [vmem:[#allocation3 + $0x340] sm:$0xff] %vm175_vm2, %v3983_v16 }
 0x73d   : > { %6115 = vmatmul.msk.f32.gmra.mxu2 %vm284_vm1, %v4034_v24  ;;  %6151 = vmatmul.msk.f32.gmra.mxu3 %vm284_vm1, %v4070_v9  ;;  %v4394_v24 = vld [vmem:[#allocation3 + $0x30] sm:$0xff] }
 0x745   : > { %6116 = vmatmul.msk.f32.gmra.mxu2 %vm284_vm1, %v4035_v15  ;;  %6152 = vmatmul.msk.f32.gmra.mxu3 %vm284_vm1, %v4071_v23 }
 0x74d   : > { %6117 = vmatmul.msk.f32.gmra.mxu2 %vm284_vm1, %v4036_v59  ;;  %6153 = vmatmul.msk.f32.gmra.mxu3 %vm284_vm1, %v4072_v41  ;;  %v4052_v59 = vld [vmem:[#allocation2 + $0x3a0] sm:$0xff]  ;;  %v575_v41 = vld [vmem:[%s6250_s19 + $0x88] sm:$0xff] }
 0x74e   : > { %608 = vst.msk [vmem:[#allocation2 + $0x3ca] sm:$0xff] %vm284_vm1, %v575_v41 }
 0x755   : > { %6118 = vmatmul.msk.f32.gmra.mxu2 %vm284_vm1, %v4037_v62  ;;  %6154 = vmatmul.msk.f32.gmra.mxu3 %vm284_vm1, %v4073_v61  ;;  %v4431_v61 = vld [vmem:[#allocation3 + $0x278] sm:$0xff] }
 0x75d   : > { %6119 = vmatmul.msk.f32.gmra.mxu2 %vm284_vm1, %v4038_v3  ;;  %6155 = vmatmul.msk.f32.gmra.mxu3 %vm284_vm1, %v4074_v4  ;;  %v4053_v3 = vld [vmem:[#allocation2 + $0x3a8] sm:$0xff] }
 0x765   : > { %6120 = vmatmul.msk.f32.gmra.mxu2 %vm284_vm1, %v4039_v45  ;;  %6156 = vmatmul.msk.f32.gmra.mxu3 %vm284_vm1, %v4075_v37  ;;  %v4396_v45 = vld [vmem:[#allocation3 + $0x40] sm:$0xff] }
 0x76d   : > { %6121 = vmatmul.msk.f32.gmra.mxu2 %vm284_vm1, %v4040_v63  ;;  %6157 = vmatmul.msk.f32.gmra.mxu3 %vm284_vm1, %v4076_v14 }
 0x775   : > { %6122 = vmatmul.msk.f32.gmra.mxu2 %vm284_vm1, %v4041_v0  ;;  %6158 = vmatmul.msk.f32.gmra.mxu3 %vm284_vm1, %v4077_v43  ;;  %v576_v0 = vld [vmem:[%s6250_s19 + $0x90] sm:$0xff] }
 0x776   : > { %609 = vst.msk [vmem:[#allocation2 + $0x3da] sm:$0xff] %vm284_vm1, %v576_v0 }
 0x77d   : > { %6123 = vmatmul.msk.f32.gmra.mxu2 %vm284_vm1, %v4042_v29  ;;  %6159 = vmatmul.msk.f32.gmra.mxu3 %vm284_vm1, %v4078_v21  ;;  %v4397_v29 = vld [vmem:[#allocation3 + $0x60] sm:$0xff] }
 0x785   : > { %6124 = vmatmul.msk.f32.gmra.mxu2 %vm284_vm1, %v4043_v47  ;;  %6160 = vmatmul.msk.f32.gmra.mxu3 %vm284_vm1, %v4079_v55 }
 0x78d   : > { %6125 = vmatmul.msk.f32.gmra.mxu2 %vm284_vm1, %v4044_v26  ;;  %v577_v26 = vld [vmem:[%s6250_s19 + $0x98] sm:$0xff] }
 0x78e   : > { %610 = vst.msk [vmem:[#allocation2 + $0x3e2] sm:$0xff] %vm284_vm1, %v577_v26 }
 0x795   : > { %6126 = vmatmul.msk.f32.gmra.mxu2 %vm284_vm1, %v4045_v32 }
 0x79d   : > { %6127 = vmatmul.msk.f32.gmra.mxu2 %vm284_vm1, %v4046_v50 }
 0x7a5   : > { %6128 = vmatmul.msk.f32.gmra.mxu2 %vm284_vm1, %v4047_v56 }
 0x7ad   : > { %6129 = vmatmul.msk.f32.gmra.mxu2 %vm284_vm1, %v4048_v2 }
 0x7b0   : > { %v8663_v27 = vpop.f32.mrf.mxu2  ;;  %v8665_v19 = vpop.f32.mrf.mxu3 }
 0x7b1   : > { %v4439_v53 = vadd.f32 %v4391_v39, %v8663_v27  ;;  %v4475_v38 = vadd.f32 %v4427_v6, %v8665_v19  ;;  %4631 = vrot.lane.b32.xlu2 %v8663_v27, %s6201_s5  ;;  %v4399_v6 = vld [vmem:[#allocation3 + $0x70] sm:$0xff] }
 0x7b3   : > { %4487 = vst.msk [vmem:[#allocation3] sm:$0xff] %vm284_vm1, %v4439_v53 }
 0x7b4   : > { %4523 = vst.msk [vmem:[#allocation3 + $0x240] sm:$0xff] %vm284_vm1, %v4475_v38  ;;  %v4435_v38 = vld [vmem:[#allocation3 + $0x2b0] sm:$0xff] }
 0x7b5   : > { %6130 = vmatmul.msk.f32.gmra.mxu2 %vm284_vm1, %v4049_v52 }
 0x7b8   : > { %v8682_v13 = vpop.f32.mrf.mxu2  ;;  %v8684_v17 = vpop.f32.mrf.mxu3 }
 0x7b9   : > { %v4440_v7 = vadd.f32 %v4392_v48, %v8682_v13  ;;  %v4476_v57 = vadd.f32 %v4428_v58, %v8684_v17  ;;  %4633 = vrot.lane.b32.xlu0 %v8682_v13, %s6201_s5  ;;  %v4057_v48 = vld [vmem:[#allocation2 + $0x3c8] sm:$0xff]  ;;  %v578_v58 = vld [vmem:[%s6250_s19 + $0xa0] sm:$0xff] }
 0x7ba   : > { %v5735_v31 = vld [vmem:[#allocation3] sm:$0xff]  ;;  %611 = vst.msk [vmem:[#allocation2 + $0x3f2] sm:$0xff] %vm284_vm1, %v578_v58 }
 0x7bb   : > { %5843 = vst.msk [vmem:[%s8680_s9] sm:$0xff] %vm175_vm2, %v5735_v31 }
 0x7bc   : > { %4488 = vst.msk [vmem:[#allocation3 + $0x8] sm:$0xff] %vm284_vm1, %v4440_v7 }
 0x7bd   : > { %4524 = vst.msk [vmem:[#allocation3 + $0x248] sm:$0xff] %vm284_vm1, %v4476_v57  ;;  %6131 = vmatmul.msk.f32.gmra.mxu2 %vm284_vm1, %v4050_v46  ;;  %v4400_v57 = vld [vmem:[#allocation3 + $0x90] sm:$0xff] }
 0x7be   : > { %v4436_v46 = vld [vmem:[#allocation3 + $0x2d0] sm:$0xff] }
 0x7c0   : > { %v8695_v22 = vpop.f32.mrf.mxu2  ;;  %v8697_v34 = vpop.f32.mrf.mxu3 }
 0x7c1   : > { %v4441_v36 = vadd.f32 %v4393_v18, %v8695_v22  ;;  %v4477_v54 = vadd.f32 %v4429_v44, %v8697_v34  ;;  %4635 = vrot.lane.b32.xlu1 %v8695_v22, %s6201_s5 }
 0x7c3   : > { %v5736_v16 = vld [vmem:[#allocation3 + $0x8] sm:$0xff]  ;;  %4489 = vst.msk [vmem:[#allocation3 + $0x10] sm:$0xff] %vm284_vm1, %v4441_v36  ;;  %v4058_v36 = vld [vmem:[#allocation2 + $0x3d0] sm:$0xff] }
 0x7c4   : > { %5844 = vst.msk [vmem:[%s8680_s9 + $0x8] sm:$0xff] %vm175_vm2, %v5736_v16  ;;  %v4401_v16 = vld [vmem:[#allocation3 + $0x98] sm:$0xff] }
 0x7c5   : > { %4525 = vst.msk [vmem:[#allocation3 + $0x250] sm:$0xff] %vm284_vm1, %v4477_v54  ;;  %6132 = vmatmul.msk.f32.gmra.mxu2 %vm284_vm1, %v4051_v28  ;;  %v579_v54 = vld [vmem:[%s6250_s19 + $0xa8] sm:$0xff] }
 0x7c6   : > { %612 = vst.msk [vmem:[#allocation2 + $0x3fa] sm:$0xff] %vm284_vm1, %v579_v54  ;;  %v4407_v54 = vld [vmem:[#allocation3 + $0xf8] sm:$0xff] }
 0x7c8   : > { %v8710_v12 = vpop.f32.mrf.mxu2  ;;  %v8712_v9 = vpop.f32.mrf.mxu3 }
 0x7c9   : > { %v4442_v35 = vadd.f32 %v4394_v24, %v8710_v12  ;;  %v4478_v15 = vadd.f32 %v4430_v25, %v8712_v9  ;;  %4637 = vrot.lane.b32.xlu2 %v8710_v12, %s6201_s5  ;;  %v4437_v24 = vld [vmem:[#allocation3 + $0x2d8] sm:$0xff] }
 0x7ca   : > { %v5737_v23 = vld [vmem:[#allocation3 + $0x10] sm:$0xff] }
 0x7cb   : > { %5845 = vst.msk [vmem:[%s8680_s9 + $0x10] sm:$0xff] %vm175_vm2, %v5737_v23 }
 0x7cc   : > { %4490 = vst.msk [vmem:[#allocation3 + $0x30] sm:$0xff] %vm284_vm1, %v4442_v35 }
 0x7cd   : > { %4526 = vst.msk [vmem:[#allocation3 + $0x270] sm:$0xff] %vm284_vm1, %v4478_v15  ;;  %6133 = vmatmul.msk.f32.gmra.mxu2 %vm284_vm1, %v4052_v59  ;;  %v4059_v15 = vld [vmem:[#allocation2 + $0x3d8] sm:$0xff]  ;;  %v4402_v59 = vld [vmem:[#allocation3 + $0xa0] sm:$0xff] }
 0x7d0   : > { %v8725_v20 = vpop.f32.mrf.mxu2  ;;  %v8727_v62 = vpop.f32.mrf.mxu3 }
 0x7d1   : > { %v4443_v30 = vadd.f32 %v4395_v1, %v8725_v20  ;;  %v4479_v60 = vadd.f32 %v4431_v61, %v8727_v62  ;;  %4639 = vrot.lane.b32.xlu0 %v8725_v20, %s6201_s5  ;;  %v4438_v1 = vld [vmem:[#allocation3 + $0x2e0] sm:$0xff] }
 0x7d3   : > { %4491 = vst.msk [vmem:[#allocation3 + $0x38] sm:$0xff] %vm284_vm1, %v4443_v30 }
 0x7d4   : > { %4527 = vst.msk [vmem:[#allocation3 + $0x278] sm:$0xff] %vm284_vm1, %v4479_v60  ;;  %v4060_v60 = vld [vmem:[#allocation2 + $0x3e0] sm:$0xff] }
 0x7d5   : > { %6134 = vmatmul.msk.f32.gmra.mxu2 %vm284_vm1, %v4053_v3  ;;  %v4535_v3 = vld [vmem:[#allocation3 + $0x18] sm:$0xff] }
 0x7d8   : > { %v8736_v4 = vpop.f32.mrf.mxu2  ;;  %v8738_v37 = vpop.f32.mrf.mxu3 }
 0x7d9   : > { %v4444_v63 = vadd.f32 %v4396_v45, %v8736_v4  ;;  %v4480_v14 = vadd.f32 %v4432_v49, %v8738_v37  ;;  %4641 = vrot.lane.b32.xlu1 %v8736_v4, %s6201_s5 }
 0x7db   : > { %4492 = vst.msk [vmem:[#allocation3 + $0x40] sm:$0xff] %vm284_vm1, %v4444_v63  ;;  %v580_v63 = vld [vmem:[%s6250_s19 + $0xb0] sm:$0xff] }
 0x7dc   : > { %4528 = vst.msk [vmem:[#allocation3 + $0x280] sm:$0xff] %vm284_vm1, %v4480_v14 }
 0x7dd   : > { %6135 = vmatmul.msk.f32.gmra.mxu2 %vm284_vm1, %v4054_v33  ;;  %613 = vst.msk [vmem:[#allocation2 + $0x40a] sm:$0xff] %vm284_vm1, %v580_v63  ;;  %v4403_v33 = vld [vmem:[#allocation3 + $0xc0] sm:$0xff] }
 0x7e0   : > { %v8749_v43 = vpop.f32.mrf.mxu2  ;;  %v8751_v21 = vpop.f32.mrf.mxu3 }
 0x7e1   : > { %v4445_v47 = vadd.f32 %v4397_v29, %v8749_v43  ;;  %v4481_v55 = vadd.f32 %v4433_v11, %v8751_v21  ;;  %4643 = vrot.lane.b32.xlu2 %v8749_v43, %s6201_s5  ;;  %v4061_v29 = vld [vmem:[#allocation2 + $0x3e8] sm:$0xff] }
 0x7e3   : > { %4493 = vst.msk [vmem:[#allocation3 + $0x60] sm:$0xff] %vm284_vm1, %v4445_v47  ;;  %v581_v47 = vld [vmem:[%s6250_s19 + $0xb8] sm:$0xff] }
 0x7e4   : > { %4529 = vst.msk [vmem:[#allocation3 + $0x2a0] sm:$0xff] %vm284_vm1, %v4481_v55 }
 0x7e5   : > { %6136 = vmatmul.msk.f32.gmra.mxu2 %vm284_vm1, %v4055_v8  ;;  %614 = vst.msk [vmem:[#allocation2 + $0x412] sm:$0xff] %vm284_vm1, %v581_v47  ;;  %v4404_v8 = vld [vmem:[#allocation3 + $0xc8] sm:$0xff] }
 0x7e8   : > { %v8762_v32 = vpop.f32.mrf.mxu2  ;;  %v8764_v50 = vpop.f32.mrf.mxu3 }
 0x7e9   : > { %v4446_v56 = vadd.f32 %v4398_v42, %v8762_v32  ;;  %v4482_v2 = vadd.f32 %v4434_v40, %v8764_v50  ;;  %4645 = vrot.lane.b32.xlu0 %v8762_v32, %s6201_s5  ;;  %v4062_v42 = vld [vmem:[#allocation2 + $0x3f0] sm:$0xff] }
 0x7eb   : > { %4494 = vst.msk [vmem:[#allocation3 + $0x68] sm:$0xff] %vm284_vm1, %v4446_v56  ;;  %v4405_v56 = vld [vmem:[#allocation3 + $0xd0] sm:$0xff] }
 0x7ec   : > { %4530 = vst.msk [vmem:[#allocation3 + $0x2a8] sm:$0xff] %vm284_vm1, %v4482_v2 }
 0x7ed   : > { %6137 = vmatmul.msk.f32.gmra.mxu2 %vm284_vm1, %v4056_v51  ;;  %v4063_v51 = vld [vmem:[#allocation2 + $0x3f8] sm:$0xff] }
 0x7f0   : > { %v8773_v39 = vpop.f32.mrf.mxu2  ;;  %v8775_v53 = vpop.f32.mrf.mxu3 }
 0x7f1   : > { %v4447_v52 = vadd.f32 %v4399_v6, %v8773_v39  ;;  %v4483_v10 = vadd.f32 %v4435_v38, %v8775_v53  ;;  %4647 = vrot.lane.b32.xlu1 %v8773_v39, %s6201_s5  ;;  %v4538_v6 = vld [vmem:[#allocation3 + $0x48] sm:$0xff] }
 0x7f3   : > { %4495 = vst.msk [vmem:[#allocation3 + $0x70] sm:$0xff] %vm284_vm1, %v4447_v52 }
 0x7f4   : > { %4531 = vst.msk [vmem:[#allocation3 + $0x2b0] sm:$0xff] %vm284_vm1, %v4483_v10 }
 0x7f5   : > { %6138 = vmatmul.msk.f32.gmra.mxu2 %vm284_vm1, %v4057_v48  ;;  %v4406_v48 = vld [vmem:[#allocation3 + $0xf0] sm:$0xff] }
 0x7f8   : > { %v8786_v7 = vpop.f32.mrf.mxu2  ;;  %v8788_v31 = vpop.f32.mrf.mxu3 }
 0x7f9   : > { %v4448_v18 = vadd.f32 %v4400_v57, %v8786_v7  ;;  %v4484_v44 = vadd.f32 %v4436_v46, %v8788_v31  ;;  %4649 = vrot.lane.b32.xlu2 %v8786_v7, %s6201_s5  ;;  %v4064_v57 = vld [vmem:[#allocation2 + $0x400] sm:$0xff] }
 0x7fb   : > { %4496 = vst.msk [vmem:[#allocation3 + $0x90] sm:$0xff] %vm284_vm1, %v4448_v18  ;;  %v4536_v18 = vld [vmem:[#allocation3 + $0x20] sm:$0xff] }
 0x7fc   : > { %4532 = vst.msk [vmem:[#allocation3 + $0x2d0] sm:$0xff] %vm284_vm1, %v4484_v44 }
 0x7fd   : > { %6139 = vmatmul.msk.f32.gmra.mxu2 %vm284_vm1, %v4058_v36 }
 0x800   : > { %v8799_v28 = vpop.f32.mrf.mxu2  ;;  %v8801_v5 = vpop.f32.mrf.mxu3 }
 0x801   : > { %v4449_v25 = vadd.f32 %v4401_v16, %v8799_v28  ;;  %v4485_v35 = vadd.f32 %v4437_v24, %v8801_v5  ;;  %4651 = vrot.lane.b32.xlu0 %v8799_v28, %s6201_s5  ;;  %v4065_v24 = vld [vmem:[#allocation2 + $0x408] sm:$0xff] }
 0x803   : > { %4497 = vst.msk [vmem:[#allocation3 + $0x98] sm:$0xff] %vm284_vm1, %v4449_v25  ;;  %v4537_v25 = vld [vmem:[#allocation3 + $0x28] sm:$0xff] }
 0x804   : > { %4533 = vst.msk [vmem:[#allocation3 + $0x2d8] sm:$0xff] %vm284_vm1, %v4485_v35 }
 0x805   : > { %6140 = vmatmul.msk.f32.gmra.mxu2 %vm284_vm1, %v4059_v15 }
 0x808   : > { %v8810_v23 = vpop.f32.mrf.mxu2  ;;  %v8812_v41 = vpop.f32.mrf.mxu3 }
 0x809   : > { %v4450_v61 = vadd.f32 %v4402_v59, %v8810_v23  ;;  %v4486_v30 = vadd.f32 %v4438_v1, %v8812_v41  ;;  %4653 = vrot.lane.b32.xlu1 %v8810_v23, %s6201_s5 }
 0x80b   : > { %4498 = vst.msk [vmem:[#allocation3 + $0xa0] sm:$0xff] %vm284_vm1, %v4450_v61  ;;  %v4632_v45 = vpop.permute.xlu2 %4631  ;;  %v4408_v61 = vld [vmem:[#allocation3 + $0x100] sm:$0xff] }
 0x80c   : > { %4534 = vst.msk [vmem:[#allocation3 + $0x2e0] sm:$0xff] %vm284_vm1, %v4486_v30  ;;  %v4775_v49 = vadd.f32 %v4632_v45, %v4535_v3  ;;  %v4541_v3 = vld [vmem:[#allocation3 + $0x78] sm:$0xff] }
 0x80d   : > { %6141 = vmatmul.msk.f32.gmra.mxu2 %vm284_vm1, %v4060_v60  ;;  %v4066_v60 = vld [vmem:[#allocation2 + $0x410] sm:$0xff] }
 0x80e   : > { %4823 = vst.msk [vmem:[#allocation3 + $0x18] sm:$0xff] %vm284_vm1, %v4775_v49 }
 0x810   : > { %v8824_v14 = vpop.f32.mrf.mxu2 }
 0x811   : > { %v4451_v0 = vadd.f32 %v4403_v33, %v8824_v14  ;;  %4655 = vrot.lane.b32.xlu2 %v8824_v14, %s6201_s5 }
 0x813   : > { %4499 = vst.msk [vmem:[#allocation3 + $0xc0] sm:$0xff] %vm284_vm1, %v4451_v0  ;;  %v4409_v0 = vld [vmem:[#allocation3 + $0x120] sm:$0xff] }
 0x815   : > { %v5738_v11 = vld [vmem:[#allocation3 + $0x18] sm:$0xff]  ;;  %6142 = vmatmul.msk.f32.gmra.mxu2 %vm284_vm1, %v4061_v29 }
 0x816   : > { %5846 = vst.msk [vmem:[%s8680_s9 + $0x18] sm:$0xff] %vm175_vm2, %v5738_v11  ;;  %v4067_v11 = vld [vmem:[#allocation2 + $0x418] sm:$0xff] }
 0x818   : > { %v8835_v55 = vpop.f32.mrf.mxu2 }
 0x819   : > { %v4452_v26 = vadd.f32 %v4404_v8, %v8835_v55  ;;  %4657 = vrot.lane.b32.xlu0 %v8835_v55, %s6201_s5  ;;  %v4539_v8 = vld [vmem:[#allocation3 + $0x50] sm:$0xff] }
 0x81b   : > { %4500 = vst.msk [vmem:[#allocation3 + $0xc8] sm:$0xff] %vm284_vm1, %v4452_v26 }
 0x81d   : > { %6143 = vmatmul.msk.f32.gmra.mxu2 %vm284_vm1, %v4062_v42 }
 0x820   : > { %v8842_v40 = vpop.f32.mrf.mxu2 }
 0x821   : > { %v4453_v2 = vadd.f32 %v4405_v56, %v8842_v40  ;;  %4659 = vrot.lane.b32.xlu1 %v8842_v40, %s6201_s5  ;;  %v4410_v56 = vld [vmem:[#allocation3 + $0x128] sm:$0xff] }
 0x823   : > { %4501 = vst.msk [vmem:[#allocation3 + $0xd0] sm:$0xff] %vm284_vm1, %v4453_v2  ;;  %v4638_v38 = vpop.permute.xlu2 %4637 }
 0x824   : > { %v4778_v52 = vadd.f32 %v4638_v38, %v4538_v6 }
 0x825   : > { %6144 = vmatmul.msk.f32.gmra.mxu2 %vm284_vm1, %v4063_v51  ;;  %v4540_v51 = vld [vmem:[#allocation3 + $0x58] sm:$0xff] }
 0x826   : > { %4826 = vst.msk [vmem:[#allocation3 + $0x48] sm:$0xff] %vm284_vm1, %v4778_v52 }
 0x828   : > { %v8850_v10 = vpop.f32.mrf.mxu2 }
 0x829   : > { %v4454_v58 = vadd.f32 %v4406_v48, %v8850_v10  ;;  %4661 = vrot.lane.b32.xlu2 %v8850_v10, %s6201_s5  ;;  %v4411_v48 = vld [vmem:[#allocation3 + $0x130] sm:$0xff] }
 0x82b   : > { %4502 = vst.msk [vmem:[#allocation3 + $0xf0] sm:$0xff] %vm284_vm1, %v4454_v58  ;;  %v4634_v46 = vpop.permute.xlu0 %4633 }
 0x82c   : > { %v4776_v44 = vadd.f32 %v4634_v46, %v4536_v18 }
 0x82d   : > { %6145 = vmatmul.msk.f32.gmra.mxu2 %vm284_vm1, %v4064_v57  ;;  %v4544_v57 = vld [vmem:[#allocation3 + $0xa8] sm:$0xff] }
 0x82e   : > { %4824 = vst.msk [vmem:[#allocation3 + $0x20] sm:$0xff] %vm284_vm1, %v4776_v44 }
 0x830   : > { %v8858_v36 = vpop.f32.mrf.mxu2 }
 0x831   : > { %v4455_v16 = vadd.f32 %v4407_v54, %v8858_v36  ;;  %4663 = vrot.lane.b32.xlu0 %v8858_v36, %s6201_s5  ;;  %v4412_v54 = vld [vmem:[#allocation3 + $0x150] sm:$0xff] }
 0x833   : > { %4503 = vst.msk [vmem:[#allocation3 + $0xf8] sm:$0xff] %vm284_vm1, %v4455_v16  ;;  %v4636_v35 = vpop.permute.xlu1 %4635 }
 0x834   : > { %v4777_v15 = vadd.f32 %v4636_v35, %v4537_v25  ;;  %v4542_v25 = vld [vmem:[#allocation3 + $0x80] sm:$0xff] }
 0x835   : > { %v5739_v59 = vld [vmem:[#allocation3 + $0x20] sm:$0xff]  ;;  %6146 = vmatmul.msk.f32.gmra.mxu2 %vm284_vm1, %v4065_v24 }
 0x836   : > { %5847 = vst.msk [vmem:[%s8680_s9 + $0x20] sm:$0xff] %vm175_vm2, %v5739_v59  ;;  %v4413_v59 = vld [vmem:[#allocation3 + $0x158] sm:$0xff] }
 0x837   : > { %4825 = vst.msk [vmem:[#allocation3 + $0x28] sm:$0xff] %vm284_vm1, %v4777_v15 }
 0x838   : > { %v8868_v1 = vpop.f32.mrf.mxu2 }
 0x839   : > { %v4456_v30 = vadd.f32 %v4408_v61, %v8868_v1  ;;  %4665 = vrot.lane.b32.xlu1 %v8868_v1, %s6201_s5 }
 0x83b   : > { %4504 = vst.msk [vmem:[#allocation3 + $0x100] sm:$0xff] %vm284_vm1, %v4456_v30  ;;  %v4644_v45 = vpop.permute.xlu2 %4643  ;;  %v4543_v30 = vld [vmem:[#allocation3 + $0x88] sm:$0xff] }
 0x83c   : > { %v4781_v49 = vadd.f32 %v4644_v45, %v4541_v3 }
 0x83d   : > { %6147 = vmatmul.msk.f32.gmra.mxu2 %vm284_vm1, %v4066_v60 }
 0x83e   : > { %v5740_v63 = vld [vmem:[#allocation3 + $0x28] sm:$0xff]  ;;  %4829 = vst.msk [vmem:[#allocation3 + $0x78] sm:$0xff] %vm284_vm1, %v4781_v49  ;;  %v4414_v49 = vld [vmem:[#allocation3 + $0x160] sm:$0xff] }
 0x83f   : > { %5848 = vst.msk [vmem:[%s8680_s9 + $0x28] sm:$0xff] %vm175_vm2, %v5740_v63 }
 0x840   : > { %v8878_v33 = vpop.f32.mrf.mxu2 }
 0x841   : > { %v4457_v29 = vadd.f32 %v4409_v0, %v8878_v33  ;;  %4667 = vrot.lane.b32.xlu2 %v8878_v33, %s6201_s5  ;;  %v4547_v0 = vld [vmem:[#allocation3 + $0xd8] sm:$0xff] }
 0x843   : > { %4505 = vst.msk [vmem:[#allocation3 + $0x120] sm:$0xff] %vm284_vm1, %v4457_v29  ;;  %v4640_v47 = vpop.permute.xlu0 %4639 }
 0x844   : > { %v4779_v26 = vadd.f32 %v4640_v47, %v4539_v8  ;;  %v4415_v8 = vld [vmem:[#allocation3 + $0x180] sm:$0xff] }
 0x845   : > { %6148 = vmatmul.msk.f32.gmra.mxu2 %vm284_vm1, %v4067_v11 }
 0x846   : > { %4827 = vst.msk [vmem:[#allocation3 + $0x50] sm:$0xff] %vm284_vm1, %v4779_v26 }
 0x848   : > { %v8886_v42 = vpop.f32.mrf.mxu2 }
 0x849   : > { %v4458_v2 = vadd.f32 %v4410_v56, %v8886_v42  ;;  %4669 = vrot.lane.b32.xlu0 %v8886_v42, %s6201_s5 }
 0x84b   : > { %4506 = vst.msk [vmem:[#allocation3 + $0x128] sm:$0xff] %vm284_vm1, %v4458_v2  ;;  %v4642_v6 = vpop.permute.xlu1 %4641  ;;  %v4545_v2 = vld [vmem:[#allocation3 + $0xb0] sm:$0xff] }
 0x84c   : > { %v4780_v38 = vadd.f32 %v4642_v6, %v4540_v51 }
 0x84e   : > { %4828 = vst.msk [vmem:[#allocation3 + $0x58] sm:$0xff] %vm284_vm1, %v4780_v38  ;;  %v4416_v38 = vld [vmem:[#allocation3 + $0x188] sm:$0xff] }
 0x850   : > { %v8893_v52 = vpop.f32.mrf.mxu2 }
 0x851   : > { %v4459_v58 = vadd.f32 %v4411_v48, %v8893_v52  ;;  %4671 = vrot.lane.b32.xlu1 %v8893_v52, %s6201_s5 }
 0x853   : > { %4507 = vst.msk [vmem:[#allocation3 + $0x130] sm:$0xff] %vm284_vm1, %v4459_v58  ;;  %v4650_v46 = vpop.permute.xlu2 %4649  ;;  %v4546_v58 = vld [vmem:[#allocation3 + $0xb8] sm:$0xff] }
 0x854   : > { %v4784_v18 = vadd.f32 %v4650_v46, %v4544_v57 }
 0x856   : > { %4832 = vst.msk [vmem:[#allocation3 + $0xa8] sm:$0xff] %vm284_vm1, %v4784_v18 }
 0x858   : > { %v8900_v44 = vpop.f32.mrf.mxu2 }
 0x859   : > { %v4460_v16 = vadd.f32 %v4412_v54, %v8900_v44  ;;  %4673 = vrot.lane.b32.xlu2 %v8900_v44, %s6201_s5  ;;  %v4417_v54 = vld [vmem:[#allocation3 + $0x190] sm:$0xff] }
 0x85b   : > { %4508 = vst.msk [vmem:[#allocation3 + $0x150] sm:$0xff] %vm284_vm1, %v4460_v16  ;;  %v4646_v24 = vpop.permute.xlu0 %4645 }
 0x85c   : > { %v4782_v35 = vadd.f32 %v4646_v24, %v4542_v25  ;;  %v4550_v24 = vld [vmem:[#allocation3 + $0x108] sm:$0xff] }
 0x85e   : > { %4830 = vst.msk [vmem:[#allocation3 + $0x80] sm:$0xff] %vm284_vm1, %v4782_v35 }
 0x860   : > { %v8907_v15 = vpop.f32.mrf.mxu2 }
 0x861   : > { %v4461_v61 = vadd.f32 %v4413_v59, %v8907_v15  ;;  %4675 = vrot.lane.b32.xlu0 %v8907_v15, %s6201_s5 }
 0x863   : > { %4509 = vst.msk [vmem:[#allocation3 + $0x158] sm:$0xff] %vm284_vm1, %v4461_v61  ;;  %v4648_v60 = vpop.permute.xlu1 %4647  ;;  %v4418_v61 = vld [vmem:[#allocation3 + $0x1b0] sm:$0xff] }
 0x864   : > { %v4783_v3 = vadd.f32 %v4648_v60, %v4543_v30 }
 0x866   : > { %4831 = vst.msk [vmem:[#allocation3 + $0x88] sm:$0xff] %vm284_vm1, %v4783_v3  ;;  %v4548_v3 = vld [vmem:[#allocation3 + $0xe0] sm:$0xff] }
 0x868   : > { %v8914_v45 = vpop.f32.mrf.mxu2 }
 0x869   : > { %v4462_v63 = vadd.f32 %v4414_v49, %v8914_v45  ;;  %4677 = vrot.lane.b32.xlu1 %v8914_v45, %s6201_s5 }
 0x86b   : > { %4510 = vst.msk [vmem:[#allocation3 + $0x160] sm:$0xff] %vm284_vm1, %v4462_v63  ;;  %v4656_v29 = vpop.permute.xlu2 %4655 }
 0x86c   : > { %v4787_v11 = vadd.f32 %v4656_v29, %v4547_v0  ;;  %v4419_v0 = vld [vmem:[#allocation3 + $0x1b8] sm:$0xff] }
 0x86e   : > { %4835 = vst.msk [vmem:[#allocation3 + $0xd8] sm:$0xff] %vm284_vm1, %v4787_v11  ;;  %v4549_v11 = vld [vmem:[#allocation3 + $0xe8] sm:$0xff] }
 0x870   : > { %v8921_v47 = vpop.f32.mrf.mxu2 }
 0x871   : > { %v4463_v26 = vadd.f32 %v4415_v8, %v8921_v47  ;;  %4679 = vrot.lane.b32.xlu2 %v8921_v47, %s6201_s5 }
 0x873   : > { %4511 = vst.msk [vmem:[#allocation3 + $0x180] sm:$0xff] %vm284_vm1, %v4463_v26  ;;  %v4652_v56 = vpop.permute.xlu0 %4651 }
 0x874   : > { %v4785_v51 = vadd.f32 %v4652_v56, %v4545_v2  ;;  %v4420_v2 = vld [vmem:[#allocation3 + $0x1c0] sm:$0xff] }
 0x876   : > { %4833 = vst.msk [vmem:[#allocation3 + $0xb0] sm:$0xff] %vm284_vm1, %v4785_v51 }
 0x878   : > { %v8928_v6 = vpop.f32.mrf.mxu2 }
 0x879   : > { %v4464_v48 = vadd.f32 %v4416_v38, %v8928_v6  ;;  %4681 = vrot.lane.b32.xlu0 %v8928_v6, %s6201_s5  ;;  %v4553_v38 = vld [vmem:[#allocation3 + $0x138] sm:$0xff] }
 0x87b   : > { %4512 = vst.msk [vmem:[#allocation3 + $0x188] sm:$0xff] %vm284_vm1, %v4464_v48  ;;  %v4654_v57 = vpop.permute.xlu1 %4653 }
 0x87c   : > { %v4786_v46 = vadd.f32 %v4654_v57, %v4546_v58 }
 0x87e   : > { %4834 = vst.msk [vmem:[#allocation3 + $0xb8] sm:$0xff] %vm284_vm1, %v4786_v46  ;;  %v4421_v46 = vld [vmem:[#allocation3 + $0x1e0] sm:$0xff] }
 0x880   : > { %v8935_v18 = vpop.f32.mrf.mxu2 }
 0x881   : > { %v4465_v16 = vadd.f32 %v4417_v54, %v8935_v18  ;;  %4683 = vrot.lane.b32.xlu1 %v8935_v18, %s6201_s5 }
 0x883   : > { %4513 = vst.msk [vmem:[#allocation3 + $0x190] sm:$0xff] %vm284_vm1, %v4465_v16  ;;  %v4662_v25 = vpop.permute.xlu2 %4661 }
 0x884   : > { %v4790_v35 = vadd.f32 %v4662_v25, %v4550_v24  ;;  %v4551_v24 = vld [vmem:[#allocation3 + $0x110] sm:$0xff] }
 0x886   : > { %4838 = vst.msk [vmem:[#allocation3 + $0x108] sm:$0xff] %vm284_vm1, %v4790_v35 }
 0x888   : > { %v8942_v59 = vpop.f32.mrf.mxu2 }
 0x889   : > { %v4466_v30 = vadd.f32 %v4418_v61, %v8942_v59  ;;  %4685 = vrot.lane.b32.xlu2 %v8942_v59, %s6201_s5  ;;  %v4422_v61 = vld [vmem:[#allocation3 + $0x1e8] sm:$0xff] }
 0x88b   : > { %4514 = vst.msk [vmem:[#allocation3 + $0x1b0] sm:$0xff] %vm284_vm1, %v4466_v30  ;;  %v4658_v60 = vpop.permute.xlu0 %4657 }
 0x88c   : > { %v4788_v49 = vadd.f32 %v4658_v60, %v4548_v3  ;;  %v4552_v60 = vld [vmem:[#allocation3 + $0x118] sm:$0xff] }
 0x88e   : > { %4836 = vst.msk [vmem:[#allocation3 + $0xe0] sm:$0xff] %vm284_vm1, %v4788_v49 }
 0x890   : > { %v8949_v63 = vpop.f32.mrf.mxu2 }
 0x891   : > { %v4467_v29 = vadd.f32 %v4419_v0, %v8949_v63  ;;  %4687 = vrot.lane.b32.xlu0 %v8949_v63, %s6201_s5 }
 0x893   : > { %4515 = vst.msk [vmem:[#allocation3 + $0x1b8] sm:$0xff] %vm284_vm1, %v4467_v29  ;;  %v4660_v8 = vpop.permute.xlu1 %4659  ;;  %v4423_v29 = vld [vmem:[#allocation3 + $0x1f0] sm:$0xff] }
 0x894   : > { %v4789_v26 = vadd.f32 %v4660_v8, %v4549_v11  ;;  %v4556_v8 = vld [vmem:[#allocation3 + $0x168] sm:$0xff] }
 0x896   : > { %4837 = vst.msk [vmem:[#allocation3 + $0xe8] sm:$0xff] %vm284_vm1, %v4789_v26 }
 0x898   : > { %v8956_v56 = vpop.f32.mrf.mxu2 }
 0x899   : > { %v4468_v51 = vadd.f32 %v4420_v2, %v8956_v56  ;;  %4689 = vrot.lane.b32.xlu1 %v8956_v56, %s6201_s5 }
 0x89b   : > { %4516 = vst.msk [vmem:[#allocation3 + $0x1c0] sm:$0xff] %vm284_vm1, %v4468_v51  ;;  %v4668_v48 = vpop.permute.xlu2 %4667 }
 0x89c   : > { %v4793_v58 = vadd.f32 %v4668_v48, %v4553_v38  ;;  %v4424_v38 = vld [vmem:[#allocation3 + $0x210] sm:$0xff] }
 0x89e   : > { %4841 = vst.msk [vmem:[#allocation3 + $0x138] sm:$0xff] %vm284_vm1, %v4793_v58 }
 0x8a0   : > { %v8963_v57 = vpop.f32.mrf.mxu2 }
 0x8a1   : > { %v4469_v54 = vadd.f32 %v4421_v46, %v8963_v57  ;;  %4691 = vrot.lane.b32.xlu2 %v8963_v57, %s6201_s5  ;;  %v4554_v46 = vld [vmem:[#allocation3 + $0x140] sm:$0xff] }
 0x8a3   : > { %4517 = vst.msk [vmem:[#allocation3 + $0x1e0] sm:$0xff] %vm284_vm1, %v4469_v54  ;;  %v4664_v16 = vpop.permute.xlu0 %4663 }
 0x8a4   : > { %v4791_v25 = vadd.f32 %v4664_v16, %v4551_v24  ;;  %v4425_v24 = vld [vmem:[#allocation3 + $0x218] sm:$0xff] }
 0x8a6   : > { %4839 = vst.msk [vmem:[#allocation3 + $0x110] sm:$0xff] %vm284_vm1, %v4791_v25 }
 0x8a8   : > { %v8970_v35 = vpop.f32.mrf.mxu2 }
 0x8a9   : > { %v4470_v30 = vadd.f32 %v4422_v61, %v8970_v35  ;;  %4693 = vrot.lane.b32.xlu0 %v8970_v35, %s6201_s5  ;;  %v4555_v61 = vld [vmem:[#allocation3 + $0x148] sm:$0xff] }
 0x8ab   : > { %4518 = vst.msk [vmem:[#allocation3 + $0x1e8] sm:$0xff] %vm284_vm1, %v4470_v30  ;;  %v4666_v3 = vpop.permute.xlu1 %4665 }
 0x8ac   : > { %v4792_v49 = vadd.f32 %v4666_v3, %v4552_v60 }
 0x8ae   : > { %4840 = vst.msk [vmem:[#allocation3 + $0x118] sm:$0xff] %vm284_vm1, %v4792_v49  ;;  %v4426_v49 = vld [vmem:[#allocation3 + $0x220] sm:$0xff] }
 0x8b0   : > { %v8977_v0 = vpop.f32.mrf.mxu2 }
 0x8b1   : > { %v4471_v11 = vadd.f32 %v4423_v29, %v8977_v0  ;;  %4695 = vrot.lane.b32.xlu1 %v8977_v0, %s6201_s5 }
 0x8b3   : > { %4519 = vst.msk [vmem:[#allocation3 + $0x1f0] sm:$0xff] %vm284_vm1, %v4471_v11  ;;  %v4674_v26 = vpop.permute.xlu2 %4673  ;;  %v4559_v11 = vld [vmem:[#allocation3 + $0x198] sm:$0xff] }
 0x8b4   : > { %v4796_v2 = vadd.f32 %v4674_v26, %v4556_v8 }
 0x8b6   : > { %4844 = vst.msk [vmem:[#allocation3 + $0x168] sm:$0xff] %vm284_vm1, %v4796_v2 }
 0x8b8   : > { %v8984_v51 = vpop.f32.mrf.mxu2 }
 0x8b9   : > { %v4472_v48 = vadd.f32 %v4424_v38, %v8984_v51  ;;  %4697 = vrot.lane.b32.xlu2 %v8984_v51, %s6201_s5  ;;  %v4557_v38 = vld [vmem:[#allocation3 + $0x170] sm:$0xff] }
 0x8bb   : > { %4520 = vst.msk [vmem:[#allocation3 + $0x210] sm:$0xff] %vm284_vm1, %v4472_v48  ;;  %v4670_v58 = vpop.permute.xlu0 %4669 }
 0x8bc   : > { %v4794_v54 = vadd.f32 %v4670_v58, %v4554_v46  ;;  %v4558_v58 = vld [vmem:[#allocation3 + $0x178] sm:$0xff] }
 0x8be   : > { %4842 = vst.msk [vmem:[#allocation3 + $0x140] sm:$0xff] %vm284_vm1, %v4794_v54 }
 0x8c0   : > { %v8991_v16 = vpop.f32.mrf.mxu2 }
 0x8c1   : > { %v4473_v25 = vadd.f32 %v4425_v24, %v8991_v16  ;;  %4699 = vrot.lane.b32.xlu0 %v8991_v16, %s6201_s5  ;;  %4703 = vrot.lane.b32.xlu2 %v8665_v19, %s6201_s5  ;;  %v4562_v24 = vld [vmem:[#allocation3 + $0x1c8] sm:$0xff] }
 0x8c3   : > { %4521 = vst.msk [vmem:[#allocation3 + $0x218] sm:$0xff] %vm284_vm1, %v4473_v25  ;;  %v4672_v30 = vpop.permute.xlu1 %4671 }
 0x8c4   : > { %v4795_v60 = vadd.f32 %v4672_v30, %v4555_v61 }
 0x8c6   : > { %4843 = vst.msk [vmem:[#allocation3 + $0x148] sm:$0xff] %vm284_vm1, %v4795_v60  ;;  %v4560_v60 = vld [vmem:[#allocation3 + $0x1a0] sm:$0xff] }
 0x8c8   : > { %v9000_v3 = vpop.f32.mrf.mxu2 }
 0x8c9   : > { %v4474_v29 = vadd.f32 %v4426_v49, %v9000_v3  ;;  %4705 = vrot.lane.b32.xlu0 %v8684_v17, %s6201_s5  ;;  %4701 = vrot.lane.b32.xlu1 %v9000_v3, %s6201_s5 }
 0x8ca   : > { %4709 = vrot.lane.b32.xlu2 %v8712_v9, %s6201_s5 }
 0x8cb   : > { %4522 = vst.msk [vmem:[#allocation3 + $0x220] sm:$0xff] %vm284_vm1, %v4474_v29  ;;  %v4680_v8 = vpop.permute.xlu2 %4679  ;;  %v4561_v29 = vld [vmem:[#allocation3 + $0x1a8] sm:$0xff] }
 0x8cc   : > { %v4799_v26 = vadd.f32 %v4680_v8, %v4559_v11 }
 0x8ce   : > { %4847 = vst.msk [vmem:[#allocation3 + $0x198] sm:$0xff] %vm284_vm1, %v4799_v26  ;;  %v4565_v26 = vld [vmem:[#allocation3 + $0x1f8] sm:$0xff] }
 0x8d1   : > { %4711 = vrot.lane.b32.xlu0 %v8727_v62, %s6201_s5  ;;  %4707 = vrot.lane.b32.xlu1 %v8697_v34, %s6201_s5 }
 0x8d2   : > { %4715 = vrot.lane.b32.xlu2 %v8751_v21, %s6201_s5 }
 0x8d3   : > { %v4676_v2 = vpop.permute.xlu0 %4675 }
 0x8d4   : > { %v4797_v48 = vadd.f32 %v4676_v2, %v4557_v38 }
 0x8d6   : > { %4845 = vst.msk [vmem:[#allocation3 + $0x170] sm:$0xff] %vm284_vm1, %v4797_v48 }
 0x8d9   : > { %4717 = vrot.lane.b32.xlu0 %v8764_v50, %s6201_s5  ;;  %4713 = vrot.lane.b32.xlu1 %v8738_v37, %s6201_s5 }
 0x8da   : > { %4721 = vrot.lane.b32.xlu2 %v8788_v31, %s6201_s5 }
 0x8db   : > { %v4678_v46 = vpop.permute.xlu1 %4677 }
 0x8dc   : > { %v4798_v54 = vadd.f32 %v4678_v46, %v4558_v58  ;;  %v4563_v58 = vld [vmem:[#allocation3 + $0x1d0] sm:$0xff] }
 0x8de   : > { %4846 = vst.msk [vmem:[#allocation3 + $0x178] sm:$0xff] %vm284_vm1, %v4798_v54  ;;  %v4564_v54 = vld [vmem:[#allocation3 + $0x1d8] sm:$0xff] }
 0x8e1   : > { %4723 = vrot.lane.b32.xlu0 %v8801_v5, %s6201_s5  ;;  %4719 = vrot.lane.b32.xlu1 %v8775_v53, %s6201_s5 }
 0x8e2   : > { %4919 = vrot.lane.b32.xlu2 %v8663_v27, %s6195_s22 }
 0x8e3   : > { %v4686_v25 = vpop.permute.xlu2 %4685 }
 0x8e4   : > { %v4802_v61 = vadd.f32 %v4686_v25, %v4562_v24 }
 0x8e6   : > { %4850 = vst.msk [vmem:[#allocation3 + $0x1c8] sm:$0xff] %vm284_vm1, %v4802_v61  ;;  %v4568_v61 = vld [vmem:[#allocation3 + $0x228] sm:$0xff] }
 0x8e9   : > { %4921 = vrot.lane.b32.xlu0 %v8682_v13, %s6195_s22  ;;  %4725 = vrot.lane.b32.xlu1 %v8812_v41, %s6201_s5 }
 0x8ea   : > { %4925 = vrot.lane.b32.xlu2 %v8710_v12, %s6195_s22 }
 0x8eb   : > { %v4682_v30 = vpop.permute.xlu0 %4681 }
 0x8ec   : > { %v4800_v49 = vadd.f32 %v4682_v30, %v4560_v60 }
 0x8ee   : > { %4848 = vst.msk [vmem:[#allocation3 + $0x1a0] sm:$0xff] %vm284_vm1, %v4800_v49 }
 0x8f1   : > { %4927 = vrot.lane.b32.xlu0 %v8725_v20, %s6195_s22  ;;  %4923 = vrot.lane.b32.xlu1 %v8695_v22, %s6195_s22 }
 0x8f2   : > { %4931 = vrot.lane.b32.xlu2 %v8749_v43, %s6195_s22 }
 0x8f3   : > { %v4684_v11 = vpop.permute.xlu1 %4683 }
 0x8f4   : > { %v4801_v8 = vadd.f32 %v4684_v11, %v4561_v29  ;;  %v4566_v29 = vld [vmem:[#allocation3 + $0x200] sm:$0xff]  ;;  %v4571_v11 = vld [vmem:[#allocation3 + $0x258] sm:$0xff] }
 0x8f6   : > { %4849 = vst.msk [vmem:[#allocation3 + $0x1a8] sm:$0xff] %vm284_vm1, %v4801_v8 }
 0x8f9   : > { %4933 = vrot.lane.b32.xlu0 %v8762_v32, %s6195_s22  ;;  %4929 = vrot.lane.b32.xlu1 %v8736_v4, %s6195_s22 }
 0x8fa   : > { %4937 = vrot.lane.b32.xlu2 %v8786_v7, %s6195_s22 }
 0x8fb   : > { %v4692_v2 = vpop.permute.xlu2 %4691 }
 0x8fc   : > { %v4805_v38 = vadd.f32 %v4692_v2, %v4565_v26 }
 0x8fe   : > { %4853 = vst.msk [vmem:[#allocation3 + $0x1f8] sm:$0xff] %vm284_vm1, %v4805_v38  ;;  %v4567_v38 = vld [vmem:[#allocation3 + $0x208] sm:$0xff] }
 0x901   : > { %4939 = vrot.lane.b32.xlu0 %v8799_v28, %s6195_s22  ;;  %4935 = vrot.lane.b32.xlu1 %v8773_v39, %s6195_s22 }
 0x902   : > { %4943 = vrot.lane.b32.xlu2 %v8824_v14, %s6195_s22 }
 0x903   : > { %v4688_v48 = vpop.permute.xlu0 %4687 }
 0x904   : > { %v4803_v46 = vadd.f32 %v4688_v48, %v4563_v58 }
 0x906   : > { %4851 = vst.msk [vmem:[#allocation3 + $0x1d0] sm:$0xff] %vm284_vm1, %v4803_v46  ;;  %v4574_v46 = vld [vmem:[#allocation3 + $0x288] sm:$0xff] }
 0x909   : > { %4945 = vrot.lane.b32.xlu0 %v8835_v55, %s6195_s22  ;;  %4941 = vrot.lane.b32.xlu1 %v8810_v23, %s6195_s22 }
 0x90a   : > { %4949 = vrot.lane.b32.xlu2 %v8850_v10, %s6195_s22 }
 0x90b   : > { %v4690_v24 = vpop.permute.xlu1 %4689 }
 0x90c   : > { %v4804_v25 = vadd.f32 %v4690_v24, %v4564_v54 }
 0x90e   : > { %4852 = vst.msk [vmem:[#allocation3 + $0x1d8] sm:$0xff] %vm284_vm1, %v4804_v25  ;;  %v4577_v25 = vld [vmem:[#allocation3 + $0x2b8] sm:$0xff] }
 0x911   : > { %4951 = vrot.lane.b32.xlu0 %v8858_v36, %s6195_s22  ;;  %4947 = vrot.lane.b32.xlu1 %v8842_v40, %s6195_s22 }
 0x912   : > { %4955 = vrot.lane.b32.xlu2 %v8878_v33, %s6195_s22 }
 0x913   : > { %v4698_v30 = vpop.permute.xlu2 %4697 }
 0x914   : > { %v4808_v60 = vadd.f32 %v4698_v30, %v4568_v61 }
 0x916   : > { %4856 = vst.msk [vmem:[#allocation3 + $0x228] sm:$0xff] %vm284_vm1, %v4808_v60 }
 0x919   : > { %4957 = vrot.lane.b32.xlu0 %v8886_v42, %s6195_s22  ;;  %4953 = vrot.lane.b32.xlu1 %v8868_v1, %s6195_s22 }
 0x91a   : > { %4961 = vrot.lane.b32.xlu2 %v8900_v44, %s6195_s22 }
 0x91b   : > { %v4694_v49 = vpop.permute.xlu0 %4693  ;;  %v4704_v8 = vpop.permute.xlu2 %4703 }
 0x91c   : > { %v4806_v26 = vadd.f32 %v4694_v49, %v4566_v29  ;;  %v4811_v2 = vadd.f32 %v4704_v8, %v4571_v11  ;;  %v4569_v49 = vld [vmem:[#allocation3 + $0x230] sm:$0xff]  ;;  %v4580_v11 = vld [vmem:[#allocation3 + $0x2e8] sm:$0xff] }
 0x91e   : > { %4854 = vst.msk [vmem:[#allocation3 + $0x200] sm:$0xff] %vm284_vm1, %v4806_v26 }
 0x91f   : > { %4859 = vst.msk [vmem:[#allocation3 + $0x258] sm:$0xff] %vm284_vm1, %v4811_v2 }
 0x921   : > { %4963 = vrot.lane.b32.xlu0 %v8907_v15, %s6195_s22  ;;  %4959 = vrot.lane.b32.xlu1 %v8893_v52, %s6195_s22 }
 0x922   : > { %4967 = vrot.lane.b32.xlu2 %v8921_v47, %s6195_s22 }
 0x923   : > { %v4696_v48 = vpop.permute.xlu1 %4695 }
 0x924   : > { %v4807_v58 = vadd.f32 %v4696_v48, %v4567_v38  ;;  %v4710_v54 = vpop.permute.xlu2 %4709  ;;  %v4572_v38 = vld [vmem:[#allocation3 + $0x260] sm:$0xff] }
 0x925   : > { %v4814_v24 = vadd.f32 %v4710_v54, %v4574_v46 }
 0x926   : > { %4855 = vst.msk [vmem:[#allocation3 + $0x208] sm:$0xff] %vm284_vm1, %v4807_v58  ;;  %v4570_v58 = vld [vmem:[#allocation3 + $0x238] sm:$0xff] }
 0x927   : > { %4862 = vst.msk [vmem:[#allocation3 + $0x288] sm:$0xff] %vm284_vm1, %v4814_v24  ;;  %v4871_v24 = vld [vmem:[#allocation3 + $0x30] sm:$0xff] }
 0x929   : > { %4969 = vrot.lane.b32.xlu0 %v8928_v6, %s6195_s22  ;;  %4965 = vrot.lane.b32.xlu1 %v8914_v45, %s6195_s22 }
 0x92a   : > { %4973 = vrot.lane.b32.xlu2 %v8942_v59, %s6195_s22 }
 0x92c   : > { %v4716_v61 = vpop.permute.xlu2 %4715 }
 0x92d   : > { %v4817_v30 = vadd.f32 %v4716_v61, %v4577_v25 }
 0x92f   : > { %4865 = vst.msk [vmem:[#allocation3 + $0x2b8] sm:$0xff] %vm284_vm1, %v4817_v30 }
 0x931   : > { %4975 = vrot.lane.b32.xlu0 %v8949_v63, %s6195_s22  ;;  %4971 = vrot.lane.b32.xlu1 %v8935_v18, %s6195_s22 }
 0x932   : > { %4979 = vrot.lane.b32.xlu2 %v8963_v57, %s6195_s22 }
 0x933   : > { %v4700_v60 = vpop.permute.xlu0 %4699 }
 0x934   : > { %v4809_v29 = vadd.f32 %v4700_v60, %v4569_v49  ;;  %v4722_v8 = vpop.permute.xlu2 %4721  ;;  %v4575_v60 = vld [vmem:[#allocation3 + $0x290] sm:$0xff] }
 0x935   : > { %v4820_v26 = vadd.f32 %v4722_v8, %v4580_v11 }
 0x936   : > { %4857 = vst.msk [vmem:[#allocation3 + $0x230] sm:$0xff] %vm284_vm1, %v4809_v29  ;;  %v4573_v29 = vld [vmem:[#allocation3 + $0x268] sm:$0xff] }
 0x937   : > { %4868 = vst.msk [vmem:[#allocation3 + $0x2e8] sm:$0xff] %vm284_vm1, %v4820_v26  ;;  %v4874_v26 = vld [vmem:[#allocation3 + $0x60] sm:$0xff] }
 0x939   : > { %4981 = vrot.lane.b32.xlu0 %v8970_v35, %s6195_s22  ;;  %4977 = vrot.lane.b32.xlu1 %v8956_v56, %s6195_s22 }
 0x93a   : > { %4985 = vrot.lane.b32.xlu2 %v8984_v51, %s6195_s22 }
 0x93b   : > { %v4706_v2 = vpop.permute.xlu0 %4705  ;;  %v4702_v48 = vpop.permute.xlu1 %4701 }
 0x93c   : > { %v4812_v46 = vadd.f32 %v4706_v2, %v4572_v38  ;;  %v4810_v54 = vadd.f32 %v4702_v48, %v4570_v58  ;;  %v4920_v25 = vpop.permute.xlu2 %4919 }
 0x93d   : > { %v5063_v61 = vadd.f32 %v4920_v25, %v4871_v24 }
 0x93e   : > { %4860 = vst.msk [vmem:[#allocation3 + $0x260] sm:$0xff] %vm284_vm1, %v4812_v46  ;;  %v4578_v46 = vld [vmem:[#allocation3 + $0x2c0] sm:$0xff] }
 0x93f   : > { %4858 = vst.msk [vmem:[#allocation3 + $0x238] sm:$0xff] %vm284_vm1, %v4810_v54  ;;  %v4576_v54 = vld [vmem:[#allocation3 + $0x298] sm:$0xff] }
 0x940   : > { %5111 = vst.msk [vmem:[#allocation3 + $0x30] sm:$0xff] %vm284_vm1, %v5063_v61 }
 0x941   : > { %4987 = vrot.lane.b32.xlu0 %v8991_v16, %s6195_s22  ;;  %4983 = vrot.lane.b32.xlu1 %v8977_v0, %s6195_s22 }
 0x942   : > { %4991 = vrot.lane.b32.xlu2 %v8665_v19, %s6195_s22 }
 0x943   : > { %v4712_v30 = vpop.permute.xlu0 %4711  ;;  %v4708_v49 = vpop.permute.xlu1 %4707 }
 0x944   : > { %v4815_v11 = vadd.f32 %v4712_v30, %v4575_v60  ;;  %v4813_v8 = vadd.f32 %v4708_v49, %v4573_v29  ;;  %v4926_v2 = vpop.permute.xlu2 %4925  ;;  %v4877_v30 = vld [vmem:[#allocation3 + $0x90] sm:$0xff] }
 0x945   : > { %v5066_v38 = vadd.f32 %v4926_v2, %v4874_v26 }
 0x946   : > { %4863 = vst.msk [vmem:[#allocation3 + $0x290] sm:$0xff] %vm284_vm1, %v4815_v11  ;;  %v4581_v11 = vld [vmem:[#allocation3 + $0x2f0] sm:$0xff] }
 0x947   : > { %v5741_v48 = vld [vmem:[#allocation3 + $0x30] sm:$0xff]  ;;  %4861 = vst.msk [vmem:[#allocation3 + $0x268] sm:$0xff] %vm284_vm1, %v4813_v8  ;;  %v4579_v8 = vld [vmem:[#allocation3 + $0x2c8] sm:$0xff] }
 0x948   : > { %5849 = vst.msk [vmem:[%s8680_s9 + $0x30] sm:$0xff] %vm175_vm2, %v5741_v48  ;;  %v4880_v48 = vld [vmem:[#allocation3 + $0xc0] sm:$0xff] }
 0x949   : > { %5114 = vst.msk [vmem:[#allocation3 + $0x60] sm:$0xff] %vm284_vm1, %v5066_v38  ;;  %4993 = vrot.lane.b32.xlu0 %v8684_v17, %s6195_s22  ;;  %4989 = vrot.lane.b32.xlu1 %v9000_v3, %s6195_s22 }
 0x94a   : > { %4997 = vrot.lane.b32.xlu2 %v8712_v9, %s6195_s22 }
 0x94b   : > { %v4718_v58 = vpop.permute.xlu0 %4717  ;;  %v4714_v24 = vpop.permute.xlu1 %4713 }
 0x94c   : > { %v4818_v25 = vadd.f32 %v4718_v58, %v4578_v46  ;;  %v4816_v61 = vadd.f32 %v4714_v24, %v4576_v54  ;;  %v4932_v60 = vpop.permute.xlu2 %4931  ;;  %v4872_v24 = vld [vmem:[#allocation3 + $0x38] sm:$0xff] }
 0x94d   : > { %v5069_v49 = vadd.f32 %v4932_v60, %v4877_v30 }
 0x94e   : > { %4866 = vst.msk [vmem:[#allocation3 + $0x2c0] sm:$0xff] %vm284_vm1, %v4818_v25  ;;  %v4582_v25 = vld [vmem:[#allocation3 + $0x2f8] sm:$0xff] }
 0x94f   : > { %4864 = vst.msk [vmem:[#allocation3 + $0x298] sm:$0xff] %vm284_vm1, %v4816_v61 }
 0x950   : > { %5117 = vst.msk [vmem:[#allocation3 + $0x90] sm:$0xff] %vm284_vm1, %v5069_v49  ;;  %v4883_v49 = vld [vmem:[#allocation3 + $0xf0] sm:$0xff] }
 0x951   : > { %4999 = vrot.lane.b32.xlu0 %v8727_v62, %s6195_s22  ;;  %4995 = vrot.lane.b32.xlu1 %v8697_v34, %s6195_s22 }
 0x952   : > { %5003 = vrot.lane.b32.xlu2 %v8751_v21, %s6195_s22 }
 0x953   : > { %v4724_v29 = vpop.permute.xlu0 %4723  ;;  %v4720_v26 = vpop.permute.xlu1 %4719 }
 0x954   : > { %v4821_v2 = vadd.f32 %v4724_v29, %v4581_v11  ;;  %v4819_v38 = vadd.f32 %v4720_v26, %v4579_v8  ;;  %v4938_v58 = vpop.permute.xlu2 %4937  ;;  %v4875_v26 = vld [vmem:[#allocation3 + $0x68] sm:$0xff] }
 0x955   : > { %v5072_v46 = vadd.f32 %v4938_v58, %v4880_v48 }
 0x956   : > { %4869 = vst.msk [vmem:[#allocation3 + $0x2f0] sm:$0xff] %vm284_vm1, %v4821_v2  ;;  %v4873_v2 = vld [vmem:[#allocation3 + $0x40] sm:$0xff] }
 0x957   : > { %4867 = vst.msk [vmem:[#allocation3 + $0x2c8] sm:$0xff] %vm284_vm1, %v4819_v38 }
 0x958   : > { %5120 = vst.msk [vmem:[#allocation3 + $0xc0] sm:$0xff] %vm284_vm1, %v5072_v46  ;;  %v4886_v46 = vld [vmem:[#allocation3 + $0x120] sm:$0xff] }
 0x959   : > { %5005 = vrot.lane.b32.xlu0 %v8764_v50, %s6195_s22  ;;  %5001 = vrot.lane.b32.xlu1 %v8738_v37, %s6195_s22 }
 0x95a   : > { %5009 = vrot.lane.b32.xlu2 %v8788_v31, %s6195_s22 }
 0x95b   : > { %v4922_v54 = vpop.permute.xlu0 %4921  ;;  %v4726_v61 = vpop.permute.xlu1 %4725 }
 0x95c   : > { %v5064_v30 = vadd.f32 %v4922_v54, %v4872_v24  ;;  %v4822_v60 = vadd.f32 %v4726_v61, %v4582_v25  ;;  %v4944_v29 = vpop.permute.xlu2 %4943 }
 0x95d   : > { %v5075_v11 = vadd.f32 %v4944_v29, %v4883_v49 }
 0x95e   : > { %5112 = vst.msk [vmem:[#allocation3 + $0x38] sm:$0xff] %vm284_vm1, %v5064_v30  ;;  %v4878_v30 = vld [vmem:[#allocation3 + $0x98] sm:$0xff] }
 0x95f   : > { %4870 = vst.msk [vmem:[#allocation3 + $0x2f8] sm:$0xff] %vm284_vm1, %v4822_v60  ;;  %v4876_v60 = vld [vmem:[#allocation3 + $0x70] sm:$0xff] }
 0x960   : > { %5123 = vst.msk [vmem:[#allocation3 + $0xf0] sm:$0xff] %vm284_vm1, %v5075_v11 }
 0x961   : > { %5011 = vrot.lane.b32.xlu0 %v8801_v5, %s6195_s22  ;;  %5007 = vrot.lane.b32.xlu1 %v8775_v53, %s6195_s22 }
 0x962   : > { %5207 = vrot.lane.b32.xlu2 %v8663_v27, %s6202_s10 }
 0x963   : > { %v4928_v8 = vpop.permute.xlu0 %4927  ;;  %v4924_v38 = vpop.permute.xlu1 %4923 }
 0x964   : > { %v5067_v48 = vadd.f32 %v4928_v8, %v4875_v26  ;;  %v5065_v58 = vadd.f32 %v4924_v38, %v4873_v2  ;;  %v4950_v54 = vpop.permute.xlu2 %4949  ;;  %v4889_v8 = vld [vmem:[#allocation3 + $0x150] sm:$0xff] }
 0x965   : > { %v5742_v24 = vld [vmem:[#allocation3 + $0x38] sm:$0xff]  ;;  %v5078_v25 = vadd.f32 %v4950_v54, %v4886_v46  ;;  %v4879_v46 = vld [vmem:[#allocation3 + $0xa0] sm:$0xff] }
 0x966   : > { %5850 = vst.msk [vmem:[%s8680_s9 + $0x38] sm:$0xff] %vm175_vm2, %v5742_v24 }
 0x967   : > { %5115 = vst.msk [vmem:[#allocation3 + $0x68] sm:$0xff] %vm284_vm1, %v5067_v48 }
 0x968   : > { %5113 = vst.msk [vmem:[#allocation3 + $0x40] sm:$0xff] %vm284_vm1, %v5065_v58  ;;  %v4881_v58 = vld [vmem:[#allocation3 + $0xc8] sm:$0xff] }
 0x969   : > { %5126 = vst.msk [vmem:[#allocation3 + $0x120] sm:$0xff] %vm284_vm1, %v5078_v25  ;;  %5209 = vrot.lane.b32.xlu0 %v8682_v13, %s6202_s10  ;;  %5013 = vrot.lane.b32.xlu1 %v8812_v41, %s6195_s22 }
 0x96a   : > { %5213 = vrot.lane.b32.xlu2 %v8710_v12, %s6202_s10 }
 0x96b   : > { %v4934_v61 = vpop.permute.xlu0 %4933  ;;  %v4930_v49 = vpop.permute.xlu1 %4929 }
 0x96c   : > { %v5070_v29 = vadd.f32 %v4934_v61, %v4878_v30  ;;  %v5068_v11 = vadd.f32 %v4930_v49, %v4876_v60  ;;  %v4956_v26 = vpop.permute.xlu2 %4955  ;;  %v4892_v61 = vld [vmem:[#allocation3 + $0x180] sm:$0xff] }
 0x96d   : > { %v5081_v2 = vadd.f32 %v4956_v26, %v4889_v8 }
 0x96e   : > { %5118 = vst.msk [vmem:[#allocation3 + $0x98] sm:$0xff] %vm284_vm1, %v5070_v29  ;;  %v4884_v29 = vld [vmem:[#allocation3 + $0xf8] sm:$0xff] }
 0x96f   : > { %v5743_v38 = vld [vmem:[#allocation3 + $0x40] sm:$0xff]  ;;  %5116 = vst.msk [vmem:[#allocation3 + $0x70] sm:$0xff] %vm284_vm1, %v5068_v11  ;;  %v4882_v11 = vld [vmem:[#allocation3 + $0xd0] sm:$0xff] }
 0x970   : > { %5851 = vst.msk [vmem:[%s8680_s9 + $0x40] sm:$0xff] %vm175_vm2, %v5743_v38  ;;  %v4895_v38 = vld [vmem:[#allocation3 + $0x1b0] sm:$0xff] }
 0x971   : > { %5129 = vst.msk [vmem:[#allocation3 + $0x150] sm:$0xff] %vm284_vm1, %v5081_v2  ;;  %5215 = vrot.lane.b32.xlu0 %v8725_v20, %s6202_s10  ;;  %5211 = vrot.lane.b32.xlu1 %v8695_v22, %s6202_s10 }
 0x972   : > { %5219 = vrot.lane.b32.xlu2 %v8749_v43, %s6202_s10 }
 0x973   : > { %v4940_v48 = vpop.permute.xlu0 %4939  ;;  %v4936_v54 = vpop.permute.xlu1 %4935 }
 0x974   : > { %v5073_v24 = vadd.f32 %v4940_v48, %v4881_v58  ;;  %v5071_v25 = vadd.f32 %v4936_v54, %v4879_v46  ;;  %v4962_v30 = vpop.permute.xlu2 %4961  ;;  %v4887_v54 = vld [vmem:[#allocation3 + $0x128] sm:$0xff] }
 0x975   : > { %v5084_v60 = vadd.f32 %v4962_v30, %v4892_v61 }
 0x976   : > { %5121 = vst.msk [vmem:[#allocation3 + $0xc8] sm:$0xff] %vm284_vm1, %v5073_v24  ;;  %v4885_v24 = vld [vmem:[#allocation3 + $0x100] sm:$0xff] }
 0x977   : > { %5119 = vst.msk [vmem:[#allocation3 + $0xa0] sm:$0xff] %vm284_vm1, %v5071_v25 }
 0x978   : > { %5132 = vst.msk [vmem:[#allocation3 + $0x180] sm:$0xff] %vm284_vm1, %v5084_v60  ;;  %v4898_v60 = vld [vmem:[#allocation3 + $0x1e0] sm:$0xff] }
 0x979   : > { %5221 = vrot.lane.b32.xlu0 %v8762_v32, %s6202_s10  ;;  %5217 = vrot.lane.b32.xlu1 %v8736_v4, %s6202_s10 }
 0x97a   : > { %5225 = vrot.lane.b32.xlu2 %v8786_v7, %s6202_s10 }
 0x97b   : > { %v4946_v49 = vpop.permute.xlu0 %4945  ;;  %v4942_v8 = vpop.permute.xlu1 %4941 }
 0x97c   : > { %v5076_v26 = vadd.f32 %v4946_v49, %v4884_v29  ;;  %v5074_v2 = vadd.f32 %v4942_v8, %v4882_v11  ;;  %v4968_v48 = vpop.permute.xlu2 %4967  ;;  %v4890_v8 = vld [vmem:[#allocation3 + $0x158] sm:$0xff] }
 0x97d   : > { %v5087_v58 = vadd.f32 %v4968_v48, %v4895_v38 }
 0x97e   : > { %5124 = vst.msk [vmem:[#allocation3 + $0xf8] sm:$0xff] %vm284_vm1, %v5076_v26  ;;  %v4888_v26 = vld [vmem:[#allocation3 + $0x130] sm:$0xff] }
 0x97f   : > { %5122 = vst.msk [vmem:[#allocation3 + $0xd0] sm:$0xff] %vm284_vm1, %v5074_v2 }
 0x980   : > { %5135 = vst.msk [vmem:[#allocation3 + $0x1b0] sm:$0xff] %vm284_vm1, %v5087_v58  ;;  %v4901_v58 = vld [vmem:[#allocation3 + $0x210] sm:$0xff] }
 0x981   : > { %5227 = vrot.lane.b32.xlu0 %v8799_v28, %s6202_s10  ;;  %5223 = vrot.lane.b32.xlu1 %v8773_v39, %s6202_s10 }
 0x982   : > { %5231 = vrot.lane.b32.xlu2 %v8824_v14, %s6202_s10 }
 0x983   : > { %v4952_v46 = vpop.permute.xlu0 %4951  ;;  %v4948_v25 = vpop.permute.xlu1 %4947 }
 0x984   : > { %v5079_v61 = vadd.f32 %v4952_v46, %v4887_v54  ;;  %v5077_v30 = vadd.f32 %v4948_v25, %v4885_v24  ;;  %v4974_v49 = vpop.permute.xlu2 %4973  ;;  %v4893_v25 = vld [vmem:[#allocation3 + $0x188] sm:$0xff] }
 0x985   : > { %v5090_v29 = vadd.f32 %v4974_v49, %v4898_v60 }
 0x986   : > { %5127 = vst.msk [vmem:[#allocation3 + $0x128] sm:$0xff] %vm284_vm1, %v5079_v61 }
 0x987   : > { %5125 = vst.msk [vmem:[#allocation3 + $0x100] sm:$0xff] %vm284_vm1, %v5077_v30  ;;  %v4891_v30 = vld [vmem:[#allocation3 + $0x160] sm:$0xff] }
 0x988   : > { %5138 = vst.msk [vmem:[#allocation3 + $0x1e0] sm:$0xff] %vm284_vm1, %v5090_v29  ;;  %v4904_v29 = vld [vmem:[#allocation3 + $0x240] sm:$0xff] }
 0x989   : > { %5233 = vrot.lane.b32.xlu0 %v8835_v55, %s6202_s10  ;;  %5229 = vrot.lane.b32.xlu1 %v8810_v23, %s6202_s10 }
 0x98a   : > { %5237 = vrot.lane.b32.xlu2 %v8850_v10, %s6202_s10 }
 0x98b   : > { %v4958_v11 = vpop.permute.xlu0 %4957  ;;  %v4954_v2 = vpop.permute.xlu1 %4953 }
 0x98c   : > { %v5082_v38 = vadd.f32 %v4958_v11, %v4890_v8  ;;  %v5080_v48 = vadd.f32 %v4954_v2, %v4888_v26  ;;  %v4980_v46 = vpop.permute.xlu2 %4979  ;;  %v4896_v2 = vld [vmem:[#allocation3 + $0x1b8] sm:$0xff] }
 0x98d   : > { %v5093_v54 = vadd.f32 %v4980_v46, %v4901_v58 }
 0x98e   : > { %5130 = vst.msk [vmem:[#allocation3 + $0x158] sm:$0xff] %vm284_vm1, %v5082_v38 }
 0x98f   : > { %5128 = vst.msk [vmem:[#allocation3 + $0x130] sm:$0xff] %vm284_vm1, %v5080_v48  ;;  %v4894_v48 = vld [vmem:[#allocation3 + $0x190] sm:$0xff] }
 0x990   : > { %5141 = vst.msk [vmem:[#allocation3 + $0x210] sm:$0xff] %vm284_vm1, %v5093_v54  ;;  %v4907_v54 = vld [vmem:[#allocation3 + $0x270] sm:$0xff] }
 0x991   : > { %5239 = vrot.lane.b32.xlu0 %v8858_v36, %s6202_s10  ;;  %5235 = vrot.lane.b32.xlu1 %v8842_v40, %s6202_s10 }
 0x992   : > { %5243 = vrot.lane.b32.xlu2 %v8878_v33, %s6202_s10 }
 0x993   : > { %v4964_v24 = vpop.permute.xlu0 %4963  ;;  %v4960_v61 = vpop.permute.xlu1 %4959 }
 0x994   : > { %v5085_v60 = vadd.f32 %v4964_v24, %v4893_v25  ;;  %v5083_v49 = vadd.f32 %v4960_v61, %v4891_v30  ;;  %v4986_v11 = vpop.permute.xlu2 %4985  ;;  %v4899_v30 = vld [vmem:[#allocation3 + $0x1e8] sm:$0xff] }
 0x995   : > { %v5096_v8 = vadd.f32 %v4986_v11, %v4904_v29 }
 0x996   : > { %5133 = vst.msk [vmem:[#allocation3 + $0x188] sm:$0xff] %vm284_vm1, %v5085_v60 }
 0x997   : > { %5131 = vst.msk [vmem:[#allocation3 + $0x160] sm:$0xff] %vm284_vm1, %v5083_v49  ;;  %v4897_v49 = vld [vmem:[#allocation3 + $0x1c0] sm:$0xff] }
 0x998   : > { %5144 = vst.msk [vmem:[#allocation3 + $0x240] sm:$0xff] %vm284_vm1, %v5096_v8  ;;  %v4910_v8 = vld [vmem:[#allocation3 + $0x2a0] sm:$0xff] }
 0x999   : > { %5245 = vrot.lane.b32.xlu0 %v8886_v42, %s6202_s10  ;;  %5241 = vrot.lane.b32.xlu1 %v8868_v1, %s6202_s10 }
 0x99a   : > { %5249 = vrot.lane.b32.xlu2 %v8900_v44, %s6202_s10 }
 0x99b   : > { %v4970_v26 = vpop.permute.xlu0 %4969  ;;  %v4966_v38 = vpop.permute.xlu1 %4965 }
 0x99c   : > { %v5088_v58 = vadd.f32 %v4970_v26, %v4896_v2  ;;  %v5086_v46 = vadd.f32 %v4966_v38, %v4894_v48  ;;  %v4992_v24 = vpop.permute.xlu2 %4991  ;;  %v4902_v48 = vld [vmem:[#allocation3 + $0x218] sm:$0xff] }
 0x99d   : > { %v5099_v25 = vadd.f32 %v4992_v24, %v4907_v54 }
 0x99e   : > { %5136 = vst.msk [vmem:[#allocation3 + $0x1b8] sm:$0xff] %vm284_vm1, %v5088_v58 }
 0x99f   : > { %5134 = vst.msk [vmem:[#allocation3 + $0x190] sm:$0xff] %vm284_vm1, %v5086_v46  ;;  %v4900_v46 = vld [vmem:[#allocation3 + $0x1f0] sm:$0xff] }
 0x9a0   : > { %5147 = vst.msk [vmem:[#allocation3 + $0x270] sm:$0xff] %vm284_vm1, %v5099_v25  ;;  %v4913_v25 = vld [vmem:[#allocation3 + $0x2d0] sm:$0xff] }
 0x9a1   : > { %5251 = vrot.lane.b32.xlu0 %v8907_v15, %s6202_s10  ;;  %5247 = vrot.lane.b32.xlu1 %v8893_v52, %s6202_s10 }
 0x9a2   : > { %5255 = vrot.lane.b32.xlu2 %v8921_v47, %s6202_s10 }
 0x9a3   : > { %v4976_v61 = vpop.permute.xlu0 %4975  ;;  %v4972_v60 = vpop.permute.xlu1 %4971 }
 0x9a4   : > { %v5091_v29 = vadd.f32 %v4976_v61, %v4899_v30  ;;  %v5089_v11 = vadd.f32 %v4972_v60, %v4897_v49  ;;  %v4998_v26 = vpop.permute.xlu2 %4997  ;;  %v4905_v49 = vld [vmem:[#allocation3 + $0x248] sm:$0xff] }
 0x9a5   : > { %v5102_v2 = vadd.f32 %v4998_v26, %v4910_v8 }
 0x9a6   : > { %5139 = vst.msk [vmem:[#allocation3 + $0x1e8] sm:$0xff] %vm284_vm1, %v5091_v29 }
 0x9a7   : > { %5137 = vst.msk [vmem:[#allocation3 + $0x1c0] sm:$0xff] %vm284_vm1, %v5089_v11  ;;  %v4903_v11 = vld [vmem:[#allocation3 + $0x220] sm:$0xff] }
 0x9a8   : > { %5150 = vst.msk [vmem:[#allocation3 + $0x2a0] sm:$0xff] %vm284_vm1, %v5102_v2  ;;  %v4916_v2 = vld [vmem:[#allocation3 + $0x300] sm:$0xff] }
 0x9a9   : > { %5257 = vrot.lane.b32.xlu0 %v8928_v6, %s6202_s10  ;;  %5253 = vrot.lane.b32.xlu1 %v8914_v45, %s6202_s10 }
 0x9aa   : > { %5261 = vrot.lane.b32.xlu2 %v8942_v59, %s6202_s10 }
 0x9ab   : > { %v4982_v38 = vpop.permute.xlu0 %4981  ;;  %v4978_v58 = vpop.permute.xlu1 %4977 }
 0x9ac   : > { %v5094_v54 = vadd.f32 %v4982_v38, %v4902_v48  ;;  %v5092_v24 = vadd.f32 %v4978_v58, %v4900_v46  ;;  %v5004_v61 = vpop.permute.xlu2 %5003  ;;  %v4908_v46 = vld [vmem:[#allocation3 + $0x278] sm:$0xff] }
 0x9ad   : > { %v5105_v30 = vadd.f32 %v5004_v61, %v4913_v25 }
 0x9ae   : > { %5142 = vst.msk [vmem:[#allocation3 + $0x218] sm:$0xff] %vm284_vm1, %v5094_v54 }
 0x9af   : > { %5140 = vst.msk [vmem:[#allocation3 + $0x1f0] sm:$0xff] %vm284_vm1, %v5092_v24  ;;  %v4906_v24 = vld [vmem:[#allocation3 + $0x250] sm:$0xff] }
 0x9b0   : > { %5153 = vst.msk [vmem:[#allocation3 + $0x2d0] sm:$0xff] %vm284_vm1, %v5105_v30  ;;  %v5159_v30 = vld [vmem:[#allocation3 + $0x48] sm:$0xff] }
 0x9b1   : > { %5263 = vrot.lane.b32.xlu0 %v8949_v63, %s6202_s10  ;;  %5259 = vrot.lane.b32.xlu1 %v8935_v18, %s6202_s10 }
 0x9b2   : > { %5267 = vrot.lane.b32.xlu2 %v8963_v57, %s6202_s10 }
 0x9b3   : > { %v4988_v60 = vpop.permute.xlu0 %4987  ;;  %v4984_v29 = vpop.permute.xlu1 %4983 }
 0x9b4   : > { %v5097_v8 = vadd.f32 %v4988_v60, %v4905_v49  ;;  %v5095_v26 = vadd.f32 %v4984_v29, %v4903_v11  ;;  %v5010_v38 = vpop.permute.xlu2 %5009  ;;  %v4911_v11 = vld [vmem:[#allocation3 + $0x2a8] sm:$0xff] }
 0x9b5   : > { %v5108_v48 = vadd.f32 %v5010_v38, %v4916_v2 }
 0x9b6   : > { %5145 = vst.msk [vmem:[#allocation3 + $0x248] sm:$0xff] %vm284_vm1, %v5097_v8 }
 0x9b7   : > { %5143 = vst.msk [vmem:[#allocation3 + $0x220] sm:$0xff] %vm284_vm1, %v5095_v26  ;;  %v4909_v26 = vld [vmem:[#allocation3 + $0x280] sm:$0xff] }
 0x9b8   : > { %5156 = vst.msk [vmem:[#allocation3 + $0x300] sm:$0xff] %vm284_vm1, %v5108_v48  ;;  %v5162_v48 = vld [vmem:[#allocation3 + $0x78] sm:$0xff] }
 0x9b9   : > { %5269 = vrot.lane.b32.xlu0 %v8970_v35, %s6202_s10  ;;  %5265 = vrot.lane.b32.xlu1 %v8956_v56, %s6202_s10 }
 0x9ba   : > { %5273 = vrot.lane.b32.xlu2 %v8984_v51, %s6202_s10 }
 0x9bb   : > { %v4994_v58 = vpop.permute.xlu0 %4993  ;;  %v4990_v54 = vpop.permute.xlu1 %4989 }
 0x9bc   : > { %v5100_v25 = vadd.f32 %v4994_v58, %v4908_v46  ;;  %v5098_v61 = vadd.f32 %v4990_v54, %v4906_v24  ;;  %v5208_v60 = vpop.permute.xlu2 %5207 }
 0x9bd   : > { %v5351_v49 = vadd.f32 %v5208_v60, %v5159_v30  ;;  %v4912_v30 = vld [vmem:[#allocation3 + $0x2b0] sm:$0xff] }
 0x9be   : > { %5148 = vst.msk [vmem:[#allocation3 + $0x278] sm:$0xff] %vm284_vm1, %v5100_v25  ;;  %v4914_v25 = vld [vmem:[#allocation3 + $0x2d8] sm:$0xff] }
 0x9bf   : > { %5146 = vst.msk [vmem:[#allocation3 + $0x250] sm:$0xff] %vm284_vm1, %v5098_v61 }
 0x9c0   : > { %5399 = vst.msk [vmem:[#allocation3 + $0x48] sm:$0xff] %vm284_vm1, %v5351_v49 }
 0x9c1   : > { %5275 = vrot.lane.b32.xlu0 %v8991_v16, %s6202_s10  ;;  %5271 = vrot.lane.b32.xlu1 %v8977_v0, %s6202_s10 }
 0x9c2   : > { %5279 = vrot.lane.b32.xlu2 %v8665_v19, %s6202_s10 }
 0x9c3   : > { %v5000_v29 = vpop.permute.xlu0 %4999  ;;  %v4996_v8 = vpop.permute.xlu1 %4995 }
 0x9c4   : > { %v5103_v2 = vadd.f32 %v5000_v29, %v4911_v11  ;;  %v5101_v38 = vadd.f32 %v4996_v8, %v4909_v26  ;;  %v5214_v58 = vpop.permute.xlu2 %5213  ;;  %v5165_v29 = vld [vmem:[#allocation3 + $0xa8] sm:$0xff] }
 0x9c5   : > { %v5354_v46 = vadd.f32 %v5214_v58, %v5162_v48  ;;  %v4915_v58 = vld [vmem:[#allocation3 + $0x2e0] sm:$0xff] }
 0x9c6   : > { %5151 = vst.msk [vmem:[#allocation3 + $0x2a8] sm:$0xff] %vm284_vm1, %v5103_v2 }
 0x9c7   : > { %v5744_v54 = vld [vmem:[#allocation3 + $0x48] sm:$0xff]  ;;  %5149 = vst.msk [vmem:[#allocation3 + $0x280] sm:$0xff] %vm284_vm1, %v5101_v38 }
 0x9c8   : > { %5852 = vst.msk [vmem:[%s8680_s9 + $0x48] sm:$0xff] %vm175_vm2, %v5744_v54  ;;  %v4917_v38 = vld [vmem:[#allocation3 + $0x308] sm:$0xff] }
 0x9c9   : > { %5402 = vst.msk [vmem:[#allocation3 + $0x78] sm:$0xff] %vm284_vm1, %v5354_v46  ;;  %5281 = vrot.lane.b32.xlu0 %v8684_v17, %s6202_s10  ;;  %5277 = vrot.lane.b32.xlu1 %v9000_v3, %s6202_s10 }
 0x9ca   : > { %5285 = vrot.lane.b32.xlu2 %v8712_v9, %s6202_s10 }
 0x9cb   : > { %v5006_v24 = vpop.permute.xlu0 %5005  ;;  %v5002_v61 = vpop.permute.xlu1 %5001 }
 0x9cc   : > { %v5106_v60 = vadd.f32 %v5006_v24, %v4914_v25  ;;  %v5104_v49 = vadd.f32 %v5002_v61, %v4912_v30  ;;  %v5220_v11 = vpop.permute.xlu2 %5219  ;;  %v5168_v24 = vld [vmem:[#allocation3 + $0xd8] sm:$0xff] }
 0x9cd   : > { %v5357_v8 = vadd.f32 %v5220_v11, %v5165_v29  ;;  %v4918_v11 = vld [vmem:[#allocation3 + $0x310] sm:$0xff] }
 0x9ce   : > { %5154 = vst.msk [vmem:[#allocation3 + $0x2d8] sm:$0xff] %vm284_vm1, %v5106_v60 }
 0x9cf   : > { %5152 = vst.msk [vmem:[#allocation3 + $0x2b0] sm:$0xff] %vm284_vm1, %v5104_v49  ;;  %v5160_v49 = vld [vmem:[#allocation3 + $0x50] sm:$0xff] }
 0x9d0   : > { %v5750_v26 = vld [vmem:[#allocation3 + $0x78] sm:$0xff]  ;;  %5405 = vst.msk [vmem:[#allocation3 + $0xa8] sm:$0xff] %vm284_vm1, %v5357_v8 }
 0x9d1   : > { %5858 = vst.msk [vmem:[%s8680_s9 + $0x78] sm:$0xff] %vm175_vm2, %v5750_v26  ;;  %5287 = vrot.lane.b32.xlu0 %v8727_v62, %s6202_s10  ;;  %5283 = vrot.lane.b32.xlu1 %v8697_v34, %s6202_s10 }
 0x9d2   : > { %5291 = vrot.lane.b32.xlu2 %v8751_v21, %s6202_s10 }
 0x9d3   : > { %v5012_v2 = vpop.permute.xlu0 %5011  ;;  %v5008_v48 = vpop.permute.xlu1 %5007 }
 0x9d4   : > { %v5109_v46 = vadd.f32 %v5012_v2, %v4917_v38  ;;  %v5107_v54 = vadd.f32 %v5008_v48, %v4915_v58  ;;  %v5226_v25 = vpop.permute.xlu2 %5225  ;;  %v5171_v2 = vld [vmem:[#allocation3 + $0x108] sm:$0xff] }
 0x9d5   : > { %v5360_v61 = vadd.f32 %v5226_v25, %v5168_v24 }
 0x9d6   : > { %5157 = vst.msk [vmem:[#allocation3 + $0x308] sm:$0xff] %vm284_vm1, %v5109_v46 }
 0x9d7   : > { %v5756_v30 = vld [vmem:[#allocation3 + $0xa8] sm:$0xff]  ;;  %5155 = vst.msk [vmem:[#allocation3 + $0x2e0] sm:$0xff] %vm284_vm1, %v5107_v54  ;;  %v5163_v54 = vld [vmem:[#allocation3 + $0x80] sm:$0xff] }
 0x9d8   : > { %5864 = vst.msk [vmem:[%s8680_s9 + $0xa8] sm:$0xff] %vm175_vm2, %v5756_v30 }
 0x9d9   : > { %5408 = vst.msk [vmem:[#allocation3 + $0xd8] sm:$0xff] %vm284_vm1, %v5360_v61  ;;  %5293 = vrot.lane.b32.xlu0 %v8764_v50, %s6202_s10  ;;  %5289 = vrot.lane.b32.xlu1 %v8738_v37, %s6202_s10  ;;  %v5161_v61 = vld [vmem:[#allocation3 + $0x58] sm:$0xff] }
 0x9da   : > { %5297 = vrot.lane.b32.xlu2 %v8788_v31, %s6202_s10 }
 0x9db   : > { %v5210_v60 = vpop.permute.xlu0 %5209  ;;  %v5014_v29 = vpop.permute.xlu1 %5013 }
 0x9dc   : > { %v5352_v8 = vadd.f32 %v5210_v60, %v5160_v49  ;;  %v5110_v26 = vadd.f32 %v5014_v29, %v4918_v11  ;;  %v5232_v38 = vpop.permute.xlu2 %5231  ;;  %v5174_v29 = vld [vmem:[#allocation3 + $0x138] sm:$0xff] }
 0x9dd   : > { %v5363_v48 = vadd.f32 %v5232_v38, %v5171_v2  ;;  %v5164_v2 = vld [vmem:[#allocation3 + $0x88] sm:$0xff] }
 0x9de   : > { %5400 = vst.msk [vmem:[#allocation3 + $0x50] sm:$0xff] %vm284_vm1, %v5352_v8 }
 0x9df   : > { %5158 = vst.msk [vmem:[#allocation3 + $0x310] sm:$0xff] %vm284_vm1, %v5110_v26  ;;  %v5166_v26 = vld [vmem:[#allocation3 + $0xb0] sm:$0xff] }
 0x9e0   : > { %v5762_v58 = vld [vmem:[#allocation3 + $0xd8] sm:$0xff]  ;;  %5411 = vst.msk [vmem:[#allocation3 + $0x108] sm:$0xff] %vm284_vm1, %v5363_v48 }
 0x9e1   : > { %5870 = vst.msk [vmem:[%s8680_s9 + $0xd8] sm:$0xff] %vm175_vm2, %v5762_v58  ;;  %5299 = vrot.lane.b32.xlu0 %v8801_v5, %s6202_s10  ;;  %5295 = vrot.lane.b32.xlu1 %v8775_v53, %s6202_s10 }
 0x9e2   : > { %5495 = vrot.lane.b32.xlu2 %v8663_v27, %s6196_s23 }
 0x9e3   : > { %v5216_v46 = vpop.permute.xlu0 %5215  ;;  %v5212_v24 = vpop.permute.xlu1 %5211 }
 0x9e4   : > { %v5355_v25 = vadd.f32 %v5216_v46, %v5163_v54  ;;  %v5238_v30 = vpop.permute.xlu2 %5237  ;;  %v5353_v49 = vadd.f32 %v5212_v24, %v5161_v61 }
 0x9e5   : > { %v5745_v60 = vld [vmem:[#allocation3 + $0x50] sm:$0xff]  ;;  %v5366_v11 = vadd.f32 %v5238_v30, %v5174_v29  ;;  %v5169_v30 = vld [vmem:[#allocation3 + $0xe0] sm:$0xff]  ;;  %v5167_v29 = vld [vmem:[#allocation3 + $0xb8] sm:$0xff] }
 0x9e6   : > { %5853 = vst.msk [vmem:[%s8680_s9 + $0x50] sm:$0xff] %vm175_vm2, %v5745_v60 }
 0x9e7   : > { %v5768_v8 = vld [vmem:[#allocation3 + $0x108] sm:$0xff]  ;;  %5403 = vst.msk [vmem:[#allocation3 + $0x80] sm:$0xff] %vm284_vm1, %v5355_v25 }
 0x9e8   : > { %5876 = vst.msk [vmem:[%s8680_s9 + $0x108] sm:$0xff] %vm175_vm2, %v5768_v8 }
 0x9e9   : > { %5401 = vst.msk [vmem:[#allocation3 + $0x58] sm:$0xff] %vm284_vm1, %v5353_v49  ;;  %5497 = vrot.lane.b32.xlu0 %v8682_v13, %s6196_s23  ;;  %5301 = vrot.lane.b32.xlu1 %v8812_v41, %s6202_s10  ;;  %v5177_v13 = vld [vmem:[#allocation3 + $0x168] sm:$0xff] }
 0x9ea   : > { %5414 = vst.msk [vmem:[#allocation3 + $0x138] sm:$0xff] %vm284_vm1, %v5366_v11  ;;  %5501 = vrot.lane.b32.xlu2 %v8710_v12, %s6196_s23 }
 0x9eb   : > { %v5222_v27 = vpop.permute.xlu0 %5221  ;;  %v5218_v38 = vpop.permute.xlu1 %5217 }
 0x9ec   : > { %v5358_v48 = vadd.f32 %v5222_v27, %v5166_v26  ;;  %v5356_v58 = vadd.f32 %v5218_v38, %v5164_v2  ;;  %v5244_v46 = vpop.permute.xlu2 %5243  ;;  %v5180_v27 = vld [vmem:[#allocation3 + $0x198] sm:$0xff]  ;;  %v5172_v38 = vld [vmem:[#allocation3 + $0x110] sm:$0xff] }
 0x9ed   : > { %v5369_v24 = vadd.f32 %v5244_v46, %v5177_v13 }
 0x9ee   : > { %v5751_v54 = vld [vmem:[#allocation3 + $0x80] sm:$0xff]  ;;  %5406 = vst.msk [vmem:[#allocation3 + $0xb0] sm:$0xff] %vm284_vm1, %v5358_v48  ;;  %v5170_v48 = vld [vmem:[#allocation3 + $0xe8] sm:$0xff] }
 0x9ef   : > { %5859 = vst.msk [vmem:[%s8680_s9 + $0x80] sm:$0xff] %vm175_vm2, %v5751_v54 }
 0x9f0   : > { %v5746_v25 = vld [vmem:[#allocation3 + $0x58] sm:$0xff]  ;;  %5404 = vst.msk [vmem:[#allocation3 + $0x88] sm:$0xff] %vm284_vm1, %v5356_v58 }
 0x9f1   : > { %5854 = vst.msk [vmem:[%s8680_s9 + $0x58] sm:$0xff] %vm175_vm2, %v5746_v25  ;;  %v5774_v12 = vld [vmem:[#allocation3 + $0x138] sm:$0xff]  ;;  %5503 = vrot.lane.b32.xlu0 %v8725_v20, %s6196_s23  ;;  %5499 = vrot.lane.b32.xlu1 %v8695_v22, %s6196_s23 }
 0x9f2   : > { %5882 = vst.msk [vmem:[%s8680_s9 + $0x138] sm:$0xff] %vm175_vm2, %v5774_v12  ;;  %5507 = vrot.lane.b32.xlu2 %v8749_v43, %s6196_s23 }
 0x9f3   : > { %5417 = vst.msk [vmem:[#allocation3 + $0x168] sm:$0xff] %vm284_vm1, %v5369_v24  ;;  %v5228_v61 = vpop.permute.xlu0 %5227  ;;  %v5224_v60 = vpop.permute.xlu1 %5223 }
 0x9f4   : > { %v5361_v49 = vadd.f32 %v5228_v61, %v5169_v30  ;;  %v5250_v11 = vpop.permute.xlu2 %5249  ;;  %v5359_v20 = vadd.f32 %v5224_v60, %v5167_v29  ;;  %v5175_v61 = vld [vmem:[#allocation3 + $0x140] sm:$0xff] }
 0x9f5   : > { %v5757_v8 = vld [vmem:[#allocation3 + $0xb0] sm:$0xff]  ;;  %v5372_v22 = vadd.f32 %v5250_v11, %v5180_v27 }
 0x9f6   : > { %5865 = vst.msk [vmem:[%s8680_s9 + $0xb0] sm:$0xff] %vm175_vm2, %v5757_v8  ;;  %v5186_v8 = vld [vmem:[#allocation3 + $0x1f8] sm:$0xff] }
 0x9f7   : > { %v5752_v26 = vld [vmem:[#allocation3 + $0x88] sm:$0xff]  ;;  %5409 = vst.msk [vmem:[#allocation3 + $0xe0] sm:$0xff] %vm284_vm1, %v5361_v49  ;;  %v5173_v49 = vld [vmem:[#allocation3 + $0x118] sm:$0xff] }
 0x9f8   : > { %5860 = vst.msk [vmem:[%s8680_s9 + $0x88] sm:$0xff] %vm175_vm2, %v5752_v26  ;;  %v5176_v26 = vld [vmem:[#allocation3 + $0x148] sm:$0xff] }
 0x9f9   : > { %5407 = vst.msk [vmem:[#allocation3 + $0xb8] sm:$0xff] %vm284_vm1, %v5359_v20  ;;  %5509 = vrot.lane.b32.xlu0 %v8762_v32, %s6196_s23  ;;  %5505 = vrot.lane.b32.xlu1 %v8736_v4, %s6196_s23  ;;  %v5183_v4 = vld [vmem:[#allocation3 + $0x1c8] sm:$0xff] }
 0x9fa   : > { %v5780_v43 = vld [vmem:[#allocation3 + $0x168] sm:$0xff]  ;;  %5420 = vst.msk [vmem:[#allocation3 + $0x198] sm:$0xff] %vm284_vm1, %v5372_v22  ;;  %5513 = vrot.lane.b32.xlu2 %v8786_v7, %s6196_s23  ;;  %v5178_v22 = vld [vmem:[#allocation3 + $0x170] sm:$0xff] }
 0x9fb   : > { %5888 = vst.msk [vmem:[%s8680_s9 + $0x168] sm:$0xff] %vm175_vm2, %v5780_v43  ;;  %v5234_v2 = vpop.permute.xlu0 %5233  ;;  %v5230_v58 = vpop.permute.xlu1 %5229 }
 0x9fc   : > { %v5364_v46 = vadd.f32 %v5234_v2, %v5172_v38  ;;  %v5362_v32 = vadd.f32 %v5230_v58, %v5170_v48  ;;  %v5256_v54 = vpop.permute.xlu2 %5255 }
 0x9fd   : > { %v5375_v24 = vadd.f32 %v5256_v54, %v5183_v4  ;;  %v5181_v54 = vld [vmem:[#allocation3 + $0x1a0] sm:$0xff] }
 0x9fe   : > { %v5763_v13 = vld [vmem:[#allocation3 + $0xe0] sm:$0xff]  ;;  %5412 = vst.msk [vmem:[#allocation3 + $0x110] sm:$0xff] %vm284_vm1, %v5364_v46 }
 0x9ff   : > { %5871 = vst.msk [vmem:[%s8680_s9 + $0xe0] sm:$0xff] %vm175_vm2, %v5763_v13 }
 0xa00   : > { %v5758_v25 = vld [vmem:[#allocation3 + $0xb8] sm:$0xff]  ;;  %5410 = vst.msk [vmem:[#allocation3 + $0xe8] sm:$0xff] %vm284_vm1, %v5362_v32 }
 0xa01   : > { %5866 = vst.msk [vmem:[%s8680_s9 + $0xb8] sm:$0xff] %vm175_vm2, %v5758_v25  ;;  %v5786_v7 = vld [vmem:[#allocation3 + $0x198] sm:$0xff]  ;;  %5515 = vrot.lane.b32.xlu0 %v8799_v28, %s6196_s23  ;;  %5511 = vrot.lane.b32.xlu1 %v8773_v39, %s6196_s23 }
 0xa02   : > { %5894 = vst.msk [vmem:[%s8680_s9 + $0x198] sm:$0xff] %vm175_vm2, %v5786_v7  ;;  %5519 = vrot.lane.b32.xlu2 %v8824_v14, %s6196_s23 }
 0xa03   : > { %5423 = vst.msk [vmem:[#allocation3 + $0x1c8] sm:$0xff] %vm284_vm1, %v5375_v24  ;;  %v5240_v12 = vpop.permute.xlu0 %5239  ;;  %v5236_v30 = vpop.permute.xlu1 %5235  ;;  %v5179_v24 = vld [vmem:[#allocation3 + $0x178] sm:$0xff] }
 0xa04   : > { %v5367_v60 = vadd.f32 %v5240_v12, %v5175_v61  ;;  %v5262_v29 = vpop.permute.xlu2 %5261  ;;  %v5365_v28 = vadd.f32 %v5236_v30, %v5173_v49  ;;  %v5192_v12 = vld [vmem:[#allocation3 + $0x258] sm:$0xff]  ;;  %v5182_v49 = vld [vmem:[#allocation3 + $0x1a8] sm:$0xff] }
 0xa05   : > { %v5769_v11 = vld [vmem:[#allocation3 + $0x110] sm:$0xff]  ;;  %v5378_v39 = vadd.f32 %v5262_v29, %v5186_v8 }
 0xa06   : > { %5877 = vst.msk [vmem:[%s8680_s9 + $0x110] sm:$0xff] %vm175_vm2, %v5769_v11 }
 0xa07   : > { %v5764_v20 = vld [vmem:[#allocation3 + $0xe8] sm:$0xff]  ;;  %5415 = vst.msk [vmem:[#allocation3 + $0x140] sm:$0xff] %vm284_vm1, %v5367_v60  ;;  %v5184_v60 = vld [vmem:[#allocation3 + $0x1d0] sm:$0xff] }
 0xa08   : > { %5872 = vst.msk [vmem:[%s8680_s9 + $0xe8] sm:$0xff] %vm175_vm2, %v5764_v20 }
 0xa09   : > { %5413 = vst.msk [vmem:[#allocation3 + $0x118] sm:$0xff] %vm284_vm1, %v5365_v28  ;;  %5521 = vrot.lane.b32.xlu0 %v8835_v55, %s6196_s23  ;;  %5517 = vrot.lane.b32.xlu1 %v8810_v23, %s6196_s23  ;;  %v5189_v23 = vld [vmem:[#allocation3 + $0x228] sm:$0xff] }
 0xa0a   : > { %v5792_v14 = vld [vmem:[#allocation3 + $0x1c8] sm:$0xff]  ;;  %5426 = vst.msk [vmem:[#allocation3 + $0x1f8] sm:$0xff] %vm284_vm1, %v5378_v39  ;;  %5525 = vrot.lane.b32.xlu2 %v8850_v10, %s6196_s23 }
 0xa0b   : > { %5900 = vst.msk [vmem:[%s8680_s9 + $0x1c8] sm:$0xff] %vm175_vm2, %v5792_v14  ;;  %v5246_v27 = vpop.permute.xlu0 %5245  ;;  %v5242_v43 = vpop.permute.xlu1 %5241 }
 0xa0c   : > { %v5370_v2 = vadd.f32 %v5246_v27, %v5178_v22  ;;  %v5368_v55 = vadd.f32 %v5242_v43, %v5176_v26  ;;  %v5268_v38 = vpop.permute.xlu2 %5267  ;;  %v5187_v27 = vld [vmem:[#allocation3 + $0x200] sm:$0xff]  ;;  %v5185_v43 = vld [vmem:[#allocation3 + $0x1d8] sm:$0xff] }
 0xa0d   : > { %v5381_v58 = vadd.f32 %v5268_v38, %v5189_v23  ;;  %v5198_v38 = vld [vmem:[#allocation3 + $0x2b8] sm:$0xff] }
 0xa0e   : > { %v5775_v48 = vld [vmem:[#allocation3 + $0x140] sm:$0xff]  ;;  %5418 = vst.msk [vmem:[#allocation3 + $0x170] sm:$0xff] %vm284_vm1, %v5370_v2 }
 0xa0f   : > { %5883 = vst.msk [vmem:[%s8680_s9 + $0x140] sm:$0xff] %vm175_vm2, %v5775_v48 }
 0xa10   : > { %v5770_v46 = vld [vmem:[#allocation3 + $0x118] sm:$0xff]  ;;  %5416 = vst.msk [vmem:[#allocation3 + $0x148] sm:$0xff] %vm284_vm1, %v5368_v55 }
 0xa11   : > { %5878 = vst.msk [vmem:[%s8680_s9 + $0x118] sm:$0xff] %vm175_vm2, %v5770_v46  ;;  %v5798_v10 = vld [vmem:[#allocation3 + $0x1f8] sm:$0xff]  ;;  %5527 = vrot.lane.b32.xlu0 %v8858_v36, %s6196_s23  ;;  %5523 = vrot.lane.b32.xlu1 %v8842_v40, %s6196_s23  ;;  %v5188_v46 = vld [vmem:[#allocation3 + $0x208] sm:$0xff] }
 0xa12   : > { %5906 = vst.msk [vmem:[%s8680_s9 + $0x1f8] sm:$0xff] %vm175_vm2, %v5798_v10  ;;  %5531 = vrot.lane.b32.xlu2 %v8878_v33, %s6196_s23 }
 0xa13   : > { %5429 = vst.msk [vmem:[#allocation3 + $0x228] sm:$0xff] %vm284_vm1, %v5381_v58  ;;  %v5252_v32 = vpop.permute.xlu0 %5251  ;;  %v5248_v13 = vpop.permute.xlu1 %5247  ;;  %v5190_v58 = vld [vmem:[#allocation3 + $0x230] sm:$0xff] }
 0xa14   : > { %v5373_v4 = vadd.f32 %v5252_v32, %v5181_v54  ;;  %v5274_v25 = vpop.permute.xlu2 %5273  ;;  %v5371_v36 = vadd.f32 %v5248_v13, %v5179_v24 }
 0xa15   : > { %v5781_v7 = vld [vmem:[#allocation3 + $0x170] sm:$0xff]  ;;  %v5384_v40 = vadd.f32 %v5274_v25, %v5192_v12 }
 0xa16   : > { %5889 = vst.msk [vmem:[%s8680_s9 + $0x170] sm:$0xff] %vm175_vm2, %v5781_v7  ;;  %v5193_v7 = vld [vmem:[#allocation3 + $0x260] sm:$0xff] }
 0xa17   : > { %v5776_v61 = vld [vmem:[#allocation3 + $0x148] sm:$0xff]  ;;  %5421 = vst.msk [vmem:[#allocation3 + $0x1a0] sm:$0xff] %vm284_vm1, %v5373_v4 }
 0xa18   : > { %5884 = vst.msk [vmem:[%s8680_s9 + $0x148] sm:$0xff] %vm175_vm2, %v5776_v61 }
 0xa19   : > { %5419 = vst.msk [vmem:[#allocation3 + $0x178] sm:$0xff] %vm284_vm1, %v5371_v36  ;;  %5533 = vrot.lane.b32.xlu0 %v8886_v42, %s6196_s23  ;;  %5529 = vrot.lane.b32.xlu1 %v8868_v1, %s6196_s23  ;;  %v5195_v1 = vld [vmem:[#allocation3 + $0x288] sm:$0xff] }
 0xa1a   : > { %v5804_v33 = vld [vmem:[#allocation3 + $0x228] sm:$0xff]  ;;  %5432 = vst.msk [vmem:[#allocation3 + $0x258] sm:$0xff] %vm284_vm1, %v5384_v40  ;;  %5537 = vrot.lane.b32.xlu2 %v8900_v44, %s6196_s23  ;;  %v5191_v40 = vld [vmem:[#allocation3 + $0x238] sm:$0xff] }
 0xa1b   : > { %5912 = vst.msk [vmem:[%s8680_s9 + $0x228] sm:$0xff] %vm175_vm2, %v5804_v33  ;;  %v5258_v30 = vpop.permute.xlu0 %5257  ;;  %v5254_v29 = vpop.permute.xlu1 %5253 }
 0xa1c   : > { %v5376_v11 = vadd.f32 %v5258_v30, %v5184_v60  ;;  %v5374_v42 = vadd.f32 %v5254_v29, %v5182_v49  ;;  %v5280_v28 = vpop.permute.xlu2 %5279  ;;  %v5204_v30 = vld [vmem:[#allocation3 + $0x318] sm:$0xff]  ;;  %v5196_v29 = vld [vmem:[#allocation3 + $0x290] sm:$0xff] }
 0xa1d   : > { %v5387_v39 = vadd.f32 %v5280_v28, %v5195_v1 }
 0xa1e   : > { %v5787_v8 = vld [vmem:[#allocation3 + $0x1a0] sm:$0xff]  ;;  %5424 = vst.msk [vmem:[#allocation3 + $0x1d0] sm:$0xff] %vm284_vm1, %v5376_v11 }
 0xa1f   : > { %5895 = vst.msk [vmem:[%s8680_s9 + $0x1a0] sm:$0xff] %vm175_vm2, %v5787_v8 }
 0xa20   : > { %v5782_v20 = vld [vmem:[#allocation3 + $0x178] sm:$0xff]  ;;  %5422 = vst.msk [vmem:[#allocation3 + $0x1a8] sm:$0xff] %vm284_vm1, %v5374_v42  ;;  %v5194_v42 = vld [vmem:[#allocation3 + $0x268] sm:$0xff] }
 0xa21   : > { %5890 = vst.msk [vmem:[%s8680_s9 + $0x178] sm:$0xff] %vm175_vm2, %v5782_v20  ;;  %v5810_v44 = vld [vmem:[#allocation3 + $0x258] sm:$0xff]  ;;  %5539 = vrot.lane.b32.xlu0 %v8907_v15, %s6196_s23  ;;  %5535 = vrot.lane.b32.xlu1 %v8893_v52, %s6196_s23 }
 0xa22   : > { %5918 = vst.msk [vmem:[%s8680_s9 + $0x258] sm:$0xff] %vm175_vm2, %v5810_v44  ;;  %5543 = vrot.lane.b32.xlu2 %v8921_v47, %s6196_s23 }
 0xa23   : > { %5435 = vst.msk [vmem:[#allocation3 + $0x288] sm:$0xff] %vm284_vm1, %v5387_v39  ;;  %v5264_v14 = vpop.permute.xlu0 %5263  ;;  %v5260_v22 = vpop.permute.xlu1 %5259 }
 0xa24   : > { %v5379_v26 = vadd.f32 %v5264_v14, %v5187_v27  ;;  %v5286_v2 = vpop.permute.xlu2 %5285  ;;  %v5377_v15 = vadd.f32 %v5260_v22, %v5185_v43  ;;  %v5199_v14 = vld [vmem:[#allocation3 + $0x2c0] sm:$0xff] }
 0xa25   : > { %v5793_v55 = vld [vmem:[#allocation3 + $0x1d0] sm:$0xff]  ;;  %v5390_v52 = vadd.f32 %v5286_v2, %v5198_v38 }
 0xa26   : > { %5901 = vst.msk [vmem:[%s8680_s9 + $0x1d0] sm:$0xff] %vm175_vm2, %v5793_v55  ;;  %v5450_v55 = vld [vmem:[#allocation3 + $0x90] sm:$0xff] }
 0xa27   : > { %v5788_v48 = vld [vmem:[#allocation3 + $0x1a8] sm:$0xff]  ;;  %5427 = vst.msk [vmem:[#allocation3 + $0x200] sm:$0xff] %vm284_vm1, %v5379_v26  ;;  %v5197_v26 = vld [vmem:[#allocation3 + $0x298] sm:$0xff] }
 0xa28   : > { %5896 = vst.msk [vmem:[%s8680_s9 + $0x1a8] sm:$0xff] %vm175_vm2, %v5788_v48  ;;  %v5200_v48 = vld [vmem:[#allocation3 + $0x2c8] sm:$0xff] }
 0xa29   : > { %5425 = vst.msk [vmem:[#allocation3 + $0x1d8] sm:$0xff] %vm284_vm1, %v5377_v15  ;;  %5545 = vrot.lane.b32.xlu0 %v8928_v6, %s6196_s23  ;;  %5541 = vrot.lane.b32.xlu1 %v8914_v45, %s6196_s23  ;;  %v5201_v45 = vld [vmem:[#allocation3 + $0x2e8] sm:$0xff] }
 0xa2a   : > { %v5816_v47 = vld [vmem:[#allocation3 + $0x288] sm:$0xff]  ;;  %5438 = vst.msk [vmem:[#allocation3 + $0x2b8] sm:$0xff] %vm284_vm1, %v5390_v52  ;;  %5549 = vrot.lane.b32.xlu2 %v8942_v59, %s6196_s23  ;;  %v5202_v52 = vld [vmem:[#allocation3 + $0x2f0] sm:$0xff] }
 0xa2b   : > { %5924 = vst.msk [vmem:[%s8680_s9 + $0x288] sm:$0xff] %vm175_vm2, %v5816_v47  ;;  %v5270_v23 = vpop.permute.xlu0 %5269  ;;  %v5266_v10 = vpop.permute.xlu1 %5265 }
 0xa2c   : > { %v5382_v32 = vadd.f32 %v5270_v23, %v5190_v58  ;;  %v5380_v6 = vadd.f32 %v5266_v10, %v5188_v46  ;;  %v5292_v54 = vpop.permute.xlu2 %5291 }
 0xa2d   : > { %v5393_v4 = vadd.f32 %v5292_v54, %v5201_v45  ;;  %v5205_v54 = vld [vmem:[#allocation3 + $0x320] sm:$0xff] }
 0xa2e   : > { %v5799_v13 = vld [vmem:[#allocation3 + $0x200] sm:$0xff]  ;;  %5430 = vst.msk [vmem:[#allocation3 + $0x230] sm:$0xff] %vm284_vm1, %v5382_v32 }
 0xa2f   : > { %5907 = vst.msk [vmem:[%s8680_s9 + $0x200] sm:$0xff] %vm175_vm2, %v5799_v13 }
 0xa30   : > { %v5794_v24 = vld [vmem:[#allocation3 + $0x1d8] sm:$0xff]  ;;  %5428 = vst.msk [vmem:[#allocation3 + $0x208] sm:$0xff] %vm284_vm1, %v5380_v6 }
 0xa31   : > { %5902 = vst.msk [vmem:[%s8680_s9 + $0x1d8] sm:$0xff] %vm175_vm2, %v5794_v24  ;;  %v5822_v59 = vld [vmem:[#allocation3 + $0x2b8] sm:$0xff]  ;;  %5551 = vrot.lane.b32.xlu0 %v8949_v63, %s6196_s23  ;;  %5547 = vrot.lane.b32.xlu1 %v8935_v18, %s6196_s23 }
 0xa32   : > { %5930 = vst.msk [vmem:[%s8680_s9 + $0x2b8] sm:$0xff] %vm175_vm2, %v5822_v59  ;;  %5555 = vrot.lane.b32.xlu2 %v8963_v57, %s6196_s23 }
 0xa33   : > { %5441 = vst.msk [vmem:[#allocation3 + $0x2e8] sm:$0xff] %vm284_vm1, %v5393_v4  ;;  %v5276_v25 = vpop.permute.xlu0 %5275  ;;  %v5272_v36 = vpop.permute.xlu1 %5271  ;;  %v5203_v4 = vld [vmem:[#allocation3 + $0x2f8] sm:$0xff] }
 0xa34   : > { %v5385_v12 = vadd.f32 %v5276_v25, %v5193_v7  ;;  %v5298_v61 = vpop.permute.xlu2 %5297  ;;  %v5383_v63 = vadd.f32 %v5272_v36, %v5191_v40  ;;  %v5456_v25 = vld [vmem:[#allocation3 + $0xf0] sm:$0xff]  ;;  %v5206_v40 = vld [vmem:[#allocation3 + $0x328] sm:$0xff] }
 0xa35   : > { %v5805_v33 = vld [vmem:[#allocation3 + $0x230] sm:$0xff]  ;;  %v5396_v18 = vadd.f32 %v5298_v61, %v5204_v30 }
 0xa36   : > { %5913 = vst.msk [vmem:[%s8680_s9 + $0x230] sm:$0xff] %vm175_vm2, %v5805_v33 }
 0xa37   : > { %v5800_v60 = vld [vmem:[#allocation3 + $0x208] sm:$0xff]  ;;  %5433 = vst.msk [vmem:[#allocation3 + $0x260] sm:$0xff] %vm284_vm1, %v5385_v12 }
 0xa38   : > { %5908 = vst.msk [vmem:[%s8680_s9 + $0x208] sm:$0xff] %vm175_vm2, %v5800_v60  ;;  %v5448_v12 = vld [vmem:[#allocation3 + $0x68] sm:$0xff] }
 0xa39   : > { %5431 = vst.msk [vmem:[#allocation3 + $0x238] sm:$0xff] %vm284_vm1, %v5383_v63  ;;  %5557 = vrot.lane.b32.xlu0 %v8970_v35, %s6196_s23  ;;  %5553 = vrot.lane.b32.xlu1 %v8956_v56, %s6196_s23  ;;  %v5447_v56 = vld [vmem:[#allocation3 + $0x60] sm:$0xff] }
 0xa3a   : > { %v5828_v57 = vld [vmem:[#allocation3 + $0x2e8] sm:$0xff]  ;;  %5444 = vst.msk [vmem:[#allocation3 + $0x318] sm:$0xff] %vm284_vm1, %v5396_v18  ;;  %5561 = vrot.lane.b32.xlu2 %v8984_v51, %s6196_s23 }
 0xa3b   : > { %5936 = vst.msk [vmem:[%s8680_s9 + $0x2e8] sm:$0xff] %vm175_vm2, %v5828_v57  ;;  %v5282_v49 = vpop.permute.xlu0 %5281  ;;  %v5278_v11 = vpop.permute.xlu1 %5277 }
 0xa3c   : > { %v5388_v28 = vadd.f32 %v5282_v49, %v5196_v29  ;;  %v5386_v35 = vadd.f32 %v5278_v11, %v5194_v42  ;;  %v5496_v8 = vpop.permute.xlu2 %5495  ;;  %v5451_v49 = vld [vmem:[#allocation3 + $0x98] sm:$0xff]  ;;  %v5449_v42 = vld [vmem:[#allocation3 + $0x70] sm:$0xff] }
 0xa3d   : > { %v5639_v39 = vadd.f32 %v5496_v8, %v5447_v56 }
 0xa3e   : > { %v5811_v1 = vld [vmem:[#allocation3 + $0x260] sm:$0xff]  ;;  %5436 = vst.msk [vmem:[#allocation3 + $0x290] sm:$0xff] %vm284_vm1, %v5388_v28 }
 0xa3f   : > { %5919 = vst.msk [vmem:[%s8680_s9 + $0x260] sm:$0xff] %vm175_vm2, %v5811_v1  ;;  %v5462_v1 = vld [vmem:[#allocation3 + $0x150] sm:$0xff] }
 0xa40   : > { %v5806_v20 = vld [vmem:[#allocation3 + $0x238] sm:$0xff]  ;;  %5434 = vst.msk [vmem:[#allocation3 + $0x268] sm:$0xff] %vm284_vm1, %v5386_v35 }
 0xa41   : > { %5914 = vst.msk [vmem:[%s8680_s9 + $0x238] sm:$0xff] %vm175_vm2, %v5806_v20  ;;  %v5834_v51 = vld [vmem:[#allocation3 + $0x318] sm:$0xff]  ;;  %5563 = vrot.lane.b32.xlu0 %v8991_v16, %s6196_s23  ;;  %5559 = vrot.lane.b32.xlu1 %v8977_v0, %s6196_s23  ;;  %v5454_v20 = vld [vmem:[#allocation3 + $0xc8] sm:$0xff] }
 0xa42   : > { %5942 = vst.msk [vmem:[%s8680_s9 + $0x318] sm:$0xff] %vm175_vm2, %v5834_v51  ;;  %5567 = vrot.lane.b32.xlu2 %v8665_v19, %s6196_s23  ;;  %v5452_v51 = vld [vmem:[#allocation3 + $0xa0] sm:$0xff] }
 0xa43   : > { %5687 = vst.msk [vmem:[#allocation3 + $0x60] sm:$0xff] %vm284_vm1, %v5639_v39  ;;  %v5288_v44 = vpop.permute.xlu0 %5287  ;;  %v5284_v27 = vpop.permute.xlu1 %5283 }
 0xa44   : > { %v5391_v22 = vadd.f32 %v5288_v44, %v5199_v14  ;;  %v5502_v43 = vpop.permute.xlu2 %5501  ;;  %v5389_v16 = vadd.f32 %v5284_v27, %v5197_v26 }
 0xa45   : > { %v5817_v2 = vld [vmem:[#allocation3 + $0x290] sm:$0xff]  ;;  %v5642_v0 = vadd.f32 %v5502_v43, %v5450_v55  ;;  %v5465_v43 = vld [vmem:[#allocation3 + $0x180] sm:$0xff] }
 0xa46   : > { %5925 = vst.msk [vmem:[%s8680_s9 + $0x290] sm:$0xff] %vm175_vm2, %v5817_v2 }
 0xa47   : > { %v5812_v15 = vld [vmem:[#allocation3 + $0x268] sm:$0xff]  ;;  %5439 = vst.msk [vmem:[#allocation3 + $0x2c0] sm:$0xff] %vm284_vm1, %v5391_v22 }
 0xa48   : > { %5920 = vst.msk [vmem:[%s8680_s9 + $0x268] sm:$0xff] %vm175_vm2, %v5812_v15 }
 0xa49   : > { %5437 = vst.msk [vmem:[#allocation3 + $0x298] sm:$0xff] %vm284_vm1, %v5389_v16  ;;  %5569 = vrot.lane.b32.xlu0 %v8684_v17, %s6196_s23  ;;  %5565 = vrot.lane.b32.xlu1 %v9000_v3, %s6196_s23  ;;  %v5453_v3 = vld [vmem:[#allocation3 + $0xc0] sm:$0xff] }
 0xa4a   : > { %v5747_v19 = vld [vmem:[#allocation3 + $0x60] sm:$0xff]  ;;  %5690 = vst.msk [vmem:[#allocation3 + $0x90] sm:$0xff] %vm284_vm1, %v5642_v0  ;;  %5573 = vrot.lane.b32.xlu2 %v8712_v9, %s6196_s23  ;;  %v5457_v0 = vld [vmem:[#allocation3 + $0xf8] sm:$0xff] }
 0xa4b   : > { %5855 = vst.msk [vmem:[%s8680_s9 + $0x60] sm:$0xff] %vm175_vm2, %v5747_v19  ;;  %v5294_v38 = vpop.permute.xlu0 %5293  ;;  %v5290_v47 = vpop.permute.xlu1 %5289 }
 0xa4c   : > { %v5394_v23 = vadd.f32 %v5294_v38, %v5202_v52  ;;  %v5392_v17 = vadd.f32 %v5290_v47, %v5200_v48  ;;  %v5508_v58 = vpop.permute.xlu2 %5507  ;;  %v5455_v38 = vld [vmem:[#allocation3 + $0xd0] sm:$0xff] }
 0xa4d   : > { %v5645_v10 = vadd.f32 %v5508_v58, %v5453_v3 }
 0xa4e   : > { %v5823_v46 = vld [vmem:[#allocation3 + $0x2c0] sm:$0xff]  ;;  %5442 = vst.msk [vmem:[#allocation3 + $0x2f0] sm:$0xff] %vm284_vm1, %v5394_v23  ;;  %v5468_v23 = vld [vmem:[#allocation3 + $0x1b0] sm:$0xff] }
 0xa4f   : > { %5931 = vst.msk [vmem:[%s8680_s9 + $0x2c0] sm:$0xff] %vm175_vm2, %v5823_v46 }
 0xa50   : > { %v5818_v32 = vld [vmem:[#allocation3 + $0x298] sm:$0xff]  ;;  %5440 = vst.msk [vmem:[#allocation3 + $0x2c8] sm:$0xff] %vm284_vm1, %v5392_v17 }
 0xa51   : > { %5926 = vst.msk [vmem:[%s8680_s9 + $0x298] sm:$0xff] %vm175_vm2, %v5818_v32  ;;  %v5753_v9 = vld [vmem:[#allocation3 + $0x90] sm:$0xff]  ;;  %5575 = vrot.lane.b32.xlu0 %v8727_v62, %s6196_s23  ;;  %5571 = vrot.lane.b32.xlu1 %v8697_v34, %s6196_s23  ;;  %v5458_v32 = vld [vmem:[#allocation3 + $0x100] sm:$0xff] }
 0xa52   : > { %5861 = vst.msk [vmem:[%s8680_s9 + $0x90] sm:$0xff] %vm175_vm2, %v5753_v9  ;;  %5579 = vrot.lane.b32.xlu2 %v8751_v21, %s6196_s23 }
 0xa53   : > { %5693 = vst.msk [vmem:[#allocation3 + $0xc0] sm:$0xff] %vm284_vm1, %v5645_v10  ;;  %v5300_v6 = vpop.permute.xlu0 %5299  ;;  %v5296_v13 = vpop.permute.xlu1 %5295  ;;  %v5460_v10 = vld [vmem:[#allocation3 + $0x128] sm:$0xff] }
 0xa54   : > { %v5397_v45 = vadd.f32 %v5300_v6, %v5205_v54  ;;  %v5514_v24 = vpop.permute.xlu2 %5513  ;;  %v5395_v62 = vadd.f32 %v5296_v13, %v5203_v4  ;;  %v5471_v4 = vld [vmem:[#allocation3 + $0x1e0] sm:$0xff] }
 0xa55   : > { %v5829_v59 = vld [vmem:[#allocation3 + $0x2f0] sm:$0xff]  ;;  %v5648_v34 = vadd.f32 %v5514_v24, %v5456_v25 }
 0xa56   : > { %5937 = vst.msk [vmem:[%s8680_s9 + $0x2f0] sm:$0xff] %vm175_vm2, %v5829_v59 }
 0xa57   : > { %v5824_v7 = vld [vmem:[#allocation3 + $0x2c8] sm:$0xff]  ;;  %5445 = vst.msk [vmem:[#allocation3 + $0x320] sm:$0xff] %vm284_vm1, %v5397_v45 }
 0xa58   : > { %5932 = vst.msk [vmem:[%s8680_s9 + $0x2c8] sm:$0xff] %vm175_vm2, %v5824_v7 }
 0xa59   : > { %5443 = vst.msk [vmem:[#allocation3 + $0x2f8] sm:$0xff] %vm284_vm1, %v5395_v62  ;;  %5581 = vrot.lane.b32.xlu0 %v8764_v50, %s6196_s23  ;;  %5577 = vrot.lane.b32.xlu1 %v8738_v37, %s6196_s23  ;;  %v5459_v37 = vld [vmem:[#allocation3 + $0x120] sm:$0xff] }
 0xa5a   : > { %v5759_v21 = vld [vmem:[#allocation3 + $0xc0] sm:$0xff]  ;;  %5696 = vst.msk [vmem:[#allocation3 + $0xf0] sm:$0xff] %vm284_vm1, %v5648_v34  ;;  %5585 = vrot.lane.b32.xlu2 %v8788_v31, %s6196_s23  ;;  %v5463_v34 = vld [vmem:[#allocation3 + $0x158] sm:$0xff] }
 0xa5b   : > { %5867 = vst.msk [vmem:[%s8680_s9 + $0xc0] sm:$0xff] %vm175_vm2, %v5759_v21  ;;  %v5498_v36 = vpop.permute.xlu0 %5497  ;;  %v5302_v61 = vpop.permute.xlu1 %5301 }
 0xa5c   : > { %v5640_v33 = vadd.f32 %v5498_v36, %v5448_v12  ;;  %v5398_v50 = vadd.f32 %v5302_v61, %v5206_v40  ;;  %v5520_v63 = vpop.permute.xlu2 %5519  ;;  %v5461_v36 = vld [vmem:[#allocation3 + $0x130] sm:$0xff] }
 0xa5d   : > { %v5651_v18 = vadd.f32 %v5520_v63, %v5459_v37 }
 0xa5e   : > { %v5835_v30 = vld [vmem:[#allocation3 + $0x320] sm:$0xff]  ;;  %5688 = vst.msk [vmem:[#allocation3 + $0x68] sm:$0xff] %vm284_vm1, %v5640_v33  ;;  %v5474_v33 = vld [vmem:[#allocation3 + $0x210] sm:$0xff] }
 0xa5f   : > { %5943 = vst.msk [vmem:[%s8680_s9 + $0x320] sm:$0xff] %vm175_vm2, %v5835_v30 }
 0xa60   : > { %v5830_v60 = vld [vmem:[#allocation3 + $0x2f8] sm:$0xff]  ;;  %5446 = vst.msk [vmem:[#allocation3 + $0x328] sm:$0xff] %vm284_vm1, %v5398_v50 }
 0xa61   : > { %5938 = vst.msk [vmem:[%s8680_s9 + $0x2f8] sm:$0xff] %vm175_vm2, %v5830_v60  ;;  %v5765_v31 = vld [vmem:[#allocation3 + $0xf0] sm:$0xff]  ;;  %5587 = vrot.lane.b32.xlu0 %v8801_v5, %s6196_s23  ;;  %5583 = vrot.lane.b32.xlu1 %v8775_v53, %s6196_s23 }
 0xa62   : > { %5873 = vst.msk [vmem:[%s8680_s9 + $0xf0] sm:$0xff] %vm175_vm2, %v5765_v31  ;;  %v5464_v31 = vld [vmem:[#allocation3 + $0x160] sm:$0xff] }
 0xa63   : > { %5699 = vst.msk [vmem:[#allocation3 + $0x120] sm:$0xff] %vm284_vm1, %v5651_v18  ;;  %v5504_v57 = vpop.permute.xlu0 %5503  ;;  %v5500_v29 = vpop.permute.xlu1 %5499  ;;  %v5466_v18 = vld [vmem:[#allocation3 + $0x188] sm:$0xff] }
 0xa64   : > { %v5643_v11 = vadd.f32 %v5504_v57, %v5451_v49  ;;  %v5526_v28 = vpop.permute.xlu2 %5525  ;;  %v5641_v8 = vadd.f32 %v5500_v29, %v5449_v42  ;;  %v5477_v42 = vld [vmem:[#allocation3 + $0x240] sm:$0xff] }
 0xa65   : > { %v5748_v35 = vld [vmem:[#allocation3 + $0x68] sm:$0xff]  ;;  %v5654_v5 = vadd.f32 %v5526_v28, %v5462_v1 }
 0xa66   : > { %5856 = vst.msk [vmem:[%s8680_s9 + $0x68] sm:$0xff] %vm175_vm2, %v5748_v35 }
 0xa67   : > { %v5836_v56 = vld [vmem:[#allocation3 + $0x328] sm:$0xff]  ;;  %5691 = vst.msk [vmem:[#allocation3 + $0x98] sm:$0xff] %vm284_vm1, %v5643_v11 }
 0xa68   : > { %5944 = vst.msk [vmem:[%s8680_s9 + $0x328] sm:$0xff] %vm175_vm2, %v5836_v56 }
 0xa69   : > { %5689 = vst.msk [vmem:[#allocation3 + $0x70] sm:$0xff] %vm284_vm1, %v5641_v8  ;;  %5589 = vrot.lane.b32.xlu1 %v8812_v41, %s6196_s23 }
 0xa6a   : > { %v5771_v53 = vld [vmem:[#allocation3 + $0x120] sm:$0xff]  ;;  %5702 = vst.msk [vmem:[#allocation3 + $0x150] sm:$0xff] %vm284_vm1, %v5654_v5  ;;  %v5469_v5 = vld [vmem:[#allocation3 + $0x1b8] sm:$0xff] }
 0xa6b   : > { %5879 = vst.msk [vmem:[%s8680_s9 + $0x120] sm:$0xff] %vm175_vm2, %v5771_v53  ;;  %v5510_v39 = vpop.permute.xlu0 %5509  ;;  %v5506_v44 = vpop.permute.xlu1 %5505 }
 0xa6c   : > { %v5646_v14 = vadd.f32 %v5510_v39, %v5454_v20  ;;  %v5644_v27 = vadd.f32 %v5506_v44, %v5452_v51  ;;  %v5532_v22 = vpop.permute.xlu2 %5531  ;;  %v5467_v39 = vld [vmem:[#allocation3 + $0x190] sm:$0xff] }
 0xa6d   : > { %v5657_v41 = vadd.f32 %v5532_v22, %v5465_v43 }
 0xa6e   : > { %v5754_v26 = vld [vmem:[#allocation3 + $0x98] sm:$0xff]  ;;  %5694 = vst.msk [vmem:[#allocation3 + $0xc8] sm:$0xff] %vm284_vm1, %v5646_v14  ;;  %v5480_v14 = vld [vmem:[#allocation3 + $0x270] sm:$0xff] }
 0xa6f   : > { %5862 = vst.msk [vmem:[%s8680_s9 + $0x98] sm:$0xff] %vm175_vm2, %v5754_v26 }
 0xa70   : > { %v5749_v2 = vld [vmem:[#allocation3 + $0x70] sm:$0xff]  ;;  %5692 = vst.msk [vmem:[#allocation3 + $0xa0] sm:$0xff] %vm284_vm1, %v5644_v27 }
 0xa71   : > { %5857 = vst.msk [vmem:[%s8680_s9 + $0x70] sm:$0xff] %vm175_vm2, %v5749_v2  ;;  %v5777_v16 = vld [vmem:[#allocation3 + $0x150] sm:$0xff] }
 0xa72   : > { %5885 = vst.msk [vmem:[%s8680_s9 + $0x150] sm:$0xff] %vm175_vm2, %v5777_v16  ;;  %v5470_v16 = vld [vmem:[#allocation3 + $0x1c0] sm:$0xff] }
 0xa73   : > { %5705 = vst.msk [vmem:[#allocation3 + $0x180] sm:$0xff] %vm284_vm1, %v5657_v41  ;;  %v5516_v55 = vpop.permute.xlu0 %5515  ;;  %v5512_v15 = vpop.permute.xlu1 %5511  ;;  %v5472_v41 = vld [vmem:[#allocation3 + $0x1e8] sm:$0xff] }
 0xa74   : > { %v5649_v19 = vadd.f32 %v5516_v55, %v5457_v0  ;;  %v5538_v52 = vpop.permute.xlu2 %5537  ;;  %v5647_v47 = vadd.f32 %v5512_v15, %v5455_v38  ;;  %v5483_v38 = vld [vmem:[#allocation3 + $0x2a0] sm:$0xff] }
 0xa75   : > { %v5760_v48 = vld [vmem:[#allocation3 + $0xc8] sm:$0xff]  ;;  %v5660_v17 = vadd.f32 %v5538_v52, %v5468_v23 }
 0xa76   : > { %5868 = vst.msk [vmem:[%s8680_s9 + $0xc8] sm:$0xff] %vm175_vm2, %v5760_v48 }
 0xa77   : > { %v5755_v58 = vld [vmem:[#allocation3 + $0xa0] sm:$0xff]  ;;  %5697 = vst.msk [vmem:[#allocation3 + $0xf8] sm:$0xff] %vm284_vm1, %v5649_v19 }
 0xa78   : > { %5863 = vst.msk [vmem:[%s8680_s9 + $0xa0] sm:$0xff] %vm175_vm2, %v5755_v58 }
 0xa79   : > { %5695 = vst.msk [vmem:[#allocation3 + $0xd0] sm:$0xff] %vm284_vm1, %v5647_v47 }
 0xa7a   : > { %v5783_v46 = vld [vmem:[#allocation3 + $0x180] sm:$0xff]  ;;  %5708 = vst.msk [vmem:[#allocation3 + $0x1b0] sm:$0xff] %vm284_vm1, %v5660_v17  ;;  %v5475_v17 = vld [vmem:[#allocation3 + $0x218] sm:$0xff] }
 0xa7b   : > { %5891 = vst.msk [vmem:[%s8680_s9 + $0x180] sm:$0xff] %vm175_vm2, %v5783_v46  ;;  %v5522_v3 = vpop.permute.xlu0 %5521  ;;  %v5518_v9 = vpop.permute.xlu1 %5517 }
 0xa7c   : > { %v5652_v6 = vadd.f32 %v5522_v3, %v5460_v10  ;;  %v5650_v54 = vadd.f32 %v5518_v9, %v5458_v32  ;;  %v5544_v13 = vpop.permute.xlu2 %5543  ;;  %v5473_v3 = vld [vmem:[#allocation3 + $0x1f0] sm:$0xff] }
 0xa7d   : > { %v5663_v24 = vadd.f32 %v5544_v13, %v5471_v4 }
 0xa7e   : > { %v5766_v45 = vld [vmem:[#allocation3 + $0xf8] sm:$0xff]  ;;  %5700 = vst.msk [vmem:[#allocation3 + $0x128] sm:$0xff] %vm284_vm1, %v5652_v6  ;;  %v5486_v6 = vld [vmem:[#allocation3 + $0x2d0] sm:$0xff] }
 0xa7f   : > { %5874 = vst.msk [vmem:[%s8680_s9 + $0xf8] sm:$0xff] %vm175_vm2, %v5766_v45 }
 0xa80   : > { %v5761_v59 = vld [vmem:[#allocation3 + $0xd0] sm:$0xff]  ;;  %5698 = vst.msk [vmem:[#allocation3 + $0x100] sm:$0xff] %vm284_vm1, %v5650_v54 }
 0xa81   : > { %5869 = vst.msk [vmem:[%s8680_s9 + $0xd0] sm:$0xff] %vm175_vm2, %v5761_v59  ;;  %v5789_v62 = vld [vmem:[#allocation3 + $0x1b0] sm:$0xff] }
 0xa82   : > { %5897 = vst.msk [vmem:[%s8680_s9 + $0x1b0] sm:$0xff] %vm175_vm2, %v5789_v62  ;;  %v5476_v62 = vld [vmem:[#allocation3 + $0x220] sm:$0xff] }
 0xa83   : > { %5711 = vst.msk [vmem:[#allocation3 + $0x1e0] sm:$0xff] %vm284_vm1, %v5663_v24  ;;  %v5528_v25 = vpop.permute.xlu0 %5527  ;;  %v5524_v7 = vpop.permute.xlu1 %5523  ;;  %v5478_v24 = vld [vmem:[#allocation3 + $0x248] sm:$0xff] }
 0xa84   : > { %v5655_v21 = vadd.f32 %v5528_v25, %v5463_v34  ;;  %v5550_v12 = vpop.permute.xlu2 %5549  ;;  %v5653_v61 = vadd.f32 %v5524_v7, %v5461_v36  ;;  %v5489_v36 = vld [vmem:[#allocation3 + $0x300] sm:$0xff] }
 0xa85   : > { %v5772_v40 = vld [vmem:[#allocation3 + $0x128] sm:$0xff]  ;;  %v5666_v50 = vadd.f32 %v5550_v12, %v5474_v33 }
 0xa86   : > { %5880 = vst.msk [vmem:[%s8680_s9 + $0x128] sm:$0xff] %vm175_vm2, %v5772_v40 }
 0xa87   : > { %v5767_v63 = vld [vmem:[#allocation3 + $0x100] sm:$0xff]  ;;  %5703 = vst.msk [vmem:[#allocation3 + $0x158] sm:$0xff] %vm284_vm1, %v5655_v21 }
 0xa88   : > { %5875 = vst.msk [vmem:[%s8680_s9 + $0x100] sm:$0xff] %vm175_vm2, %v5767_v63 }
 0xa89   : > { %5701 = vst.msk [vmem:[#allocation3 + $0x130] sm:$0xff] %vm284_vm1, %v5653_v61 }
 0xa8a   : > { %v5795_v30 = vld [vmem:[#allocation3 + $0x1e0] sm:$0xff]  ;;  %5714 = vst.msk [vmem:[#allocation3 + $0x210] sm:$0xff] %vm284_vm1, %v5666_v50  ;;  %v5481_v50 = vld [vmem:[#allocation3 + $0x278] sm:$0xff] }
 0xa8b   : > { %5903 = vst.msk [vmem:[%s8680_s9 + $0x1e0] sm:$0xff] %vm175_vm2, %v5795_v30  ;;  %v5534_v37 = vpop.permute.xlu0 %5533  ;;  %v5530_v60 = vpop.permute.xlu1 %5529 }
 0xa8c   : > { %v5658_v57 = vadd.f32 %v5534_v37, %v5466_v18  ;;  %v5656_v49 = vadd.f32 %v5530_v60, %v5464_v31  ;;  %v5556_v29 = vpop.permute.xlu2 %5555  ;;  %v5479_v37 = vld [vmem:[#allocation3 + $0x250] sm:$0xff] }
 0xa8d   : > { %v5669_v28 = vadd.f32 %v5556_v29, %v5477_v42 }
 0xa8e   : > { %v5778_v11 = vld [vmem:[#allocation3 + $0x158] sm:$0xff]  ;;  %5706 = vst.msk [vmem:[#allocation3 + $0x188] sm:$0xff] %vm284_vm1, %v5658_v57  ;;  %v5492_v57 = vld [vmem:[#allocation3 + $0x330] sm:$0xff] }
 0xa8f   : > { %5886 = vst.msk [vmem:[%s8680_s9 + $0x158] sm:$0xff] %vm175_vm2, %v5778_v11 }
 0xa90   : > { %v5773_v35 = vld [vmem:[#allocation3 + $0x130] sm:$0xff]  ;;  %5704 = vst.msk [vmem:[#allocation3 + $0x160] sm:$0xff] %vm284_vm1, %v5656_v49 }
 0xa91   : > { %5881 = vst.msk [vmem:[%s8680_s9 + $0x130] sm:$0xff] %vm175_vm2, %v5773_v35  ;;  %v5801_v8 = vld [vmem:[#allocation3 + $0x210] sm:$0xff] }
 0xa92   : > { %5909 = vst.msk [vmem:[%s8680_s9 + $0x210] sm:$0xff] %vm175_vm2, %v5801_v8  ;;  %v5482_v8 = vld [vmem:[#allocation3 + $0x280] sm:$0xff] }
 0xa93   : > { %5717 = vst.msk [vmem:[#allocation3 + $0x240] sm:$0xff] %vm284_vm1, %v5669_v28  ;;  %v5540_v1 = vpop.permute.xlu0 %5539  ;;  %v5536_v56 = vpop.permute.xlu1 %5535  ;;  %v5484_v28 = vld [vmem:[#allocation3 + $0x2a8] sm:$0xff] }
 0xa94   : > { %v5661_v53 = vadd.f32 %v5540_v1, %v5469_v5  ;;  %v5562_v20 = vpop.permute.xlu2 %5561  ;;  %v5659_v44 = vadd.f32 %v5536_v56, %v5467_v39 }
 0xa95   : > { %v5784_v51 = vld [vmem:[#allocation3 + $0x188] sm:$0xff]  ;;  %v5672_v27 = vadd.f32 %v5562_v20, %v5480_v14 }
 0xa96   : > { %5892 = vst.msk [vmem:[%s8680_s9 + $0x188] sm:$0xff] %vm175_vm2, %v5784_v51  ;;  %v5487_v51 = vld [vmem:[#allocation3 + $0x2d8] sm:$0xff] }
 0xa97   : > { %v5779_v22 = vld [vmem:[#allocation3 + $0x160] sm:$0xff]  ;;  %5709 = vst.msk [vmem:[#allocation3 + $0x1b8] sm:$0xff] %vm284_vm1, %v5661_v53 }
 0xa98   : > { %5887 = vst.msk [vmem:[%s8680_s9 + $0x160] sm:$0xff] %vm175_vm2, %v5779_v22 }
 0xa99   : > { %5707 = vst.msk [vmem:[#allocation3 + $0x190] sm:$0xff] %vm284_vm1, %v5659_v44 }
 0xa9a   : > { %v5807_v26 = vld [vmem:[#allocation3 + $0x240] sm:$0xff]  ;;  %5720 = vst.msk [vmem:[#allocation3 + $0x270] sm:$0xff] %vm284_vm1, %v5672_v27  ;;  %v5485_v27 = vld [vmem:[#allocation3 + $0x2b0] sm:$0xff] }
 0xa9b   : > { %5915 = vst.msk [vmem:[%s8680_s9 + $0x240] sm:$0xff] %vm175_vm2, %v5807_v26  ;;  %v5546_v43 = vpop.permute.xlu0 %5545  ;;  %v5542_v2 = vpop.permute.xlu1 %5541 }
 0xa9c   : > { %v5664_v55 = vadd.f32 %v5546_v43, %v5472_v41  ;;  %v5662_v0 = vadd.f32 %v5542_v2, %v5470_v16  ;;  %v5568_v15 = vpop.permute.xlu2 %5567  ;;  %v5840_v41 = vld [vmem:[#allocation3 + $0x348] sm:$0xff]  ;;  %v5841_v2 = vld [vmem:[#allocation3 + $0x350] sm:$0xff]  ;;  %v5842_v16 = vld [vmem:[#allocation3 + $0x358] sm:$0xff] }
 0xa9d   : > { %v5675_v52 = vadd.f32 %v5568_v15, %v5483_v38  ;;  %5948 = vst.msk [vmem:[%s8680_s9 + $0x348] sm:$0xff] %vm175_vm2, %v5840_v41 }
 0xa9e   : > { %v5790_v19 = vld [vmem:[#allocation3 + $0x1b8] sm:$0xff]  ;;  %5712 = vst.msk [vmem:[#allocation3 + $0x1e8] sm:$0xff] %vm284_vm1, %v5664_v55 }
 0xa9f   : > { %5898 = vst.msk [vmem:[%s8680_s9 + $0x1b8] sm:$0xff] %vm175_vm2, %v5790_v19  ;;  %v5488_v19 = vld [vmem:[#allocation3 + $0x2e0] sm:$0xff] }
 0xaa0   : > { %v5785_v48 = vld [vmem:[#allocation3 + $0x190] sm:$0xff]  ;;  %5710 = vst.msk [vmem:[#allocation3 + $0x1c0] sm:$0xff] %vm284_vm1, %v5662_v0  ;;  %v5490_v0 = vld [vmem:[#allocation3 + $0x308] sm:$0xff] }
 0xaa1   : > { %5893 = vst.msk [vmem:[%s8680_s9 + $0x190] sm:$0xff] %vm175_vm2, %v5785_v48  ;;  %v5813_v47 = vld [vmem:[#allocation3 + $0x270] sm:$0xff] }
 0xaa2   : > { %5921 = vst.msk [vmem:[%s8680_s9 + $0x270] sm:$0xff] %vm175_vm2, %v5813_v47 }
 0xaa3   : > { %5723 = vst.msk [vmem:[#allocation3 + $0x2a0] sm:$0xff] %vm284_vm1, %v5675_v52  ;;  %v5552_v23 = vpop.permute.xlu0 %5551  ;;  %v5548_v58 = vpop.permute.xlu1 %5547 }
 0xaa4   : > { %v5667_v46 = vadd.f32 %v5552_v23, %v5475_v17  ;;  %v5574_v10 = vpop.permute.xlu2 %5573  ;;  %v5665_v9 = vadd.f32 %v5548_v58, %v5473_v3  ;;  %5949 = vst.msk [vmem:[%s8680_s9 + $0x350] sm:$0xff] %vm175_vm2, %v5841_v2  ;;  %v5493_v17 = vld [vmem:[#allocation3 + $0x338] sm:$0xff]  ;;  %v5491_v3 = vld [vmem:[#allocation3 + $0x310] sm:$0xff] }
 0xaa5   : > { %v5796_v32 = vld [vmem:[#allocation3 + $0x1e8] sm:$0xff]  ;;  %v5678_v54 = vadd.f32 %v5574_v10, %v5486_v6  ;;  %5950 = vst.msk [vmem:[%s8680_s9 + $0x358] sm:$0xff] %vm175_vm2, %v5842_v16 }
 0xaa6   : > { %5904 = vst.msk [vmem:[%s8680_s9 + $0x1e8] sm:$0xff] %vm175_vm2, %v5796_v32 }
 0xaa7   : > { %v5791_v13 = vld [vmem:[#allocation3 + $0x1c0] sm:$0xff]  ;;  %5715 = vst.msk [vmem:[#allocation3 + $0x218] sm:$0xff] %vm284_vm1, %v5667_v46 }
 0xaa8   : > { %5899 = vst.msk [vmem:[%s8680_s9 + $0x1c0] sm:$0xff] %vm175_vm2, %v5791_v13 }
 0xaa9   : > { %5713 = vst.msk [vmem:[#allocation3 + $0x1f0] sm:$0xff] %vm284_vm1, %v5665_v9 }
 0xaaa   : > { %v5819_v45 = vld [vmem:[#allocation3 + $0x2a0] sm:$0xff]  ;;  %5726 = vst.msk [vmem:[#allocation3 + $0x2d0] sm:$0xff] %vm284_vm1, %v5678_v54 }
 0xaab   : > { %5927 = vst.msk [vmem:[%s8680_s9 + $0x2a0] sm:$0xff] %vm175_vm2, %v5819_v45  ;;  %v5558_v4 = vpop.permute.xlu0 %5557  ;;  %v5554_v59 = vpop.permute.xlu1 %5553  ;;  %v5494_v54 = vld [vmem:[#allocation3 + $0x340] sm:$0xff] }
 0xaac   : > { %v5670_v25 = vadd.f32 %v5558_v4, %v5478_v24  ;;  %v5668_v34 = vadd.f32 %v5554_v59, %v5476_v62  ;;  %v5580_v7 = vpop.permute.xlu2 %5579 }
 0xaad   : > { %v5681_v12 = vadd.f32 %v5580_v7, %v5489_v36 }
 0xaae   : > { %v5802_v21 = vld [vmem:[#allocation3 + $0x218] sm:$0xff]  ;;  %5718 = vst.msk [vmem:[#allocation3 + $0x248] sm:$0xff] %vm284_vm1, %v5670_v25 }
 0xaaf   : > { %5910 = vst.msk [vmem:[%s8680_s9 + $0x218] sm:$0xff] %vm175_vm2, %v5802_v21 }
 0xab0   : > { %v5797_v40 = vld [vmem:[#allocation3 + $0x1f0] sm:$0xff]  ;;  %5716 = vst.msk [vmem:[#allocation3 + $0x220] sm:$0xff] %vm284_vm1, %v5668_v34 }
 0xab1   : > { %5905 = vst.msk [vmem:[%s8680_s9 + $0x1f0] sm:$0xff] %vm175_vm2, %v5797_v40  ;;  %v5825_v61 = vld [vmem:[#allocation3 + $0x2d0] sm:$0xff] }
 0xab2   : > { %5933 = vst.msk [vmem:[%s8680_s9 + $0x2d0] sm:$0xff] %vm175_vm2, %v5825_v61 }
 0xab3   : > { %5729 = vst.msk [vmem:[#allocation3 + $0x300] sm:$0xff] %vm284_vm1, %v5681_v12  ;;  %v5564_v33 = vpop.permute.xlu0 %5563  ;;  %v5560_v63 = vpop.permute.xlu1 %5559 }
 0xab4   : > { %v5673_v30 = vadd.f32 %v5564_v33, %v5481_v50  ;;  %v5586_v18 = vpop.permute.xlu2 %5585  ;;  %v5671_v31 = vadd.f32 %v5560_v63, %v5479_v37 }
 0xab5   : > { %v5808_v60 = vld [vmem:[#allocation3 + $0x248] sm:$0xff]  ;;  %v5684_v49 = vadd.f32 %v5586_v18, %v5492_v57 }
 0xab6   : > { %5916 = vst.msk [vmem:[%s8680_s9 + $0x248] sm:$0xff] %vm175_vm2, %v5808_v60 }
 0xab7   : > { %v5803_v29 = vld [vmem:[#allocation3 + $0x220] sm:$0xff]  ;;  %5721 = vst.msk [vmem:[#allocation3 + $0x278] sm:$0xff] %vm284_vm1, %v5673_v30 }
 0xab8   : > { %5911 = vst.msk [vmem:[%s8680_s9 + $0x220] sm:$0xff] %vm175_vm2, %v5803_v29 }
 0xab9   : > { %5719 = vst.msk [vmem:[#allocation3 + $0x250] sm:$0xff] %vm284_vm1, %v5671_v31 }
 0xaba   : > { %v5831_v11 = vld [vmem:[#allocation3 + $0x300] sm:$0xff]  ;;  %5732 = vst.msk [vmem:[#allocation3 + $0x330] sm:$0xff] %vm284_vm1, %v5684_v49 }
 0xabb   : > { %5939 = vst.msk [vmem:[%s8680_s9 + $0x300] sm:$0xff] %vm175_vm2, %v5831_v11  ;;  %v5570_v42 = vpop.permute.xlu0 %5569  ;;  %v5566_v35 = vpop.permute.xlu1 %5565 }
 0xabc   : > { %v5676_v1 = vadd.f32 %v5570_v42, %v5484_v28  ;;  %v5674_v5 = vadd.f32 %v5566_v35, %v5482_v8 }
 0xabe   : > { %v5814_v56 = vld [vmem:[#allocation3 + $0x278] sm:$0xff]  ;;  %5724 = vst.msk [vmem:[#allocation3 + $0x2a8] sm:$0xff] %vm284_vm1, %v5676_v1 }
 0xabf   : > { %5922 = vst.msk [vmem:[%s8680_s9 + $0x278] sm:$0xff] %vm175_vm2, %v5814_v56 }
 0xac0   : > { %v5809_v53 = vld [vmem:[#allocation3 + $0x250] sm:$0xff]  ;;  %5722 = vst.msk [vmem:[#allocation3 + $0x280] sm:$0xff] %vm284_vm1, %v5674_v5 }
 0xac1   : > { %5917 = vst.msk [vmem:[%s8680_s9 + $0x250] sm:$0xff] %vm175_vm2, %v5809_v53  ;;  %v5837_v39 = vld [vmem:[#allocation3 + $0x330] sm:$0xff] }
 0xac2   : > { %5945 = vst.msk [vmem:[%s8680_s9 + $0x330] sm:$0xff] %vm175_vm2, %v5837_v39 }
 0xac3   : > { %v5576_v20 = vpop.permute.xlu0 %5575  ;;  %v5572_v44 = vpop.permute.xlu1 %5571 }
 0xac4   : > { %v5679_v14 = vadd.f32 %v5576_v20, %v5487_v51  ;;  %v5677_v26 = vadd.f32 %v5572_v44, %v5485_v27 }
 0xac5   : > { %v5820_v22 = vld [vmem:[#allocation3 + $0x2a8] sm:$0xff] }
 0xac6   : > { %5928 = vst.msk [vmem:[%s8680_s9 + $0x2a8] sm:$0xff] %vm175_vm2, %v5820_v22 }
 0xac7   : > { %v5815_v43 = vld [vmem:[#allocation3 + $0x280] sm:$0xff]  ;;  %5727 = vst.msk [vmem:[#allocation3 + $0x2d8] sm:$0xff] %vm284_vm1, %v5679_v14 }
 0xac8   : > { %5923 = vst.msk [vmem:[%s8680_s9 + $0x280] sm:$0xff] %vm175_vm2, %v5815_v43 }
 0xac9   : > { %5725 = vst.msk [vmem:[#allocation3 + $0x2b0] sm:$0xff] %vm284_vm1, %v5677_v26 }
 0xacb   : > { %v5582_v55 = vpop.permute.xlu0 %5581  ;;  %v5578_v15 = vpop.permute.xlu1 %5577 }
 0xacc   : > { %v5682_v38 = vadd.f32 %v5582_v55, %v5490_v0  ;;  %v5680_v52 = vadd.f32 %v5578_v15, %v5488_v19 }
 0xace   : > { %v5826_v48 = vld [vmem:[#allocation3 + $0x2d8] sm:$0xff]  ;;  %5730 = vst.msk [vmem:[#allocation3 + $0x308] sm:$0xff] %vm284_vm1, %v5682_v38 }
 0xacf   : > { %5934 = vst.msk [vmem:[%s8680_s9 + $0x2d8] sm:$0xff] %vm175_vm2, %v5826_v48 }
 0xad0   : > { %v5821_v47 = vld [vmem:[#allocation3 + $0x2b0] sm:$0xff]  ;;  %5728 = vst.msk [vmem:[#allocation3 + $0x2e0] sm:$0xff] %vm284_vm1, %v5680_v52 }
 0xad1   : > { %5929 = vst.msk [vmem:[%s8680_s9 + $0x2b0] sm:$0xff] %vm175_vm2, %v5821_v47 }
 0xad3   : > { %v5588_v23 = vpop.permute.xlu0 %5587  ;;  %v5584_v58 = vpop.permute.xlu1 %5583 }
 0xad4   : > { %v5685_v46 = vadd.f32 %v5588_v23, %v5493_v17  ;;  %v5683_v32 = vadd.f32 %v5584_v58, %v5491_v3 }
 0xad5   : > { %v5832_v10 = vld [vmem:[#allocation3 + $0x308] sm:$0xff] }
 0xad6   : > { %5940 = vst.msk [vmem:[%s8680_s9 + $0x308] sm:$0xff] %vm175_vm2, %v5832_v10 }
 0xad7   : > { %v5827_v9 = vld [vmem:[#allocation3 + $0x2e0] sm:$0xff]  ;;  %5733 = vst.msk [vmem:[#allocation3 + $0x338] sm:$0xff] %vm284_vm1, %v5685_v46 }
 0xad8   : > { %5935 = vst.msk [vmem:[%s8680_s9 + $0x2e0] sm:$0xff] %vm175_vm2, %v5827_v9 }
 0xad9   : > { %5731 = vst.msk [vmem:[#allocation3 + $0x310] sm:$0xff] %vm284_vm1, %v5683_v32 }
 0xadb   : > { %v5590_v6 = vpop.permute.xlu1 %5589 }
 0xadc   : > { %v5686_v13 = vadd.f32 %v5590_v6, %v5494_v54 }
 0xade   : > { %v5838_v45 = vld [vmem:[#allocation3 + $0x338] sm:$0xff]  ;;  %5734 = vst.msk [vmem:[#allocation3 + $0x340] sm:$0xff] %vm284_vm1, %v5686_v13 }
 0xadf   : > { %5946 = vst.msk [vmem:[%s8680_s9 + $0x338] sm:$0xff] %vm175_vm2, %v5838_v45 }
 0xae0   : > { %v5833_v4 = vld [vmem:[#allocation3 + $0x310] sm:$0xff] }
 0xae1   : > { %5941 = vst.msk [vmem:[%s8680_s9 + $0x310] sm:$0xff] %vm175_vm2, %v5833_v4 }
 0xae5   : > { %v5839_v24 = vld [vmem:[#allocation3 + $0x340] sm:$0xff] }
 0xae6   : > { %5947 = vst.msk [vmem:[%s8680_s9 + $0x340] sm:$0xff] %vm175_vm2, %v5839_v24 }
 0xae7 PF: > { %s13_s12 = sadd.s32 1, %s6192_s12  }
 0xae8   : > { %p10_p4 = scmp.ge.s32.totalorder %s13_s12, 4  }
 0xaea   :  { %12 = sbr.rel (!%p10_p4) target bundleno = 1 (0x1), region = 68 }

</bundles_post_ra>
